<compile_context>
chip_gen: v7x
topology: tpu7x:2x2x1
jax: 0.10.0
libtpu: 0.0.40
codegen_flags: <defaults>
</compile_context>

<pallas_src>
import math

import numpy as np
import jax
import jax.numpy as jnp
from jax.experimental import pallas as pl
from jax.experimental.pallas import tpu as pltpu

# ----------------------------- model hyper-params ---------------------------
BATCH = 2
TIME_HORIZON = 8
EMB = 32            # embedding_size
HID = 32            # lstm_hidden_size
NUM_LAYERS = 1      # num_stacked_layers
NUM_HEADS = 4       # num_multi_att_headers
HEAD_DIM = EMB // NUM_HEADS
FC_SIZE = (64, 32, 16)
TARGET_FEAT = 14
SURR_FEAT = 15
LEAKY_SLOPE = 0.01
BN_EPS = 1e-5
NEG_INF = -1e9

SLAB_WIDTH = 128    # >= widest parameter (4*HID = 128)
_T_SHIFT = TIME_HORIZON.bit_length() - 1
assert (1 << _T_SHIFT) == TIME_HORIZON, "time_horizon must be a power of two"

# ------------------------- packed-weight slab layout -------------------------
_PARAM_ORDER = (
    "te_w", "te_b", "se_w", "se_b",
    "ta_wqkv", "ta_bqkv", "ta_wo", "ta_bo",
    "sa_wqkv", "sa_bqkv", "sa_wo", "sa_bo",
    "ca_wqkv", "ca_bqkv", "ca_wo", "ca_bo",
    "lt_wih", "lt_whh", "lt_b",
    "ls_wih", "ls_whh", "ls_b",
    "f1_w", "f1_b", "f2_w", "f2_b", "f3_w", "f3_b", "f4_w", "f4_b",
)

_PARAM_SHAPES = {
    "te_w": (TARGET_FEAT, EMB), "te_b": (1, EMB),
    "se_w": (SURR_FEAT, EMB), "se_b": (1, EMB),
    "ta_wqkv": (EMB, 3 * EMB), "ta_bqkv": (1, 3 * EMB),
    "ta_wo": (EMB, EMB), "ta_bo": (1, EMB),
    "sa_wqkv": (EMB, 3 * EMB), "sa_bqkv": (1, 3 * EMB),
    "sa_wo": (EMB, EMB), "sa_bo": (1, EMB),
    "ca_wqkv": (HID, 3 * HID), "ca_bqkv": (1, 3 * HID),
    "ca_wo": (HID, HID), "ca_bo": (1, HID),
    "lt_wih": (EMB, 4 * HID), "lt_whh": (HID, 4 * HID), "lt_b": (1, 4 * HID),
    "ls_wih": (EMB, 4 * HID), "ls_whh": (HID, 4 * HID), "ls_b": (1, 4 * HID),
    "f1_w": (HID, FC_SIZE[0]), "f1_b": (1, FC_SIZE[0]),
    "f2_w": (FC_SIZE[0], FC_SIZE[1]), "f2_b": (1, FC_SIZE[1]),
    "f3_w": (FC_SIZE[1], FC_SIZE[2]), "f3_b": (1, FC_SIZE[2]),
    "f4_w": (FC_SIZE[2], 3), "f4_b": (1, 3),
}


def _build_layout():
    layout, row = {}, 0
    for name in _PARAM_ORDER:
        r, c = _PARAM_SHAPES[name]
        assert c <= SLAB_WIDTH
        layout[name] = (row, r, c)
        row += -(-r // 8) * 8            # pad each tensor to an 8-row boundary
    return layout, row


_LAYOUT, _SLAB_ROWS = _build_layout()


# ================================ fused kernel ===============================
def _fused_forward_kernel(tgt_ref, sur_ref, w_ref, out_ref):
    f32 = jnp.float32

    def W(name):
        off, r, c = _LAYOUT[name]
        return w_ref[off:off + r, 0:c]

    def leaky(v):
        return jnp.where(v >= 0, v, LEAKY_SLOPE * v)

    def linear(x, wname, bname):
        return jnp.dot(x, W(wname), preferred_element_type=f32) + W(bname)

    # -------- block-diagonal additive masks built in-kernel (iota + compare) --
    def self_mask(n):
        r = jax.lax.broadcasted_iota(jnp.int32, (n, n), 0)
        c = jax.lax.broadcasted_iota(jnp.int32, (n, n), 1)
        same = (r >> _T_SHIFT) == (c >> _T_SHIFT)
        return jnp.where(same, 0.0, NEG_INF).astype(f32)

    def cross_mask(nq, k_per_q):
        r = jax.lax.broadcasted_iota(jnp.int32, (nq, nq * k_per_q), 0)
        c = jax.lax.broadcasted_iota(jnp.int32, (nq, nq * k_per_q), 1)
        d = c - k_per_q * r
        keep = jnp.logical_and(d >= 0, d < k_per_q)
        return jnp.where(keep, 0.0, NEG_INF).astype(f32)

    # ------------------------------ multi-head attention ---------------------
    def mha(q2, mask_add, prefix, kv2=None):
        """q2: (Mq, E). kv2=None -> self attention. Per-sequence structure is
        enforced by the additive block-diagonal mask."""
        E = q2.shape[1]
        d = HEAD_DIM
        scale = 1.0 / math.sqrt(d)
        wqkv = W(prefix + "_wqkv")                  # (E, 3E) = [Wq | Wk | Wv]
        bqkv = W(prefix + "_bqkv")                  # (1, 3E)
        if kv2 is None:                             # self-attn: one fused matmul
            qkv = jnp.dot(q2, wqkv, preferred_element_type=f32) + bqkv
            q_p = qkv[:, 0:E]
            kv_p = qkv[:, E:3 * E]                  # (M, 2E) = [K | V]
        else:                                       # cross-attn: Q and fused KV
            q_p = jnp.dot(q2, wqkv[:, 0:E],
                          preferred_element_type=f32) + bqkv[:, 0:E]
            kv_p = jnp.dot(kv2, wqkv[:, E:3 * E],
                           preferred_element_type=f32) + bqkv[:, E:3 * E]
        ctx = []
        for h in range(NUM_HEADS):
            qh = q_p[:, h * d:(h + 1) * d]                  # (Mq, d)
            kh = kv_p[:, h * d:(h + 1) * d]                 # (Mk, d)
            vh = kv_p[:, E + h * d:E + (h + 1) * d]         # (Mk, d)
            s = jax.lax.dot_general(qh, kh, (((1,), (1,)), ((), ())),
                                    preferred_element_type=f32) * scale
            s = s + mask_add
            s = s - jnp.max(s, axis=-1, keepdims=True)
            p = jnp.exp(s)                                  # masked -> exactly 0
            p = p * pl.reciprocal(jnp.sum(p, axis=-1, keepdims=True), approx=True)
            ctx.append(jnp.dot(p, vh, preferred_element_type=f32))
        ctx = jnp.concatenate(ctx, axis=-1)                 # (Mq, E)
        return (jnp.dot(ctx, W(prefix + "_wo"), preferred_element_type=f32)
                + W(prefix + "_bo"))

    # ------------------- two LSTMs, interleaved single time loop -------------
    def lstm_pair_last(xt2, xs2):
        """xt2: (B*T, E), xs2: (B*5*T, E); rows grouped per sequence in blocks
        of T.  Returns final hidden states (B, H) and (B*5, H).  PyTorch gate
        order (i, f, g, o); zero initial h/c."""
        H, T = HID, TIME_HORIZON
        nt = xt2.shape[0] // T
        ns = xs2.shape[0] // T
        # Input-gate contributions for every timestep in one matmul per LSTM.
        gx_t = jnp.dot(xt2, W("lt_wih"), preferred_element_type=f32) + W("lt_b")
        gx_s = jnp.dot(xs2, W("ls_wih"), preferred_element_type=f32) + W("ls_b")
        gx_t = gx_t.reshape(nt, T, 4 * H)
        gx_s = gx_s.reshape(ns, T, 4 * H)
        # Hoist the per-step gate slices out of the recurrence (time-major
        # gates): the gathers no longer sit on the serial critical path.
        gt_steps = [gx_t[:, t, :] for t in range(T)]
        gs_steps = [gx_s[:, t, :] for t in range(T)]
        whh_t = W("lt_whh")
        whh_s = W("ls_whh")

        ht = jnp.zeros((nt, H), f32)
        ct = jnp.zeros((nt, H), f32)
        hs = jnp.zeros((ns, H), f32)
        cs = jnp.zeros((ns, H), f32)

        def cell(g, c):
            sig = jax.nn.sigmoid(g)            # one EUP pass over all 4H lanes
            i_g = sig[:, 0:H]
            f_g = sig[:, H:2 * H]
            o_g = sig[:, 3 * H:4 * H]
            g_g = jnp.tanh(g[:, 2 * H:3 * H])
            c_new = f_g * c + i_g * g_g
            h_new = o_g * jnp.tanh(c_new)
            return h_new, c_new

        for t in range(T):
            # Two independent recurrences issued back-to-back so their
            # MXU push->pop and EUP latencies overlap.
            g_t = gt_steps[t] + jnp.dot(ht, whh_t, preferred_element_type=f32)
            g_s = gs_steps[t] + jnp.dot(hs, whh_s, preferred_element_type=f32)
            ht, ct = cell(g_t, ct)
            hs, cs = cell(g_s, cs)
        return ht, hs

    # =============================== forward pass ============================
    BT = tgt_ref.shape[0]           # B * T
    BST = sur_ref.shape[0]          # B * 5 * T
    B = BT // TIME_HORIZON

    mask_t = self_mask(BT)                    # target self-attn   (B*T, B*T)
    mask_s = self_mask(BST)                   # surrounding self-attn
    mask_c = cross_mask(B, 5)                 # cross-attn (Tq=1, Tk=5)

    # Embedding layers (Linear + folded BN + LeakyReLU).
    xt = leaky(linear(tgt_ref[...], "te_w", "te_b"))        # (B*T, E)
    xs = leaky(linear(sur_ref[...], "se_w", "se_b"))        # (B*T*5, E)

    # Self-attention on both branches (independent; scheduler interleaves).
    at = mha(xt, mask_t, "ta")                               # (B*T, E)
    as_ = mha(xs, mask_s, "sa")                              # (B*T*5, E)

    # Interleaved LSTM recurrences; LeakyReLU on the final hidden states.
    ht, hs = lstm_pair_last(at, as_)
    ht = leaky(ht)                                           # (B, H)
    hs = leaky(hs)                                           # (B*5, H)

    # Cross attention (target hidden attends over 5 surrounding hiddens).
    enc = mha(ht, mask_c, "ca", kv2=hs)                      # (B, H)

    # FC head + softmax.
    y = leaky(linear(enc, "f1_w", "f1_b"))
    y = leaky(linear(y, "f2_w", "f2_b"))
    y = leaky(linear(y, "f3_w", "f3_b"))
    z = linear(y, "f4_w", "f4_b")                            # (B, 3)
    z = z - jnp.max(z, axis=-1, keepdims=True)
    e = jnp.exp(z)
    out_ref[...] = (e / jnp.sum(e, axis=-1, keepdims=True)).astype(out_ref.dtype)


# =============================== parameter setup =============================
def init_params(key):
    keys = iter(jax.random.split(key, 64))

    def nrm(shape, s=0.1):
        return (s * jax.random.normal(next(keys), shape)).astype(jnp.float32)

    def linear_bn(in_f, out_f):
        """Linear + eval-mode BatchNorm1d folded into (W_eff, b_eff)."""
        Wm, b = nrm((out_f, in_f)), nrm((out_f,))
        gamma = 1.0 + nrm((out_f,))
        beta = nrm((out_f,))
        mean = nrm((out_f,))
        var = 1.0 + 0.1 * jnp.abs(nrm((out_f,)))
        scale = gamma / jnp.sqrt(var + BN_EPS)
        w_eff = Wm.T * scale[None, :]
        b_eff = (b - mean) * scale + beta
        return w_eff, b_eff.reshape(1, out_f)

    def mha_params(e):
        in_w, in_b = nrm((3 * e, e)), nrm((3 * e,))          # rows = [q; k; v]
        out_w, out_b = nrm((e, e)), nrm((e,))
        return (in_w.T, in_b.reshape(1, 3 * e),
                out_w.T, out_b.reshape(1, e))

    def lstm_params(in_f, h):
        w_ih, w_hh = nrm((4 * h, in_f)), nrm((4 * h, h))
        b_ih, b_hh = nrm((4 * h,)), nrm((4 * h,))
        return w_ih.T, w_hh.T, (b_ih + b_hh).reshape(1, 4 * h)

    p = {}
    p["te_w"], p["te_b"] = linear_bn(TARGET_FEAT, EMB)
    p["se_w"], p["se_b"] = linear_bn(SURR_FEAT, EMB)
    (p["ta_wqkv"], p["ta_bqkv"], p["ta_wo"], p["ta_bo"]) = mha_params(EMB)
    (p["sa_wqkv"], p["sa_bqkv"], p["sa_wo"], p["sa_bo"]) = mha_params(EMB)
    (p["ca_wqkv"], p["ca_bqkv"], p["ca_wo"], p["ca_bo"]) = mha_params(HID)
    p["lt_wih"], p["lt_whh"], p["lt_b"] = lstm_params(EMB, HID)   # NUM_LAYERS=1
    p["ls_wih"], p["ls_whh"], p["ls_b"] = lstm_params(EMB, HID)
    p["f1_w"], p["f1_b"] = linear_bn(HID, FC_SIZE[0])
    p["f2_w"], p["f2_b"] = linear_bn(FC_SIZE[0], FC_SIZE[1])
    p["f3_w"], p["f3_b"] = linear_bn(FC_SIZE[1], FC_SIZE[2])
    p["f4_w"] = nrm((3, FC_SIZE[2])).T
    p["f4_b"] = nrm((3,)).reshape(1, 3)
    return p


def pack_params(params):
    """Pack every parameter into one (ROWS, 128) fp32 slab (single input DMA)."""
    slab = np.zeros((_SLAB_ROWS, SLAB_WIDTH), np.float32)
    for name in _PARAM_ORDER:
        off, r, c = _LAYOUT[name]
        arr = np.asarray(params[name], np.float32)
        assert arr.shape == (r, c), (name, arr.shape, (r, c))
        slab[off:off + r, 0:c] = arr
    return jnp.asarray(slab)


# ================================ forward pass ===============================
@jax.jit
def lane_change_forward(weight_slab, target, surrounding):
    B = target.shape[0]
    tgt2 = target.reshape(B * TIME_HORIZON, TARGET_FEAT)
    sur2 = surrounding.reshape(B * TIME_HORIZON * 5, SURR_FEAT)
    return pl.pallas_call(
        _fused_forward_kernel,
        out_shape=jax.ShapeDtypeStruct((B, 3), jnp.float32),
        in_specs=[
            pl.BlockSpec(memory_space=pltpu.MemorySpace.VMEM),
            pl.BlockSpec(memory_space=pltpu.MemorySpace.VMEM),
            pl.BlockSpec(memory_space=pltpu.MemorySpace.VMEM),
        ],
        out_specs=pl.BlockSpec(memory_space=pltpu.MemorySpace.VMEM),
    )(tgt2, sur2, weight_slab)


# ==================================== main ===================================
if __name__ == "__main__":
    key = jax.random.PRNGKey(0)
    kp, kt, ks = jax.random.split(key, 3)
    params = init_params(kp)
    weight_slab = pack_params(params)
    target = jax.random.normal(kt, (BATCH, TIME_HORIZON, TARGET_FEAT), jnp.float32)
    surrounding = jax.random.normal(ks, (BATCH, TIME_HORIZON, 5, SURR_FEAT),
                                    jnp.float32)

    out = lane_change_forward(weight_slab, target, surrounding)
    out = jax.block_until_ready(out)
    assert out.shape == (BATCH, 3)
    assert bool(jnp.all(jnp.isfinite(out)))
    # final softmax uses an exact divide, so rows sum to ~1
    assert bool(jnp.all(jnp.abs(jnp.sum(out, axis=-1) - 1.0) < 1e-4))
    print("KERNEL_OK")
</pallas_src>

<mosaic_0001>
module attributes {stable_mosaic.version = 11 : i64} {
  func.func @_fused_forward_kernel(%arg0: memref<16x14xf32, #tpu.memory_space<vmem>>, %arg1: memref<80x15xf32, #tpu.memory_space<vmem>>, %arg2: memref<608x128xf32, #tpu.memory_space<vmem>>, %arg3: memref<2x3xf32, #tpu.memory_space<vmem>>) attributes {dimension_semantics = [], scalar_prefetch = 0 : i64, scratch_operands = 0 : i64, tpu.core_type = #tpu.core_type<tc>} {
    %0 = tpu.iota {dimensions = array<i32: 0>} : vector<16x16xi32>
    %1 = tpu.iota {dimensions = array<i32: 1>} : vector<16x16xi32>
    %c3_i32 = arith.constant 3 : i32
    %2 = vector.broadcast %c3_i32 : i32 to vector<16x16xi32>
    %3 = arith.shrsi %0, %2 : vector<16x16xi32>
    %c3_i32_0 = arith.constant 3 : i32
    %4 = vector.broadcast %c3_i32_0 : i32 to vector<16x16xi32>
    %5 = arith.shrsi %1, %4 : vector<16x16xi32>
    %6 = arith.cmpi eq, %3, %5 : vector<16x16xi32>
    %cst = arith.constant 0.000000e+00 : f32
    %cst_1 = arith.constant -1.000000e+09 : f32
    %7 = vector.broadcast %cst : f32 to vector<16x16xf32>
    %8 = vector.broadcast %cst_1 : f32 to vector<16x16xf32>
    %9 = arith.select %6, %7, %8 : vector<16x16xi1>, vector<16x16xf32>
    %10 = tpu.iota {dimensions = array<i32: 0>} : vector<80x80xi32>
    %11 = tpu.iota {dimensions = array<i32: 1>} : vector<80x80xi32>
    %c3_i32_2 = arith.constant 3 : i32
    %12 = vector.broadcast %c3_i32_2 : i32 to vector<80x80xi32>
    %13 = arith.shrsi %10, %12 : vector<80x80xi32>
    %c3_i32_3 = arith.constant 3 : i32
    %14 = vector.broadcast %c3_i32_3 : i32 to vector<80x80xi32>
    %15 = arith.shrsi %11, %14 : vector<80x80xi32>
    %16 = arith.cmpi eq, %13, %15 : vector<80x80xi32>
    %cst_4 = arith.constant 0.000000e+00 : f32
    %cst_5 = arith.constant -1.000000e+09 : f32
    %17 = vector.broadcast %cst_4 : f32 to vector<80x80xf32>
    %18 = vector.broadcast %cst_5 : f32 to vector<80x80xf32>
    %19 = arith.select %16, %17, %18 : vector<80x80xi1>, vector<80x80xf32>
    %20 = tpu.iota {dimensions = array<i32: 0>} : vector<2x10xi32>
    %21 = tpu.iota {dimensions = array<i32: 1>} : vector<2x10xi32>
    %c5_i32 = arith.constant 5 : i32
    %22 = vector.broadcast %c5_i32 : i32 to vector<2x10xi32>
    %23 = arith.muli %22, %20 : vector<2x10xi32>
    %24 = arith.subi %21, %23 : vector<2x10xi32>
    %c0_i32 = arith.constant 0 : i32
    %25 = vector.broadcast %c0_i32 : i32 to vector<2x10xi32>
    %26 = arith.cmpi sge, %24, %25 : vector<2x10xi32>
    %c5_i32_6 = arith.constant 5 : i32
    %27 = vector.broadcast %c5_i32_6 : i32 to vector<2x10xi32>
    %28 = arith.cmpi slt, %24, %27 : vector<2x10xi32>
    %29 = arith.andi %26, %28 : vector<2x10xi1>
    %cst_7 = arith.constant 0.000000e+00 : f32
    %cst_8 = arith.constant -1.000000e+09 : f32
    %30 = vector.broadcast %cst_7 : f32 to vector<2x10xf32>
    %31 = vector.broadcast %cst_8 : f32 to vector<2x10xf32>
    %32 = arith.select %29, %30, %31 : vector<2x10xi1>, vector<2x10xf32>
    %c0 = arith.constant 0 : index
    %c0_9 = arith.constant 0 : index
    %33 = vector.load %arg0[%c0, %c0_9] : memref<16x14xf32, #tpu.memory_space<vmem>>, vector<16x14xf32>
    %c0_10 = arith.constant 0 : index
    %c0_11 = arith.constant 0 : index
    %34 = vector.load %arg2[%c0_10, %c0_11] : memref<608x128xf32, #tpu.memory_space<vmem>>, vector<14x32xf32>
    %cst_12 = arith.constant dense<0.000000e+00> : vector<16x32xf32>
    %35 = tpu.matmul %33, %34, %cst_12 {dimension_numbers = #tpu.dot_dimension_numbers<[1], [0], [0], [1], [0, 0, 1, 1], [], []>} : vector<16x14xf32>, vector<14x32xf32>, vector<16x32xf32> -> vector<16x32xf32>
    %c16 = arith.constant 16 : index
    %c0_13 = arith.constant 0 : index
    %36 = vector.load %arg2[%c16, %c0_13] : memref<608x128xf32, #tpu.memory_space<vmem>>, vector<1x32xf32>
    %37 = vector.broadcast %36 : vector<1x32xf32> to vector<16x32xf32>
    %38 = arith.addf %35, %37 : vector<16x32xf32>
    %cst_14 = arith.constant 0.000000e+00 : f32
    %39 = vector.broadcast %cst_14 : f32 to vector<16x32xf32>
    %40 = arith.cmpf oge, %38, %39 : vector<16x32xf32>
    %cst_15 = arith.constant 0.00999999977 : f32
    %41 = vector.broadcast %cst_15 : f32 to vector<16x32xf32>
    %42 = arith.mulf %41, %38 : vector<16x32xf32>
    %43 = arith.select %40, %38, %42 : vector<16x32xi1>, vector<16x32xf32>
    %c0_16 = arith.constant 0 : index
    %c0_17 = arith.constant 0 : index
    %44 = vector.load %arg1[%c0_16, %c0_17] : memref<80x15xf32, #tpu.memory_space<vmem>>, vector<80x15xf32>
    %c24 = arith.constant 24 : index
    %c0_18 = arith.constant 0 : index
    %45 = vector.load %arg2[%c24, %c0_18] : memref<608x128xf32, #tpu.memory_space<vmem>>, vector<15x32xf32>
    %cst_19 = arith.constant dense<0.000000e+00> : vector<80x32xf32>
    %46 = tpu.matmul %44, %45, %cst_19 {dimension_numbers = #tpu.dot_dimension_numbers<[1], [0], [0], [1], [0, 0, 1, 1], [], []>} : vector<80x15xf32>, vector<15x32xf32>, vector<80x32xf32> -> vector<80x32xf32>
    %c40 = arith.constant 40 : index
    %c0_20 = arith.constant 0 : index
    %47 = vector.load %arg2[%c40, %c0_20] : memref<608x128xf32, #tpu.memory_space<vmem>>, vector<1x32xf32>
    %48 = vector.broadcast %47 : vector<1x32xf32> to vector<80x32xf32>
    %49 = arith.addf %46, %48 : vector<80x32xf32>
    %cst_21 = arith.constant 0.000000e+00 : f32
    %50 = vector.broadcast %cst_21 : f32 to vector<80x32xf32>
    %51 = arith.cmpf oge, %49, %50 : vector<80x32xf32>
    %cst_22 = arith.constant 0.00999999977 : f32
    %52 = vector.broadcast %cst_22 : f32 to vector<80x32xf32>
    %53 = arith.mulf %52, %49 : vector<80x32xf32>
    %54 = arith.select %51, %49, %53 : vector<80x32xi1>, vector<80x32xf32>
    %c48 = arith.constant 48 : index
    %c0_23 = arith.constant 0 : index
    %55 = vector.load %arg2[%c48, %c0_23] : memref<608x128xf32, #tpu.memory_space<vmem>>, vector<32x96xf32>
    %c80 = arith.constant 80 : index
    %c0_24 = arith.constant 0 : index
    %56 = vector.load %arg2[%c80, %c0_24] : memref<608x128xf32, #tpu.memory_space<vmem>>, vector<1x96xf32>
    %cst_25 = arith.constant dense<0.000000e+00> : vector<16x96xf32>
    %57 = tpu.matmul %43, %55, %cst_25 {dimension_numbers = #tpu.dot_dimension_numbers<[1], [0], [0], [1], [0, 0, 1, 1], [], []>} : vector<16x32xf32>, vector<32x96xf32>, vector<16x96xf32> -> vector<16x96xf32>
    %58 = vector.broadcast %56 : vector<1x96xf32> to vector<16x96xf32>
    %59 = arith.addf %57, %58 : vector<16x96xf32>
    %60 = vector.extract_strided_slice %59 {offsets = [0, 0], sizes = [16, 32], strides = [1, 1]} : vector<16x96xf32> to vector<16x32xf32>
    %61 = vector.extract_strided_slice %59 {offsets = [0, 32], sizes = [16, 64], strides = [1, 1]} : vector<16x96xf32> to vector<16x64xf32>
    %62 = vector.extract_strided_slice %60 {offsets = [0, 0], sizes = [16, 8], strides = [1, 1]} : vector<16x32xf32> to vector<16x8xf32>
    %63 = vector.extract_strided_slice %61 {offsets = [0, 0], sizes = [16, 8], strides = [1, 1]} : vector<16x64xf32> to vector<16x8xf32>
    %64 = vector.extract_strided_slice %61 {offsets = [0, 32], sizes = [16, 8], strides = [1, 1]} : vector<16x64xf32> to vector<16x8xf32>
    %cst_26 = arith.constant dense<0.000000e+00> : vector<16x16xf32>
    %65 = tpu.matmul %62, %63, %cst_26 {dimension_numbers = #tpu.dot_dimension_numbers<[1], [1], [0], [0], [0, 0, 1, 0], [], []>} : vector<16x8xf32>, vector<16x8xf32>, vector<16x16xf32> -> vector<16x16xf32>
    %cst_27 = arith.constant 0.353553385 : f32
    %66 = vector.broadcast %cst_27 : f32 to vector<16x16xf32>
    %67 = arith.mulf %65, %66 : vector<16x16xf32>
    %68 = arith.addf %67, %9 : vector<16x16xf32>
    %cst_28 = arith.constant dense<0xFF800000> : vector<16xf32>
    %69 = vector.multi_reduction <maximumf>, %68, %cst_28 [1] : vector<16x16xf32> to vector<16xf32>
    %70 = vector.shape_cast %69 : vector<16xf32> to vector<16x1xf32>
    %71 = vector.broadcast %70 : vector<16x1xf32> to vector<16x16xf32>
    %72 = arith.subf %68, %71 : vector<16x16xf32>
    %73 = math.exp %72 : vector<16x16xf32>
    %cst_29 = arith.constant dense<0.000000e+00> : vector<16xf32>
    %74 = vector.multi_reduction <add>, %73, %cst_29 [1] : vector<16x16xf32> to vector<16xf32>
    %75 = vector.shape_cast %74 : vector<16xf32> to vector<16x1xf32>
    %76 = tpu.reciprocal %75 {approx = true} : vector<16x1xf32> -> vector<16x1xf32>
    %77 = vector.broadcast %76 : vector<16x1xf32> to vector<16x16xf32>
    %78 = arith.mulf %73, %77 : vector<16x16xf32>
    %cst_30 = arith.constant dense<0.000000e+00> : vector<16x8xf32>
    %79 = tpu.matmul %78, %64, %cst_30 {dimension_numbers = #tpu.dot_dimension_numbers<[1], [0], [0], [1], [0, 0, 1, 1], [], []>} : vector<16x16xf32>, vector<16x8xf32>, vector<16x8xf32> -> vector<16x8xf32>
    %80 = vector.extract_strided_slice %60 {offsets = [0, 8], sizes = [16, 8], strides = [1, 1]} : vector<16x32xf32> to vector<16x8xf32>
    %81 = vector.extract_strided_slice %61 {offsets = [0, 8], sizes = [16, 8], strides = [1, 1]} : vector<16x64xf32> to vector<16x8xf32>
    %82 = vector.extract_strided_slice %61 {offsets = [0, 40], sizes = [16, 8], strides = [1, 1]} : vector<16x64xf32> to vector<16x8xf32>
    %cst_31 = arith.constant dense<0.000000e+00> : vector<16x16xf32>
    %83 = tpu.matmul %80, %81, %cst_31 {dimension_numbers = #tpu.dot_dimension_numbers<[1], [1], [0], [0], [0, 0, 1, 0], [], []>} : vector<16x8xf32>, vector<16x8xf32>, vector<16x16xf32> -> vector<16x16xf32>
    %cst_32 = arith.constant 0.353553385 : f32
    %84 = vector.broadcast %cst_32 : f32 to vector<16x16xf32>
    %85 = arith.mulf %83, %84 : vector<16x16xf32>
    %86 = arith.addf %85, %9 : vector<16x16xf32>
    %cst_33 = arith.constant dense<0xFF800000> : vector<16xf32>
    %87 = vector.multi_reduction <maximumf>, %86, %cst_33 [1] : vector<16x16xf32> to vector<16xf32>
    %88 = vector.shape_cast %87 : vector<16xf32> to vector<16x1xf32>
    %89 = vector.broadcast %88 : vector<16x1xf32> to vector<16x16xf32>
    %90 = arith.subf %86, %89 : vector<16x16xf32>
    %91 = math.exp %90 : vector<16x16xf32>
    %cst_34 = arith.constant dense<0.000000e+00> : vector<16xf32>
    %92 = vector.multi_reduction <add>, %91, %cst_34 [1] : vector<16x16xf32> to vector<16xf32>
    %93 = vector.shape_cast %92 : vector<16xf32> to vector<16x1xf32>
    %94 = tpu.reciprocal %93 {approx = true} : vector<16x1xf32> -> vector<16x1xf32>
    %95 = vector.broadcast %94 : vector<16x1xf32> to vector<16x16xf32>
    %96 = arith.mulf %91, %95 : vector<16x16xf32>
    %cst_35 = arith.constant dense<0.000000e+00> : vector<16x8xf32>
    %97 = tpu.matmul %96, %82, %cst_35 {dimension_numbers = #tpu.dot_dimension_numbers<[1], [0], [0], [1], [0, 0, 1, 1], [], []>} : vector<16x16xf32>, vector<16x8xf32>, vector<16x8xf32> -> vector<16x8xf32>
    %98 = vector.extract_strided_slice %60 {offsets = [0, 16], sizes = [16, 8], strides = [1, 1]} : vector<16x32xf32> to vector<16x8xf32>
    %99 = vector.extract_strided_slice %61 {offsets = [0, 16], sizes = [16, 8], strides = [1, 1]} : vector<16x64xf32> to vector<16x8xf32>
    %100 = vector.extract_strided_slice %61 {offsets = [0, 48], sizes = [16, 8], strides = [1, 1]} : vector<16x64xf32> to vector<16x8xf32>
    %cst_36 = arith.constant dense<0.000000e+00> : vector<16x16xf32>
    %101 = tpu.matmul %98, %99, %cst_36 {dimension_numbers = #tpu.dot_dimension_numbers<[1], [1], [0], [0], [0, 0, 1, 0], [], []>} : vector<16x8xf32>, vector<16x8xf32>, vector<16x16xf32> -> vector<16x16xf32>
    %cst_37 = arith.constant 0.353553385 : f32
    %102 = vector.broadcast %cst_37 : f32 to vector<16x16xf32>
    %103 = arith.mulf %101, %102 : vector<16x16xf32>
    %104 = arith.addf %103, %9 : vector<16x16xf32>
    %cst_38 = arith.constant dense<0xFF800000> : vector<16xf32>
    %105 = vector.multi_reduction <maximumf>, %104, %cst_38 [1] : vector<16x16xf32> to vector<16xf32>
    %106 = vector.shape_cast %105 : vector<16xf32> to vector<16x1xf32>
    %107 = vector.broadcast %106 : vector<16x1xf32> to vector<16x16xf32>
    %108 = arith.subf %104, %107 : vector<16x16xf32>
    %109 = math.exp %108 : vector<16x16xf32>
    %cst_39 = arith.constant dense<0.000000e+00> : vector<16xf32>
    %110 = vector.multi_reduction <add>, %109, %cst_39 [1] : vector<16x16xf32> to vector<16xf32>
    %111 = vector.shape_cast %110 : vector<16xf32> to vector<16x1xf32>
    %112 = tpu.reciprocal %111 {approx = true} : vector<16x1xf32> -> vector<16x1xf32>
    %113 = vector.broadcast %112 : vector<16x1xf32> to vector<16x16xf32>
    %114 = arith.mulf %109, %113 : vector<16x16xf32>
    %cst_40 = arith.constant dense<0.000000e+00> : vector<16x8xf32>
    %115 = tpu.matmul %114, %100, %cst_40 {dimension_numbers = #tpu.dot_dimension_numbers<[1], [0], [0], [1], [0, 0, 1, 1], [], []>} : vector<16x16xf32>, vector<16x8xf32>, vector<16x8xf32> -> vector<16x8xf32>
    %116 = vector.extract_strided_slice %60 {offsets = [0, 24], sizes = [16, 8], strides = [1, 1]} : vector<16x32xf32> to vector<16x8xf32>
    %117 = vector.extract_strided_slice %61 {offsets = [0, 24], sizes = [16, 8], strides = [1, 1]} : vector<16x64xf32> to vector<16x8xf32>
    %118 = vector.extract_strided_slice %61 {offsets = [0, 56], sizes = [16, 8], strides = [1, 1]} : vector<16x64xf32> to vector<16x8xf32>
    %cst_41 = arith.constant dense<0.000000e+00> : vector<16x16xf32>
    %119 = tpu.matmul %116, %117, %cst_41 {dimension_numbers = #tpu.dot_dimension_numbers<[1], [1], [0], [0], [0, 0, 1, 0], [], []>} : vector<16x8xf32>, vector<16x8xf32>, vector<16x16xf32> -> vector<16x16xf32>
    %cst_42 = arith.constant 0.353553385 : f32
    %120 = vector.broadcast %cst_42 : f32 to vector<16x16xf32>
    %121 = arith.mulf %119, %120 : vector<16x16xf32>
    %122 = arith.addf %121, %9 : vector<16x16xf32>
    %cst_43 = arith.constant dense<0xFF800000> : vector<16xf32>
    %123 = vector.multi_reduction <maximumf>, %122, %cst_43 [1] : vector<16x16xf32> to vector<16xf32>
    %124 = vector.shape_cast %123 : vector<16xf32> to vector<16x1xf32>
    %125 = vector.broadcast %124 : vector<16x1xf32> to vector<16x16xf32>
    %126 = arith.subf %122, %125 : vector<16x16xf32>
    %127 = math.exp %126 : vector<16x16xf32>
    %cst_44 = arith.constant dense<0.000000e+00> : vector<16xf32>
    %128 = vector.multi_reduction <add>, %127, %cst_44 [1] : vector<16x16xf32> to vector<16xf32>
    %129 = vector.shape_cast %128 : vector<16xf32> to vector<16x1xf32>
    %130 = tpu.reciprocal %129 {approx = true} : vector<16x1xf32> -> vector<16x1xf32>
    %131 = vector.broadcast %130 : vector<16x1xf32> to vector<16x16xf32>
    %132 = arith.mulf %127, %131 : vector<16x16xf32>
    %cst_45 = arith.constant dense<0.000000e+00> : vector<16x8xf32>
    %133 = tpu.matmul %132, %118, %cst_45 {dimension_numbers = #tpu.dot_dimension_numbers<[1], [0], [0], [1], [0, 0, 1, 1], [], []>} : vector<16x16xf32>, vector<16x8xf32>, vector<16x8xf32> -> vector<16x8xf32>
    %134 = tpu.concatenate %79, %97, %115, %133 in 1 : vector<16x8xf32>, vector<16x8xf32>, vector<16x8xf32>, vector<16x8xf32> -> vector<16x32xf32>
    %c88 = arith.constant 88 : index
    %c0_46 = arith.constant 0 : index
    %135 = vector.load %arg2[%c88, %c0_46] : memref<608x128xf32, #tpu.memory_space<vmem>>, vector<32x32xf32>
    %cst_47 = arith.constant dense<0.000000e+00> : vector<16x32xf32>
    %136 = tpu.matmul %134, %135, %cst_47 {dimension_numbers = #tpu.dot_dimension_numbers<[1], [0], [0], [1], [0, 0, 1, 1], [], []>} : vector<16x32xf32>, vector<32x32xf32>, vector<16x32xf32> -> vector<16x32xf32>
    %c120 = arith.constant 120 : index
    %c0_48 = arith.constant 0 : index
    %137 = vector.load %arg2[%c120, %c0_48] : memref<608x128xf32, #tpu.memory_space<vmem>>, vector<1x32xf32>
    %138 = vector.broadcast %137 : vector<1x32xf32> to vector<16x32xf32>
    %139 = arith.addf %136, %138 : vector<16x32xf32>
    %c128 = arith.constant 128 : index
    %c0_49 = arith.constant 0 : index
    %140 = vector.load %arg2[%c128, %c0_49] : memref<608x128xf32, #tpu.memory_space<vmem>>, vector<32x96xf32>
    %c160 = arith.constant 160 : index
    %c0_50 = arith.constant 0 : index
    %141 = vector.load %arg2[%c160, %c0_50] : memref<608x128xf32, #tpu.memory_space<vmem>>, vector<1x96xf32>
    %cst_51 = arith.constant dense<0.000000e+00> : vector<80x96xf32>
    %142 = tpu.matmul %54, %140, %cst_51 {dimension_numbers = #tpu.dot_dimension_numbers<[1], [0], [0], [1], [0, 0, 1, 1], [], []>} : vector<80x32xf32>, vector<32x96xf32>, vector<80x96xf32> -> vector<80x96xf32>
    %143 = vector.broadcast %141 : vector<1x96xf32> to vector<80x96xf32>
    %144 = arith.addf %142, %143 : vector<80x96xf32>
    %145 = vector.extract_strided_slice %144 {offsets = [0, 0], sizes = [80, 32], strides = [1, 1]} : vector<80x96xf32> to vector<80x32xf32>
    %146 = vector.extract_strided_slice %144 {offsets = [0, 32], sizes = [80, 64], strides = [1, 1]} : vector<80x96xf32> to vector<80x64xf32>
    %147 = vector.extract_strided_slice %145 {offsets = [0, 0], sizes = [80, 8], strides = [1, 1]} : vector<80x32xf32> to vector<80x8xf32>
    %148 = vector.extract_strided_slice %146 {offsets = [0, 0], sizes = [80, 8], strides = [1, 1]} : vector<80x64xf32> to vector<80x8xf32>
    %149 = vector.extract_strided_slice %146 {offsets = [0, 32], sizes = [80, 8], strides = [1, 1]} : vector<80x64xf32> to vector<80x8xf32>
    %cst_52 = arith.constant dense<0.000000e+00> : vector<80x80xf32>
    %150 = tpu.matmul %147, %148, %cst_52 {dimension_numbers = #tpu.dot_dimension_numbers<[1], [1], [0], [0], [0, 0, 1, 0], [], []>} : vector<80x8xf32>, vector<80x8xf32>, vector<80x80xf32> -> vector<80x80xf32>
    %cst_53 = arith.constant 0.353553385 : f32
    %151 = vector.broadcast %cst_53 : f32 to vector<80x80xf32>
    %152 = arith.mulf %150, %151 : vector<80x80xf32>
    %153 = arith.addf %152, %19 : vector<80x80xf32>
    %cst_54 = arith.constant dense<0xFF800000> : vector<80xf32>
    %154 = vector.multi_reduction <maximumf>, %153, %cst_54 [1] : vector<80x80xf32> to vector<80xf32>
    %155 = vector.shape_cast %154 : vector<80xf32> to vector<80x1xf32>
    %156 = vector.broadcast %155 : vector<80x1xf32> to vector<80x80xf32>
    %157 = arith.subf %153, %156 : vector<80x80xf32>
    %158 = math.exp %157 : vector<80x80xf32>
    %cst_55 = arith.constant dense<0.000000e+00> : vector<80xf32>
    %159 = vector.multi_reduction <add>, %158, %cst_55 [1] : vector<80x80xf32> to vector<80xf32>
    %160 = vector.shape_cast %159 : vector<80xf32> to vector<80x1xf32>
    %161 = tpu.reciprocal %160 {approx = true} : vector<80x1xf32> -> vector<80x1xf32>
    %162 = vector.broadcast %161 : vector<80x1xf32> to vector<80x80xf32>
    %163 = arith.mulf %158, %162 : vector<80x80xf32>
    %cst_56 = arith.constant dense<0.000000e+00> : vector<80x8xf32>
    %164 = tpu.matmul %163, %149, %cst_56 {dimension_numbers = #tpu.dot_dimension_numbers<[1], [0], [0], [1], [0, 0, 1, 1], [], []>} : vector<80x80xf32>, vector<80x8xf32>, vector<80x8xf32> -> vector<80x8xf32>
    %165 = vector.extract_strided_slice %145 {offsets = [0, 8], sizes = [80, 8], strides = [1, 1]} : vector<80x32xf32> to vector<80x8xf32>
    %166 = vector.extract_strided_slice %146 {offsets = [0, 8], sizes = [80, 8], strides = [1, 1]} : vector<80x64xf32> to vector<80x8xf32>
    %167 = vector.extract_strided_slice %146 {offsets = [0, 40], sizes = [80, 8], strides = [1, 1]} : vector<80x64xf32> to vector<80x8xf32>
    %cst_57 = arith.constant dense<0.000000e+00> : vector<80x80xf32>
    %168 = tpu.matmul %165, %166, %cst_57 {dimension_numbers = #tpu.dot_dimension_numbers<[1], [1], [0], [0], [0, 0, 1, 0], [], []>} : vector<80x8xf32>, vector<80x8xf32>, vector<80x80xf32> -> vector<80x80xf32>
    %cst_58 = arith.constant 0.353553385 : f32
    %169 = vector.broadcast %cst_58 : f32 to vector<80x80xf32>
    %170 = arith.mulf %168, %169 : vector<80x80xf32>
    %171 = arith.addf %170, %19 : vector<80x80xf32>
    %cst_59 = arith.constant dense<0xFF800000> : vector<80xf32>
    %172 = vector.multi_reduction <maximumf>, %171, %cst_59 [1] : vector<80x80xf32> to vector<80xf32>
    %173 = vector.shape_cast %172 : vector<80xf32> to vector<80x1xf32>
    %174 = vector.broadcast %173 : vector<80x1xf32> to vector<80x80xf32>
    %175 = arith.subf %171, %174 : vector<80x80xf32>
    %176 = math.exp %175 : vector<80x80xf32>
    %cst_60 = arith.constant dense<0.000000e+00> : vector<80xf32>
    %177 = vector.multi_reduction <add>, %176, %cst_60 [1] : vector<80x80xf32> to vector<80xf32>
    %178 = vector.shape_cast %177 : vector<80xf32> to vector<80x1xf32>
    %179 = tpu.reciprocal %178 {approx = true} : vector<80x1xf32> -> vector<80x1xf32>
    %180 = vector.broadcast %179 : vector<80x1xf32> to vector<80x80xf32>
    %181 = arith.mulf %176, %180 : vector<80x80xf32>
    %cst_61 = arith.constant dense<0.000000e+00> : vector<80x8xf32>
    %182 = tpu.matmul %181, %167, %cst_61 {dimension_numbers = #tpu.dot_dimension_numbers<[1], [0], [0], [1], [0, 0, 1, 1], [], []>} : vector<80x80xf32>, vector<80x8xf32>, vector<80x8xf32> -> vector<80x8xf32>
    %183 = vector.extract_strided_slice %145 {offsets = [0, 16], sizes = [80, 8], strides = [1, 1]} : vector<80x32xf32> to vector<80x8xf32>
    %184 = vector.extract_strided_slice %146 {offsets = [0, 16], sizes = [80, 8], strides = [1, 1]} : vector<80x64xf32> to vector<80x8xf32>
    %185 = vector.extract_strided_slice %146 {offsets = [0, 48], sizes = [80, 8], strides = [1, 1]} : vector<80x64xf32> to vector<80x8xf32>
    %cst_62 = arith.constant dense<0.000000e+00> : vector<80x80xf32>
    %186 = tpu.matmul %183, %184, %cst_62 {dimension_numbers = #tpu.dot_dimension_numbers<[1], [1], [0], [0], [0, 0, 1, 0], [], []>} : vector<80x8xf32>, vector<80x8xf32>, vector<80x80xf32> -> vector<80x80xf32>
    %cst_63 = arith.constant 0.353553385 : f32
    %187 = vector.broadcast %cst_63 : f32 to vector<80x80xf32>
    %188 = arith.mulf %186, %187 : vector<80x80xf32>
    %189 = arith.addf %188, %19 : vector<80x80xf32>
    %cst_64 = arith.constant dense<0xFF800000> : vector<80xf32>
    %190 = vector.multi_reduction <maximumf>, %189, %cst_64 [1] : vector<80x80xf32> to vector<80xf32>
    %191 = vector.shape_cast %190 : vector<80xf32> to vector<80x1xf32>
    %192 = vector.broadcast %191 : vector<80x1xf32> to vector<80x80xf32>
    %193 = arith.subf %189, %192 : vector<80x80xf32>
    %194 = math.exp %193 : vector<80x80xf32>
    %cst_65 = arith.constant dense<0.000000e+00> : vector<80xf32>
    %195 = vector.multi_reduction <add>, %194, %cst_65 [1] : vector<80x80xf32> to vector<80xf32>
    %196 = vector.shape_cast %195 : vector<80xf32> to vector<80x1xf32>
    %197 = tpu.reciprocal %196 {approx = true} : vector<80x1xf32> -> vector<80x1xf32>
    %198 = vector.broadcast %197 : vector<80x1xf32> to vector<80x80xf32>
    %199 = arith.mulf %194, %198 : vector<80x80xf32>
    %cst_66 = arith.constant dense<0.000000e+00> : vector<80x8xf32>
    %200 = tpu.matmul %199, %185, %cst_66 {dimension_numbers = #tpu.dot_dimension_numbers<[1], [0], [0], [1], [0, 0, 1, 1], [], []>} : vector<80x80xf32>, vector<80x8xf32>, vector<80x8xf32> -> vector<80x8xf32>
    %201 = vector.extract_strided_slice %145 {offsets = [0, 24], sizes = [80, 8], strides = [1, 1]} : vector<80x32xf32> to vector<80x8xf32>
    %202 = vector.extract_strided_slice %146 {offsets = [0, 24], sizes = [80, 8], strides = [1, 1]} : vector<80x64xf32> to vector<80x8xf32>
    %203 = vector.extract_strided_slice %146 {offsets = [0, 56], sizes = [80, 8], strides = [1, 1]} : vector<80x64xf32> to vector<80x8xf32>
    %cst_67 = arith.constant dense<0.000000e+00> : vector<80x80xf32>
    %204 = tpu.matmul %201, %202, %cst_67 {dimension_numbers = #tpu.dot_dimension_numbers<[1], [1], [0], [0], [0, 0, 1, 0], [], []>} : vector<80x8xf32>, vector<80x8xf32>, vector<80x80xf32> -> vector<80x80xf32>
    %cst_68 = arith.constant 0.353553385 : f32
    %205 = vector.broadcast %cst_68 : f32 to vector<80x80xf32>
    %206 = arith.mulf %204, %205 : vector<80x80xf32>
    %207 = arith.addf %206, %19 : vector<80x80xf32>
    %cst_69 = arith.constant dense<0xFF800000> : vector<80xf32>
    %208 = vector.multi_reduction <maximumf>, %207, %cst_69 [1] : vector<80x80xf32> to vector<80xf32>
    %209 = vector.shape_cast %208 : vector<80xf32> to vector<80x1xf32>
    %210 = vector.broadcast %209 : vector<80x1xf32> to vector<80x80xf32>
    %211 = arith.subf %207, %210 : vector<80x80xf32>
    %212 = math.exp %211 : vector<80x80xf32>
    %cst_70 = arith.constant dense<0.000000e+00> : vector<80xf32>
    %213 = vector.multi_reduction <add>, %212, %cst_70 [1] : vector<80x80xf32> to vector<80xf32>
    %214 = vector.shape_cast %213 : vector<80xf32> to vector<80x1xf32>
    %215 = tpu.reciprocal %214 {approx = true} : vector<80x1xf32> -> vector<80x1xf32>
    %216 = vector.broadcast %215 : vector<80x1xf32> to vector<80x80xf32>
    %217 = arith.mulf %212, %216 : vector<80x80xf32>
    %cst_71 = arith.constant dense<0.000000e+00> : vector<80x8xf32>
    %218 = tpu.matmul %217, %203, %cst_71 {dimension_numbers = #tpu.dot_dimension_numbers<[1], [0], [0], [1], [0, 0, 1, 1], [], []>} : vector<80x80xf32>, vector<80x8xf32>, vector<80x8xf32> -> vector<80x8xf32>
    %219 = tpu.concatenate %164, %182, %200, %218 in 1 : vector<80x8xf32>, vector<80x8xf32>, vector<80x8xf32>, vector<80x8xf32> -> vector<80x32xf32>
    %c168 = arith.constant 168 : index
    %c0_72 = arith.constant 0 : index
    %220 = vector.load %arg2[%c168, %c0_72] : memref<608x128xf32, #tpu.memory_space<vmem>>, vector<32x32xf32>
    %cst_73 = arith.constant dense<0.000000e+00> : vector<80x32xf32>
    %221 = tpu.matmul %219, %220, %cst_73 {dimension_numbers = #tpu.dot_dimension_numbers<[1], [0], [0], [1], [0, 0, 1, 1], [], []>} : vector<80x32xf32>, vector<32x32xf32>, vector<80x32xf32> -> vector<80x32xf32>
    %c200 = arith.constant 200 : index
    %c0_74 = arith.constant 0 : index
    %222 = vector.load %arg2[%c200, %c0_74] : memref<608x128xf32, #tpu.memory_space<vmem>>, vector<1x32xf32>
    %223 = vector.broadcast %222 : vector<1x32xf32> to vector<80x32xf32>
    %224 = arith.addf %221, %223 : vector<80x32xf32>
    %c288 = arith.constant 288 : index
    %c0_75 = arith.constant 0 : index
    %225 = vector.load %arg2[%c288, %c0_75] : memref<608x128xf32, #tpu.memory_space<vmem>>, vector<32x128xf32>
    %cst_76 = arith.constant dense<0.000000e+00> : vector<16x128xf32>
    %226 = tpu.matmul %139, %225, %cst_76 {dimension_numbers = #tpu.dot_dimension_numbers<[1], [0], [0], [1], [0, 0, 1, 1], [], []>} : vector<16x32xf32>, vector<32x128xf32>, vector<16x128xf32> -> vector<16x128xf32>
    %c352 = arith.constant 352 : index
    %c0_77 = arith.constant 0 : index
    %227 = vector.load %arg2[%c352, %c0_77] : memref<608x128xf32, #tpu.memory_space<vmem>>, vector<1x128xf32>
    %228 = vector.broadcast %227 : vector<1x128xf32> to vector<16x128xf32>
    %229 = arith.addf %226, %228 : vector<16x128xf32>
    %c360 = arith.constant 360 : index
    %c0_78 = arith.constant 0 : index
    %230 = vector.load %arg2[%c360, %c0_78] : memref<608x128xf32, #tpu.memory_space<vmem>>, vector<32x128xf32>
    %cst_79 = arith.constant dense<0.000000e+00> : vector<80x128xf32>
    %231 = tpu.matmul %224, %230, %cst_79 {dimension_numbers = #tpu.dot_dimension_numbers<[1], [0], [0], [1], [0, 0, 1, 1], [], []>} : vector<80x32xf32>, vector<32x128xf32>, vector<80x128xf32> -> vector<80x128xf32>
    %c424 = arith.constant 424 : index
    %c0_80 = arith.constant 0 : index
    %232 = vector.load %arg2[%c424, %c0_80] : memref<608x128xf32, #tpu.memory_space<vmem>>, vector<1x128xf32>
    %233 = vector.broadcast %232 : vector<1x128xf32> to vector<80x128xf32>
    %234 = arith.addf %231, %233 : vector<80x128xf32>
    %235 = vector.shape_cast %229 : vector<16x128xf32> to vector<2x8x128xf32>
    %236 = vector.shape_cast %234 : vector<80x128xf32> to vector<10x8x128xf32>
    %237 = vector.extract_strided_slice %235 {offsets = [0, 0, 0], sizes = [2, 1, 128], strides = [1, 1, 1]} : vector<2x8x128xf32> to vector<2x1x128xf32>
    %238 = vector.shape_cast %237 : vector<2x1x128xf32> to vector<2x128xf32>
    %239 = vector.extract_strided_slice %235 {offsets = [0, 1, 0], sizes = [2, 1, 128], strides = [1, 1, 1]} : vector<2x8x128xf32> to vector<2x1x128xf32>
    %240 = vector.shape_cast %239 : vector<2x1x128xf32> to vector<2x128xf32>
    %241 = vector.extract_strided_slice %235 {offsets = [0, 2, 0], sizes = [2, 1, 128], strides = [1, 1, 1]} : vector<2x8x128xf32> to vector<2x1x128xf32>
    %242 = vector.shape_cast %241 : vector<2x1x128xf32> to vector<2x128xf32>
    %243 = vector.extract_strided_slice %235 {offsets = [0, 3, 0], sizes = [2, 1, 128], strides = [1, 1, 1]} : vector<2x8x128xf32> to vector<2x1x128xf32>
    %244 = vector.shape_cast %243 : vector<2x1x128xf32> to vector<2x128xf32>
    %245 = vector.extract_strided_slice %235 {offsets = [0, 4, 0], sizes = [2, 1, 128], strides = [1, 1, 1]} : vector<2x8x128xf32> to vector<2x1x128xf32>
    %246 = vector.shape_cast %245 : vector<2x1x128xf32> to vector<2x128xf32>
    %247 = vector.extract_strided_slice %235 {offsets = [0, 5, 0], sizes = [2, 1, 128], strides = [1, 1, 1]} : vector<2x8x128xf32> to vector<2x1x128xf32>
    %248 = vector.shape_cast %247 : vector<2x1x128xf32> to vector<2x128xf32>
    %249 = vector.extract_strided_slice %235 {offsets = [0, 6, 0], sizes = [2, 1, 128], strides = [1, 1, 1]} : vector<2x8x128xf32> to vector<2x1x128xf32>
    %250 = vector.shape_cast %249 : vector<2x1x128xf32> to vector<2x128xf32>
    %251 = vector.extract_strided_slice %235 {offsets = [0, 7, 0], sizes = [2, 1, 128], strides = [1, 1, 1]} : vector<2x8x128xf32> to vector<2x1x128xf32>
    %252 = vector.shape_cast %251 : vector<2x1x128xf32> to vector<2x128xf32>
    %253 = vector.extract_strided_slice %236 {offsets = [0, 0, 0], sizes = [10, 1, 128], strides = [1, 1, 1]} : vector<10x8x128xf32> to vector<10x1x128xf32>
    %254 = vector.shape_cast %253 : vector<10x1x128xf32> to vector<10x128xf32>
    %255 = vector.extract_strided_slice %236 {offsets = [0, 1, 0], sizes = [10, 1, 128], strides = [1, 1, 1]} : vector<10x8x128xf32> to vector<10x1x128xf32>
    %256 = vector.shape_cast %255 : vector<10x1x128xf32> to vector<10x128xf32>
    %257 = vector.extract_strided_slice %236 {offsets = [0, 2, 0], sizes = [10, 1, 128], strides = [1, 1, 1]} : vector<10x8x128xf32> to vector<10x1x128xf32>
    %258 = vector.shape_cast %257 : vector<10x1x128xf32> to vector<10x128xf32>
    %259 = vector.extract_strided_slice %236 {offsets = [0, 3, 0], sizes = [10, 1, 128], strides = [1, 1, 1]} : vector<10x8x128xf32> to vector<10x1x128xf32>
    %260 = vector.shape_cast %259 : vector<10x1x128xf32> to vector<10x128xf32>
    %261 = vector.extract_strided_slice %236 {offsets = [0, 4, 0], sizes = [10, 1, 128], strides = [1, 1, 1]} : vector<10x8x128xf32> to vector<10x1x128xf32>
    %262 = vector.shape_cast %261 : vector<10x1x128xf32> to vector<10x128xf32>
    %263 = vector.extract_strided_slice %236 {offsets = [0, 5, 0], sizes = [10, 1, 128], strides = [1, 1, 1]} : vector<10x8x128xf32> to vector<10x1x128xf32>
    %264 = vector.shape_cast %263 : vector<10x1x128xf32> to vector<10x128xf32>
    %265 = vector.extract_strided_slice %236 {offsets = [0, 6, 0], sizes = [10, 1, 128], strides = [1, 1, 1]} : vector<10x8x128xf32> to vector<10x1x128xf32>
    %266 = vector.shape_cast %265 : vector<10x1x128xf32> to vector<10x128xf32>
    %267 = vector.extract_strided_slice %236 {offsets = [0, 7, 0], sizes = [10, 1, 128], strides = [1, 1, 1]} : vector<10x8x128xf32> to vector<10x1x128xf32>
    %268 = vector.shape_cast %267 : vector<10x1x128xf32> to vector<10x128xf32>
    %c320 = arith.constant 320 : index
    %c0_81 = arith.constant 0 : index
    %269 = vector.load %arg2[%c320, %c0_81] : memref<608x128xf32, #tpu.memory_space<vmem>>, vector<32x128xf32>
    %c392 = arith.constant 392 : index
    %c0_82 = arith.constant 0 : index
    %270 = vector.load %arg2[%c392, %c0_82] : memref<608x128xf32, #tpu.memory_space<vmem>>, vector<32x128xf32>
    %cst_83 = arith.constant 0.000000e+00 : f32
    %271 = vector.broadcast %cst_83 : f32 to vector<2x32xf32>
    %cst_84 = arith.constant 0.000000e+00 : f32
    %272 = vector.broadcast %cst_84 : f32 to vector<2x32xf32>
    %cst_85 = arith.constant 0.000000e+00 : f32
    %273 = vector.broadcast %cst_85 : f32 to vector<10x32xf32>
    %cst_86 = arith.constant 0.000000e+00 : f32
    %274 = vector.broadcast %cst_86 : f32 to vector<10x32xf32>
    %cst_87 = arith.constant dense<0.000000e+00> : vector<2x128xf32>
    %275 = tpu.matmul %271, %269, %cst_87 {dimension_numbers = #tpu.dot_dimension_numbers<[1], [0], [0], [1], [0, 0, 1, 1], [], []>} : vector<2x32xf32>, vector<32x128xf32>, vector<2x128xf32> -> vector<2x128xf32>
    %276 = arith.addf %238, %275 : vector<2x128xf32>
    %cst_88 = arith.constant dense<0.000000e+00> : vector<10x128xf32>
    %277 = tpu.matmul %273, %270, %cst_88 {dimension_numbers = #tpu.dot_dimension_numbers<[1], [0], [0], [1], [0, 0, 1, 1], [], []>} : vector<10x32xf32>, vector<32x128xf32>, vector<10x128xf32> -> vector<10x128xf32>
    %278 = arith.addf %254, %277 : vector<10x128xf32>
    %279 = arith.negf %276 : vector<2x128xf32>
    %280 = math.exp %279 : vector<2x128xf32>
    %cst_89 = arith.constant 1.000000e+00 : f32
    %281 = vector.broadcast %cst_89 : f32 to vector<2x128xf32>
    %282 = arith.addf %281, %280 : vector<2x128xf32>
    %283 = arith.divf %281, %282 : vector<2x128xf32>
    %284 = vector.extract_strided_slice %283 {offsets = [0, 0], sizes = [2, 32], strides = [1, 1]} : vector<2x128xf32> to vector<2x32xf32>
    %285 = vector.extract_strided_slice %283 {offsets = [0, 32], sizes = [2, 32], strides = [1, 1]} : vector<2x128xf32> to vector<2x32xf32>
    %286 = vector.extract_strided_slice %283 {offsets = [0, 96], sizes = [2, 32], strides = [1, 1]} : vector<2x128xf32> to vector<2x32xf32>
    %287 = vector.extract_strided_slice %276 {offsets = [0, 64], sizes = [2, 32], strides = [1, 1]} : vector<2x128xf32> to vector<2x32xf32>
    %288 = math.tanh %287 : vector<2x32xf32>
    %289 = arith.mulf %285, %272 : vector<2x32xf32>
    %290 = arith.mulf %284, %288 : vector<2x32xf32>
    %291 = arith.addf %289, %290 : vector<2x32xf32>
    %292 = math.tanh %291 : vector<2x32xf32>
    %293 = arith.mulf %286, %292 : vector<2x32xf32>
    %294 = arith.negf %278 : vector<10x128xf32>
    %295 = math.exp %294 : vector<10x128xf32>
    %cst_90 = arith.constant 1.000000e+00 : f32
    %296 = vector.broadcast %cst_90 : f32 to vector<10x128xf32>
    %297 = arith.addf %296, %295 : vector<10x128xf32>
    %298 = arith.divf %296, %297 : vector<10x128xf32>
    %299 = vector.extract_strided_slice %298 {offsets = [0, 0], sizes = [10, 32], strides = [1, 1]} : vector<10x128xf32> to vector<10x32xf32>
    %300 = vector.extract_strided_slice %298 {offsets = [0, 32], sizes = [10, 32], strides = [1, 1]} : vector<10x128xf32> to vector<10x32xf32>
    %301 = vector.extract_strided_slice %298 {offsets = [0, 96], sizes = [10, 32], strides = [1, 1]} : vector<10x128xf32> to vector<10x32xf32>
    %302 = vector.extract_strided_slice %278 {offsets = [0, 64], sizes = [10, 32], strides = [1, 1]} : vector<10x128xf32> to vector<10x32xf32>
    %303 = math.tanh %302 : vector<10x32xf32>
    %304 = arith.mulf %300, %274 : vector<10x32xf32>
    %305 = arith.mulf %299, %303 : vector<10x32xf32>
    %306 = arith.addf %304, %305 : vector<10x32xf32>
    %307 = math.tanh %306 : vector<10x32xf32>
    %308 = arith.mulf %301, %307 : vector<10x32xf32>
    %cst_91 = arith.constant dense<0.000000e+00> : vector<2x128xf32>
    %309 = tpu.matmul %293, %269, %cst_91 {dimension_numbers = #tpu.dot_dimension_numbers<[1], [0], [0], [1], [0, 0, 1, 1], [], []>} : vector<2x32xf32>, vector<32x128xf32>, vector<2x128xf32> -> vector<2x128xf32>
    %310 = arith.addf %240, %309 : vector<2x128xf32>
    %cst_92 = arith.constant dense<0.000000e+00> : vector<10x128xf32>
    %311 = tpu.matmul %308, %270, %cst_92 {dimension_numbers = #tpu.dot_dimension_numbers<[1], [0], [0], [1], [0, 0, 1, 1], [], []>} : vector<10x32xf32>, vector<32x128xf32>, vector<10x128xf32> -> vector<10x128xf32>
    %312 = arith.addf %256, %311 : vector<10x128xf32>
    %313 = arith.negf %310 : vector<2x128xf32>
    %314 = math.exp %313 : vector<2x128xf32>
    %cst_93 = arith.constant 1.000000e+00 : f32
    %315 = vector.broadcast %cst_93 : f32 to vector<2x128xf32>
    %316 = arith.addf %315, %314 : vector<2x128xf32>
    %317 = arith.divf %315, %316 : vector<2x128xf32>
    %318 = vector.extract_strided_slice %317 {offsets = [0, 0], sizes = [2, 32], strides = [1, 1]} : vector<2x128xf32> to vector<2x32xf32>
    %319 = vector.extract_strided_slice %317 {offsets = [0, 32], sizes = [2, 32], strides = [1, 1]} : vector<2x128xf32> to vector<2x32xf32>
    %320 = vector.extract_strided_slice %317 {offsets = [0, 96], sizes = [2, 32], strides = [1, 1]} : vector<2x128xf32> to vector<2x32xf32>
    %321 = vector.extract_strided_slice %310 {offsets = [0, 64], sizes = [2, 32], strides = [1, 1]} : vector<2x128xf32> to vector<2x32xf32>
    %322 = math.tanh %321 : vector<2x32xf32>
    %323 = arith.mulf %319, %291 : vector<2x32xf32>
    %324 = arith.mulf %318, %322 : vector<2x32xf32>
    %325 = arith.addf %323, %324 : vector<2x32xf32>
    %326 = math.tanh %325 : vector<2x32xf32>
    %327 = arith.mulf %320, %326 : vector<2x32xf32>
    %328 = arith.negf %312 : vector<10x128xf32>
    %329 = math.exp %328 : vector<10x128xf32>
    %cst_94 = arith.constant 1.000000e+00 : f32
    %330 = vector.broadcast %cst_94 : f32 to vector<10x128xf32>
    %331 = arith.addf %330, %329 : vector<10x128xf32>
    %332 = arith.divf %330, %331 : vector<10x128xf32>
    %333 = vector.extract_strided_slice %332 {offsets = [0, 0], sizes = [10, 32], strides = [1, 1]} : vector<10x128xf32> to vector<10x32xf32>
    %334 = vector.extract_strided_slice %332 {offsets = [0, 32], sizes = [10, 32], strides = [1, 1]} : vector<10x128xf32> to vector<10x32xf32>
    %335 = vector.extract_strided_slice %332 {offsets = [0, 96], sizes = [10, 32], strides = [1, 1]} : vector<10x128xf32> to vector<10x32xf32>
    %336 = vector.extract_strided_slice %312 {offsets = [0, 64], sizes = [10, 32], strides = [1, 1]} : vector<10x128xf32> to vector<10x32xf32>
    %337 = math.tanh %336 : vector<10x32xf32>
    %338 = arith.mulf %334, %306 : vector<10x32xf32>
    %339 = arith.mulf %333, %337 : vector<10x32xf32>
    %340 = arith.addf %338, %339 : vector<10x32xf32>
    %341 = math.tanh %340 : vector<10x32xf32>
    %342 = arith.mulf %335, %341 : vector<10x32xf32>
    %cst_95 = arith.constant dense<0.000000e+00> : vector<2x128xf32>
    %343 = tpu.matmul %327, %269, %cst_95 {dimension_numbers = #tpu.dot_dimension_numbers<[1], [0], [0], [1], [0, 0, 1, 1], [], []>} : vector<2x32xf32>, vector<32x128xf32>, vector<2x128xf32> -> vector<2x128xf32>
    %344 = arith.addf %242, %343 : vector<2x128xf32>
    %cst_96 = arith.constant dense<0.000000e+00> : vector<10x128xf32>
    %345 = tpu.matmul %342, %270, %cst_96 {dimension_numbers = #tpu.dot_dimension_numbers<[1], [0], [0], [1], [0, 0, 1, 1], [], []>} : vector<10x32xf32>, vector<32x128xf32>, vector<10x128xf32> -> vector<10x128xf32>
    %346 = arith.addf %258, %345 : vector<10x128xf32>
    %347 = arith.negf %344 : vector<2x128xf32>
    %348 = math.exp %347 : vector<2x128xf32>
    %cst_97 = arith.constant 1.000000e+00 : f32
    %349 = vector.broadcast %cst_97 : f32 to vector<2x128xf32>
    %350 = arith.addf %349, %348 : vector<2x128xf32>
    %351 = arith.divf %349, %350 : vector<2x128xf32>
    %352 = vector.extract_strided_slice %351 {offsets = [0, 0], sizes = [2, 32], strides = [1, 1]} : vector<2x128xf32> to vector<2x32xf32>
    %353 = vector.extract_strided_slice %351 {offsets = [0, 32], sizes = [2, 32], strides = [1, 1]} : vector<2x128xf32> to vector<2x32xf32>
    %354 = vector.extract_strided_slice %351 {offsets = [0, 96], sizes = [2, 32], strides = [1, 1]} : vector<2x128xf32> to vector<2x32xf32>
    %355 = vector.extract_strided_slice %344 {offsets = [0, 64], sizes = [2, 32], strides = [1, 1]} : vector<2x128xf32> to vector<2x32xf32>
    %356 = math.tanh %355 : vector<2x32xf32>
    %357 = arith.mulf %353, %325 : vector<2x32xf32>
    %358 = arith.mulf %352, %356 : vector<2x32xf32>
    %359 = arith.addf %357, %358 : vector<2x32xf32>
    %360 = math.tanh %359 : vector<2x32xf32>
    %361 = arith.mulf %354, %360 : vector<2x32xf32>
    %362 = arith.negf %346 : vector<10x128xf32>
    %363 = math.exp %362 : vector<10x128xf32>
    %cst_98 = arith.constant 1.000000e+00 : f32
    %364 = vector.broadcast %cst_98 : f32 to vector<10x128xf32>
    %365 = arith.addf %364, %363 : vector<10x128xf32>
    %366 = arith.divf %364, %365 : vector<10x128xf32>
    %367 = vector.extract_strided_slice %366 {offsets = [0, 0], sizes = [10, 32], strides = [1, 1]} : vector<10x128xf32> to vector<10x32xf32>
    %368 = vector.extract_strided_slice %366 {offsets = [0, 32], sizes = [10, 32], strides = [1, 1]} : vector<10x128xf32> to vector<10x32xf32>
    %369 = vector.extract_strided_slice %366 {offsets = [0, 96], sizes = [10, 32], strides = [1, 1]} : vector<10x128xf32> to vector<10x32xf32>
    %370 = vector.extract_strided_slice %346 {offsets = [0, 64], sizes = [10, 32], strides = [1, 1]} : vector<10x128xf32> to vector<10x32xf32>
    %371 = math.tanh %370 : vector<10x32xf32>
    %372 = arith.mulf %368, %340 : vector<10x32xf32>
    %373 = arith.mulf %367, %371 : vector<10x32xf32>
    %374 = arith.addf %372, %373 : vector<10x32xf32>
    %375 = math.tanh %374 : vector<10x32xf32>
    %376 = arith.mulf %369, %375 : vector<10x32xf32>
    %cst_99 = arith.constant dense<0.000000e+00> : vector<2x128xf32>
    %377 = tpu.matmul %361, %269, %cst_99 {dimension_numbers = #tpu.dot_dimension_numbers<[1], [0], [0], [1], [0, 0, 1, 1], [], []>} : vector<2x32xf32>, vector<32x128xf32>, vector<2x128xf32> -> vector<2x128xf32>
    %378 = arith.addf %244, %377 : vector<2x128xf32>
    %cst_100 = arith.constant dense<0.000000e+00> : vector<10x128xf32>
    %379 = tpu.matmul %376, %270, %cst_100 {dimension_numbers = #tpu.dot_dimension_numbers<[1], [0], [0], [1], [0, 0, 1, 1], [], []>} : vector<10x32xf32>, vector<32x128xf32>, vector<10x128xf32> -> vector<10x128xf32>
    %380 = arith.addf %260, %379 : vector<10x128xf32>
    %381 = arith.negf %378 : vector<2x128xf32>
    %382 = math.exp %381 : vector<2x128xf32>
    %cst_101 = arith.constant 1.000000e+00 : f32
    %383 = vector.broadcast %cst_101 : f32 to vector<2x128xf32>
    %384 = arith.addf %383, %382 : vector<2x128xf32>
    %385 = arith.divf %383, %384 : vector<2x128xf32>
    %386 = vector.extract_strided_slice %385 {offsets = [0, 0], sizes = [2, 32], strides = [1, 1]} : vector<2x128xf32> to vector<2x32xf32>
    %387 = vector.extract_strided_slice %385 {offsets = [0, 32], sizes = [2, 32], strides = [1, 1]} : vector<2x128xf32> to vector<2x32xf32>
    %388 = vector.extract_strided_slice %385 {offsets = [0, 96], sizes = [2, 32], strides = [1, 1]} : vector<2x128xf32> to vector<2x32xf32>
    %389 = vector.extract_strided_slice %378 {offsets = [0, 64], sizes = [2, 32], strides = [1, 1]} : vector<2x128xf32> to vector<2x32xf32>
    %390 = math.tanh %389 : vector<2x32xf32>
    %391 = arith.mulf %387, %359 : vector<2x32xf32>
    %392 = arith.mulf %386, %390 : vector<2x32xf32>
    %393 = arith.addf %391, %392 : vector<2x32xf32>
    %394 = math.tanh %393 : vector<2x32xf32>
    %395 = arith.mulf %388, %394 : vector<2x32xf32>
    %396 = arith.negf %380 : vector<10x128xf32>
    %397 = math.exp %396 : vector<10x128xf32>
    %cst_102 = arith.constant 1.000000e+00 : f32
    %398 = vector.broadcast %cst_102 : f32 to vector<10x128xf32>
    %399 = arith.addf %398, %397 : vector<10x128xf32>
    %400 = arith.divf %398, %399 : vector<10x128xf32>
    %401 = vector.extract_strided_slice %400 {offsets = [0, 0], sizes = [10, 32], strides = [1, 1]} : vector<10x128xf32> to vector<10x32xf32>
    %402 = vector.extract_strided_slice %400 {offsets = [0, 32], sizes = [10, 32], strides = [1, 1]} : vector<10x128xf32> to vector<10x32xf32>
    %403 = vector.extract_strided_slice %400 {offsets = [0, 96], sizes = [10, 32], strides = [1, 1]} : vector<10x128xf32> to vector<10x32xf32>
    %404 = vector.extract_strided_slice %380 {offsets = [0, 64], sizes = [10, 32], strides = [1, 1]} : vector<10x128xf32> to vector<10x32xf32>
    %405 = math.tanh %404 : vector<10x32xf32>
    %406 = arith.mulf %402, %374 : vector<10x32xf32>
    %407 = arith.mulf %401, %405 : vector<10x32xf32>
    %408 = arith.addf %406, %407 : vector<10x32xf32>
    %409 = math.tanh %408 : vector<10x32xf32>
    %410 = arith.mulf %403, %409 : vector<10x32xf32>
    %cst_103 = arith.constant dense<0.000000e+00> : vector<2x128xf32>
    %411 = tpu.matmul %395, %269, %cst_103 {dimension_numbers = #tpu.dot_dimension_numbers<[1], [0], [0], [1], [0, 0, 1, 1], [], []>} : vector<2x32xf32>, vector<32x128xf32>, vector<2x128xf32> -> vector<2x128xf32>
    %412 = arith.addf %246, %411 : vector<2x128xf32>
    %cst_104 = arith.constant dense<0.000000e+00> : vector<10x128xf32>
    %413 = tpu.matmul %410, %270, %cst_104 {dimension_numbers = #tpu.dot_dimension_numbers<[1], [0], [0], [1], [0, 0, 1, 1], [], []>} : vector<10x32xf32>, vector<32x128xf32>, vector<10x128xf32> -> vector<10x128xf32>
    %414 = arith.addf %262, %413 : vector<10x128xf32>
    %415 = arith.negf %412 : vector<2x128xf32>
    %416 = math.exp %415 : vector<2x128xf32>
    %cst_105 = arith.constant 1.000000e+00 : f32
    %417 = vector.broadcast %cst_105 : f32 to vector<2x128xf32>
    %418 = arith.addf %417, %416 : vector<2x128xf32>
    %419 = arith.divf %417, %418 : vector<2x128xf32>
    %420 = vector.extract_strided_slice %419 {offsets = [0, 0], sizes = [2, 32], strides = [1, 1]} : vector<2x128xf32> to vector<2x32xf32>
    %421 = vector.extract_strided_slice %419 {offsets = [0, 32], sizes = [2, 32], strides = [1, 1]} : vector<2x128xf32> to vector<2x32xf32>
    %422 = vector.extract_strided_slice %419 {offsets = [0, 96], sizes = [2, 32], strides = [1, 1]} : vector<2x128xf32> to vector<2x32xf32>
    %423 = vector.extract_strided_slice %412 {offsets = [0, 64], sizes = [2, 32], strides = [1, 1]} : vector<2x128xf32> to vector<2x32xf32>
    %424 = math.tanh %423 : vector<2x32xf32>
    %425 = arith.mulf %421, %393 : vector<2x32xf32>
    %426 = arith.mulf %420, %424 : vector<2x32xf32>
    %427 = arith.addf %425, %426 : vector<2x32xf32>
    %428 = math.tanh %427 : vector<2x32xf32>
    %429 = arith.mulf %422, %428 : vector<2x32xf32>
    %430 = arith.negf %414 : vector<10x128xf32>
    %431 = math.exp %430 : vector<10x128xf32>
    %cst_106 = arith.constant 1.000000e+00 : f32
    %432 = vector.broadcast %cst_106 : f32 to vector<10x128xf32>
    %433 = arith.addf %432, %431 : vector<10x128xf32>
    %434 = arith.divf %432, %433 : vector<10x128xf32>
    %435 = vector.extract_strided_slice %434 {offsets = [0, 0], sizes = [10, 32], strides = [1, 1]} : vector<10x128xf32> to vector<10x32xf32>
    %436 = vector.extract_strided_slice %434 {offsets = [0, 32], sizes = [10, 32], strides = [1, 1]} : vector<10x128xf32> to vector<10x32xf32>
    %437 = vector.extract_strided_slice %434 {offsets = [0, 96], sizes = [10, 32], strides = [1, 1]} : vector<10x128xf32> to vector<10x32xf32>
    %438 = vector.extract_strided_slice %414 {offsets = [0, 64], sizes = [10, 32], strides = [1, 1]} : vector<10x128xf32> to vector<10x32xf32>
    %439 = math.tanh %438 : vector<10x32xf32>
    %440 = arith.mulf %436, %408 : vector<10x32xf32>
    %441 = arith.mulf %435, %439 : vector<10x32xf32>
    %442 = arith.addf %440, %441 : vector<10x32xf32>
    %443 = math.tanh %442 : vector<10x32xf32>
    %444 = arith.mulf %437, %443 : vector<10x32xf32>
    %cst_107 = arith.constant dense<0.000000e+00> : vector<2x128xf32>
    %445 = tpu.matmul %429, %269, %cst_107 {dimension_numbers = #tpu.dot_dimension_numbers<[1], [0], [0], [1], [0, 0, 1, 1], [], []>} : vector<2x32xf32>, vector<32x128xf32>, vector<2x128xf32> -> vector<2x128xf32>
    %446 = arith.addf %248, %445 : vector<2x128xf32>
    %cst_108 = arith.constant dense<0.000000e+00> : vector<10x128xf32>
    %447 = tpu.matmul %444, %270, %cst_108 {dimension_numbers = #tpu.dot_dimension_numbers<[1], [0], [0], [1], [0, 0, 1, 1], [], []>} : vector<10x32xf32>, vector<32x128xf32>, vector<10x128xf32> -> vector<10x128xf32>
    %448 = arith.addf %264, %447 : vector<10x128xf32>
    %449 = arith.negf %446 : vector<2x128xf32>
    %450 = math.exp %449 : vector<2x128xf32>
    %cst_109 = arith.constant 1.000000e+00 : f32
    %451 = vector.broadcast %cst_109 : f32 to vector<2x128xf32>
    %452 = arith.addf %451, %450 : vector<2x128xf32>
    %453 = arith.divf %451, %452 : vector<2x128xf32>
    %454 = vector.extract_strided_slice %453 {offsets = [0, 0], sizes = [2, 32], strides = [1, 1]} : vector<2x128xf32> to vector<2x32xf32>
    %455 = vector.extract_strided_slice %453 {offsets = [0, 32], sizes = [2, 32], strides = [1, 1]} : vector<2x128xf32> to vector<2x32xf32>
    %456 = vector.extract_strided_slice %453 {offsets = [0, 96], sizes = [2, 32], strides = [1, 1]} : vector<2x128xf32> to vector<2x32xf32>
    %457 = vector.extract_strided_slice %446 {offsets = [0, 64], sizes = [2, 32], strides = [1, 1]} : vector<2x128xf32> to vector<2x32xf32>
    %458 = math.tanh %457 : vector<2x32xf32>
    %459 = arith.mulf %455, %427 : vector<2x32xf32>
    %460 = arith.mulf %454, %458 : vector<2x32xf32>
    %461 = arith.addf %459, %460 : vector<2x32xf32>
    %462 = math.tanh %461 : vector<2x32xf32>
    %463 = arith.mulf %456, %462 : vector<2x32xf32>
    %464 = arith.negf %448 : vector<10x128xf32>
    %465 = math.exp %464 : vector<10x128xf32>
    %cst_110 = arith.constant 1.000000e+00 : f32
    %466 = vector.broadcast %cst_110 : f32 to vector<10x128xf32>
    %467 = arith.addf %466, %465 : vector<10x128xf32>
    %468 = arith.divf %466, %467 : vector<10x128xf32>
    %469 = vector.extract_strided_slice %468 {offsets = [0, 0], sizes = [10, 32], strides = [1, 1]} : vector<10x128xf32> to vector<10x32xf32>
    %470 = vector.extract_strided_slice %468 {offsets = [0, 32], sizes = [10, 32], strides = [1, 1]} : vector<10x128xf32> to vector<10x32xf32>
    %471 = vector.extract_strided_slice %468 {offsets = [0, 96], sizes = [10, 32], strides = [1, 1]} : vector<10x128xf32> to vector<10x32xf32>
    %472 = vector.extract_strided_slice %448 {offsets = [0, 64], sizes = [10, 32], strides = [1, 1]} : vector<10x128xf32> to vector<10x32xf32>
    %473 = math.tanh %472 : vector<10x32xf32>
    %474 = arith.mulf %470, %442 : vector<10x32xf32>
    %475 = arith.mulf %469, %473 : vector<10x32xf32>
    %476 = arith.addf %474, %475 : vector<10x32xf32>
    %477 = math.tanh %476 : vector<10x32xf32>
    %478 = arith.mulf %471, %477 : vector<10x32xf32>
    %cst_111 = arith.constant dense<0.000000e+00> : vector<2x128xf32>
    %479 = tpu.matmul %463, %269, %cst_111 {dimension_numbers = #tpu.dot_dimension_numbers<[1], [0], [0], [1], [0, 0, 1, 1], [], []>} : vector<2x32xf32>, vector<32x128xf32>, vector<2x128xf32> -> vector<2x128xf32>
    %480 = arith.addf %250, %479 : vector<2x128xf32>
    %cst_112 = arith.constant dense<0.000000e+00> : vector<10x128xf32>
    %481 = tpu.matmul %478, %270, %cst_112 {dimension_numbers = #tpu.dot_dimension_numbers<[1], [0], [0], [1], [0, 0, 1, 1], [], []>} : vector<10x32xf32>, vector<32x128xf32>, vector<10x128xf32> -> vector<10x128xf32>
    %482 = arith.addf %266, %481 : vector<10x128xf32>
    %483 = arith.negf %480 : vector<2x128xf32>
    %484 = math.exp %483 : vector<2x128xf32>
    %cst_113 = arith.constant 1.000000e+00 : f32
    %485 = vector.broadcast %cst_113 : f32 to vector<2x128xf32>
    %486 = arith.addf %485, %484 : vector<2x128xf32>
    %487 = arith.divf %485, %486 : vector<2x128xf32>
    %488 = vector.extract_strided_slice %487 {offsets = [0, 0], sizes = [2, 32], strides = [1, 1]} : vector<2x128xf32> to vector<2x32xf32>
    %489 = vector.extract_strided_slice %487 {offsets = [0, 32], sizes = [2, 32], strides = [1, 1]} : vector<2x128xf32> to vector<2x32xf32>
    %490 = vector.extract_strided_slice %487 {offsets = [0, 96], sizes = [2, 32], strides = [1, 1]} : vector<2x128xf32> to vector<2x32xf32>
    %491 = vector.extract_strided_slice %480 {offsets = [0, 64], sizes = [2, 32], strides = [1, 1]} : vector<2x128xf32> to vector<2x32xf32>
    %492 = math.tanh %491 : vector<2x32xf32>
    %493 = arith.mulf %489, %461 : vector<2x32xf32>
    %494 = arith.mulf %488, %492 : vector<2x32xf32>
    %495 = arith.addf %493, %494 : vector<2x32xf32>
    %496 = math.tanh %495 : vector<2x32xf32>
    %497 = arith.mulf %490, %496 : vector<2x32xf32>
    %498 = arith.negf %482 : vector<10x128xf32>
    %499 = math.exp %498 : vector<10x128xf32>
    %cst_114 = arith.constant 1.000000e+00 : f32
    %500 = vector.broadcast %cst_114 : f32 to vector<10x128xf32>
    %501 = arith.addf %500, %499 : vector<10x128xf32>
    %502 = arith.divf %500, %501 : vector<10x128xf32>
    %503 = vector.extract_strided_slice %502 {offsets = [0, 0], sizes = [10, 32], strides = [1, 1]} : vector<10x128xf32> to vector<10x32xf32>
    %504 = vector.extract_strided_slice %502 {offsets = [0, 32], sizes = [10, 32], strides = [1, 1]} : vector<10x128xf32> to vector<10x32xf32>
    %505 = vector.extract_strided_slice %502 {offsets = [0, 96], sizes = [10, 32], strides = [1, 1]} : vector<10x128xf32> to vector<10x32xf32>
    %506 = vector.extract_strided_slice %482 {offsets = [0, 64], sizes = [10, 32], strides = [1, 1]} : vector<10x128xf32> to vector<10x32xf32>
    %507 = math.tanh %506 : vector<10x32xf32>
    %508 = arith.mulf %504, %476 : vector<10x32xf32>
    %509 = arith.mulf %503, %507 : vector<10x32xf32>
    %510 = arith.addf %508, %509 : vector<10x32xf32>
    %511 = math.tanh %510 : vector<10x32xf32>
    %512 = arith.mulf %505, %511 : vector<10x32xf32>
    %cst_115 = arith.constant dense<0.000000e+00> : vector<2x128xf32>
    %513 = tpu.matmul %497, %269, %cst_115 {dimension_numbers = #tpu.dot_dimension_numbers<[1], [0], [0], [1], [0, 0, 1, 1], [], []>} : vector<2x32xf32>, vector<32x128xf32>, vector<2x128xf32> -> vector<2x128xf32>
    %514 = arith.addf %252, %513 : vector<2x128xf32>
    %cst_116 = arith.constant dense<0.000000e+00> : vector<10x128xf32>
    %515 = tpu.matmul %512, %270, %cst_116 {dimension_numbers = #tpu.dot_dimension_numbers<[1], [0], [0], [1], [0, 0, 1, 1], [], []>} : vector<10x32xf32>, vector<32x128xf32>, vector<10x128xf32> -> vector<10x128xf32>
    %516 = arith.addf %268, %515 : vector<10x128xf32>
    %517 = arith.negf %514 : vector<2x128xf32>
    %518 = math.exp %517 : vector<2x128xf32>
    %cst_117 = arith.constant 1.000000e+00 : f32
    %519 = vector.broadcast %cst_117 : f32 to vector<2x128xf32>
    %520 = arith.addf %519, %518 : vector<2x128xf32>
    %521 = arith.divf %519, %520 : vector<2x128xf32>
    %522 = vector.extract_strided_slice %521 {offsets = [0, 0], sizes = [2, 32], strides = [1, 1]} : vector<2x128xf32> to vector<2x32xf32>
    %523 = vector.extract_strided_slice %521 {offsets = [0, 32], sizes = [2, 32], strides = [1, 1]} : vector<2x128xf32> to vector<2x32xf32>
    %524 = vector.extract_strided_slice %521 {offsets = [0, 96], sizes = [2, 32], strides = [1, 1]} : vector<2x128xf32> to vector<2x32xf32>
    %525 = vector.extract_strided_slice %514 {offsets = [0, 64], sizes = [2, 32], strides = [1, 1]} : vector<2x128xf32> to vector<2x32xf32>
    %526 = math.tanh %525 : vector<2x32xf32>
    %527 = arith.mulf %523, %495 : vector<2x32xf32>
    %528 = arith.mulf %522, %526 : vector<2x32xf32>
    %529 = arith.addf %527, %528 : vector<2x32xf32>
    %530 = math.tanh %529 : vector<2x32xf32>
    %531 = arith.mulf %524, %530 : vector<2x32xf32>
    %532 = arith.negf %516 : vector<10x128xf32>
    %533 = math.exp %532 : vector<10x128xf32>
    %cst_118 = arith.constant 1.000000e+00 : f32
    %534 = vector.broadcast %cst_118 : f32 to vector<10x128xf32>
    %535 = arith.addf %534, %533 : vector<10x128xf32>
    %536 = arith.divf %534, %535 : vector<10x128xf32>
    %537 = vector.extract_strided_slice %536 {offsets = [0, 0], sizes = [10, 32], strides = [1, 1]} : vector<10x128xf32> to vector<10x32xf32>
    %538 = vector.extract_strided_slice %536 {offsets = [0, 32], sizes = [10, 32], strides = [1, 1]} : vector<10x128xf32> to vector<10x32xf32>
    %539 = vector.extract_strided_slice %536 {offsets = [0, 96], sizes = [10, 32], strides = [1, 1]} : vector<10x128xf32> to vector<10x32xf32>
    %540 = vector.extract_strided_slice %516 {offsets = [0, 64], sizes = [10, 32], strides = [1, 1]} : vector<10x128xf32> to vector<10x32xf32>
    %541 = math.tanh %540 : vector<10x32xf32>
    %542 = arith.mulf %538, %510 : vector<10x32xf32>
    %543 = arith.mulf %537, %541 : vector<10x32xf32>
    %544 = arith.addf %542, %543 : vector<10x32xf32>
    %545 = math.tanh %544 : vector<10x32xf32>
    %546 = arith.mulf %539, %545 : vector<10x32xf32>
    %cst_119 = arith.constant 0.000000e+00 : f32
    %547 = vector.broadcast %cst_119 : f32 to vector<2x32xf32>
    %548 = arith.cmpf oge, %531, %547 : vector<2x32xf32>
    %cst_120 = arith.constant 0.00999999977 : f32
    %549 = vector.broadcast %cst_120 : f32 to vector<2x32xf32>
    %550 = arith.mulf %549, %531 : vector<2x32xf32>
    %551 = arith.select %548, %531, %550 : vector<2x32xi1>, vector<2x32xf32>
    %cst_121 = arith.constant 0.000000e+00 : f32
    %552 = vector.broadcast %cst_121 : f32 to vector<10x32xf32>
    %553 = arith.cmpf oge, %546, %552 : vector<10x32xf32>
    %cst_122 = arith.constant 0.00999999977 : f32
    %554 = vector.broadcast %cst_122 : f32 to vector<10x32xf32>
    %555 = arith.mulf %554, %546 : vector<10x32xf32>
    %556 = arith.select %553, %546, %555 : vector<10x32xi1>, vector<10x32xf32>
    %c208 = arith.constant 208 : index
    %c0_123 = arith.constant 0 : index
    %557 = vector.load %arg2[%c208, %c0_123] : memref<608x128xf32, #tpu.memory_space<vmem>>, vector<32x96xf32>
    %c240 = arith.constant 240 : index
    %c0_124 = arith.constant 0 : index
    %558 = vector.load %arg2[%c240, %c0_124] : memref<608x128xf32, #tpu.memory_space<vmem>>, vector<1x96xf32>
    %559 = vector.extract_strided_slice %557 {offsets = [0, 0], sizes = [32, 32], strides = [1, 1]} : vector<32x96xf32> to vector<32x32xf32>
    %cst_125 = arith.constant dense<0.000000e+00> : vector<2x32xf32>
    %560 = tpu.matmul %551, %559, %cst_125 {dimension_numbers = #tpu.dot_dimension_numbers<[1], [0], [0], [1], [0, 0, 1, 1], [], []>} : vector<2x32xf32>, vector<32x32xf32>, vector<2x32xf32> -> vector<2x32xf32>
    %561 = vector.extract_strided_slice %558 {offsets = [0, 0], sizes = [1, 32], strides = [1, 1]} : vector<1x96xf32> to vector<1x32xf32>
    %562 = vector.broadcast %561 : vector<1x32xf32> to vector<2x32xf32>
    %563 = arith.addf %560, %562 : vector<2x32xf32>
    %564 = vector.extract_strided_slice %557 {offsets = [0, 32], sizes = [32, 64], strides = [1, 1]} : vector<32x96xf32> to vector<32x64xf32>
    %cst_126 = arith.constant dense<0.000000e+00> : vector<10x64xf32>
    %565 = tpu.matmul %556, %564, %cst_126 {dimension_numbers = #tpu.dot_dimension_numbers<[1], [0], [0], [1], [0, 0, 1, 1], [], []>} : vector<10x32xf32>, vector<32x64xf32>, vector<10x64xf32> -> vector<10x64xf32>
    %566 = vector.extract_strided_slice %558 {offsets = [0, 32], sizes = [1, 64], strides = [1, 1]} : vector<1x96xf32> to vector<1x64xf32>
    %567 = vector.broadcast %566 : vector<1x64xf32> to vector<10x64xf32>
    %568 = arith.addf %565, %567 : vector<10x64xf32>
    %569 = vector.extract_strided_slice %563 {offsets = [0, 0], sizes = [2, 8], strides = [1, 1]} : vector<2x32xf32> to vector<2x8xf32>
    %570 = vector.extract_strided_slice %568 {offsets = [0, 0], sizes = [10, 8], strides = [1, 1]} : vector<10x64xf32> to vector<10x8xf32>
    %571 = vector.extract_strided_slice %568 {offsets = [0, 32], sizes = [10, 8], strides = [1, 1]} : vector<10x64xf32> to vector<10x8xf32>
    %cst_127 = arith.constant dense<0.000000e+00> : vector<2x10xf32>
    %572 = tpu.matmul %569, %570, %cst_127 {dimension_numbers = #tpu.dot_dimension_numbers<[1], [1], [0], [0], [0, 0, 1, 0], [], []>} : vector<2x8xf32>, vector<10x8xf32>, vector<2x10xf32> -> vector<2x10xf32>
    %cst_128 = arith.constant 0.353553385 : f32
    %573 = vector.broadcast %cst_128 : f32 to vector<2x10xf32>
    %574 = arith.mulf %572, %573 : vector<2x10xf32>
    %575 = arith.addf %574, %32 : vector<2x10xf32>
    %cst_129 = arith.constant dense<0xFF800000> : vector<2xf32>
    %576 = vector.multi_reduction <maximumf>, %575, %cst_129 [1] : vector<2x10xf32> to vector<2xf32>
    %577 = vector.shape_cast %576 : vector<2xf32> to vector<2x1xf32>
    %578 = vector.broadcast %577 : vector<2x1xf32> to vector<2x10xf32>
    %579 = arith.subf %575, %578 : vector<2x10xf32>
    %580 = math.exp %579 : vector<2x10xf32>
    %cst_130 = arith.constant dense<0.000000e+00> : vector<2xf32>
    %581 = vector.multi_reduction <add>, %580, %cst_130 [1] : vector<2x10xf32> to vector<2xf32>
    %582 = vector.shape_cast %581 : vector<2xf32> to vector<2x1xf32>
    %583 = tpu.reciprocal %582 {approx = true} : vector<2x1xf32> -> vector<2x1xf32>
    %584 = vector.broadcast %583 : vector<2x1xf32> to vector<2x10xf32>
    %585 = arith.mulf %580, %584 : vector<2x10xf32>
    %cst_131 = arith.constant dense<0.000000e+00> : vector<2x8xf32>
    %586 = tpu.matmul %585, %571, %cst_131 {dimension_numbers = #tpu.dot_dimension_numbers<[1], [0], [0], [1], [0, 0, 1, 1], [], []>} : vector<2x10xf32>, vector<10x8xf32>, vector<2x8xf32> -> vector<2x8xf32>
    %587 = vector.extract_strided_slice %563 {offsets = [0, 8], sizes = [2, 8], strides = [1, 1]} : vector<2x32xf32> to vector<2x8xf32>
    %588 = vector.extract_strided_slice %568 {offsets = [0, 8], sizes = [10, 8], strides = [1, 1]} : vector<10x64xf32> to vector<10x8xf32>
    %589 = vector.extract_strided_slice %568 {offsets = [0, 40], sizes = [10, 8], strides = [1, 1]} : vector<10x64xf32> to vector<10x8xf32>
    %cst_132 = arith.constant dense<0.000000e+00> : vector<2x10xf32>
    %590 = tpu.matmul %587, %588, %cst_132 {dimension_numbers = #tpu.dot_dimension_numbers<[1], [1], [0], [0], [0, 0, 1, 0], [], []>} : vector<2x8xf32>, vector<10x8xf32>, vector<2x10xf32> -> vector<2x10xf32>
    %cst_133 = arith.constant 0.353553385 : f32
    %591 = vector.broadcast %cst_133 : f32 to vector<2x10xf32>
    %592 = arith.mulf %590, %591 : vector<2x10xf32>
    %593 = arith.addf %592, %32 : vector<2x10xf32>
    %cst_134 = arith.constant dense<0xFF800000> : vector<2xf32>
    %594 = vector.multi_reduction <maximumf>, %593, %cst_134 [1] : vector<2x10xf32> to vector<2xf32>
    %595 = vector.shape_cast %594 : vector<2xf32> to vector<2x1xf32>
    %596 = vector.broadcast %595 : vector<2x1xf32> to vector<2x10xf32>
    %597 = arith.subf %593, %596 : vector<2x10xf32>
    %598 = math.exp %597 : vector<2x10xf32>
    %cst_135 = arith.constant dense<0.000000e+00> : vector<2xf32>
    %599 = vector.multi_reduction <add>, %598, %cst_135 [1] : vector<2x10xf32> to vector<2xf32>
    %600 = vector.shape_cast %599 : vector<2xf32> to vector<2x1xf32>
    %601 = tpu.reciprocal %600 {approx = true} : vector<2x1xf32> -> vector<2x1xf32>
    %602 = vector.broadcast %601 : vector<2x1xf32> to vector<2x10xf32>
    %603 = arith.mulf %598, %602 : vector<2x10xf32>
    %cst_136 = arith.constant dense<0.000000e+00> : vector<2x8xf32>
    %604 = tpu.matmul %603, %589, %cst_136 {dimension_numbers = #tpu.dot_dimension_numbers<[1], [0], [0], [1], [0, 0, 1, 1], [], []>} : vector<2x10xf32>, vector<10x8xf32>, vector<2x8xf32> -> vector<2x8xf32>
    %605 = vector.extract_strided_slice %563 {offsets = [0, 16], sizes = [2, 8], strides = [1, 1]} : vector<2x32xf32> to vector<2x8xf32>
    %606 = vector.extract_strided_slice %568 {offsets = [0, 16], sizes = [10, 8], strides = [1, 1]} : vector<10x64xf32> to vector<10x8xf32>
    %607 = vector.extract_strided_slice %568 {offsets = [0, 48], sizes = [10, 8], strides = [1, 1]} : vector<10x64xf32> to vector<10x8xf32>
    %cst_137 = arith.constant dense<0.000000e+00> : vector<2x10xf32>
    %608 = tpu.matmul %605, %606, %cst_137 {dimension_numbers = #tpu.dot_dimension_numbers<[1], [1], [0], [0], [0, 0, 1, 0], [], []>} : vector<2x8xf32>, vector<10x8xf32>, vector<2x10xf32> -> vector<2x10xf32>
    %cst_138 = arith.constant 0.353553385 : f32
    %609 = vector.broadcast %cst_138 : f32 to vector<2x10xf32>
    %610 = arith.mulf %608, %609 : vector<2x10xf32>
    %611 = arith.addf %610, %32 : vector<2x10xf32>
    %cst_139 = arith.constant dense<0xFF800000> : vector<2xf32>
    %612 = vector.multi_reduction <maximumf>, %611, %cst_139 [1] : vector<2x10xf32> to vector<2xf32>
    %613 = vector.shape_cast %612 : vector<2xf32> to vector<2x1xf32>
    %614 = vector.broadcast %613 : vector<2x1xf32> to vector<2x10xf32>
    %615 = arith.subf %611, %614 : vector<2x10xf32>
    %616 = math.exp %615 : vector<2x10xf32>
    %cst_140 = arith.constant dense<0.000000e+00> : vector<2xf32>
    %617 = vector.multi_reduction <add>, %616, %cst_140 [1] : vector<2x10xf32> to vector<2xf32>
    %618 = vector.shape_cast %617 : vector<2xf32> to vector<2x1xf32>
    %619 = tpu.reciprocal %618 {approx = true} : vector<2x1xf32> -> vector<2x1xf32>
    %620 = vector.broadcast %619 : vector<2x1xf32> to vector<2x10xf32>
    %621 = arith.mulf %616, %620 : vector<2x10xf32>
    %cst_141 = arith.constant dense<0.000000e+00> : vector<2x8xf32>
    %622 = tpu.matmul %621, %607, %cst_141 {dimension_numbers = #tpu.dot_dimension_numbers<[1], [0], [0], [1], [0, 0, 1, 1], [], []>} : vector<2x10xf32>, vector<10x8xf32>, vector<2x8xf32> -> vector<2x8xf32>
    %623 = vector.extract_strided_slice %563 {offsets = [0, 24], sizes = [2, 8], strides = [1, 1]} : vector<2x32xf32> to vector<2x8xf32>
    %624 = vector.extract_strided_slice %568 {offsets = [0, 24], sizes = [10, 8], strides = [1, 1]} : vector<10x64xf32> to vector<10x8xf32>
    %625 = vector.extract_strided_slice %568 {offsets = [0, 56], sizes = [10, 8], strides = [1, 1]} : vector<10x64xf32> to vector<10x8xf32>
    %cst_142 = arith.constant dense<0.000000e+00> : vector<2x10xf32>
    %626 = tpu.matmul %623, %624, %cst_142 {dimension_numbers = #tpu.dot_dimension_numbers<[1], [1], [0], [0], [0, 0, 1, 0], [], []>} : vector<2x8xf32>, vector<10x8xf32>, vector<2x10xf32> -> vector<2x10xf32>
    %cst_143 = arith.constant 0.353553385 : f32
    %627 = vector.broadcast %cst_143 : f32 to vector<2x10xf32>
    %628 = arith.mulf %626, %627 : vector<2x10xf32>
    %629 = arith.addf %628, %32 : vector<2x10xf32>
    %cst_144 = arith.constant dense<0xFF800000> : vector<2xf32>
    %630 = vector.multi_reduction <maximumf>, %629, %cst_144 [1] : vector<2x10xf32> to vector<2xf32>
    %631 = vector.shape_cast %630 : vector<2xf32> to vector<2x1xf32>
    %632 = vector.broadcast %631 : vector<2x1xf32> to vector<2x10xf32>
    %633 = arith.subf %629, %632 : vector<2x10xf32>
    %634 = math.exp %633 : vector<2x10xf32>
    %cst_145 = arith.constant dense<0.000000e+00> : vector<2xf32>
    %635 = vector.multi_reduction <add>, %634, %cst_145 [1] : vector<2x10xf32> to vector<2xf32>
    %636 = vector.shape_cast %635 : vector<2xf32> to vector<2x1xf32>
    %637 = tpu.reciprocal %636 {approx = true} : vector<2x1xf32> -> vector<2x1xf32>
    %638 = vector.broadcast %637 : vector<2x1xf32> to vector<2x10xf32>
    %639 = arith.mulf %634, %638 : vector<2x10xf32>
    %cst_146 = arith.constant dense<0.000000e+00> : vector<2x8xf32>
    %640 = tpu.matmul %639, %625, %cst_146 {dimension_numbers = #tpu.dot_dimension_numbers<[1], [0], [0], [1], [0, 0, 1, 1], [], []>} : vector<2x10xf32>, vector<10x8xf32>, vector<2x8xf32> -> vector<2x8xf32>
    %641 = tpu.concatenate %586, %604, %622, %640 in 1 : vector<2x8xf32>, vector<2x8xf32>, vector<2x8xf32>, vector<2x8xf32> -> vector<2x32xf32>
    %c248 = arith.constant 248 : index
    %c0_147 = arith.constant 0 : index
    %642 = vector.load %arg2[%c248, %c0_147] : memref<608x128xf32, #tpu.memory_space<vmem>>, vector<32x32xf32>
    %cst_148 = arith.constant dense<0.000000e+00> : vector<2x32xf32>
    %643 = tpu.matmul %641, %642, %cst_148 {dimension_numbers = #tpu.dot_dimension_numbers<[1], [0], [0], [1], [0, 0, 1, 1], [], []>} : vector<2x32xf32>, vector<32x32xf32>, vector<2x32xf32> -> vector<2x32xf32>
    %c280 = arith.constant 280 : index
    %c0_149 = arith.constant 0 : index
    %644 = vector.load %arg2[%c280, %c0_149] : memref<608x128xf32, #tpu.memory_space<vmem>>, vector<1x32xf32>
    %645 = vector.broadcast %644 : vector<1x32xf32> to vector<2x32xf32>
    %646 = arith.addf %643, %645 : vector<2x32xf32>
    %c432 = arith.constant 432 : index
    %c0_150 = arith.constant 0 : index
    %647 = vector.load %arg2[%c432, %c0_150] : memref<608x128xf32, #tpu.memory_space<vmem>>, vector<32x64xf32>
    %cst_151 = arith.constant dense<0.000000e+00> : vector<2x64xf32>
    %648 = tpu.matmul %646, %647, %cst_151 {dimension_numbers = #tpu.dot_dimension_numbers<[1], [0], [0], [1], [0, 0, 1, 1], [], []>} : vector<2x32xf32>, vector<32x64xf32>, vector<2x64xf32> -> vector<2x64xf32>
    %c464 = arith.constant 464 : index
    %c0_152 = arith.constant 0 : index
    %649 = vector.load %arg2[%c464, %c0_152] : memref<608x128xf32, #tpu.memory_space<vmem>>, vector<1x64xf32>
    %650 = vector.broadcast %649 : vector<1x64xf32> to vector<2x64xf32>
    %651 = arith.addf %648, %650 : vector<2x64xf32>
    %cst_153 = arith.constant 0.000000e+00 : f32
    %652 = vector.broadcast %cst_153 : f32 to vector<2x64xf32>
    %653 = arith.cmpf oge, %651, %652 : vector<2x64xf32>
    %cst_154 = arith.constant 0.00999999977 : f32
    %654 = vector.broadcast %cst_154 : f32 to vector<2x64xf32>
    %655 = arith.mulf %654, %651 : vector<2x64xf32>
    %656 = arith.select %653, %651, %655 : vector<2x64xi1>, vector<2x64xf32>
    %c472 = arith.constant 472 : index
    %c0_155 = arith.constant 0 : index
    %657 = vector.load %arg2[%c472, %c0_155] : memref<608x128xf32, #tpu.memory_space<vmem>>, vector<64x32xf32>
    %cst_156 = arith.constant dense<0.000000e+00> : vector<2x32xf32>
    %658 = tpu.matmul %656, %657, %cst_156 {dimension_numbers = #tpu.dot_dimension_numbers<[1], [0], [0], [1], [0, 0, 1, 1], [], []>} : vector<2x64xf32>, vector<64x32xf32>, vector<2x32xf32> -> vector<2x32xf32>
    %c536 = arith.constant 536 : index
    %c0_157 = arith.constant 0 : index
    %659 = vector.load %arg2[%c536, %c0_157] : memref<608x128xf32, #tpu.memory_space<vmem>>, vector<1x32xf32>
    %660 = vector.broadcast %659 : vector<1x32xf32> to vector<2x32xf32>
    %661 = arith.addf %658, %660 : vector<2x32xf32>
    %cst_158 = arith.constant 0.000000e+00 : f32
    %662 = vector.broadcast %cst_158 : f32 to vector<2x32xf32>
    %663 = arith.cmpf oge, %661, %662 : vector<2x32xf32>
    %cst_159 = arith.constant 0.00999999977 : f32
    %664 = vector.broadcast %cst_159 : f32 to vector<2x32xf32>
    %665 = arith.mulf %664, %661 : vector<2x32xf32>
    %666 = arith.select %663, %661, %665 : vector<2x32xi1>, vector<2x32xf32>
    %c544 = arith.constant 544 : index
    %c0_160 = arith.constant 0 : index
    %667 = vector.load %arg2[%c544, %c0_160] : memref<608x128xf32, #tpu.memory_space<vmem>>, vector<32x16xf32>
    %cst_161 = arith.constant dense<0.000000e+00> : vector<2x16xf32>
    %668 = tpu.matmul %666, %667, %cst_161 {dimension_numbers = #tpu.dot_dimension_numbers<[1], [0], [0], [1], [0, 0, 1, 1], [], []>} : vector<2x32xf32>, vector<32x16xf32>, vector<2x16xf32> -> vector<2x16xf32>
    %c576 = arith.constant 576 : index
    %c0_162 = arith.constant 0 : index
    %669 = vector.load %arg2[%c576, %c0_162] : memref<608x128xf32, #tpu.memory_space<vmem>>, vector<1x16xf32>
    %670 = vector.broadcast %669 : vector<1x16xf32> to vector<2x16xf32>
    %671 = arith.addf %668, %670 : vector<2x16xf32>
    %cst_163 = arith.constant 0.000000e+00 : f32
    %672 = vector.broadcast %cst_163 : f32 to vector<2x16xf32>
    %673 = arith.cmpf oge, %671, %672 : vector<2x16xf32>
    %cst_164 = arith.constant 0.00999999977 : f32
    %674 = vector.broadcast %cst_164 : f32 to vector<2x16xf32>
    %675 = arith.mulf %674, %671 : vector<2x16xf32>
    %676 = arith.select %673, %671, %675 : vector<2x16xi1>, vector<2x16xf32>
    %c584 = arith.constant 584 : index
    %c0_165 = arith.constant 0 : index
    %677 = vector.load %arg2[%c584, %c0_165] : memref<608x128xf32, #tpu.memory_space<vmem>>, vector<16x3xf32>
    %cst_166 = arith.constant dense<0.000000e+00> : vector<2x3xf32>
    %678 = tpu.matmul %676, %677, %cst_166 {dimension_numbers = #tpu.dot_dimension_numbers<[1], [0], [0], [1], [0, 0, 1, 1], [], []>} : vector<2x16xf32>, vector<16x3xf32>, vector<2x3xf32> -> vector<2x3xf32>
    %c600 = arith.constant 600 : index
    %c0_167 = arith.constant 0 : index
    %679 = vector.load %arg2[%c600, %c0_167] : memref<608x128xf32, #tpu.memory_space<vmem>>, vector<1x3xf32>
    %680 = vector.broadcast %679 : vector<1x3xf32> to vector<2x3xf32>
    %681 = arith.addf %678, %680 : vector<2x3xf32>
    %cst_168 = arith.constant dense<0xFF800000> : vector<2xf32>
    %682 = vector.multi_reduction <maximumf>, %681, %cst_168 [1] : vector<2x3xf32> to vector<2xf32>
    %683 = vector.shape_cast %682 : vector<2xf32> to vector<2x1xf32>
    %684 = vector.broadcast %683 : vector<2x1xf32> to vector<2x3xf32>
    %685 = arith.subf %681, %684 : vector<2x3xf32>
    %686 = math.exp %685 : vector<2x3xf32>
    %cst_169 = arith.constant dense<0.000000e+00> : vector<2xf32>
    %687 = vector.multi_reduction <add>, %686, %cst_169 [1] : vector<2x3xf32> to vector<2xf32>
    %688 = vector.shape_cast %687 : vector<2xf32> to vector<2x1xf32>
    %689 = vector.broadcast %688 : vector<2x1xf32> to vector<2x3xf32>
    %690 = arith.divf %686, %689 : vector<2x3xf32>
    %c0_170 = arith.constant 0 : index
    %c0_171 = arith.constant 0 : index
    %691 = vector.load %arg3[%c0_170, %c0_171] : memref<2x3xf32, #tpu.memory_space<vmem>>, vector<2x3xf32>
    tpu.vector_store %arg3[%c0_170, %c0_171], %690 {strides = array<i32>} : memref<2x3xf32, #tpu.memory_space<vmem>>, vector<2x3xf32>,
    return
  }
}

</mosaic_0001>

<bundles_post_ra>
// kernel: lane_change_forward.1
= control target key start
LH: loop header
LB: loop body
LE: loop exit
PB: predicated region body
PF: predicated region fallthrough
CT: control target
= control target key end

     0   :  { %8 = vsyncpa [#allocation3], 0  ;;  %s16073_s0 = inlined_call_operand.vmem [shape: f32[16,14], index: 0, kind: input, shape index: {}]   ;;  %s16074_s1 = inlined_call_operand.vmem [shape: f32[80,15], index: 1, kind: input, shape index: {}]   ;;  %s16075_s2 = inlined_call_operand.hbm [shape: f32[608,128], index: 2, kind: input, shape index: {}]   ;;  %s16076_s3 = inlined_call_operand.hbm [shape: f32[2,3], index: 3, kind: output, shape index: {}]  }
   0x1   :  { %9 = vsyncpa [#allocation4], 0  ;;  %s13230_s12 = smov [#allocation2]   ;;  %s13182_s16 = scalar_lea.hbm %s16075_s2, 9728 }
   0x2   :  { %s19_s13 = sshll.u32 %s13230_s12, 4  ;;  %p13183_p0 = scmp.ne.s32.totalorder %s16075_s2, %s13182_s16  ;;  %s20_s13 = int_to_ptr.vmem [resolvable:$true] %s19_s13 }
   0x3   :  { %p13186_p1 = scmp.lt.u32.totalorder %s13182_s16, %s16075_s2 }
   0x5   :  { %p13188_p2 = pnand %p13186_p1, %p13183_p0 }
   0x7   :  { %13191 = shalt.err (!%p13188_p2)
}
   0x8   :  { %s13192_s21 = scalar_lea.vmem %s20_s13, 9728  ;;  %p13197_p4 = scmp.lt.s32.totalorder %s20_s13, %s20_s13 }
   0x9   :  { %p13193_p3 = scmp.ne.s32.totalorder %s20_s13, %s13192_s21  ;;  %p13198_p5 = scmp.lt.s32.totalorder %s13192_s21, %s13192_s21 }
   0xb   :  { %p13199_p6 = por %p13198_p5, %p13197_p4 }
   0xd   :  { %p13200_p7 = pnand %p13199_p6, %p13193_p3 }
   0xf   :  { %13203 = shalt.err (!%p13200_p7)
}
  0x10   :  { %s13231_s22 = smov 128   ;;  %s13232_s23 = smov 8  }
  0x11   :  { %25 = dma.hbm_to_vmem [thread:$0]  %s16075_s2, 9728, %s20_s13, [#allocation3], %s13231_s22, %s13231_s22, %s13232_s23  }
  0x12   :  { %13226 = dma.done.wait [#allocation3], 9728  }
  0x13   :  { %13227 = vsyncadd [#allocation3], 4294957568  ;;  %vm95_vm0 = vcmask 1045504   ;;  %vm88_vm1 = vcmask 113664   ;;  %vm13233_vm2 = vmmov 1   ;;  %v81_v0 = vld [vmem:[#allocation2] sm:$0xff] }
  0x14   :  { %vm11404_vm3 = vmpackc.low %vm95_vm0, %vm13233_vm2  ;;  %v82_v1 = vld [vmem:[#allocation2 + $0x8] sm:$0x3f]  ;;  %v79_v2 = vld [vmem:[%s16073_s0] sm:$0xff]  ;;  %vm386_vm6 = vcmask 261120   ;;  %vm228_vm7 = vcmask 1046528   ;;  %vm197_vm8 = vcmask 121856  }
  0x15   :  { %v11403_v3 = vpack.c.bf16 %v82_v1, %v81_v0  ;;  %10630 = vmatprep.mubr.msk.f32.mxu0 %vm88_vm1, %v79_v2  ;;  %v80_v4 = vld [vmem:[%s16073_s0 + $0x8] sm:$0xff]  ;;  %v377_v5 = vld [vmem:[#allocation2 + $0x30] sm:$0xff]  ;;  %v378_v6 = vld [vmem:[#allocation2 + $0x38] sm:$0xff]  ;;  %vm474_vm10 = vcmask 64512   ;;  %s13234_s21 = smov 120   ;;  %s13236_s22 = smov 80   ;;  %v29_v2 = vlaneseq }
  0x16   :  { %v11415_v7 = vpack.c.bf16 %v378_v6, %v377_v5  ;;  %v379_v8 = vld [vmem:[#allocation2 + $0x40] sm:$0xff]  ;;  %v380_v9 = vld [vmem:[#allocation2 + $0x48] sm:$0xff]  ;;  %v9855_v11 = vld [vmem:[#allocation2 + $0x10] ss:$0 sm:$0xff]  ;;  %s13237_s24 = smov 88   ;;  %s13238_s25 = smov 112  }
  0x17   :  { %11405 = vmatprep.subr.msk.bf16.mxu0 %vm11404_vm3, %v11403_v3  ;;  %v11419_v10 = vpack.c.bf16 %v380_v9, %v379_v8  ;;  %v190_v20 = vld [vmem:[#allocation2 + $0x18] sm:$0xff]  ;;  %v191_v21 = vld [vmem:[#allocation2 + $0x20] sm:$0x7f]  ;;  %vm11410_vm9 = vmpackc.low %vm228_vm7, %vm13233_vm2  ;;  %v13407_v5 = vand.u32 127, %v29_v2  ;;  %vm16081_vm14 = vcmask 130048   ;;  %s13240_s26 = smov 56  }
  0x18   :  { %11408 = vmatpush3.bf16.msk.msra.mxu0 %vm11404_vm3, %v11403_v3  ;;  %v180_v22 = vld [vmem:[%s16074_s1] sm:$0xff]  ;;  %v11409_v23 = vpack.c.bf16 %v191_v21, %v190_v20  ;;  %v181_v24 = vld [vmem:[%s16074_s1 + $0x8] sm:$0xff]  ;;  %v182_v25 = vld [vmem:[%s16074_s1 + $0x10] sm:$0xff]  ;;  %v13404_v3 = vshrl.u32 %v29_v2, 7  ;;  %s13241_s27 = smov 64   ;;  %s13242_s28 = smov 48  }
  0x19   :  { %11416 = vmatprep.subr.bf16.mxu0 %v11415_v7  ;;  %10637 = vmatprep.mubr.msk.f32.mxu1 %vm197_vm8, %v180_v22  ;;  %v183_v26 = vld [vmem:[%s16074_s1 + $0x18] sm:$0xff]  ;;  %v184_v27 = vld [vmem:[%s16074_s1 + $0x20] sm:$0xff]  ;;  %v185_v28 = vld [vmem:[%s16074_s1 + $0x28] sm:$0xff]  ;;  %16085 = vst [vmem:[#allocation9_spill] sm:$0xff] %v13407_v5  ;;  %s13243_s29 = smov 72   ;;  %s13244_s0 = smov 104  }
  0x1a   :  { %11411 = vmatprep.subr.msk.bf16.mxu1 %vm11410_vm9, %v11409_v23  ;;  %v186_v29 = vld [vmem:[%s16074_s1 + $0x30] sm:$0xff]  ;;  %v187_v30 = vld [vmem:[%s16074_s1 + $0x38] sm:$0xff]  ;;  %v188_v31 = vld [vmem:[%s16074_s1 + $0x40] sm:$0xff]  ;;  %16084 = vst [vmem:[#allocation8_spill] sm:$0xff] %v13404_v3  ;;  %v34_v8 = vshra.s32 %v13404_v3, 3  ;;  %s13245_s2 = smov 40  }
  0x1b   :  { %10631 = vmatmul.mubr.msk.f32.vlgmr.msra.gmra.mrb[0].mxu0 %vm88_vm1, %v80_v4  ;;  %11414 = vmatpush3.bf16.msk.msra.mxu1 %vm11410_vm9, %v11409_v23  ;;  %v189_v32 = vld [vmem:[%s16074_s1 + $0x48] sm:$0xff]  ;;  %v9871_v33 = vld [vmem:[#allocation2 + $0x50] ss:$0 sm:$0xff]  ;;  %s13235_s1 = smov 96   ;;  %vm13377_vm11 = vmpackc.low %vm474_vm10, %vm474_vm10  ;;  %v31_v4 = vadd.s32 8, %v13404_v3  ;;  %s13246_s30 = smov 16  }
  0x1c   :  { %11418 = vmatpush3.bf16.msra.mxu0 %v11415_v7  ;;  %v13410_v7 = vshra.s32 %v13407_v5, 3  ;;  %s13247_s4 = smov 24   ;;  %s13251_s5 = smov 32  }
  0x1d   :  { %11420 = vmatprep.subr.bf16.mxu0 %v11419_v10  ;;  %v35_v6 = vshra.s32 %v31_v4, 3 }
  0x1e   :  { %10638 = vmatmul.mubr.msk.f32.vlgmr.msra.gmra.mrb[0].mxu1 %vm197_vm8, %v181_v24  ;;  %vm37_vm13 = vcmp.eq.s32.totalorder %v34_v8, %v13410_v7 }
  0x1f   :  { %10640 = vmatprep.mubr.msk.f32.mxu1 %vm197_vm8, %v182_v25  ;;  %vm38_vm12 = vcmp.eq.s32.totalorder %v35_v6, %v13410_v7 }
  0x20   :  { %11422 = vmatpush3.bf16.msra.mxu0 %v11419_v10  ;;  %v16077_v10 = vmov -1e+09  }
  0x22   :  { %10641 = vmatmul.mubr.msk.f32.gmra.mrb[2].mxu1 %vm197_vm8, %v183_v26 }
  0x23   :  { %10643 = vmatprep.mubr.msk.f32.mxu1 %vm197_vm8, %v184_v27 }
  0x26   :  { %10644 = vmatmul.mubr.msk.f32.gmra.mrb[4].mxu1 %vm197_vm8, %v185_v28 }
  0x27   :  { %10646 = vmatprep.mubr.msk.f32.mxu1 %vm197_vm8, %v186_v29 }
  0x2a   :  { %10647 = vmatmul.mubr.msk.f32.gmra.mrb[6].mxu1 %vm197_vm8, %v187_v30 }
  0x2b   :  { %10649 = vmatprep.mubr.msk.f32.mxu1 %vm197_vm8, %v188_v31 }
  0x2e   :  { %10650 = vmatmul.mubr.msk.f32.gmra.mrb[8].mxu1 %vm197_vm8, %v189_v32 }
  0xee   :  { %v10632_v12 = vpop.f32.mrb[0].mxu0 }
  0xef   :  { %v171_v13 = vadd.f32 %v10632_v12, %v9855_v11  ;;  %v165_v14 = vpop.f32.mrb[1].mxu0 }
  0xf0   :  { %v166_v15 = vadd.f32 %v9855_v11, %v165_v14  ;;  %v13416_v11 = vsel %vm38_vm12, 0.0, %v16077_v10  ;;  %v13419_v14 = vsel %vm37_vm13, 0.0, %v16077_v10  ;;  %vm16080_vm13 = vcmask 195584  }
  0xf1   :  { %v177_v16 = vmul.f32 0.01, %v171_v13  ;;  %vm175_vm4 = vcmp.ge.f32.partialorder %v171_v13, 0.0  ;;  %v13360_v39 = vpop.f32.mrb[0].mxu1 }
  0xf2   :  { %vm174_vm5 = vcmp.ge.f32.partialorder %v166_v15, 0.0  ;;  %v176_v17 = vmul.f32 0.01, %v166_v15  ;;  %v13362_v40 = vpop.f32.mrb[1].mxu1 }
  0xf3   :  { %v179_v19 = vsel %vm175_vm4, %v171_v13, %v177_v16 }
  0xf4   :  { %v178_v18 = vsel %vm174_vm5, %v166_v15, %v176_v17 }
  0xf5   :  { %10660 = vmatprep.mubr.msk.f32.mxu0 %vm386_vm6, %v178_v18  ;;  %v13364_v41 = vpop.f32.mrb[2].mxu1 }
  0xf6   :  { %10661 = vmatmul.mubr.msk.f32.vlgmr.msra.gmra.mrb[2].mxu0 %vm386_vm6, %v179_v19  ;;  %v13366_v42 = vpop.f32.mrb[3].mxu1 }
  0xf9   :  { %v13368_v43 = vpop.f32.mrb[4].mxu1 }
  0xfa   :  { %v13370_v44 = vpop.f32.mrb[5].mxu1 }
  0xfd   :  { %v13373_v47 = vpop.f32.mrb[6].mxu1 }
  0xfe   :  { %v13398_v63 = vpop.f32.mrb[7].mxu1 }
 0x101   :  { %v13400_v0 = vpop.f32.mrb[8].mxu1 }
 0x102   :  { %v13402_v1 = vpop.f32.mrb[9].mxu1 }
 0x1c9   :  { %v10662_v34 = vpop.f32.mrb[2].mxu0 }
 0x1ca   :  { %v13336_v35 = vadd.f32 %v10662_v34, %v9871_v33  ;;  %v459_v36 = vpop.f32.mrb[3].mxu0 }
 0x1cb   :  { %v13338_v37 = vadd.f32 %v9871_v33, %v459_v36 }
 0x1cd   :  { %672 = vrot.lane.b32.xlu1 %v13338_v37, %s13234_s21  ;;  %10667 = vmatprep.mubr.msk.f32.mxu0 %vm474_vm10, %v13338_v37  ;;  %v13346_v38 = vpack.i.bf16 %v13336_v35, %v13338_v37 }
 0x1cf   :  { %11918 = vrot.lane.b32.xlu0 %v13346_v38, %s13235_s1 }
 0x1d1   :  { %11928 = vrot.lane.b32.xlu1 %v13346_v38, %s13236_s22 }
 0x1d3   :  { %11923 = vrot.lane.b32.xlu0 %v13346_v38, %s13237_s24 }
 0x1d5   :  { %876 = vrot.lane.b32.xlu1 %v13338_v37, %s13238_s25 }
 0x1d7   :  { %674 = vrot.lane.b32.xlu0 %v13336_v35, %s13234_s21 }
 0x1db   :  { %878 = vrot.lane.b32.xlu0 %v13336_v35, %s13238_s25 }
 0x23f   :  { %v673_v45 = vpop.permute.xlu1 %672 }
 0x240   :  { %10681 = vmatprep.mubr.msk.f32.mxu1 %vm474_vm10, %v673_v45 }
 0x241   :  { %v11919_v46 = vpop.permute.xlu0 %11918 }
 0x242   :  { %v11921_v48 = vunpack.i.h.bf16 %v11919_v46  ;;  %v11920_v49 = vunpack.i.l.bf16 %v11919_v46 }
 0x243   :  { %v11929_v50 = vpop.permute.xlu1 %11928 }
 0x244   :  { %v11423_v52 = vpack.c.bf16 %v11921_v48, %v11920_v49  ;;  %v11931_v54 = vunpack.i.h.bf16 %v11929_v50  ;;  %v11930_v55 = vunpack.i.l.bf16 %v11929_v50 }
 0x245   :  { %v11924_v53 = vpop.permute.xlu0 %11923 }
 0x246   :  { %v11926_v56 = vunpack.i.h.bf16 %v11924_v53  ;;  %v11925_v57 = vunpack.i.l.bf16 %v11924_v53  ;;  %11425 = vmatprep.subr.msk.bf16.mxu0 %vm13377_vm11, %v11423_v52  ;;  %v11443_v59 = vpack.c.bf16 %v11931_v54, %v11930_v55 }
 0x247   :  { %11428 = vmatpush3.bf16.xpose.msk.msra.mxu0 %vm13377_vm11, %v11423_v52  ;;  %v877_v61 = vpop.permute.xlu1 %876 }
 0x248   :  { %v11433_v58 = vpack.c.bf16 %v11926_v56, %v11925_v57 }
 0x249   :  { %v675_v60 = vpop.permute.xlu0 %674 }
 0x24a   :  { %11435 = vmatprep.subr.msk.bf16.mxu1 %vm13377_vm11, %v11433_v58 }
 0x24b   :  { %11438 = vmatpush3.bf16.xpose.msk.msra.mxu1 %vm13377_vm11, %v11433_v58 }
 0x24c   :  { %11445 = vmatprep.subr.msk.bf16.mxu1 %vm13377_vm11, %v11443_v59 }
 0x24d   :  { %v879_v62 = vpop.permute.xlu0 %878 }
 0x24e   :  { %10668 = vmatmul.mubr.msk.f32.vlgmr.msra.gmra.mrb[4].mxu0 %vm474_vm10, %v13336_v35 }
 0x252   :  { %10682 = vmatmul.mubr.msk.f32.vlgmr.msra.gmra.mrb[10].mxu1 %vm474_vm10, %v675_v60 }
 0x253   :  { %11448 = vmatpush3.bf16.xpose.msk.msra.mxu1 %vm13377_vm11, %v11443_v59  ;;  %10695 = vmatprep.mubr.msk.f32.mxu1 %vm474_vm10, %v877_v61 }
 0x25a   :  { %10696 = vmatmul.mubr.msk.f32.vlgmr.msra.gmra.mrb[12].mxu1 %vm474_vm10, %v879_v62 }
 0x321   :  { %v10669_v9 = vpop.f32.mrb[4].mxu0 }
 0x322   :  { %v559_v12 = vmul.f32 0.35355338, %v10669_v9  ;;  %v549_v13 = vpop.f32.mrb[5].mxu0 }
 0x323   :  { %v558_v15 = vmul.f32 0.35355338, %v549_v13 }
 0x324   :  { %v561_v16 = vadd.f32 %v559_v12, %v13416_v11 }
 0x325   :  { %v10683_v17 = vpop.f32.mrb[10].mxu1  ;;  %v560_v18 = vadd.f32 %v558_v15, %v13419_v14 }
 0x326   :  { %v764_v19 = vmul.f32 0.35355338, %v10683_v17  ;;  %v754_v20 = vpop.f32.mrb[11].mxu1  ;;  %v566_v21 = vsel %vm16081_vm14, %v561_v16, -inf }
 0x327   :  { %v763_v22 = vmul.f32 0.35355338, %v754_v20  ;;  %567 = vmax.xlane.f32.xlu0 %v566_v21  ;;  %v563_v23 = vsel %vm16081_vm14, %v560_v18, -inf }
 0x328   :  { %564 = vmax.xlane.f32.xlu1 %v563_v23  ;;  %v766_v24 = vadd.f32 %v764_v19, %v13416_v11 }
 0x329   :  { %v765_v25 = vadd.f32 %v763_v22, %v13419_v14 }
 0x32a   :  { %v770_v26 = vsel %vm16081_vm14, %v766_v24, -inf }
 0x32b   :  { %v767_v27 = vsel %vm16081_vm14, %v765_v25, -inf }
 0x32c   :  { %768 = vmax.xlane.f32.xlu0 %v767_v27  ;;  %771 = vmax.xlane.f32.xlu1 %v770_v26 }
 0x32d   :  { %v10697_v28 = vpop.f32.mrb[12].mxu1 }
 0x32e   :  { %v968_v29 = vmul.f32 0.35355338, %v10697_v28  ;;  %v958_v30 = vpop.f32.mrb[13].mxu1 }
 0x32f   :  { %v967_v31 = vmul.f32 0.35355338, %v958_v30 }
 0x330   :  { %v13430_v32 = vadd.f32 %v968_v29, %v13416_v11 }
 0x331   :  { %v969_v33 = vadd.f32 %v967_v31, %v13419_v14 }
 0x332   :  { %v974_v34 = vsel %vm16081_vm14, %v13430_v32, -inf }
 0x333   :  { %975 = vmax.xlane.f32.xlu1 %v974_v34  ;;  %v971_v36 = vsel %vm16081_vm14, %v969_v33, -inf }
 0x334   :  { %972 = vmax.xlane.f32.xlu0 %v971_v36 }
 0x344   :  { %11938 = vrot.lane.b32.xlu1 %v13346_v38, %s13240_s26 }
 0x34a   :  { %11933 = vrot.lane.b32.xlu0 %v13346_v38, %s13241_s27 }
 0x3b4   :  { %v568_v45 = vpop.xlane.xlu0 %567 }
 0x3b5   :  { %v570_v46 = vsub.f32 %v561_v16, %v568_v45  ;;  %v565_v48 = vpop.xlane.xlu1 %564 }
 0x3b6   :  { %v569_v49 = vsub.f32 %v560_v18, %v565_v48 }
 0x3b7   :  { %v573_v50 = vmul.f32 1.442695, %v570_v46 }
 0x3b8   :  { %v571_v52 = vmul.f32 1.442695, %v569_v49 }
 0x3b9   :  { %12202 = vpow2.f32 %v573_v50  ;;  %v769_v53 = vpop.xlane.xlu0 %768  ;;  %v772_v54 = vpop.xlane.xlu1 %771 }
 0x3ba   :  { %12204 = vpow2.f32 %v571_v52  ;;  %v773_v55 = vsub.f32 %v765_v25, %v769_v53  ;;  %v774_v56 = vsub.f32 %v766_v24, %v772_v54 }
 0x3bc   :  { %v775_v57 = vmul.f32 1.442695, %v773_v55  ;;  %v777_v58 = vmul.f32 1.442695, %v774_v56 }
 0x3be   :  { %12206 = vpow2.f32 %v775_v57 }
 0x3bf   :  { %12208 = vpow2.f32 %v777_v58 }
 0x3c0   :  { %v976_v59 = vpop.xlane.xlu1 %975 }
 0x3c1   :  { %v973_v60 = vpop.xlane.xlu0 %972  ;;  %v978_v26 = vsub.f32 %v13430_v32, %v976_v59 }
 0x3c2   :  { %v977_v61 = vsub.f32 %v969_v33, %v973_v60 }
 0x3c3   :  { %v12203_v62 = vpop.eup %12202  ;;  %v981_v27 = vmul.f32 1.442695, %v978_v26 }
 0x3c4   :  { %v12205_v2 = vpop.eup %12204  ;;  %v979_v4 = vmul.f32 1.442695, %v977_v61  ;;  %v11939_v6 = vpop.permute.xlu1 %11938  ;;  %v578_v8 = vsel %vm16081_vm14, %v12203_v62, 0.0 }
 0x3c5   :  { %v11941_v9 = vunpack.i.h.bf16 %v11939_v6  ;;  %v11934_v12 = vpop.permute.xlu0 %11933  ;;  %579 = vadd.xlane.f32.xlu1 %v578_v8  ;;  %v575_v13 = vsel %vm16081_vm14, %v12205_v2, 0.0  ;;  %v11940_v15 = vunpack.i.l.bf16 %v11939_v6  ;;  %v9859_v8 = vld [vmem:[#allocation2 + $0x28] ss:$0 sm:$0xff] }
 0x3c6   :  { %12210 = vpow2.f32 %v979_v4  ;;  %v11936_v16 = vunpack.i.h.bf16 %v11934_v12  ;;  %v11935_v17 = vunpack.i.l.bf16 %v11934_v12  ;;  %576 = vadd.xlane.f32.xlu0 %v575_v13  ;;  %v1406_v4 = vld [vmem:[#allocation2 + $0x88] sm:$0xff]  ;;  %v299_v13 = vadd.f32 %v9859_v8, %v13362_v40 }
 0x3c7   :  { %v11439_v23 = vpack.c.bf16 %v11941_v9, %v11940_v15  ;;  %12212 = vpow2.f32 %v981_v27  ;;  %v319_v26 = vadd.f32 %v9859_v8, %v13370_v44 }
 0x3c8   :  { %v12207_v18 = vpop.eup %12206  ;;  %v11429_v19 = vpack.c.bf16 %v11936_v16, %v11935_v17  ;;  %v1407_v16 = vld [vmem:[#allocation2 + $0x90] sm:$0xff]  ;;  %v1408_v17 = vld [vmem:[#allocation2 + $0x98] sm:$0xff]  ;;  %vm347_vm15 = vcmp.ge.f32.partialorder %v299_v13, 0.0 }
 0x3c9   :  { %v12209_v20 = vpop.eup %12208  ;;  %v779_v21 = vsel %vm16081_vm14, %v12207_v18, 0.0  ;;  %vm351_vm4 = vcmp.ge.f32.partialorder %v319_v26, 0.0 }
 0x3ca   :  { %11430 = vmatprep.subr.bf16.mxu0 %v11429_v19  ;;  %780 = vadd.xlane.f32.xlu0 %v779_v21  ;;  %v782_v22 = vsel %vm16081_vm14, %v12209_v20, 0.0 }
 0x3cb   :  { %783 = vadd.xlane.f32.xlu1 %v782_v22  ;;  %11432 = vmatpush3.bf16.msra.mxu0 %v11429_v19  ;;  %v11475_v19 = vpack.c.bf16 %v1408_v17, %v1407_v16  ;;  %v309_v22 = vadd.f32 %v9859_v8, %v13366_v42  ;;  %v324_v42 = vadd.f32 %v13368_v43, %v9859_v8 }
 0x3cc   :  { %11440 = vmatprep.subr.bf16.mxu0 %v11439_v23 }
 0x3cd   :  { %vm349_vm1 = vcmp.ge.f32.partialorder %v309_v22, 0.0  ;;  %vm352_vm5 = vcmp.ge.f32.partialorder %v324_v42, 0.0 }
 0x3d0   :  { %v12211_v24 = vpop.eup %12210 }
 0x3d1   :  { %v983_v25 = vsel %vm16081_vm14, %v12211_v24, 0.0  ;;  %v12213_v28 = vpop.eup %12212 }
 0x3d2   :  { %984 = vadd.xlane.f32.xlu0 %v983_v25  ;;  %v986_v29 = vsel %vm16081_vm14, %v12213_v28, 0.0  ;;  %v359_v25 = vmul.f32 0.01, %v309_v22 }
 0x3dc   :  { %11943 = vrot.lane.b32.xlu1 %v13346_v38, %s13242_s28 }
 0x3e8   :  { %11948 = vrot.lane.b32.xlu0 %v13346_v38, %s13243_s29 }
 0x3ec   :  { %1082 = vrot.lane.b32.xlu0 %v13336_v35, %s13244_s0 }
 0x400   :  { %987 = vadd.xlane.f32.xlu1 %v986_v29  ;;  %v329_v29 = vadd.f32 %v9859_v8, %v13398_v63 }
 0x402   :  { %vm353_vm7 = vcmp.ge.f32.partialorder %v329_v29, 0.0 }
 0x411   :  { %1080 = vrot.lane.b32.xlu1 %v13338_v37, %s13244_s0 }
 0x452   :  { %v580_v30 = vpop.xlane.xlu1 %579 }
 0x453   :  { %12214 = vrcp.f32 %v580_v30  ;;  %v577_v31 = vpop.xlane.xlu0 %576  ;;  %v369_v30 = vsel %vm349_vm1, %v309_v22, %v359_v25 }
 0x454   :  { %12216 = vrcp.f32 %v577_v31  ;;  %v334_v31 = vadd.f32 %v13373_v47, %v9859_v8 }
 0x456   :  { %v364_v63 = vmul.f32 0.01, %v334_v31  ;;  %vm354_vm8 = vcmp.ge.f32.partialorder %v334_v31, 0.0 }
 0x457   :  { %v781_v33 = vpop.xlane.xlu0 %780 }
 0x458   :  { %12218 = vrcp.f32 %v781_v33  ;;  %v784_v32 = vpop.xlane.xlu1 %783  ;;  %v363_v33 = vmul.f32 0.01, %v329_v29 }
 0x459   :  { %12220 = vrcp.f32 %v784_v32  ;;  %v339_v32 = vadd.f32 %v9859_v8, %v13402_v1  ;;  %v374_v1 = vsel %vm354_vm8, %v334_v31, %v364_v63 }
 0x45a   :  { %v373_v47 = vsel %vm353_vm7, %v329_v29, %v363_v33 }
 0x45b   :  { %vm355_vm9 = vcmp.ge.f32.partialorder %v339_v32, 0.0 }
 0x45c   :  { %v11944_v34 = vpop.permute.xlu1 %11943 }
 0x45d   :  { %v12215_v36 = vpop.eup %12214  ;;  %v11946_v45 = vunpack.i.h.bf16 %v11944_v34  ;;  %v11945_v46 = vunpack.i.l.bf16 %v11944_v34  ;;  %v344_v34 = vadd.f32 %v13400_v0, %v9859_v8 }
 0x45e   :  { %v12217_v35 = vpop.eup %12216  ;;  %v584_v50 = vmul.f32 %v12215_v36, %v12203_v62 }
 0x45f   :  { %v985_v48 = vpop.xlane.xlu0 %984  ;;  %v583_v49 = vmul.f32 %v12217_v35, %v12205_v2  ;;  %v11449_v52 = vpack.c.bf16 %v11946_v45, %v11945_v46  ;;  %v1405_v2 = vld [vmem:[#allocation2 + $0x80] sm:$0xff]  ;;  %v365_v35 = vmul.f32 0.01, %v339_v32  ;;  %v366_v45 = vmul.f32 0.01, %v344_v34 }
 0x460   :  { %12222 = vrcp.f32 %v985_v48  ;;  %v11471_v12 = vpack.c.bf16 %v1406_v4, %v1405_v2  ;;  %vm356_vm12 = vcmp.ge.f32.partialorder %v344_v34, 0.0  ;;  %v9901_v4 = vld [vmem:[#allocation2 + $0xa0] ss:$0 sm:$0xff] }
 0x461   :  { %10674 = vmatprep.mubr.msk.f32.mxu0 %vm16081_vm14, %v583_v49  ;;  %v375_v46 = vsel %vm355_vm9, %v339_v32, %v365_v35  ;;  %v376_v48 = vsel %vm356_vm12, %v344_v34, %v366_v45  ;;  %v1315_v35 = vld [vmem:[#allocation2 + $0x58] sm:$0xff]  ;;  %vm13249_vm12 = vmmov 0  }
 0x462   :  { %v12219_v37 = vpop.eup %12218  ;;  %10675 = vmatmul.mubr.msk.f32.vlgmr.msra.gmra.mrb[6].mxu0 %vm16081_vm14, %v584_v50 }
 0x463   :  { %v12221_v53 = vpop.eup %12220  ;;  %11442 = vmatpush3.bf16.msra.mxu0 %v11439_v23  ;;  %v11949_v54 = vpop.permute.xlu0 %11948  ;;  %v787_v55 = vmul.f32 %v12219_v37, %v12207_v18  ;;  %v357_v18 = vmul.f32 0.01, %v299_v13 }
 0x464   :  { %v11951_v56 = vunpack.i.h.bf16 %v11949_v54  ;;  %v11950_v57 = vunpack.i.l.bf16 %v11949_v54  ;;  %11450 = vmatprep.subr.bf16.mxu0 %v11449_v52  ;;  %v788_v58 = vmul.f32 %v12221_v53, %v12209_v20  ;;  %v304_v20 = vadd.f32 %v13360_v39, %v9859_v8 }
 0x465   :  { %10688 = vmatprep.mubr.msk.f32.mxu0 %vm16081_vm14, %v787_v55  ;;  %v367_v40 = vsel %vm347_vm15, %v299_v13, %v357_v18  ;;  %vm1764_vm15 = vcmask 654336  }
 0x466   :  { %v11453_v59 = vpack.c.bf16 %v11951_v56, %v11950_v57  ;;  %10689 = vmatmul.mubr.msk.f32.vlgmr.msra.gmra.mrb[8].mxu0 %vm16081_vm14, %v788_v58  ;;  %v358_v23 = vmul.f32 0.01, %v304_v20  ;;  %vm348_vm0 = vcmp.ge.f32.partialorder %v304_v20, 0.0 }
 0x467   :  { %11452 = vmatpush3.bf16.msra.mxu0 %v11449_v52  ;;  %v1083_v21 = vpop.permute.xlu0 %1082 }
 0x468   :  { %11455 = vmatprep.subr.msk.bf16.mxu0 %vm13377_vm11, %v11453_v59  ;;  %v368_v39 = vsel %vm348_vm0, %v304_v20, %v358_v23 }
 0x46a   :  { %v12223_v60 = vpop.eup %12222 }
 0x46b   :  { %v991_v61 = vmul.f32 %v12223_v60, %v12211_v24  ;;  %v314_v24 = vadd.f32 %v13364_v41, %v9859_v8  ;;  %v362_v41 = vmul.f32 0.01, %v324_v42 }
 0x46d   :  { %10702 = vmatprep.mubr.msk.f32.mxu0 %vm16081_vm14, %v991_v61  ;;  %v360_v27 = vmul.f32 0.01, %v314_v24  ;;  %vm350_vm3 = vcmp.ge.f32.partialorder %v314_v24, 0.0  ;;  %v372_v36 = vsel %vm352_vm5, %v324_v42, %v362_v41 }
 0x46f   :  { %v370_v44 = vsel %vm350_vm3, %v314_v24, %v360_v27 }
 0x48d   :  { %v988_v62 = vpop.xlane.xlu1 %987 }
 0x48e   :  { %12224 = vrcp.f32 %v988_v62 }
 0x491   :  { %v1081_v15 = vpop.permute.xlu1 %1080 }
 0x498   :  { %v12225_v6 = vpop.eup %12224 }
 0x499   :  { %v992_v9 = vmul.f32 %v12225_v6, %v12213_v28  ;;  %v361_v28 = vmul.f32 0.01, %v319_v26 }
 0x49b   :  { %10703 = vmatmul.mubr.msk.f32.vlgmr.msra.gmra.mrb[10].mxu0 %vm16081_vm14, %v992_v9  ;;  %v371_v43 = vsel %vm351_vm4, %v319_v26, %v361_v28 }
 0x49c   :  { %11458 = vmatpush3.bf16.xpose.msk.msra.mxu0 %vm13377_vm11, %v11453_v59  ;;  %10709 = vmatprep.mubr.msk.f32.mxu0 %vm474_vm10, %v1081_v15 }
 0x49d   :  { %11472 = vmatprep.subr.bf16.mxu0 %v11471_v12 }
 0x4a3   :  { %10710 = vmatmul.mubr.msk.f32.vlgmr.msra.gmra.mrb[12].mxu0 %vm474_vm10, %v1083_v21 }
 0x4a4   :  { %11474 = vmatpush3.bf16.msra.mxu0 %v11471_v12  ;;  %10738 = vmatprep.mubr.msk.f32.mxu0 %vm386_vm6, %v367_v40 }
 0x4a5   :  { %11476 = vmatprep.subr.bf16.mxu0 %v11475_v19 }
 0x4a8   :  { %11478 = vmatpush3.bf16.msra.mxu0 %v11475_v19 }
 0x4ab   :  { %10739 = vmatmul.mubr.msk.f32.vlgmr.msra.gmra.mrb[14].mxu0 %vm386_vm6, %v368_v39 }
 0x4ac   :  { %10741 = vmatprep.mubr.msk.f32.mxu0 %vm386_vm6, %v369_v30 }
 0x4af   :  { %10742 = vmatmul.mubr.msk.f32.gmra.mrb[16].mxu0 %vm386_vm6, %v370_v44 }
 0x4b0   :  { %10744 = vmatprep.mubr.msk.f32.mxu0 %vm386_vm6, %v371_v43 }
 0x4b3   :  { %10745 = vmatmul.mubr.msk.f32.gmra.mrb[18].mxu0 %vm386_vm6, %v372_v36 }
 0x4b4   :  { %10747 = vmatprep.mubr.msk.f32.mxu0 %vm386_vm6, %v373_v47 }
 0x4b7   :  { %10748 = vmatmul.mubr.msk.f32.gmra.mrb[20].mxu0 %vm386_vm6, %v374_v1 }
 0x4b8   :  { %10750 = vmatprep.mubr.msk.f32.mxu0 %vm386_vm6, %v375_v46 }
 0x4bb   :  { %10751 = vmatmul.mubr.msk.f32.gmra.mrb[22].mxu0 %vm386_vm6, %v376_v48 }
 0x535   :  { %v13487_v0 = vpop.f32.mrb[6].mxu0 }
 0x536   :  { %v13489_v49 = vpop.f32.mrb[7].mxu0 }
 0x539   :  { %v10690_v50 = vpop.f32.mrb[8].mxu0 }
 0x53a   :  { %v867_v37 = vpop.f32.mrb[9].mxu0 }
 0x56e   :  { %v10704_v52 = vpop.f32.mrb[10].mxu0 }
 0x56f   :  { %v1071_v53 = vpop.f32.mrb[11].mxu0 }
 0x576   :  { %v10711_v54 = vpop.f32.mrb[12].mxu0 }
 0x577   :  { %v1172_v55 = vmul.f32 0.35355338, %v10711_v54  ;;  %v1162_v56 = vpop.f32.mrb[13].mxu0 }
 0x578   :  { %v1171_v57 = vmul.f32 0.35355338, %v1162_v56 }
 0x579   :  { %v1174_v58 = vadd.f32 %v1172_v55, %v13416_v11 }
 0x57a   :  { %v1173_v59 = vadd.f32 %v1171_v57, %v13419_v14 }
 0x57b   :  { %v1178_v60 = vsel %vm16081_vm14, %v1174_v58, -inf }
 0x57c   :  { %1179 = vmax.xlane.f32.xlu0 %v1178_v60  ;;  %v1175_v61 = vsel %vm16081_vm14, %v1173_v59, -inf }
 0x57d   :  { %1176 = vmax.xlane.f32.xlu1 %v1175_v61 }
 0x57e   :  { %v10740_v62 = vpop.f32.mrb[14].mxu0 }
 0x57f   :  { %v1510_v2 = vpop.f32.mrb[15].mxu0  ;;  %v13514_v44 = vadd.f32 %v10740_v62, %v9901_v4 }
 0x580   :  { %v13516_v33 = vadd.f32 %v9901_v4, %v1510_v2 }
 0x582   :  { %v10743_v6 = vpop.f32.mrb[16].mxu0  ;;  %v13523_v32 = vpack.i.bf16 %v13514_v44, %v13516_v33 }
 0x583   :  { %v13495_v8 = vadd.f32 %v10743_v6, %v9901_v4  ;;  %v1520_v9 = vpop.f32.mrb[17].mxu0 }
 0x584   :  { %v13497_v12 = vadd.f32 %v9901_v4, %v1520_v9 }
 0x586   :  { %v10746_v13 = vpop.f32.mrb[18].mxu0 }
 0x587   :  { %v13499_v15 = vadd.f32 %v10746_v13, %v9901_v4  ;;  %v1530_v16 = vpop.f32.mrb[19].mxu0 }
 0x588   :  { %v13501_v17 = vadd.f32 %v9901_v4, %v1530_v16 }
 0x58a   :  { %v10749_v18 = vpop.f32.mrb[20].mxu0  ;;  %v13537_v2 = vpack.i.bf16 %v13499_v15, %v13501_v17 }
 0x58b   :  { %v13503_v19 = vadd.f32 %v10749_v18, %v9901_v4  ;;  %v1540_v20 = vpop.f32.mrb[21].mxu0 }
 0x58c   :  { %v13505_v21 = vadd.f32 %v9901_v4, %v1540_v20 }
 0x58e   :  { %v10752_v22 = vpop.f32.mrb[22].mxu0  ;;  %v13553_v9 = vpack.i.bf16 %v13503_v19, %v13505_v21 }
 0x58f   :  { %v13507_v40 = vadd.f32 %v10752_v22, %v9901_v4  ;;  %v1550_v23 = vpop.f32.mrb[23].mxu0 }
 0x590   :  { %v13509_v24 = vadd.f32 %v9901_v4, %v1550_v23  ;;  %v13541_v4 = vpack.i.bf16 %v13495_v8, %v13497_v12 }
 0x592   :  { %v13549_v6 = vpack.i.bf16 %v13507_v40, %v13509_v24 }
 0x609   :  { %v1180_v25 = vpop.xlane.xlu0 %1179 }
 0x60a   :  { %v1182_v26 = vsub.f32 %v1174_v58, %v1180_v25  ;;  %v1177_v39 = vpop.xlane.xlu1 %1176 }
 0x60b   :  { %v1181_v27 = vsub.f32 %v1173_v59, %v1177_v39 }
 0x60c   :  { %v1185_v42 = vmul.f32 1.442695, %v1182_v26 }
 0x60d   :  { %v1183_v28 = vmul.f32 1.442695, %v1181_v27 }
 0x60e   :  { %12226 = vpow2.f32 %v1185_v42 }
 0x60f   :  { %12228 = vpow2.f32 %v1183_v28 }
 0x618   :  { %v12227_v29 = vpop.eup %12226 }
 0x619   :  { %v12229_v30 = vpop.eup %12228  ;;  %v1190_v41 = vsel %vm16081_vm14, %v12227_v29, 0.0 }
 0x61a   :  { %1191 = vadd.xlane.f32.xlu1 %v1190_v41  ;;  %v1187_v31 = vsel %vm16081_vm14, %v12229_v30, 0.0 }
 0x61b   :  { %1188 = vadd.xlane.f32.xlu0 %v1187_v31 }
 0x62b   :  { %1286 = vrot.lane.b32.xlu1 %v867_v37, %s13232_s23  ;;  %v1317_v37 = vld [vmem:[#allocation2 + $0x68] sm:$0xff] }
 0x62f   :  { %1288 = vrot.lane.b32.xlu1 %v10690_v50, %s13232_s23 }
 0x631   :  { %11953 = vrot.lane.b32.xlu0 %v13346_v38, %s13245_s2  ;;  %v1316_v38 = vld [vmem:[#allocation2 + $0x60] sm:$0xff] }
 0x632   :  { %v11463_v48 = vpack.c.bf16 %v1316_v38, %v1315_v35 }
 0x633   :  { %11958 = vrot.lane.b32.xlu1 %v13523_v32, %s13235_s1 }
 0x635   :  { %1294 = vrot.lane.b32.xlu0 %v1071_v53, %s13246_s30  ;;  %v1318_v53 = vld [vmem:[#allocation2 + $0x70] sm:$0xff] }
 0x636   :  { %v11467_v57 = vpack.c.bf16 %v1318_v53, %v1317_v37 }
 0x639   :  { %1296 = vrot.lane.b32.xlu0 %v10704_v52, %s13246_s30 }
 0x6a7   :  { %v1192_v43 = vpop.xlane.xlu1 %1191 }
 0x6a8   :  { %12230 = vrcp.f32 %v1192_v43  ;;  %v1189_v63 = vpop.xlane.xlu0 %1188 }
 0x6a9   :  { %12232 = vrcp.f32 %v1189_v63 }
 0x6ab   :  { %v1287_v34 = vpop.permute.xlu1 %1286 }
 0x6ac   :  { %v11954_v36 = vpop.permute.xlu0 %11953  ;;  %v1308_v18 = vsel %vm474_vm10, %v13489_v49, %v1287_v34 }
 0x6ad   :  { %v11956_v47 = vunpack.i.h.bf16 %v11954_v36  ;;  %v11955_v45 = vunpack.i.l.bf16 %v11954_v36 }
 0x6af   :  { %v1289_v1 = vpop.permute.xlu1 %1288  ;;  %v11459_v46 = vpack.c.bf16 %v11956_v47, %v11955_v45 }
 0x6b0   :  { %v1295_v13 = vpop.permute.xlu0 %1294  ;;  %v1309_v22 = vsel %vm474_vm10, %v13487_v0, %v1289_v1 }
 0x6b1   :  { %11460 = vmatprep.subr.bf16.mxu1 %v11459_v46  ;;  %v1310_v23 = vsel %vm16081_vm14, %v1308_v18, %v1295_v13 }
 0x6b2   :  { %v12231_v50 = vpop.eup %12230  ;;  %11462 = vmatpush3.bf16.msra.mxu1 %v11459_v46 }
 0x6b3   :  { %v12233_v54 = vpop.eup %12232  ;;  %11464 = vmatprep.subr.bf16.mxu1 %v11463_v48  ;;  %v11959_v52 = vpop.permute.xlu1 %11958  ;;  %v1196_v56 = vmul.f32 %v12231_v50, %v12227_v29 }
 0x6b4   :  { %v1195_v55 = vmul.f32 %v12233_v54, %v12229_v30  ;;  %v11961_v58 = vunpack.i.h.bf16 %v11959_v52  ;;  %v11960_v59 = vunpack.i.l.bf16 %v11959_v52  ;;  %v1297_v16 = vpop.permute.xlu0 %1296 }
 0x6b5   :  { %v1311_v26 = vsel %vm16081_vm14, %v1309_v22, %v1297_v16 }
 0x6b6   :  { %10716 = vmatprep.mubr.msk.f32.mxu1 %vm16081_vm14, %v1195_v55  ;;  %v11479_v60 = vpack.c.bf16 %v11961_v58, %v11960_v59 }
 0x6b7   :  { %10717 = vmatmul.mubr.msk.f32.vlgmr.msra.gmra.mrb[14].mxu1 %vm16081_vm14, %v1196_v56 }
 0x6b8   :  { %11466 = vmatpush3.bf16.msra.mxu1 %v11463_v48 }
 0x6b9   :  { %11468 = vmatprep.subr.bf16.mxu1 %v11467_v57 }
 0x6bc   :  { %11470 = vmatpush3.bf16.msra.mxu1 %v11467_v57 }
 0x6bd   :  { %11481 = vmatprep.subr.msk.bf16.mxu1 %vm13377_vm11, %v11479_v60 }
 0x78a   :  { %v10718_v61 = vpop.f32.mrb[14].mxu1 }
 0x78b   :  { %1304 = vrot.lane.b32.xlu0 %v10718_v61, %s13247_s4  ;;  %v1275_v62 = vpop.f32.mrb[15].mxu1 }
 0x78c   :  { %1302 = vrot.lane.b32.xlu1 %v1275_v62, %s13247_s4 }
 0x78f   :  { %11968 = vrot.lane.b32.xlu0 %v13537_v2, %s13235_s1 }
 0x790   :  { %11963 = vrot.lane.b32.xlu1 %v13541_v4, %s13235_s1 }
 0x793   :  { %11978 = vrot.lane.b32.xlu0 %v13549_v6, %s13235_s1 }
 0x794   :  { %11973 = vrot.lane.b32.xlu1 %v13553_v9, %s13235_s1 }
 0x797   :  { %11988 = vrot.lane.b32.xlu0 %v13541_v4, %s13241_s27 }
 0x798   :  { %11983 = vrot.lane.b32.xlu1 %v13523_v32, %s13241_s27 }
 0x79c   :  { %11993 = vrot.lane.b32.xlu1 %v13537_v2, %s13241_s27 }
 0x7a0   :  { %11998 = vrot.lane.b32.xlu1 %v13553_v9, %s13241_s27 }
 0x7fd   :  { %v1305_v20 = vpop.permute.xlu0 %1304 }
 0x7fe   :  { %v1303_v25 = vpop.permute.xlu1 %1302  ;;  %v1314_v27 = vsel %vm16080_vm13, %v1311_v26, %v1305_v20 }
 0x7ff   :  { %v1313_v39 = vsel %vm16080_vm13, %v1310_v23, %v1303_v25 }
 0x800   :  { %10727 = vmatprep.mubr.msk.f32.mxu1 %vm386_vm6, %v1313_v39 }
 0x801   :  { %v11969_v42 = vpop.permute.xlu0 %11968  ;;  %10728 = vmatmul.mubr.msk.f32.vlgmr.msra.gmra.mrb[16].mxu1 %vm386_vm6, %v1314_v27 }
 0x802   :  { %11484 = vmatpush3.bf16.xpose.msk.msra.mxu1 %vm13377_vm11, %v11479_v60  ;;  %10773 = vmatprep.mubr.msk.f32.mxu1 %vm474_vm10, %v13516_v33  ;;  %v11964_v0 = vpop.permute.xlu1 %11963  ;;  %v11971_v29 = vunpack.i.h.bf16 %v11969_v42  ;;  %v11970_v30 = vunpack.i.l.bf16 %v11969_v42 }
 0x803   :  { %v11966_v49 = vunpack.i.h.bf16 %v11964_v0  ;;  %v11965_v28 = vunpack.i.l.bf16 %v11964_v0 }
 0x804   :  { %v11491_v63 = vpack.c.bf16 %v11971_v29, %v11970_v30 }
 0x805   :  { %v11485_v41 = vpack.c.bf16 %v11966_v49, %v11965_v28  ;;  %v11979_v31 = vpop.permute.xlu0 %11978 }
 0x806   :  { %v11974_v43 = vpop.permute.xlu1 %11973  ;;  %v11981_v59 = vunpack.i.h.bf16 %v11979_v31  ;;  %v11980_v60 = vunpack.i.l.bf16 %v11979_v31 }
 0x807   :  { %11487 = vmatprep.subr.msk.bf16.mxu1 %vm13377_vm11, %v11485_v41  ;;  %v11976_v1 = vunpack.i.h.bf16 %v11974_v43  ;;  %v11975_v46 = vunpack.i.l.bf16 %v11974_v43  ;;  %v41_v43 = vadd.s32 16, %v13404_v3 }
 0x808   :  { %v11503_v62 = vpack.c.bf16 %v11981_v59, %v11980_v60 }
 0x809   :  { %v11989_v34 = vpop.permute.xlu0 %11988  ;;  %v11497_v52 = vpack.c.bf16 %v11976_v1, %v11975_v46  ;;  %v46_v46 = vadd.s32 56, %v13404_v3 }
 0x80a   :  { %11490 = vmatpush3.bf16.xpose.msk.msra.mxu1 %vm13377_vm11, %v11485_v41  ;;  %v11984_v36 = vpop.permute.xlu1 %11983  ;;  %v11991_v35 = vunpack.i.h.bf16 %v11989_v34  ;;  %v11990_v38 = vunpack.i.l.bf16 %v11989_v34  ;;  %v49_v34 = vshra.s32 %v41_v43, 3 }
 0x80b   :  { %v11986_v47 = vunpack.i.h.bf16 %v11984_v36  ;;  %v11985_v45 = vunpack.i.l.bf16 %v11984_v36  ;;  %11493 = vmatprep.subr.msk.bf16.mxu1 %vm13377_vm11, %v11491_v63  ;;  %v43_v36 = vadd.s32 32, %v13404_v3 }
 0x80c   :  { %v11513_v54 = vpack.c.bf16 %v11991_v35, %v11990_v38  ;;  %v44_v38 = vadd.s32 40, %v13404_v3  ;;  %vm57_vm0 = vcmp.eq.s32.totalorder %v49_v34, %v13410_v7 }
 0x80d   :  { %v11509_v48 = vpack.c.bf16 %v11986_v47, %v11985_v45  ;;  %v51_v47 = vshra.s32 %v43_v36, 3  ;;  %v45_v45 = vadd.s32 48, %v13404_v3 }
 0x80e   :  { %v11994_v50 = vpop.permute.xlu1 %11993  ;;  %v52_v1 = vshra.s32 %v44_v38, 3 }
 0x80f   :  { %v11996_v37 = vunpack.i.h.bf16 %v11994_v50  ;;  %v11995_v53 = vunpack.i.l.bf16 %v11994_v50  ;;  %11510 = vmatprep.subr.bf16.mxu0 %v11509_v48  ;;  %vm59_vm3 = vcmp.eq.s32.totalorder %v51_v47, %v13410_v7 }
 0x810   :  { %11512 = vmatpush3.bf16.msra.mxu0 %v11509_v48  ;;  %vm60_vm4 = vcmp.eq.s32.totalorder %v52_v1, %v13410_v7 }
 0x811   :  { %11514 = vmatprep.subr.bf16.mxu0 %v11513_v54  ;;  %v11517_v58 = vpack.c.bf16 %v11996_v37, %v11995_v53  ;;  %v13642_v37 = vsel %vm57_vm0, 0.0, %v16077_v10  ;;  %vm4676_vm0 = vcmask 1042434  }
 0x812   :  { %11496 = vmatpush3.bf16.xpose.msk.msra.mxu1 %vm13377_vm11, %v11491_v63  ;;  %v11999_v55 = vpop.permute.xlu1 %11998  ;;  %v42_v63 = vadd.s32 24, %v13404_v3 }
 0x813   :  { %v12001_v56 = vunpack.i.h.bf16 %v11999_v55  ;;  %v12000_v57 = vunpack.i.l.bf16 %v11999_v55  ;;  %11499 = vmatprep.subr.msk.bf16.mxu1 %vm13377_vm11, %v11497_v52  ;;  %v54_v55 = vshra.s32 %v46_v46, 3 }
 0x814   :  { %11516 = vmatpush3.bf16.msra.mxu0 %v11513_v54  ;;  %v50_v35 = vshra.s32 %v42_v63, 3  ;;  %v53_v54 = vshra.s32 %v45_v45, 3 }
 0x815   :  { %11518 = vmatprep.subr.bf16.mxu0 %v11517_v58  ;;  %v11521_v61 = vpack.c.bf16 %v12001_v56, %v12000_v57  ;;  %v48_v56 = vadd.s32 72, %v13404_v3  ;;  %vm62_vm7 = vcmp.eq.s32.totalorder %v54_v55, %v13410_v7 }
 0x816   :  { %vm58_vm1 = vcmp.eq.s32.totalorder %v50_v35, %v13410_v7  ;;  %vm61_vm5 = vcmp.eq.s32.totalorder %v53_v54, %v13410_v7 }
 0x817   :  { %v13645_v53 = vsel %vm58_vm1, 0.0, %v16077_v10  ;;  %vm4679_vm1 = vcmask 1043459  }
 0x818   :  { %11520 = vmatpush3.bf16.msra.mxu0 %v11517_v58 }
 0x819   :  { %11522 = vmatprep.subr.bf16.mxu0 %v11521_v61 }
 0x81a   :  { %11502 = vmatpush3.bf16.xpose.msk.msra.mxu1 %vm13377_vm11, %v11497_v52  ;;  %v47_v52 = vadd.s32 64, %v13404_v3 }
 0x81b   :  { %11505 = vmatprep.subr.msk.bf16.mxu1 %vm13377_vm11, %v11503_v62 }
 0x81c   :  { %11524 = vmatpush3.bf16.msra.mxu0 %v11521_v61  ;;  %v13658_v61 = vsel %vm59_vm3, 0.0, %v16077_v10  ;;  %vm4682_vm3 = vcmask 1044484  }
 0x822   :  { %11508 = vmatpush3.bf16.xpose.msk.msra.mxu1 %vm13377_vm11, %v11503_v62  ;;  %v13661_v62 = vsel %vm60_vm4, 0.0, %v16077_v10  ;;  %vm4685_vm4 = vcmask 1045509  }
 0x829   :  { %10774 = vmatmul.mubr.msk.f32.vlgmr.msra.gmra.mrb[18].mxu1 %vm474_vm10, %v13514_v44 }
 0x82a   :  { %10776 = vmatprep.mubr.msk.f32.mxu1 %vm474_vm10, %v13497_v12 }
 0x82d   :  { %10777 = vmatmul.mubr.msk.f32.gmra.mrb[20].mxu1 %vm474_vm10, %v13495_v8 }
 0x82e   :  { %10779 = vmatprep.mubr.msk.f32.mxu1 %vm474_vm10, %v13501_v17 }
 0x831   :  { %10780 = vmatmul.mubr.msk.f32.gmra.mrb[22].mxu1 %vm474_vm10, %v13499_v15 }
 0x832   :  { %10782 = vmatprep.mubr.msk.f32.mxu1 %vm474_vm10, %v13505_v21 }
 0x835   :  { %10783 = vmatmul.mubr.msk.f32.gmra.mrb[24].mxu1 %vm474_vm10, %v13503_v19 }
 0x836   :  { %10785 = vmatprep.mubr.msk.f32.mxu1 %vm474_vm10, %v13509_v24 }
 0x839   :  { %10786 = vmatmul.mubr.msk.f32.gmra.mrb[26].mxu1 %vm474_vm10, %v13507_v40 }
 0x8d4   :  { %v13615_v13 = vpop.f32.mrb[16].mxu1 }
 0x8d5   :  { %v13617_v16 = vpop.f32.mrb[17].mxu1 }
 0x8fc   :  { %v10775_v18 = vpop.f32.mrb[18].mxu1 }
 0x8fd   :  { %v1745_v20 = vmul.f32 0.35355338, %v10775_v18  ;;  %v1695_v22 = vpop.f32.mrb[19].mxu1  ;;  %v55_v18 = vshra.s32 %v47_v52, 3 }
 0x8fe   :  { %v1744_v23 = vmul.f32 0.35355338, %v1695_v22 }
 0x8ff   :  { %v13620_v25 = vadd.f32 %v1745_v20, %v13416_v11  ;;  %v56_v20 = vshra.s32 %v48_v56, 3  ;;  %vm63_vm8 = vcmp.eq.s32.totalorder %v55_v18, %v13410_v7 }
 0x900   :  { %v10778_v26 = vpop.f32.mrb[20].mxu1  ;;  %v13623_v39 = vadd.f32 %v1744_v23, %v13419_v14  ;;  %v13692_v35 = vsel %vm63_vm8, 0.0, %v16077_v10 }
 0x901   :  { %v1705_v27 = vpop.f32.mrb[21].mxu1  ;;  %v1768_v42 = vsel %vm1764_vm15, %v13620_v25, -inf  ;;  %v1747_v50 = vmul.f32 0.35355338, %v10778_v26  ;;  %vm64_vm9 = vcmp.eq.s32.totalorder %v56_v20, %v13410_v7 }
 0x902   :  { %1769 = vmax.xlane.f32.xlu0 %v1768_v42  ;;  %v1765_v0 = vsel %vm1764_vm15, %v13623_v39, -inf  ;;  %v1746_v48 = vmul.f32 0.35355338, %v1705_v27  ;;  %v13695_v7 = vsel %vm64_vm9, 0.0, %v16077_v10 }
 0x903   :  { %1766 = vmax.xlane.f32.xlu1 %v1765_v0  ;;  %v13655_v60 = vadd.f32 %v1747_v50, %v13645_v53 }
 0x904   :  { %v10781_v49 = vpop.f32.mrb[22].mxu1  ;;  %v13652_v58 = vadd.f32 %v1746_v48, %v13642_v37 }
 0x905   :  { %v1715_v28 = vpop.f32.mrb[23].mxu1  ;;  %v1749_v59 = vmul.f32 0.35355338, %v10781_v49  ;;  %v1774_v42 = vsel %vm1764_vm15, %v13655_v60, -inf  ;;  %v13676_v49 = vsel %vm61_vm5, 0.0, %v16077_v10  ;;  %vm4688_vm5 = vcmask 1046534  }
 0x906   :  { %v1748_v57 = vmul.f32 0.35355338, %v1715_v28  ;;  %v1771_v23 = vsel %vm1764_vm15, %v13652_v58, -inf  ;;  %v13679_v28 = vsel %vm62_vm7, 0.0, %v16077_v10  ;;  %vm4691_vm7 = vcmask 1047559  }
 0x907   :  { %v13673_v0 = vadd.f32 %v1749_v59, %v13661_v62 }
 0x908   :  { %v10784_v29 = vpop.f32.mrb[24].mxu1  ;;  %v13668_v26 = vadd.f32 %v1748_v57, %v13658_v61 }
 0x909   :  { %v1725_v30 = vpop.f32.mrb[25].mxu1  ;;  %v1751_v27 = vmul.f32 0.35355338, %v10784_v29  ;;  %v1780_v34 = vsel %vm1764_vm15, %v13673_v0, -inf }
 0x90a   :  { %v1750_v22 = vmul.f32 0.35355338, %v1725_v30  ;;  %v1777_v29 = vsel %vm1764_vm15, %v13668_v26, -inf }
 0x90b   :  { %v1761_v36 = vadd.f32 %v1751_v27, %v13679_v28 }
 0x90c   :  { %v10787_v41 = vpop.f32.mrb[26].mxu1  ;;  %v13686_v43 = vadd.f32 %v1750_v22, %v13676_v49 }
 0x90d   :  { %v1735_v31 = vpop.f32.mrb[27].mxu1  ;;  %v1753_v63 = vmul.f32 0.35355338, %v10787_v41  ;;  %v1786_v41 = vsel %vm1764_vm15, %v1761_v36, -inf }
 0x90e   :  { %v1752_v30 = vmul.f32 0.35355338, %v1735_v31  ;;  %v1783_v31 = vsel %vm1764_vm15, %v13686_v43, -inf }
 0x90f   :  { %v13704_v47 = vadd.f32 %v1753_v63, %v13695_v7 }
 0x910   :  { %v13700_v38 = vadd.f32 %v1752_v30, %v13692_v35 }
 0x911   :  { %v1792_v1 = vsel %vm1764_vm15, %v13704_v47, -inf }
 0x912   :  { %v1789_v45 = vsel %vm1764_vm15, %v13700_v38, -inf }
 0x914   :  { %12003 = vrot.lane.b32.xlu1 %v13549_v6, %s13241_s27 }
 0x918   :  { %12008 = vrot.lane.b32.xlu0 %v13523_v32, %s13237_s24 }
 0x937   :  { %1772 = vmax.xlane.f32.xlu0 %v1771_v23 }
 0x938   :  { %1775 = vmax.xlane.f32.xlu1 %v1774_v42 }
 0x93b   :  { %1778 = vmax.xlane.f32.xlu0 %v1777_v29 }
 0x93c   :  { %1781 = vmax.xlane.f32.xlu1 %v1780_v34 }
 0x93f   :  { %1784 = vmax.xlane.f32.xlu0 %v1783_v31 }
 0x940   :  { %1787 = vmax.xlane.f32.xlu1 %v1786_v41 }
 0x943   :  { %1790 = vmax.xlane.f32.xlu0 %v1789_v45 }
 0x944   :  { %1793 = vmax.xlane.f32.xlu1 %v1792_v1 }
 0x955   :  { %12013 = vrot.lane.b32.xlu1 %v13541_v4, %s13237_s24 }
 0x959   :  { %12018 = vrot.lane.b32.xlu0 %v13537_v2, %s13237_s24 }
 0x98f   :  { %v1770_v46 = vpop.xlane.xlu0 %1769 }
 0x990   :  { %v1796_v48 = vsub.f32 %v13620_v25, %v1770_v46  ;;  %v1767_v50 = vpop.xlane.xlu1 %1766 }
 0x991   :  { %v1795_v54 = vsub.f32 %v13623_v39, %v1767_v50 }
 0x992   :  { %v1807_v52 = vmul.f32 1.442695, %v1796_v48 }
 0x993   :  { %v1805_v55 = vmul.f32 1.442695, %v1795_v54  ;;  %v12009_v56 = vpop.permute.xlu0 %12008 }
 0x994   :  { %12234 = vpow2.f32 %v1807_v52  ;;  %v12004_v57 = vpop.permute.xlu1 %12003  ;;  %v12011_v59 = vunpack.i.h.bf16 %v12009_v56  ;;  %v12010_v18 = vunpack.i.l.bf16 %v12009_v56 }
 0x995   :  { %v12006_v20 = vunpack.i.h.bf16 %v12004_v57  ;;  %v12005_v22 = vunpack.i.l.bf16 %v12004_v57  ;;  %12236 = vpow2.f32 %v1805_v55 }
 0x996   :  { %v13716_v27 = vpack.c.bf16 %v12011_v59, %v12010_v18 }
 0x997   :  { %v11525_v23 = vpack.c.bf16 %v12006_v20, %v12005_v22 }
 0x999   :  { %11526 = vmatprep.subr.bf16.mxu0 %v11525_v23 }
 0x99a   :  { %11528 = vmatpush3.bf16.msra.mxu0 %v11525_v23 }
 0x99b   :  { %11531 = vmatprep.subr.msk.bf16.mxu0 %vm13377_vm11, %v13716_v27 }
 0x99e   :  { %v13721_v25 = vpop.eup %12234 }
 0x99f   :  { %v1828_v39 = vsel %vm1764_vm15, %v13721_v25, 0.0  ;;  %v13725_v42 = vpop.eup %12236 }
 0x9a0   :  { %1829 = vadd.xlane.f32.xlu0 %v1828_v39  ;;  %v1825_v30 = vsel %vm1764_vm15, %v13725_v42, 0.0 }
 0x9a4   :  { %1826 = vadd.xlane.f32.xlu0 %v1825_v30 }
 0x9c4   :  { %v1773_v29 = vpop.xlane.xlu0 %1772 }
 0x9c5   :  { %v1797_v63 = vsub.f32 %v13652_v58, %v1773_v29  ;;  %v1776_v34 = vpop.xlane.xlu1 %1775 }
 0x9c6   :  { %v1798_v31 = vsub.f32 %v13655_v60, %v1776_v34 }
 0x9c7   :  { %v1809_v41 = vmul.f32 1.442695, %v1797_v63 }
 0x9c8   :  { %v1811_v45 = vmul.f32 1.442695, %v1798_v31  ;;  %v1779_v1 = vpop.xlane.xlu0 %1778 }
 0x9c9   :  { %12238 = vpow2.f32 %v1809_v41  ;;  %v1799_v46 = vsub.f32 %v13668_v26, %v1779_v1  ;;  %v1782_v48 = vpop.xlane.xlu1 %1781 }
 0x9ca   :  { %12240 = vpow2.f32 %v1811_v45  ;;  %v1800_v50 = vsub.f32 %v13673_v0, %v1782_v48 }
 0x9cb   :  { %v1813_v54 = vmul.f32 1.442695, %v1799_v46 }
 0x9cc   :  { %v1815_v52 = vmul.f32 1.442695, %v1800_v50  ;;  %v1785_v55 = vpop.xlane.xlu0 %1784 }
 0x9cd   :  { %v1788_v56 = vpop.xlane.xlu1 %1787  ;;  %v1801_v58 = vsub.f32 %v13686_v43, %v1785_v55 }
 0x9ce   :  { %12242 = vpow2.f32 %v1815_v52  ;;  %v1802_v57 = vsub.f32 %v1761_v36, %v1788_v56 }
 0x9cf   :  { %12244 = vpow2.f32 %v1813_v54  ;;  %v1817_v26 = vmul.f32 1.442695, %v1801_v58 }
 0x9d0   :  { %v1819_v60 = vmul.f32 1.442695, %v1802_v57  ;;  %v1791_v1 = vpop.xlane.xlu0 %1790 }
 0x9d1   :  { %v1794_v59 = vpop.xlane.xlu1 %1793  ;;  %v1803_v46 = vsub.f32 %v13700_v38, %v1791_v1 }
 0x9d2   :  { %12246 = vpow2.f32 %v1819_v60  ;;  %v1804_v22 = vsub.f32 %v13704_v47, %v1794_v59 }
 0x9d3   :  { %v13734_v18 = vpop.eup %12238  ;;  %12248 = vpow2.f32 %v1817_v26  ;;  %v1821_v48 = vmul.f32 1.442695, %v1803_v46 }
 0x9d4   :  { %v13736_v20 = vpop.eup %12240  ;;  %v1831_v0 = vsel %vm1764_vm15, %v13734_v18, 0.0  ;;  %v1823_v43 = vmul.f32 1.442695, %v1804_v22  ;;  %v12019_v38 = vpop.permute.xlu0 %12018 }
 0x9d5   :  { %1832 = vadd.xlane.f32.xlu0 %v1831_v0  ;;  %v1834_v36 = vsel %vm1764_vm15, %v13736_v20, 0.0  ;;  %v12014_v56 = vpop.permute.xlu1 %12013 }
 0x9d6   :  { %1835 = vadd.xlane.f32.xlu1 %v1834_v36  ;;  %12250 = vpow2.f32 %v1823_v43  ;;  %v12016_v60 = vunpack.i.h.bf16 %v12014_v56  ;;  %v12015_v59 = vunpack.i.l.bf16 %v12014_v56  ;;  %v12021_v36 = vunpack.i.h.bf16 %v12019_v38 }
 0x9d7   :  { %12252 = vpow2.f32 %v1821_v48  ;;  %v12020_v43 = vunpack.i.l.bf16 %v12019_v38 }
 0x9d8   :  { %v13743_v23 = vpop.eup %12242  ;;  %v11535_v0 = vpack.c.bf16 %v12016_v60, %v12015_v59 }
 0x9d9   :  { %v1840_v39 = vsel %vm1764_vm15, %v13743_v23, 0.0  ;;  %v13747_v30 = vpop.eup %12244 }
 0x9da   :  { %1841 = vadd.xlane.f32.xlu1 %v1840_v39  ;;  %v1837_v47 = vsel %vm1764_vm15, %v13747_v30, 0.0  ;;  %v11541_v39 = vpack.c.bf16 %v12021_v36, %v12020_v43 }
 0x9dc   :  { %v13751_v29 = vpop.eup %12246 }
 0x9dd   :  { %v1846_v63 = vsel %vm1764_vm15, %v13751_v29, 0.0  ;;  %v13755_v34 = vpop.eup %12248 }
 0x9de   :  { %1838 = vadd.xlane.f32.xlu1 %v1837_v47  ;;  %v1843_v31 = vsel %vm1764_vm15, %v13755_v34, 0.0 }
 0x9e0   :  { %v13759_v41 = vpop.eup %12250 }
 0x9e1   :  { %v1852_v45 = vsel %vm1764_vm15, %v13759_v41, 0.0  ;;  %v13772_v50 = vpop.eup %12252 }
 0x9e2   :  { %1847 = vadd.xlane.f32.xlu1 %v1846_v63  ;;  %v1849_v54 = vsel %vm1764_vm15, %v13772_v50, 0.0 }
 0x9e6   :  { %1844 = vadd.xlane.f32.xlu1 %v1843_v31 }
 0x9ea   :  { %1853 = vadd.xlane.f32.xlu1 %v1852_v45 }
 0x9eb   :  { %12028 = vrot.lane.b32.xlu0 %v13549_v6, %s13237_s24 }
 0x9fb   :  { %12023 = vrot.lane.b32.xlu1 %v13553_v9, %s13237_s24 }
 0x9ff   :  { %2058 = vrot.lane.b32.xlu1 %v13501_v17, %s13234_s21 }
 0xa03   :  { %2062 = vrot.lane.b32.xlu1 %v13505_v21, %s13234_s21 }
 0xa07   :  { %2066 = vrot.lane.b32.xlu1 %v13509_v24, %s13234_s21 }
 0xa0a   :  { %1850 = vadd.xlane.f32.xlu0 %v1849_v54 }
 0xa0b   :  { %12033 = vrot.lane.b32.xlu1 %v13523_v32, %s13240_s26 }
 0xa0f   :  { %12043 = vrot.lane.b32.xlu1 %v13537_v2, %s13240_s26 }
 0xa13   :  { %12048 = vrot.lane.b32.xlu1 %v13553_v9, %s13240_s26 }
 0xa20   :  { %2050 = vrot.lane.b32.xlu0 %v13516_v33, %s13234_s21 }
 0xa24   :  { %2052 = vrot.lane.b32.xlu0 %v13514_v44, %s13234_s21 }
 0xa28   :  { %2054 = vrot.lane.b32.xlu0 %v13497_v12, %s13234_s21 }
 0xa2c   :  { %2056 = vrot.lane.b32.xlu0 %v13495_v8, %s13234_s21 }
 0xa2d   :  { %v1830_v52 = vpop.xlane.xlu0 %1829 }
 0xa2e   :  { %12254 = vrcp.f32 %v1830_v52 }
 0xa30   :  { %2060 = vrot.lane.b32.xlu0 %v13499_v15, %s13234_s21 }
 0xa31   :  { %v1827_v55 = vpop.xlane.xlu0 %1826 }
 0xa32   :  { %12256 = vrcp.f32 %v1827_v55 }
 0xa34   :  { %2064 = vrot.lane.b32.xlu0 %v13503_v19, %s13234_s21 }
 0xa38   :  { %2068 = vrot.lane.b32.xlu0 %v13507_v40, %s13234_s21  ;;  %v12255_v57 = vpop.eup %12254 }
 0xa39   :  { %v1866_v22 = vmul.f32 %v12255_v57, %v13721_v25 }
 0xa3c   :  { %v12257_v58 = vpop.eup %12256  ;;  %12038 = vrot.lane.b32.xlu0 %v13541_v4, %s13240_s26 }
 0xa3d   :  { %v1865_v26 = vmul.f32 %v12257_v58, %v13725_v42 }
 0xa3f   :  { %10808 = vmatprep.mubr.msk.f32.mxu0 %vm1764_vm15, %v1865_v26 }
 0xa40   :  { %10809 = vmatmul.mubr.msk.f32.vlgmr.msra.gmra.mrb[24].mxu0 %vm1764_vm15, %v1866_v22 }
 0xa41   :  { %11534 = vmatpush3.bf16.xpose.msk.msra.mxu0 %vm13377_vm11, %v13716_v27 }
 0xa42   :  { %11537 = vmatprep.subr.msk.bf16.mxu0 %vm13377_vm11, %v11535_v0 }
 0xa49   :  { %11540 = vmatpush3.bf16.xpose.msk.msra.mxu0 %vm13377_vm11, %v11535_v0 }
 0xa4a   :  { %11543 = vmatprep.subr.msk.bf16.mxu0 %vm13377_vm11, %v11541_v39 }
 0xa51   :  { %11546 = vmatpush3.bf16.xpose.msk.msra.mxu0 %vm13377_vm11, %v11541_v39 }
 0xa62   :  { %v1833_v25 = vpop.xlane.xlu0 %1832 }
 0xa63   :  { %12258 = vrcp.f32 %v1833_v25  ;;  %v1836_v42 = vpop.xlane.xlu1 %1835 }
 0xa64   :  { %12260 = vrcp.f32 %v1836_v42 }
 0xa66   :  { %v12029_v57 = vpop.permute.xlu0 %12028 }
 0xa67   :  { %v1842_v27 = vpop.xlane.xlu1 %1841  ;;  %v12030_v58 = vunpack.i.l.bf16 %v12029_v57 }
 0xa68   :  { %12262 = vrcp.f32 %v1842_v27 }
 0xa6b   :  { %v1839_v47 = vpop.xlane.xlu1 %1838 }
 0xa6c   :  { %12264 = vrcp.f32 %v1839_v47 }
 0xa6d   :  { %v12259_v63 = vpop.eup %12258 }
 0xa6e   :  { %v12261_v31 = vpop.eup %12260  ;;  %v1867_v45 = vmul.f32 %v12259_v63, %v13734_v18 }
 0xa6f   :  { %v1848_v1 = vpop.xlane.xlu1 %1847  ;;  %v1868_v46 = vmul.f32 %v12261_v31, %v13736_v20  ;;  %v12031_v20 = vunpack.i.h.bf16 %v12029_v57 }
 0xa70   :  { %10811 = vmatprep.mubr.msk.f32.mxu0 %vm1764_vm15, %v1867_v45  ;;  %12266 = vrcp.f32 %v1848_v1 }
 0xa71   :  { %10812 = vmatmul.mubr.msk.f32.gmra.mrb[26].mxu0 %vm1764_vm15, %v1868_v46  ;;  %v11553_v39 = vpack.c.bf16 %v12031_v20, %v12030_v58 }
 0xa72   :  { %v12263_v54 = vpop.eup %12262 }
 0xa73   :  { %v1845_v48 = vpop.xlane.xlu1 %1844  ;;  %v1870_v56 = vmul.f32 %v12263_v54, %v13743_v23 }
 0xa74   :  { %12268 = vrcp.f32 %v1845_v48 }
 0xa76   :  { %v12265_v38 = vpop.eup %12264 }
 0xa77   :  { %v1854_v52 = vpop.xlane.xlu1 %1853  ;;  %v1869_v55 = vmul.f32 %v12265_v38, %v13747_v30 }
 0xa78   :  { %12270 = vrcp.f32 %v1854_v52 }
 0xa79   :  { %10814 = vmatprep.mubr.msk.f32.mxu0 %vm1764_vm15, %v1869_v55 }
 0xa7a   :  { %10815 = vmatmul.mubr.msk.f32.gmra.mrb[28].mxu0 %vm1764_vm15, %v1870_v56  ;;  %v12267_v26 = vpop.eup %12266 }
 0xa7b   :  { %v12024_v18 = vpop.permute.xlu1 %12023  ;;  %v1872_v23 = vmul.f32 %v12267_v26, %v13751_v29 }
 0xa7c   :  { %v12026_v60 = vunpack.i.h.bf16 %v12024_v18  ;;  %v12025_v59 = vunpack.i.l.bf16 %v12024_v18 }
 0xa7e   :  { %v12269_v22 = vpop.eup %12268  ;;  %v11547_v0 = vpack.c.bf16 %v12026_v60, %v12025_v59 }
 0xa7f   :  { %v2059_v36 = vpop.permute.xlu1 %2058  ;;  %v1871_v43 = vmul.f32 %v12269_v22, %v13755_v34 }
 0xa80   :  { %11549 = vmatprep.subr.msk.bf16.mxu0 %vm13377_vm11, %v11547_v0 }
 0xa81   :  { %10817 = vmatprep.mubr.msk.f32.mxu0 %vm1764_vm15, %v1871_v43  ;;  %11552 = vmatpush3.bf16.xpose.msk.msra.mxu0 %vm13377_vm11, %v11547_v0 }
 0xa82   :  { %10818 = vmatmul.mubr.msk.f32.gmra.mrb[30].mxu0 %vm1764_vm15, %v1872_v23  ;;  %11555 = vmatprep.subr.msk.bf16.mxu0 %vm13377_vm11, %v11553_v39  ;;  %v12271_v45 = vpop.eup %12270 }
 0xa83   :  { %v2063_v30 = vpop.permute.xlu1 %2062  ;;  %v1874_v54 = vmul.f32 %v12271_v45, %v13759_v41 }
 0xa87   :  { %v2067_v25 = vpop.permute.xlu1 %2066 }
 0xa89   :  { %11558 = vmatpush3.bf16.xpose.msk.msra.mxu0 %vm13377_vm11, %v11553_v39 }
 0xa8b   :  { %v12034_v34 = vpop.permute.xlu1 %12033 }
 0xa8c   :  { %v12036_v42 = vunpack.i.h.bf16 %v12034_v34  ;;  %v12035_v27 = vunpack.i.l.bf16 %v12034_v34 }
 0xa8e   :  { %v11559_v47 = vpack.c.bf16 %v12036_v42, %v12035_v27 }
 0xa8f   :  { %v12044_v41 = vpop.permute.xlu1 %12043 }
 0xa90   :  { %11560 = vmatprep.subr.bf16.mxu1 %v11559_v47  ;;  %v12046_v57 = vunpack.i.h.bf16 %v12044_v41  ;;  %v12045_v18 = vunpack.i.l.bf16 %v12044_v41 }
 0xa91   :  { %11562 = vmatpush3.bf16.msra.mxu1 %v11559_v47 }
 0xa92   :  { %v11567_v0 = vpack.c.bf16 %v12046_v57, %v12045_v18 }
 0xa93   :  { %v12049_v60 = vpop.permute.xlu1 %12048 }
 0xa94   :  { %v12051_v26 = vunpack.i.h.bf16 %v12049_v60  ;;  %v12050_v22 = vunpack.i.l.bf16 %v12049_v60 }
 0xa97   :  { %v1851_v29 = vpop.xlane.xlu0 %1850 }
 0xa98   :  { %12272 = vrcp.f32 %v1851_v29 }
 0xa9b   :  { %v2051_v63 = vpop.permute.xlu0 %2050 }
 0xa9f   :  { %v2053_v31 = vpop.permute.xlu0 %2052 }
 0xaa2   :  { %v12273_v1 = vpop.eup %12272 }
 0xaa3   :  { %v2055_v46 = vpop.permute.xlu0 %2054  ;;  %v1873_v48 = vmul.f32 %v12273_v1, %v13772_v50 }
 0xaa5   :  { %10820 = vmatprep.mubr.msk.f32.mxu0 %vm1764_vm15, %v1873_v48 }
 0xaa6   :  { %10821 = vmatmul.mubr.msk.f32.gmra.mrb[32].mxu0 %vm1764_vm15, %v1874_v54 }
 0xaa7   :  { %10843 = vmatprep.mubr.msk.f32.mxu0 %vm474_vm10, %v2051_v63  ;;  %v2057_v38 = vpop.permute.xlu0 %2056 }
 0xaaa   :  { %10844 = vmatmul.mubr.msk.f32.vlgmr.msra.gmra.mrb[34].mxu0 %vm474_vm10, %v2053_v31 }
 0xaab   :  { %v2061_v52 = vpop.permute.xlu0 %2060  ;;  %10846 = vmatprep.mubr.msk.f32.mxu0 %vm474_vm10, %v2055_v46 }
 0xaae   :  { %10847 = vmatmul.mubr.msk.f32.gmra.mrb[36].mxu0 %vm474_vm10, %v2057_v38 }
 0xaaf   :  { %v2065_v55 = vpop.permute.xlu0 %2064  ;;  %10849 = vmatprep.mubr.msk.f32.mxu0 %vm474_vm10, %v2059_v36  ;;  %v11571_v36 = vpack.c.bf16 %v12051_v26, %v12050_v22 }
 0xab2   :  { %10850 = vmatmul.mubr.msk.f32.gmra.mrb[38].mxu0 %vm474_vm10, %v2061_v52 }
 0xab3   :  { %v2069_v50 = vpop.permute.xlu0 %2068  ;;  %10852 = vmatprep.mubr.msk.f32.mxu0 %vm474_vm10, %v2063_v30 }
 0xab6   :  { %10853 = vmatmul.mubr.msk.f32.gmra.mrb[40].mxu0 %vm474_vm10, %v2065_v55 }
 0xab7   :  { %v12039_v56 = vpop.permute.xlu0 %12038  ;;  %10855 = vmatprep.mubr.msk.f32.mxu0 %vm474_vm10, %v2067_v25 }
 0xab8   :  { %v12041_v20 = vunpack.i.h.bf16 %v12039_v56  ;;  %v12040_v58 = vunpack.i.l.bf16 %v12039_v56 }
 0xaba   :  { %10856 = vmatmul.mubr.msk.f32.gmra.mrb[42].mxu0 %vm474_vm10, %v2069_v50  ;;  %v11563_v59 = vpack.c.bf16 %v12041_v20, %v12040_v58 }
 0xabc   :  { %11564 = vmatprep.subr.bf16.mxu1 %v11563_v59 }
 0xabd   :  { %11566 = vmatpush3.bf16.msra.mxu1 %v11563_v59 }
 0xabe   :  { %11568 = vmatprep.subr.bf16.mxu1 %v11567_v0 }
 0xac1   :  { %11570 = vmatpush3.bf16.msra.mxu1 %v11567_v0 }
 0xac2   :  { %11572 = vmatprep.subr.bf16.mxu1 %v11571_v36 }
 0xac5   :  { %11574 = vmatpush3.bf16.msra.mxu1 %v11571_v36 }
 0xb13   :  { %v13849_v43 = vpop.f32.mrb[24].mxu0 }
 0xb14   :  { %16086 = vst [vmem:[#allocation10_spill] sm:$0xff] %v13849_v43  ;;  %v13851_v39 = vpop.f32.mrb[25].mxu0 }
 0xb15   :  { %16087 = vst [vmem:[#allocation11_spill] sm:$0xff] %v13851_v39 }
 0xb44   :  { %v13853_v23 = vpop.f32.mrb[26].mxu0 }
 0xb45   :  { %16088 = vst [vmem:[#allocation12_spill] sm:$0xff] %v13853_v23  ;;  %v13855_v30 = vpop.f32.mrb[27].mxu0 }
 0xb46   :  { %16089 = vst [vmem:[#allocation13_spill] sm:$0xff] %v13855_v30 }
 0xb4d   :  { %v13857_v25 = vpop.f32.mrb[28].mxu0 }
 0xb4e   :  { %16090 = vst [vmem:[#allocation14_spill] sm:$0xff] %v13857_v25  ;;  %v13859_v34 = vpop.f32.mrb[29].mxu0 }
 0xb4f   :  { %16091 = vst [vmem:[#allocation15_spill] sm:$0xff] %v13859_v34 }
 0xb55   :  { %v13861_v42 = vpop.f32.mrb[30].mxu0 }
 0xb56   :  { %16092 = vst [vmem:[#allocation16_spill] sm:$0xff] %v13861_v42  ;;  %v13863_v27 = vpop.f32.mrb[31].mxu0 }
 0xb57   :  { %16093 = vst [vmem:[#allocation17_spill] sm:$0xff] %v13863_v27 }
 0xb79   :  { %v13865_v47 = vpop.f32.mrb[32].mxu0 }
 0xb7a   :  { %16094 = vst [vmem:[#allocation18_spill] sm:$0xff] %v13865_v47  ;;  %v13867_v29 = vpop.f32.mrb[33].mxu0 }
 0xb7b   :  { %16095 = vst [vmem:[#allocation19_spill] sm:$0xff] %v13867_v29 }
 0xb7d   :  { %v10845_v63 = vpop.f32.mrb[34].mxu0 }
 0xb7e   :  { %v2246_v31 = vmul.f32 0.35355338, %v10845_v63  ;;  %v2196_v45 = vpop.f32.mrb[35].mxu0 }
 0xb7f   :  { %v2245_v1 = vmul.f32 0.35355338, %v2196_v45 }
 0xb80   :  { %v2256_v46 = vadd.f32 %v2246_v31, %v13416_v11 }
 0xb81   :  { %v10848_v48 = vpop.f32.mrb[36].mxu0  ;;  %v2255_v54 = vadd.f32 %v2245_v1, %v13419_v14 }
 0xb82   :  { %v2206_v38 = vpop.f32.mrb[37].mxu0  ;;  %v2268_v52 = vsel %vm1764_vm15, %v2256_v46, -inf  ;;  %v2248_v60 = vmul.f32 0.35355338, %v10848_v48 }
 0xb83   :  { %2269 = vmax.xlane.f32.xlu0 %v2268_v52  ;;  %v2265_v55 = vsel %vm1764_vm15, %v2255_v54, -inf  ;;  %v2247_v58 = vmul.f32 0.35355338, %v2206_v38 }
 0xb84   :  { %2266 = vmax.xlane.f32.xlu1 %v2265_v55  ;;  %v2258_v0 = vadd.f32 %v2248_v60, %v13645_v53 }
 0xb85   :  { %v10851_v41 = vpop.f32.mrb[38].mxu0  ;;  %v2257_v26 = vadd.f32 %v2247_v58, %v13642_v37 }
 0xb86   :  { %v2216_v50 = vpop.f32.mrb[39].mxu0  ;;  %v2250_v22 = vmul.f32 0.35355338, %v10851_v41  ;;  %v2274_v1 = vsel %vm1764_vm15, %v2258_v0, -inf }
 0xb87   :  { %v2249_v59 = vmul.f32 0.35355338, %v2216_v50  ;;  %v2271_v63 = vsel %vm1764_vm15, %v2257_v26, -inf }
 0xb88   :  { %v2260_v52 = vadd.f32 %v2250_v22, %v13661_v62 }
 0xb89   :  { %v10854_v56 = vpop.f32.mrb[40].mxu0  ;;  %v13881_v31 = vadd.f32 %v2249_v59, %v13658_v61 }
 0xb8a   :  { %v2226_v57 = vpop.f32.mrb[41].mxu0  ;;  %v2252_v45 = vmul.f32 0.35355338, %v10854_v56  ;;  %v2280_v50 = vsel %vm1764_vm15, %v2260_v52, -inf }
 0xb8b   :  { %v2251_v36 = vmul.f32 0.35355338, %v2226_v57  ;;  %v2277_v38 = vsel %vm1764_vm15, %v13881_v31, -inf }
 0xb8c   :  { %v2262_v57 = vadd.f32 %v2252_v45, %v13679_v28 }
 0xb8d   :  { %v10857_v18 = vpop.f32.mrb[42].mxu0  ;;  %v13888_v55 = vadd.f32 %v2251_v36, %v13676_v49 }
 0xb8e   :  { %v2236_v20 = vpop.f32.mrb[43].mxu0  ;;  %v2254_v41 = vmul.f32 0.35355338, %v10857_v18 }
 0xb8f   :  { %v2253_v48 = vmul.f32 0.35355338, %v2236_v20  ;;  %v2283_v56 = vsel %vm1764_vm15, %v13888_v55, -inf  ;;  %v2286_v20 = vsel %vm1764_vm15, %v2262_v57, -inf }
 0xb90   :  { %v13899_v60 = vadd.f32 %v2254_v41, %v13695_v7 }
 0xb91   :  { %v13895_v58 = vadd.f32 %v2253_v48, %v13692_v35 }
 0xb92   :  { %v2292_v59 = vsel %vm1764_vm15, %v13899_v60, -inf }
 0xb93   :  { %v2289_v18 = vsel %vm1764_vm15, %v13895_v58, -inf }
 0xb95   :  { %12053 = vrot.lane.b32.xlu1 %v13549_v6, %s13240_s26 }
 0xb99   :  { %12058 = vrot.lane.b32.xlu0 %v13523_v32, %s13236_s22 }
 0xbb8   :  { %2272 = vmax.xlane.f32.xlu0 %v2271_v63 }
 0xbb9   :  { %2275 = vmax.xlane.f32.xlu1 %v2274_v1 }
 0xbbc   :  { %2278 = vmax.xlane.f32.xlu0 %v2277_v38 }
 0xbbd   :  { %2281 = vmax.xlane.f32.xlu1 %v2280_v50 }
 0xbc0   :  { %2284 = vmax.xlane.f32.xlu0 %v2283_v56 }
 0xbc1   :  { %2287 = vmax.xlane.f32.xlu1 %v2286_v20 }
 0xbc4   :  { %2290 = vmax.xlane.f32.xlu0 %v2289_v18 }
 0xbc5   :  { %2293 = vmax.xlane.f32.xlu1 %v2292_v59 }
 0xbd6   :  { %12063 = vrot.lane.b32.xlu1 %v13541_v4, %s13236_s22 }
 0xbda   :  { %12068 = vrot.lane.b32.xlu0 %v13537_v2, %s13236_s22 }
 0xc10   :  { %v2270_v22 = vpop.xlane.xlu0 %2269 }
 0xc11   :  { %v2296_v36 = vsub.f32 %v2256_v46, %v2270_v22  ;;  %v2267_v63 = vpop.xlane.xlu1 %2266 }
 0xc12   :  { %v2295_v45 = vsub.f32 %v2255_v54, %v2267_v63 }
 0xc13   :  { %v2307_v1 = vmul.f32 1.442695, %v2296_v36 }
 0xc14   :  { %v2305_v48 = vmul.f32 1.442695, %v2295_v45  ;;  %v12059_v38 = vpop.permute.xlu0 %12058 }
 0xc15   :  { %12274 = vpow2.f32 %v2307_v1  ;;  %v12054_v41 = vpop.permute.xlu1 %12053  ;;  %v12061_v50 = vunpack.i.h.bf16 %v12059_v38  ;;  %v12060_v56 = vunpack.i.l.bf16 %v12059_v38 }
 0xc16   :  { %v12056_v20 = vunpack.i.h.bf16 %v12054_v41  ;;  %v12055_v18 = vunpack.i.l.bf16 %v12054_v41  ;;  %12276 = vpow2.f32 %v2305_v48 }
 0xc17   :  { %v13909_v10 = vpack.c.bf16 %v12061_v50, %v12060_v56 }
 0xc18   :  { %v11575_v59 = vpack.c.bf16 %v12056_v20, %v12055_v18 }
 0xc1a   :  { %11576 = vmatprep.subr.bf16.mxu1 %v11575_v59 }
 0xc1b   :  { %11578 = vmatpush3.bf16.msra.mxu1 %v11575_v59 }
 0xc1c   :  { %11581 = vmatprep.subr.msk.bf16.mxu1 %vm13377_vm11, %v13909_v10 }
 0xc1f   :  { %v13914_v46 = vpop.eup %12274 }
 0xc20   :  { %v2328_v54 = vsel %vm1764_vm15, %v13914_v46, 0.0  ;;  %v13918_v22 = vpop.eup %12276 }
 0xc21   :  { %2329 = vadd.xlane.f32.xlu0 %v2328_v54  ;;  %v2325_v36 = vsel %vm1764_vm15, %v13918_v22, 0.0 }
 0xc25   :  { %2326 = vadd.xlane.f32.xlu0 %v2325_v36 }
 0xc45   :  { %v2273_v63 = vpop.xlane.xlu0 %2272 }
 0xc46   :  { %v2297_v45 = vsub.f32 %v2257_v26, %v2273_v63  ;;  %v2276_v1 = vpop.xlane.xlu1 %2275 }
 0xc47   :  { %v2298_v48 = vsub.f32 %v2258_v0, %v2276_v1 }
 0xc48   :  { %v2309_v38 = vmul.f32 1.442695, %v2297_v45 }
 0xc49   :  { %v2311_v41 = vmul.f32 1.442695, %v2298_v48  ;;  %v2279_v50 = vpop.xlane.xlu0 %2278 }
 0xc4a   :  { %12278 = vpow2.f32 %v2309_v38  ;;  %v2299_v56 = vsub.f32 %v13881_v31, %v2279_v50  ;;  %v2282_v20 = vpop.xlane.xlu1 %2281 }
 0xc4b   :  { %12280 = vpow2.f32 %v2311_v41  ;;  %v2300_v18 = vsub.f32 %v2260_v52, %v2282_v20 }
 0xc4c   :  { %v2313_v59 = vmul.f32 1.442695, %v2299_v56 }
 0xc4d   :  { %v2315_v5 = vmul.f32 1.442695, %v2300_v18  ;;  %v2285_v54 = vpop.xlane.xlu0 %2284 }
 0xc4e   :  { %v2288_v3 = vpop.xlane.xlu1 %2287  ;;  %v2301_v26 = vsub.f32 %v13888_v55, %v2285_v54 }
 0xc4f   :  { %12282 = vpow2.f32 %v2315_v5  ;;  %v2302_v47 = vsub.f32 %v2262_v57, %v2288_v3 }
 0xc50   :  { %12284 = vpow2.f32 %v2313_v59  ;;  %v2317_v1 = vmul.f32 1.442695, %v2301_v26 }
 0xc51   :  { %v2319_v36 = vmul.f32 1.442695, %v2302_v47  ;;  %v2291_v18 = vpop.xlane.xlu0 %2290 }
 0xc52   :  { %v2294_v0 = vpop.xlane.xlu1 %2293  ;;  %v2303_v59 = vsub.f32 %v13895_v58, %v2291_v18 }
 0xc53   :  { %12286 = vpow2.f32 %v2319_v36  ;;  %v2304_v31 = vsub.f32 %v13899_v60, %v2294_v0 }
 0xc54   :  { %v13924_v63 = vpop.eup %12278  ;;  %12288 = vpow2.f32 %v2317_v1  ;;  %v2321_v54 = vmul.f32 1.442695, %v2303_v59 }
 0xc55   :  { %v13926_v45 = vpop.eup %12280  ;;  %v2331_v52 = vsel %vm1764_vm15, %v13924_v63, 0.0  ;;  %v2323_v47 = vmul.f32 1.442695, %v2304_v31  ;;  %v12069_v58 = vpop.permute.xlu0 %12068 }
 0xc56   :  { %2332 = vadd.xlane.f32.xlu0 %v2331_v52  ;;  %v2334_v3 = vsel %vm1764_vm15, %v13926_v45, 0.0  ;;  %v12064_v31 = vpop.permute.xlu1 %12063  ;;  %v12070_v18 = vunpack.i.l.bf16 %v12069_v58 }
 0xc57   :  { %2335 = vadd.xlane.f32.xlu1 %v2334_v3  ;;  %12290 = vpow2.f32 %v2323_v47  ;;  %v12066_v47 = vunpack.i.h.bf16 %v12064_v31 }
 0xc58   :  { %12292 = vpow2.f32 %v2321_v54 }
 0xc59   :  { %v13933_v5 = vpop.eup %12282 }
 0xc5a   :  { %v2340_v55 = vsel %vm1764_vm15, %v13933_v5, 0.0  ;;  %v13937_v57 = vpop.eup %12284 }
 0xc5b   :  { %2341 = vadd.xlane.f32.xlu1 %v2340_v55  ;;  %v2337_v60 = vsel %vm1764_vm15, %v13937_v57, 0.0  ;;  %v12065_v55 = vunpack.i.l.bf16 %v12064_v31 }
 0xc5d   :  { %v13941_v48 = vpop.eup %12286 }
 0xc5e   :  { %v2346_v38 = vsel %vm1764_vm15, %v13941_v48, 0.0  ;;  %v13945_v41 = vpop.eup %12288 }
 0xc5f   :  { %2338 = vadd.xlane.f32.xlu1 %v2337_v60  ;;  %v2343_v50 = vsel %vm1764_vm15, %v13945_v41, 0.0 }
 0xc61   :  { %v13949_v56 = vpop.eup %12290 }
 0xc62   :  { %v2352_v20 = vsel %vm1764_vm15, %v13949_v56, 0.0  ;;  %v13962_v26 = vpop.eup %12292 }
 0xc63   :  { %2347 = vadd.xlane.f32.xlu1 %v2346_v38  ;;  %v2349_v36 = vsel %vm1764_vm15, %v13962_v26, 0.0 }
 0xc67   :  { %2344 = vadd.xlane.f32.xlu1 %v2343_v50  ;;  %v11585_v50 = vpack.c.bf16 %v12066_v47, %v12065_v55 }
 0xc6b   :  { %2353 = vadd.xlane.f32.xlu1 %v2352_v20  ;;  %v12071_v20 = vunpack.i.h.bf16 %v12069_v58 }
 0xc6c   :  { %12078 = vrot.lane.b32.xlu0 %v13549_v6, %s13236_s22 }
 0xc6d   :  { %v11591_v59 = vpack.c.bf16 %v12071_v20, %v12070_v18 }
 0xc7c   :  { %12073 = vrot.lane.b32.xlu1 %v13553_v9, %s13236_s22 }
 0xc80   :  { %2558 = vrot.lane.b32.xlu1 %v13501_v17, %s13238_s25 }
 0xc84   :  { %2562 = vrot.lane.b32.xlu1 %v13505_v21, %s13238_s25 }
 0xc88   :  { %2566 = vrot.lane.b32.xlu1 %v13509_v24, %s13238_s25 }
 0xc8b   :  { %2350 = vadd.xlane.f32.xlu0 %v2349_v36 }
 0xc8c   :  { %12083 = vrot.lane.b32.xlu1 %v13523_v32, %s13242_s28 }
 0xc90   :  { %12093 = vrot.lane.b32.xlu1 %v13537_v2, %s13242_s28 }
 0xc94   :  { %12098 = vrot.lane.b32.xlu1 %v13553_v9, %s13242_s28 }
 0xca1   :  { %2550 = vrot.lane.b32.xlu0 %v13516_v33, %s13238_s25 }
 0xca5   :  { %2552 = vrot.lane.b32.xlu0 %v13514_v44, %s13238_s25 }
 0xca9   :  { %2554 = vrot.lane.b32.xlu0 %v13497_v12, %s13238_s25 }
 0xcad   :  { %2556 = vrot.lane.b32.xlu0 %v13495_v8, %s13238_s25 }
 0xcae   :  { %v2330_v0 = vpop.xlane.xlu0 %2329 }
 0xcaf   :  { %12294 = vrcp.f32 %v2330_v0 }
 0xcb1   :  { %2560 = vrot.lane.b32.xlu0 %v13499_v15, %s13238_s25 }
 0xcb2   :  { %v2327_v1 = vpop.xlane.xlu0 %2326 }
 0xcb3   :  { %12296 = vrcp.f32 %v2327_v1 }
 0xcb5   :  { %2564 = vrot.lane.b32.xlu0 %v13503_v19, %s13238_s25 }
 0xcb9   :  { %2568 = vrot.lane.b32.xlu0 %v13507_v40, %s13238_s25  ;;  %v12295_v52 = vpop.eup %12294 }
 0xcba   :  { %v2366_v38 = vmul.f32 %v12295_v52, %v13914_v46 }
 0xcbd   :  { %v12297_v3 = vpop.eup %12296  ;;  %12088 = vrot.lane.b32.xlu0 %v13541_v4, %s13242_s28 }
 0xcbe   :  { %v2365_v60 = vmul.f32 %v12297_v3, %v13918_v22 }
 0xcc0   :  { %10878 = vmatprep.mubr.msk.f32.mxu1 %vm1764_vm15, %v2365_v60 }
 0xcc1   :  { %10879 = vmatmul.mubr.msk.f32.vlgmr.msra.gmra.mrb[28].mxu1 %vm1764_vm15, %v2366_v38 }
 0xcc2   :  { %11584 = vmatpush3.bf16.xpose.msk.msra.mxu1 %vm13377_vm11, %v13909_v10 }
 0xcc3   :  { %11587 = vmatprep.subr.msk.bf16.mxu1 %vm13377_vm11, %v11585_v50 }
 0xcca   :  { %11590 = vmatpush3.bf16.xpose.msk.msra.mxu1 %vm13377_vm11, %v11585_v50 }
 0xccb   :  { %11593 = vmatprep.subr.msk.bf16.mxu1 %vm13377_vm11, %v11591_v59 }
 0xcd2   :  { %11596 = vmatpush3.bf16.xpose.msk.msra.mxu1 %vm13377_vm11, %v11591_v59 }
 0xce3   :  { %v2333_v46 = vpop.xlane.xlu0 %2332 }
 0xce4   :  { %12298 = vrcp.f32 %v2333_v46  ;;  %v2336_v22 = vpop.xlane.xlu1 %2335 }
 0xce5   :  { %12300 = vrcp.f32 %v2336_v22 }
 0xce7   :  { %v12079_v50 = vpop.permute.xlu0 %12078 }
 0xce8   :  { %v2342_v10 = vpop.xlane.xlu1 %2341  ;;  %v12080_v20 = vunpack.i.l.bf16 %v12079_v50 }
 0xce9   :  { %12302 = vrcp.f32 %v2342_v10 }
 0xcec   :  { %v2339_v54 = vpop.xlane.xlu1 %2338 }
 0xced   :  { %12304 = vrcp.f32 %v2339_v54 }
 0xcee   :  { %v12299_v36 = vpop.eup %12298 }
 0xcef   :  { %v12301_v58 = vpop.eup %12300  ;;  %v2367_v0 = vmul.f32 %v12299_v36, %v13924_v63 }
 0xcf0   :  { %v2348_v1 = vpop.xlane.xlu1 %2347  ;;  %v2368_v31 = vmul.f32 %v12301_v58, %v13926_v45  ;;  %v12081_v45 = vunpack.i.h.bf16 %v12079_v50 }
 0xcf1   :  { %10881 = vmatprep.mubr.msk.f32.mxu1 %vm1764_vm15, %v2367_v0  ;;  %12306 = vrcp.f32 %v2348_v1 }
 0xcf2   :  { %10882 = vmatmul.mubr.msk.f32.gmra.mrb[30].mxu1 %vm1764_vm15, %v2368_v31  ;;  %v11603_v58 = vpack.c.bf16 %v12081_v45, %v12080_v20 }
 0xcf3   :  { %v12303_v3 = vpop.eup %12302 }
 0xcf4   :  { %v2345_v52 = vpop.xlane.xlu1 %2344  ;;  %v2370_v38 = vmul.f32 %v12303_v3, %v13933_v5 }
 0xcf5   :  { %12308 = vrcp.f32 %v2345_v52 }
 0xcf7   :  { %v12305_v47 = vpop.eup %12304 }
 0xcf8   :  { %v2354_v55 = vpop.xlane.xlu1 %2353  ;;  %v2369_v60 = vmul.f32 %v12305_v47, %v13937_v57 }
 0xcf9   :  { %12310 = vrcp.f32 %v2354_v55 }
 0xcfa   :  { %10884 = vmatprep.mubr.msk.f32.mxu1 %vm1764_vm15, %v2369_v60 }
 0xcfb   :  { %10885 = vmatmul.mubr.msk.f32.gmra.mrb[32].mxu1 %vm1764_vm15, %v2370_v38  ;;  %v12307_v46 = vpop.eup %12306 }
 0xcfc   :  { %v12074_v63 = vpop.permute.xlu1 %12073  ;;  %v2372_v5 = vmul.f32 %v12307_v46, %v13941_v48 }
 0xcfd   :  { %v12076_v18 = vunpack.i.h.bf16 %v12074_v63  ;;  %v12075_v59 = vunpack.i.l.bf16 %v12074_v63 }
 0xcff   :  { %v12309_v22 = vpop.eup %12308  ;;  %v11597_v10 = vpack.c.bf16 %v12076_v18, %v12075_v59 }
 0xd00   :  { %v2559_v54 = vpop.permute.xlu1 %2558  ;;  %v2371_v36 = vmul.f32 %v12309_v22, %v13945_v41 }
 0xd01   :  { %11599 = vmatprep.subr.msk.bf16.mxu1 %vm13377_vm11, %v11597_v10 }
 0xd02   :  { %10887 = vmatprep.mubr.msk.f32.mxu1 %vm1764_vm15, %v2371_v36  ;;  %11602 = vmatpush3.bf16.xpose.msk.msra.mxu1 %vm13377_vm11, %v11597_v10 }
 0xd03   :  { %10888 = vmatmul.mubr.msk.f32.gmra.mrb[34].mxu1 %vm1764_vm15, %v2372_v5  ;;  %11605 = vmatprep.subr.msk.bf16.mxu1 %vm13377_vm11, %v11603_v58  ;;  %v12311_v60 = vpop.eup %12310 }
 0xd04   :  { %v2563_v57 = vpop.permute.xlu1 %2562  ;;  %v2374_v45 = vmul.f32 %v12311_v60, %v13949_v56 }
 0xd08   :  { %v2567_v0 = vpop.permute.xlu1 %2566 }
 0xd0a   :  { %11608 = vmatpush3.bf16.xpose.msk.msra.mxu1 %vm13377_vm11, %v11603_v58 }
 0xd0c   :  { %v12084_v41 = vpop.permute.xlu1 %12083 }
 0xd0d   :  { %v12086_v1 = vunpack.i.h.bf16 %v12084_v41  ;;  %v12085_v31 = vunpack.i.l.bf16 %v12084_v41 }
 0xd0f   :  { %v11609_v52 = vpack.c.bf16 %v12086_v1, %v12085_v31 }
 0xd10   :  { %v12094_v56 = vpop.permute.xlu1 %12093 }
 0xd11   :  { %11610 = vmatprep.subr.bf16.mxu0 %v11609_v52  ;;  %v12096_v46 = vunpack.i.h.bf16 %v12094_v56  ;;  %v12095_v22 = vunpack.i.l.bf16 %v12094_v56 }
 0xd12   :  { %11612 = vmatpush3.bf16.msra.mxu0 %v11609_v52 }
 0xd13   :  { %v11617_v1 = vpack.c.bf16 %v12096_v46, %v12095_v22 }
 0xd14   :  { %v12099_v58 = vpop.permute.xlu1 %12098 }
 0xd15   :  { %v12100_v41 = vunpack.i.l.bf16 %v12099_v58 }
 0xd18   :  { %v2351_v48 = vpop.xlane.xlu0 %2350 }
 0xd19   :  { %12312 = vrcp.f32 %v2351_v48 }
 0xd1c   :  { %v2551_v3 = vpop.permute.xlu0 %2550 }
 0xd20   :  { %v2553_v47 = vpop.permute.xlu0 %2552 }
 0xd23   :  { %v12313_v38 = vpop.eup %12312 }
 0xd24   :  { %v2555_v50 = vpop.permute.xlu0 %2554  ;;  %v2373_v63 = vmul.f32 %v12313_v38, %v13962_v26 }
 0xd26   :  { %10890 = vmatprep.mubr.msk.f32.mxu1 %vm1764_vm15, %v2373_v63 }
 0xd27   :  { %10891 = vmatmul.mubr.msk.f32.gmra.mrb[36].mxu1 %vm1764_vm15, %v2374_v45 }
 0xd28   :  { %10913 = vmatprep.mubr.msk.f32.mxu1 %vm474_vm10, %v2551_v3  ;;  %v2557_v20 = vpop.permute.xlu0 %2556 }
 0xd2b   :  { %10914 = vmatmul.mubr.msk.f32.vlgmr.msra.gmra.mrb[38].mxu1 %vm474_vm10, %v2553_v47 }
 0xd2c   :  { %v2561_v55 = vpop.permute.xlu0 %2560  ;;  %10916 = vmatprep.mubr.msk.f32.mxu1 %vm474_vm10, %v2555_v50 }
 0xd2f   :  { %10917 = vmatmul.mubr.msk.f32.gmra.mrb[40].mxu1 %vm474_vm10, %v2557_v20 }
 0xd30   :  { %v2565_v18 = vpop.permute.xlu0 %2564  ;;  %10919 = vmatprep.mubr.msk.f32.mxu1 %vm474_vm10, %v2559_v54  ;;  %v12101_v54 = vunpack.i.h.bf16 %v12099_v58 }
 0xd33   :  { %10920 = vmatmul.mubr.msk.f32.gmra.mrb[42].mxu1 %vm474_vm10, %v2561_v55 }
 0xd34   :  { %v2569_v26 = vpop.permute.xlu0 %2568  ;;  %10922 = vmatprep.mubr.msk.f32.mxu1 %vm474_vm10, %v2563_v57  ;;  %v11621_v57 = vpack.c.bf16 %v12101_v54, %v12100_v41 }
 0xd37   :  { %10923 = vmatmul.mubr.msk.f32.gmra.mrb[44].mxu1 %vm474_vm10, %v2565_v18 }
 0xd38   :  { %v12089_v59 = vpop.permute.xlu0 %12088  ;;  %10925 = vmatprep.mubr.msk.f32.mxu1 %vm474_vm10, %v2567_v0 }
 0xd39   :  { %v12091_v10 = vunpack.i.h.bf16 %v12089_v59  ;;  %v12090_v36 = vunpack.i.l.bf16 %v12089_v59 }
 0xd3b   :  { %10926 = vmatmul.mubr.msk.f32.gmra.mrb[46].mxu1 %vm474_vm10, %v2569_v26  ;;  %v11613_v5 = vpack.c.bf16 %v12091_v10, %v12090_v36 }
 0xd3d   :  { %11614 = vmatprep.subr.bf16.mxu0 %v11613_v5 }
 0xd3e   :  { %11616 = vmatpush3.bf16.msra.mxu0 %v11613_v5 }
 0xd3f   :  { %11618 = vmatprep.subr.bf16.mxu0 %v11617_v1 }
 0xd42   :  { %11620 = vmatpush3.bf16.msra.mxu0 %v11617_v1 }
 0xd43   :  { %11622 = vmatprep.subr.bf16.mxu0 %v11621_v57 }
 0xd46   :  { %11624 = vmatpush3.bf16.msra.mxu0 %v11621_v57 }
 0xd94   :  { %v14039_v31 = vpop.f32.mrb[28].mxu1 }
 0xd95   :  { %v14041_v0 = vpop.f32.mrb[29].mxu1 }
 0xdc5   :  { %v14043_v52 = vpop.f32.mrb[30].mxu1 }
 0xdc6   :  { %v14045_v48 = vpop.f32.mrb[31].mxu1 }
 0xdce   :  { %v14047_v3 = vpop.f32.mrb[32].mxu1 }
 0xdcf   :  { %v14049_v47 = vpop.f32.mrb[33].mxu1 }
 0xdd6   :  { %v14051_v60 = vpop.f32.mrb[34].mxu1 }
 0xdd7   :  { %v14053_v38 = vpop.f32.mrb[35].mxu1 }
 0xdfa   :  { %v14055_v50 = vpop.f32.mrb[36].mxu1 }
 0xdfb   :  { %v14057_v63 = vpop.f32.mrb[37].mxu1 }
 0xdfe   :  { %v10915_v45 = vpop.f32.mrb[38].mxu1 }
 0xdff   :  { %v2746_v20 = vmul.f32 0.35355338, %v10915_v45  ;;  %v2696_v55 = vpop.f32.mrb[39].mxu1 }
 0xe00   :  { %v2745_v18 = vmul.f32 0.35355338, %v2696_v55 }
 0xe01   :  { %v2756_v56 = vadd.f32 %v2746_v20, %v13416_v11 }
 0xe02   :  { %v2755_v26 = vadd.f32 %v2745_v18, %v13419_v14  ;;  %v10918_v59 = vpop.f32.mrb[40].mxu1 }
 0xe03   :  { %v2706_v46 = vpop.f32.mrb[41].mxu1  ;;  %v2768_v22 = vsel %vm1764_vm15, %v2756_v56, -inf  ;;  %v2748_v45 = vmul.f32 0.35355338, %v10918_v59 }
 0xe04   :  { %2769 = vmax.xlane.f32.xlu0 %v2768_v22  ;;  %v2765_v10 = vsel %vm1764_vm15, %v2755_v26, -inf  ;;  %v2747_v57 = vmul.f32 0.35355338, %v2706_v46 }
 0xe05   :  { %2766 = vmax.xlane.f32.xlu1 %v2765_v10  ;;  %v2758_v18 = vadd.f32 %v2748_v45, %v13645_v53 }
 0xe06   :  { %v10921_v36 = vpop.f32.mrb[42].mxu1  ;;  %v2757_v20 = vadd.f32 %v2747_v57, %v13642_v37 }
 0xe07   :  { %v2716_v58 = vpop.f32.mrb[43].mxu1  ;;  %v2750_v22 = vmul.f32 0.35355338, %v10921_v36  ;;  %v2774_v46 = vsel %vm1764_vm15, %v2758_v18, -inf }
 0xe08   :  { %v2749_v55 = vmul.f32 0.35355338, %v2716_v58  ;;  %v2771_v42 = vsel %vm1764_vm15, %v2757_v20, -inf }
 0xe09   :  { %v14074_v27 = vadd.f32 %v2750_v22, %v13661_v62 }
 0xe0a   :  { %v10924_v5 = vpop.f32.mrb[44].mxu1  ;;  %v14070_v10 = vadd.f32 %v2749_v55, %v13658_v61 }
 0xe0b   :  { %v2726_v54 = vpop.f32.mrb[45].mxu1  ;;  %v2752_v25 = vmul.f32 0.35355338, %v10924_v5  ;;  %v2780_v45 = vsel %vm1764_vm15, %v14074_v27, -inf }
 0xe0c   :  { %v2751_v29 = vmul.f32 0.35355338, %v2726_v54  ;;  %v2777_v36 = vsel %vm1764_vm15, %v14070_v10, -inf }
 0xe0d   :  { %v2762_v57 = vadd.f32 %v2752_v25, %v13679_v28 }
 0xe0e   :  { %v10927_v41 = vpop.f32.mrb[46].mxu1  ;;  %v14078_v59 = vadd.f32 %v2751_v29, %v13676_v49 }
 0xe0f   :  { %v2736_v1 = vpop.f32.mrb[47].mxu1  ;;  %v2754_v54 = vmul.f32 0.35355338, %v10927_v41 }
 0xe10   :  { %v2753_v58 = vmul.f32 0.35355338, %v2736_v1  ;;  %v2783_v5 = vsel %vm1764_vm15, %v14078_v59, -inf  ;;  %v2786_v1 = vsel %vm1764_vm15, %v2762_v57, -inf }
 0xe11   :  { %v14091_v29 = vadd.f32 %v2754_v54, %v13695_v7 }
 0xe13   :  { %v2792_v41 = vsel %vm1764_vm15, %v14091_v29, -inf }
 0xe16   :  { %12103 = vrot.lane.b32.xlu1 %v13549_v6, %s13242_s28 }
 0xe1a   :  { %12108 = vrot.lane.b32.xlu0 %v13523_v32, %s13243_s29 }
 0xe39   :  { %2772 = vmax.xlane.f32.xlu0 %v2771_v42  ;;  %v14086_v42 = vadd.f32 %v2753_v58, %v13692_v35 }
 0xe3a   :  { %2775 = vmax.xlane.f32.xlu1 %v2774_v46 }
 0xe3b   :  { %v2789_v25 = vsel %vm1764_vm15, %v14086_v42, -inf }
 0xe3d   :  { %2778 = vmax.xlane.f32.xlu0 %v2777_v36 }
 0xe3e   :  { %2781 = vmax.xlane.f32.xlu1 %v2780_v45 }
 0xe41   :  { %2784 = vmax.xlane.f32.xlu0 %v2783_v5 }
 0xe42   :  { %2787 = vmax.xlane.f32.xlu1 %v2786_v1 }
 0xe45   :  { %2790 = vmax.xlane.f32.xlu0 %v2789_v25 }
 0xe46   :  { %2793 = vmax.xlane.f32.xlu1 %v2792_v41 }
 0xe57   :  { %12113 = vrot.lane.b32.xlu1 %v13541_v4, %s13243_s29 }
 0xe5b   :  { %12118 = vrot.lane.b32.xlu0 %v13537_v2, %s13243_s29 }
 0xe91   :  { %v2770_v55 = vpop.xlane.xlu0 %2769 }
 0xe92   :  { %v2796_v22 = vsub.f32 %v2756_v56, %v2770_v55  ;;  %v2767_v46 = vpop.xlane.xlu1 %2766 }
 0xe93   :  { %v2795_v58 = vsub.f32 %v2755_v26, %v2767_v46 }
 0xe94   :  { %v2807_v36 = vmul.f32 1.442695, %v2796_v22 }
 0xe95   :  { %v2805_v54 = vmul.f32 1.442695, %v2795_v58  ;;  %v12109_v45 = vpop.permute.xlu0 %12108 }
 0xe96   :  { %12314 = vpow2.f32 %v2807_v36  ;;  %v12104_v5 = vpop.permute.xlu1 %12103  ;;  %v12111_v1 = vunpack.i.h.bf16 %v12109_v45  ;;  %v12110_v25 = vunpack.i.l.bf16 %v12109_v45 }
 0xe97   :  { %v12106_v34 = vunpack.i.h.bf16 %v12104_v5  ;;  %v12105_v23 = vunpack.i.l.bf16 %v12104_v5  ;;  %12316 = vpow2.f32 %v2805_v54 }
 0xe98   :  { %v14102_v30 = vpack.c.bf16 %v12111_v1, %v12110_v25 }
 0xe99   :  { %v11625_v41 = vpack.c.bf16 %v12106_v34, %v12105_v23 }
 0xe9b   :  { %11626 = vmatprep.subr.bf16.mxu0 %v11625_v41 }
 0xe9c   :  { %11628 = vmatpush3.bf16.msra.mxu0 %v11625_v41 }
 0xe9d   :  { %11631 = vmatprep.subr.msk.bf16.mxu0 %vm13377_vm11, %v14102_v30 }
 0xea0   :  { %v14107_v56 = vpop.eup %12314 }
 0xea1   :  { %v2828_v26 = vsel %vm1764_vm15, %v14107_v56, 0.0  ;;  %v14111_v55 = vpop.eup %12316 }
 0xea2   :  { %2829 = vadd.xlane.f32.xlu0 %v2828_v26  ;;  %v2825_v22 = vsel %vm1764_vm15, %v14111_v55, 0.0 }
 0xea6   :  { %2826 = vadd.xlane.f32.xlu0 %v2825_v22 }
 0xec6   :  { %v2773_v23 = vpop.xlane.xlu0 %2772 }
 0xec7   :  { %v2797_v34 = vsub.f32 %v2757_v20, %v2773_v23  ;;  %v2776_v46 = vpop.xlane.xlu1 %2775 }
 0xec8   :  { %v2798_v58 = vsub.f32 %v2758_v18, %v2776_v46 }
 0xec9   :  { %v2809_v36 = vmul.f32 1.442695, %v2797_v34 }
 0xeca   :  { %v2811_v54 = vmul.f32 1.442695, %v2798_v58  ;;  %v2779_v45 = vpop.xlane.xlu0 %2778 }
 0xecb   :  { %12318 = vpow2.f32 %v2809_v36  ;;  %v2799_v5 = vsub.f32 %v14070_v10, %v2779_v45  ;;  %v2782_v1 = vpop.xlane.xlu1 %2781 }
 0xecc   :  { %12320 = vpow2.f32 %v2811_v54  ;;  %v2800_v25 = vsub.f32 %v14074_v27, %v2782_v1 }
 0xecd   :  { %v2813_v41 = vmul.f32 1.442695, %v2799_v5 }
 0xece   :  { %v2815_v26 = vmul.f32 1.442695, %v2800_v25  ;;  %v2785_v43 = vpop.xlane.xlu0 %2784 }
 0xecf   :  { %v2788_v39 = vpop.xlane.xlu1 %2787  ;;  %v2801_v20 = vsub.f32 %v14078_v59, %v2785_v43 }
 0xed0   :  { %12322 = vpow2.f32 %v2815_v26  ;;  %v2802_v22 = vsub.f32 %v2762_v57, %v2788_v39 }
 0xed1   :  { %12324 = vpow2.f32 %v2813_v41  ;;  %v2817_v10 = vmul.f32 1.442695, %v2801_v20 }
 0xed2   :  { %v2819_v18 = vmul.f32 1.442695, %v2802_v22  ;;  %v2791_v26 = vpop.xlane.xlu0 %2790 }
 0xed3   :  { %v2794_v23 = vpop.xlane.xlu1 %2793  ;;  %v2803_v22 = vsub.f32 %v14086_v42, %v2791_v26 }
 0xed4   :  { %12326 = vpow2.f32 %v2819_v18  ;;  %v2804_v58 = vsub.f32 %v14091_v29, %v2794_v23 }
 0xed5   :  { %v14118_v34 = vpop.eup %12318  ;;  %12328 = vpow2.f32 %v2817_v10  ;;  %v2821_v20 = vmul.f32 1.442695, %v2803_v22 }
 0xed6   :  { %v14120_v46 = vpop.eup %12320  ;;  %v2831_v27 = vsel %vm1764_vm15, %v14118_v34, 0.0  ;;  %v2823_v43 = vmul.f32 1.442695, %v2804_v58 }
 0xed7   :  { %2832 = vadd.xlane.f32.xlu0 %v2831_v27  ;;  %v2834_v39 = vsel %vm1764_vm15, %v14120_v46, 0.0 }
 0xed8   :  { %2835 = vadd.xlane.f32.xlu1 %v2834_v39  ;;  %12330 = vpow2.f32 %v2823_v43 }
 0xed9   :  { %12332 = vpow2.f32 %v2821_v20 }
 0xeda   :  { %v14127_v57 = vpop.eup %12322 }
 0xedb   :  { %v2840_v59 = vsel %vm1764_vm15, %v14127_v57, 0.0  ;;  %v14131_v36 = vpop.eup %12324 }
 0xedc   :  { %2841 = vadd.xlane.f32.xlu1 %v2840_v59  ;;  %v2837_v29 = vsel %vm1764_vm15, %v14131_v36, 0.0 }
 0xede   :  { %v14135_v54 = vpop.eup %12326 }
 0xedf   :  { %v2846_v45 = vsel %vm1764_vm15, %v14135_v54, 0.0  ;;  %v14139_v5 = vpop.eup %12328 }
 0xee0   :  { %2838 = vadd.xlane.f32.xlu1 %v2837_v29  ;;  %v2843_v1 = vsel %vm1764_vm15, %v14139_v5, 0.0 }
 0xee2   :  { %v14143_v25 = vpop.eup %12330 }
 0xee3   :  { %v2852_v41 = vsel %vm1764_vm15, %v14143_v25, 0.0  ;;  %v14160_v18 = vpop.eup %12332 }
 0xee4   :  { %2847 = vadd.xlane.f32.xlu1 %v2846_v45 }
 0xee8   :  { %2844 = vadd.xlane.f32.xlu1 %v2843_v1 }
 0xeec   :  { %2853 = vadd.xlane.f32.xlu1 %v2852_v41 }
 0xeed   :  { %12128 = vrot.lane.b32.xlu0 %v13549_v6, %s13243_s29 }
 0xef1   :  { %3050 = vrot.lane.b32.xlu0 %v13516_v33, %s13244_s0  ;;  %v2849_v33 = vsel %vm1764_vm15, %v14160_v18, 0.0 }
 0xefd   :  { %12123 = vrot.lane.b32.xlu1 %v13553_v9, %s13243_s29 }
 0xf01   :  { %3058 = vrot.lane.b32.xlu1 %v13501_v17, %s13244_s0  ;;  %v12119_v17 = vpop.permute.xlu0 %12118 }
 0xf05   :  { %3062 = vrot.lane.b32.xlu1 %v13505_v21, %s13244_s0 }
 0xf09   :  { %3066 = vrot.lane.b32.xlu1 %v13509_v24, %s13244_s0 }
 0xf10   :  { %2850 = vadd.xlane.f32.xlu0 %v2849_v33 }
 0xf26   :  { %3052 = vrot.lane.b32.xlu0 %v13514_v44, %s13244_s0  ;;  %v12114_v44 = vpop.permute.xlu1 %12113 }
 0xf27   :  { %v12116_v23 = vunpack.i.h.bf16 %v12114_v44  ;;  %v12115_v10 = vunpack.i.l.bf16 %v12114_v44 }
 0xf2a   :  { %3054 = vrot.lane.b32.xlu0 %v13497_v12, %s13244_s0 }
 0xf2e   :  { %3056 = vrot.lane.b32.xlu0 %v13495_v8, %s13244_s0 }
 0xf2f   :  { %v2830_v21 = vpop.xlane.xlu0 %2829 }
 0xf30   :  { %12334 = vrcp.f32 %v2830_v21 }
 0xf32   :  { %3060 = vrot.lane.b32.xlu0 %v13499_v15, %s13244_s0  ;;  %v11635_v15 = vpack.c.bf16 %v12116_v23, %v12115_v10 }
 0xf33   :  { %v2827_v24 = vpop.xlane.xlu0 %2826 }
 0xf34   :  { %12336 = vrcp.f32 %v2827_v24 }
 0xf36   :  { %3064 = vrot.lane.b32.xlu0 %v13503_v19, %s13244_s0  ;;  %v12121_v19 = vunpack.i.h.bf16 %v12119_v17 }
 0xf3a   :  { %3068 = vrot.lane.b32.xlu0 %v13507_v40, %s13244_s0  ;;  %v12335_v42 = vpop.eup %12334  ;;  %v12120_v40 = vunpack.i.l.bf16 %v12119_v17 }
 0xf3b   :  { %v2866_v58 = vmul.f32 %v12335_v42, %v14107_v56 }
 0xf3c   :  { %v11641_v27 = vpack.c.bf16 %v12121_v19, %v12120_v40 }
 0xf3e   :  { %v12337_v12 = vpop.eup %12336 }
 0xf3f   :  { %v2865_v8 = vmul.f32 %v12337_v12, %v14111_v55 }
 0xf41   :  { %10948 = vmatprep.mubr.msk.f32.mxu0 %vm1764_vm15, %v2865_v8 }
 0xf42   :  { %10949 = vmatmul.mubr.msk.f32.vlgmr.msra.gmra.mrb[44].mxu0 %vm1764_vm15, %v2866_v58 }
 0xf43   :  { %11634 = vmatpush3.bf16.xpose.msk.msra.mxu0 %vm13377_vm11, %v14102_v30 }
 0xf44   :  { %11637 = vmatprep.subr.msk.bf16.mxu0 %vm13377_vm11, %v11635_v15 }
 0xf4b   :  { %11640 = vmatpush3.bf16.xpose.msk.msra.mxu0 %vm13377_vm11, %v11635_v15  ;;  %v3855_v15 = vld [vmem:[#allocation2 + $0x128] sm:$0xff] }
 0xf4c   :  { %11643 = vmatprep.subr.msk.bf16.mxu0 %vm13377_vm11, %v11641_v27 }
 0xf53   :  { %11646 = vmatpush3.bf16.xpose.msk.msra.mxu0 %vm13377_vm11, %v11641_v27 }
 0xf64   :  { %v2833_v56 = vpop.xlane.xlu0 %2832 }
 0xf65   :  { %12338 = vrcp.f32 %v2833_v56  ;;  %v2836_v55 = vpop.xlane.xlu1 %2835 }
 0xf66   :  { %12340 = vrcp.f32 %v2836_v55 }
 0xf68   :  { %v12129_v21 = vpop.permute.xlu0 %12128 }
 0xf69   :  { %v2842_v30 = vpop.xlane.xlu1 %2841  ;;  %v12130_v24 = vunpack.i.l.bf16 %v12129_v21 }
 0xf6a   :  { %12342 = vrcp.f32 %v2842_v30 }
 0xf6d   :  { %v2839_v39 = vpop.xlane.xlu1 %2838 }
 0xf6e   :  { %12344 = vrcp.f32 %v2839_v39 }
 0xf6f   :  { %v12339_v43 = vpop.eup %12338 }
 0xf70   :  { %v12341_v59 = vpop.eup %12340  ;;  %v2867_v29 = vmul.f32 %v12339_v43, %v14118_v34  ;;  %v3856_v43 = vld [vmem:[#allocation2 + $0x130] sm:$0xff] }
 0xf71   :  { %v2848_v45 = vpop.xlane.xlu1 %2847  ;;  %v2868_v1 = vmul.f32 %v12341_v59, %v14120_v46  ;;  %v12131_v46 = vunpack.i.h.bf16 %v12129_v21  ;;  %v3857_v59 = vld [vmem:[#allocation2 + $0x138] sm:$0xff] }
 0xf72   :  { %10951 = vmatprep.mubr.msk.f32.mxu0 %vm1764_vm15, %v2867_v29  ;;  %12346 = vrcp.f32 %v2848_v45  ;;  %v11691_v45 = vpack.c.bf16 %v3857_v59, %v3856_v43 }
 0xf73   :  { %10952 = vmatmul.mubr.msk.f32.gmra.mrb[46].mxu0 %vm1764_vm15, %v2868_v1  ;;  %v11653_v58 = vpack.c.bf16 %v12131_v46, %v12130_v24 }
 0xf74   :  { %v12343_v26 = vpop.eup %12342 }
 0xf75   :  { %v2845_v41 = vpop.xlane.xlu1 %2844  ;;  %v2870_v17 = vmul.f32 %v12343_v26, %v14127_v57  ;;  %v9898_v26 = vld [vmem:[#allocation2 + $0x78] ss:$0 sm:$0xff] }
 0xf76   :  { %12348 = vrcp.f32 %v2845_v41 }
 0xf78   :  { %v12345_v22 = vpop.eup %12344 }
 0xf79   :  { %v2854_v20 = vpop.xlane.xlu1 %2853  ;;  %v2869_v33 = vmul.f32 %v12345_v22, %v14131_v36  ;;  %v3854_v36 = vld [vmem:[#allocation2 + $0x120] sm:$0xff] }
 0xf7a   :  { %v11687_v19 = vpack.c.bf16 %v3855_v15, %v3854_v36  ;;  %12350 = vrcp.f32 %v2854_v20  ;;  %v1397_v20 = vadd.f32 %v9898_v26, %v13617_v16 }
 0xf7b   :  { %10954 = vmatprep.mubr.msk.f32.mxu0 %vm1764_vm15, %v2869_v33 }
 0xf7c   :  { %10955 = vmatmul.mubr.msk.f32.gmra.mrb[48].mxu0 %vm1764_vm15, %v2870_v17  ;;  %v12347_v12 = vpop.eup %12346  ;;  %v1402_v17 = vadd.f32 %v13615_v13, %v9898_v26 }
 0xf7d   :  { %v12124_v34 = vpop.permute.xlu1 %12123  ;;  %v2872_v57 = vmul.f32 %v12347_v12, %v14135_v54 }
 0xf7e   :  { %v12126_v44 = vunpack.i.h.bf16 %v12124_v34  ;;  %v12125_v42 = vunpack.i.l.bf16 %v12124_v34 }
 0xf80   :  { %v12349_v23 = vpop.eup %12348  ;;  %v11647_v10 = vpack.c.bf16 %v12126_v44, %v12125_v42 }
 0xf81   :  { %v2871_v8 = vmul.f32 %v12349_v23, %v14139_v5  ;;  %v3051_v5 = vpop.permute.xlu0 %3050  ;;  %v3059_v1 = vpop.permute.xlu1 %3058 }
 0xf82   :  { %11649 = vmatprep.subr.msk.bf16.mxu0 %vm13377_vm11, %v11647_v10 }
 0xf83   :  { %10957 = vmatprep.mubr.msk.f32.mxu0 %vm1764_vm15, %v2871_v8  ;;  %11652 = vmatpush3.bf16.xpose.msk.msra.mxu0 %vm13377_vm11, %v11647_v10 }
 0xf84   :  { %10958 = vmatmul.mubr.msk.f32.gmra.mrb[50].mxu0 %vm1764_vm15, %v2872_v57  ;;  %11655 = vmatprep.subr.msk.bf16.mxu0 %vm13377_vm11, %v11653_v58  ;;  %v12351_v27 = vpop.eup %12350 }
 0xf85   :  { %v2874_v39 = vmul.f32 %v12351_v27, %v14143_v25  ;;  %v3063_v25 = vpop.permute.xlu1 %3062 }
 0xf89   :  { %v3067_v22 = vpop.permute.xlu1 %3066 }
 0xf8b   :  { %11658 = vmatpush3.bf16.xpose.msk.msra.mxu0 %vm13377_vm11, %v11653_v58 }
 0xf8c   :  { %11688 = vmatprep.subr.bf16.mxu0 %v11687_v19 }
 0xf9d   :  { %v2851_v54 = vpop.xlane.xlu0 %2850 }
 0xf9e   :  { %12352 = vrcp.f32 %v2851_v54 }
 0xfa1   :  { %v3053_v40 = vpop.permute.xlu0 %3052 }
 0xfa5   :  { %v3055_v56 = vpop.permute.xlu0 %3054 }
 0xfa8   :  { %v12353_v55 = vpop.eup %12352 }
 0xfa9   :  { %v2873_v30 = vmul.f32 %v12353_v55, %v14160_v18  ;;  %v3057_v29 = vpop.permute.xlu0 %3056 }
 0xfab   :  { %10960 = vmatprep.mubr.msk.f32.mxu0 %vm1764_vm15, %v2873_v30 }
 0xfac   :  { %10961 = vmatmul.mubr.msk.f32.gmra.mrb[52].mxu0 %vm1764_vm15, %v2874_v39 }
 0xfad   :  { %10983 = vmatprep.mubr.msk.f32.mxu0 %vm474_vm10, %v3051_v5  ;;  %v3061_v18 = vpop.permute.xlu0 %3060 }
 0xfb0   :  { %10984 = vmatmul.mubr.msk.f32.vlgmr.msra.gmra.mrb[54].mxu0 %vm474_vm10, %v3053_v40 }
 0xfb1   :  { %10986 = vmatprep.mubr.msk.f32.mxu0 %vm474_vm10, %v3055_v56  ;;  %11690 = vmatpush3.bf16.msra.mxu0 %v11687_v19  ;;  %v3065_v41 = vpop.permute.xlu0 %3064 }
 0xfb2   :  { %11692 = vmatprep.subr.bf16.mxu0 %v11691_v45 }
 0xfb4   :  { %10987 = vmatmul.mubr.msk.f32.gmra.mrb[56].mxu0 %vm474_vm10, %v3057_v29 }
 0xfb5   :  { %10989 = vmatprep.mubr.msk.f32.mxu0 %vm474_vm10, %v3059_v1  ;;  %11694 = vmatpush3.bf16.msra.mxu0 %v11691_v45  ;;  %v3069_v33 = vpop.permute.xlu0 %3068 }
 0xfb8   :  { %10990 = vmatmul.mubr.msk.f32.gmra.mrb[58].mxu0 %vm474_vm10, %v3061_v18 }
 0xfb9   :  { %10992 = vmatprep.mubr.msk.f32.mxu0 %vm474_vm10, %v3063_v25 }
 0xfbc   :  { %10993 = vmatmul.mubr.msk.f32.gmra.mrb[60].mxu0 %vm474_vm10, %v3065_v41 }
 0xfbd   :  { %10995 = vmatprep.mubr.msk.f32.mxu0 %vm474_vm10, %v3067_v22 }
 0xfc0   :  { %10996 = vmatmul.mubr.msk.f32.gmra.mrb[62].mxu0 %vm474_vm10, %v3069_v33 }
 0xfc1   :  { %11064 = vmatprep.mubr.msk.f32.mxu0 %vm386_vm6, %v1397_v20 }
 0xfc4   :  { %11065 = vmatmul.mubr.msk.f32.vlgmr.msra.gmra.mrb[64].mxu0 %vm386_vm6, %v1402_v17 }
0x1015   :  { %v14229_v21 = vpop.f32.mrb[44].mxu0 }
0x1016   :  { %v14231_v34 = vpop.f32.mrb[45].mxu0 }
0x1046   :  { %v14233_v46 = vpop.f32.mrb[46].mxu0 }
0x1047   :  { %v14235_v24 = vpop.f32.mrb[47].mxu0 }
0x104f   :  { %v14237_v44 = vpop.f32.mrb[48].mxu0 }
0x1050   :  { %v14239_v16 = vpop.f32.mrb[49].mxu0 }
0x1057   :  { %v14241_v42 = vpop.f32.mrb[50].mxu0 }
0x1058   :  { %v14243_v12 = vpop.f32.mrb[51].mxu0 }
0x107f   :  { %v14245_v23 = vpop.f32.mrb[52].mxu0 }
0x1080   :  { %v14247_v13 = vpop.f32.mrb[53].mxu0 }
0x1083   :  { %v10985_v10 = vpop.f32.mrb[54].mxu0 }
0x1084   :  { %v3246_v8 = vmul.f32 0.35355338, %v10985_v10  ;;  %v3196_v58 = vpop.f32.mrb[55].mxu0 }
0x1085   :  { %v3245_v57 = vmul.f32 0.35355338, %v3196_v58 }
0x1086   :  { %v3256_v36 = vadd.f32 %v3246_v8, %v13416_v11 }
0x1087   :  { %v3255_v15 = vadd.f32 %v3245_v57, %v13419_v14  ;;  %v10988_v19 = vpop.f32.mrb[56].mxu0 }
0x1088   :  { %v3248_v5 = vmul.f32 0.35355338, %v10988_v19  ;;  %v3206_v54 = vpop.f32.mrb[57].mxu0  ;;  %v3268_v40 = vsel %vm1764_vm15, %v3256_v36, -inf }
0x1089   :  { %v3247_v27 = vmul.f32 0.35355338, %v3206_v54  ;;  %3269 = vmax.xlane.f32.xlu0 %v3268_v40  ;;  %v3265_v56 = vsel %vm1764_vm15, %v3255_v15, -inf }
0x108a   :  { %v3258_v55 = vadd.f32 %v3248_v5, %v13645_v53  ;;  %3266 = vmax.xlane.f32.xlu1 %v3265_v56 }
0x108b   :  { %v3257_v30 = vadd.f32 %v3247_v27, %v13642_v37  ;;  %v10991_v39 = vpop.f32.mrb[58].mxu0 }
0x108c   :  { %v3250_v43 = vmul.f32 0.35355338, %v10991_v39  ;;  %v3216_v59 = vpop.f32.mrb[59].mxu0  ;;  %v3274_v11 = vsel %vm1764_vm15, %v3258_v55, -inf }
0x108d   :  { %v3249_v14 = vmul.f32 0.35355338, %v3216_v59  ;;  %v3271_v29 = vsel %vm1764_vm15, %v3257_v30, -inf }
0x108e   :  { %v3260_v45 = vadd.f32 %v3250_v43, %v13661_v62  ;;  %3275 = vmax.xlane.f32.xlu1 %v3274_v11  ;;  %3272 = vmax.xlane.f32.xlu0 %v3271_v29 }
0x108f   :  { %v3259_v1 = vadd.f32 %v3249_v14, %v13658_v61  ;;  %v10994_v18 = vpop.f32.mrb[60].mxu0 }
0x1090   :  { %v3252_v25 = vmul.f32 0.35355338, %v10994_v18  ;;  %v3226_v53 = vpop.f32.mrb[61].mxu0  ;;  %v3280_v41 = vsel %vm1764_vm15, %v3260_v45, -inf }
0x1091   :  { %v3251_v37 = vmul.f32 0.35355338, %v3226_v53  ;;  %v3277_v26 = vsel %vm1764_vm15, %v3259_v1, -inf }
0x1092   :  { %v3262_v22 = vadd.f32 %v3252_v25, %v13679_v28  ;;  %3281 = vmax.xlane.f32.xlu1 %v3280_v41  ;;  %3278 = vmax.xlane.f32.xlu0 %v3277_v26 }
0x1093   :  { %v3261_v20 = vadd.f32 %v3251_v37, %v13676_v49  ;;  %v10997_v33 = vpop.f32.mrb[62].mxu0 }
0x1094   :  { %v3254_v62 = vmul.f32 0.35355338, %v10997_v33  ;;  %v3236_v17 = vpop.f32.mrb[63].mxu0  ;;  %v3286_v10 = vsel %vm1764_vm15, %v3262_v22, -inf }
0x1095   :  { %v3253_v61 = vmul.f32 0.35355338, %v3236_v17  ;;  %v3283_v8 = vsel %vm1764_vm15, %v3261_v20, -inf }
0x1096   :  { %v3264_v58 = vadd.f32 %v3254_v62, %v13695_v7  ;;  %3287 = vmax.xlane.f32.xlu1 %v3286_v10  ;;  %3284 = vmax.xlane.f32.xlu0 %v3283_v8 }
0x1097   :  { %v14267_v57 = vadd.f32 %v3253_v61, %v13692_v35  ;;  %v14269_v28 = vpop.f32.mrb[64].mxu0 }
0x1098   :  { %v14271_v19 = vpop.f32.mrb[65].mxu0  ;;  %v3292_v49 = vsel %vm1764_vm15, %v3264_v58, -inf }
0x1099   :  { %v3289_v5 = vsel %vm1764_vm15, %v14267_v57, -inf }
0x109a   :  { %3293 = vmax.xlane.f32.xlu1 %v3292_v49  ;;  %3290 = vmax.xlane.f32.xlu0 %v3289_v5 }
0x10ab   :  { %12138 = vrot.lane.b32.xlu1 %v13541_v4, %s13245_s2 }
0x10b0   :  { %12133 = vrot.lane.b32.xlu0 %v13523_v32, %s13245_s2 }
0x10b4   :  { %12143 = vrot.lane.b32.xlu0 %v13537_v2, %s13245_s2 }
0x1116   :  { %v3270_v35 = vpop.xlane.xlu0 %3269 }
0x1117   :  { %v3296_v7 = vsub.f32 %v3256_v36, %v3270_v35  ;;  %v3267_v54 = vpop.xlane.xlu1 %3266 }
0x1118   :  { %v3295_v40 = vsub.f32 %v3255_v15, %v3267_v54 }
0x1119   :  { %v3307_v27 = vmul.f32 1.442695, %v3296_v7 }
0x111a   :  { %v3305_v56 = vmul.f32 1.442695, %v3295_v40 }
0x111b   :  { %12354 = vpow2.f32 %v3307_v27  ;;  %v3276_v39 = vpop.xlane.xlu1 %3275  ;;  %v3273_v43 = vpop.xlane.xlu0 %3272 }
0x111c   :  { %12356 = vpow2.f32 %v3305_v56  ;;  %v3298_v59 = vsub.f32 %v3258_v55, %v3276_v39  ;;  %v3297_v11 = vsub.f32 %v3257_v30, %v3273_v43 }
0x111e   :  { %v3311_v14 = vmul.f32 1.442695, %v3298_v59  ;;  %v3309_v4 = vmul.f32 1.442695, %v3297_v11 }
0x111f   :  { %v3282_v29 = vpop.xlane.xlu1 %3281  ;;  %v3279_v18 = vpop.xlane.xlu0 %3278 }
0x1120   :  { %12358 = vpow2.f32 %v3311_v14  ;;  %v3300_v32 = vsub.f32 %v3260_v45, %v3282_v29  ;;  %v3299_v25 = vsub.f32 %v3259_v1, %v3279_v18 }
0x1121   :  { %12360 = vpow2.f32 %v3309_v4 }
0x1122   :  { %v3315_v2 = vmul.f32 1.442695, %v3300_v32  ;;  %v3313_v36 = vmul.f32 1.442695, %v3299_v25 }
0x1123   :  { %v3288_v53 = vpop.xlane.xlu1 %3287  ;;  %v3285_v15 = vpop.xlane.xlu0 %3284 }
0x1124   :  { %12362 = vpow2.f32 %v3315_v2  ;;  %v3302_v41 = vsub.f32 %v3262_v22, %v3288_v53  ;;  %v3301_v37 = vsub.f32 %v3261_v20, %v3285_v15 }
0x1125   :  { %v14282_v26 = vpop.eup %12354  ;;  %12364 = vpow2.f32 %v3313_v36 }
0x1126   :  { %v14284_v33 = vpop.eup %12356  ;;  %v3319_v55 = vmul.f32 1.442695, %v3302_v41  ;;  %v3317_v30 = vmul.f32 1.442695, %v3301_v37  ;;  %v3328_v62 = vsel %vm1764_vm15, %v14282_v26, 0.0 }
0x1127   :  { %3329 = vadd.xlane.f32.xlu1 %v3328_v62  ;;  %v3294_v45 = vpop.xlane.xlu1 %3293  ;;  %v3291_v1 = vpop.xlane.xlu0 %3290  ;;  %v3325_v17 = vsel %vm1764_vm15, %v14284_v33, 0.0 }
0x1128   :  { %v3304_v10 = vsub.f32 %v3264_v58, %v3294_v45  ;;  %3326 = vadd.xlane.f32.xlu0 %v3325_v17  ;;  %12366 = vpow2.f32 %v3317_v30  ;;  %v3303_v61 = vsub.f32 %v14267_v57, %v3291_v1 }
0x1129   :  { %12368 = vpow2.f32 %v3319_v55 }
0x112a   :  { %v14290_v22 = vpop.eup %12358  ;;  %v3323_v20 = vmul.f32 1.442695, %v3304_v10  ;;  %v3321_v39 = vmul.f32 1.442695, %v3303_v61 }
0x112b   :  { %v14293_v8 = vpop.eup %12360  ;;  %v12139_v49 = vpop.permute.xlu1 %12138  ;;  %v3334_v35 = vsel %vm1764_vm15, %v14290_v22, 0.0 }
0x112c   :  { %v12134_v5 = vpop.permute.xlu0 %12133  ;;  %3335 = vadd.xlane.f32.xlu1 %v3334_v35  ;;  %v12141_v54 = vunpack.i.h.bf16 %v12139_v49  ;;  %v12140_v40 = vunpack.i.l.bf16 %v12139_v49  ;;  %v3331_v27 = vsel %vm1764_vm15, %v14293_v8, 0.0  ;;  %12370 = vpow2.f32 %v3323_v20 }
0x112d   :  { %v12136_v7 = vunpack.i.h.bf16 %v12134_v5  ;;  %v12135_v58 = vunpack.i.l.bf16 %v12134_v5  ;;  %3332 = vadd.xlane.f32.xlu0 %v3331_v27  ;;  %12372 = vpow2.f32 %v3321_v39 }
0x112e   :  { %v14299_v56 = vpop.eup %12362  ;;  %v11663_v29 = vpack.c.bf16 %v12141_v54, %v12140_v40  ;;  %v3700_v54 = vld [vmem:[#allocation2 + $0xa8] sm:$0xff]  ;;  %v3701_v40 = vld [vmem:[#allocation2 + $0xb0] sm:$0xff] }
0x112f   :  { %v3340_v43 = vsel %vm1764_vm15, %v14299_v56, 0.0  ;;  %v11659_v59 = vpack.c.bf16 %v12136_v7, %v12135_v58  ;;  %v14303_v11 = vpop.eup %12364  ;;  %v3702_v58 = vld [vmem:[#allocation2 + $0xb8] sm:$0xff]  ;;  %v11679_v27 = vpack.c.bf16 %v3701_v40, %v3700_v54 }
0x1130   :  { %v12144_v57 = vpop.permute.xlu0 %12143  ;;  %3341 = vadd.xlane.f32.xlu1 %v3340_v43  ;;  %v3337_v32 = vsel %vm1764_vm15, %v14303_v11, 0.0 }
0x1131   :  { %v12146_v14 = vunpack.i.h.bf16 %v12144_v57  ;;  %v12145_v4 = vunpack.i.l.bf16 %v12144_v57  ;;  %11660 = vmatprep.subr.bf16.mxu1 %v11659_v59 }
0x1132   :  { %11662 = vmatpush3.bf16.msra.mxu1 %v11659_v59  ;;  %v14305_v18 = vpop.eup %12366 }
0x1133   :  { %11664 = vmatprep.subr.bf16.mxu1 %v11663_v29  ;;  %v14309_v25 = vpop.eup %12368  ;;  %v3343_v2 = vsel %vm1764_vm15, %v14305_v18, 0.0  ;;  %v11667_v36 = vpack.c.bf16 %v12146_v14, %v12145_v4 }
0x1134   :  { %3338 = vadd.xlane.f32.xlu1 %v3337_v32  ;;  %3344 = vadd.xlane.f32.xlu0 %v3343_v2  ;;  %v3346_v53 = vsel %vm1764_vm15, %v14309_v25, 0.0 }
0x1136   :  { %11666 = vmatpush3.bf16.msra.mxu1 %v11663_v29  ;;  %v14315_v15 = vpop.eup %12370 }
0x1137   :  { %11668 = vmatprep.subr.bf16.mxu1 %v11667_v36  ;;  %v3352_v41 = vsel %vm1764_vm15, %v14315_v15, 0.0  ;;  %v14319_v37 = vpop.eup %12372 }
0x1138   :  { %3347 = vadd.xlane.f32.xlu1 %v3346_v53  ;;  %v3349_v55 = vsel %vm1764_vm15, %v14319_v37, 0.0 }
0x113a   :  { %11670 = vmatpush3.bf16.msra.mxu1 %v11667_v36 }
0x113c   :  { %3353 = vadd.xlane.f32.xlu1 %v3352_v41 }
0x1140   :  { %3350 = vadd.xlane.f32.xlu1 %v3349_v55 }
0x114a   :  { %12153 = vrot.lane.b32.xlu0 %v13549_v6, %s13245_s2 }
0x114e   :  { %3560 = vrot.lane.b32.xlu0 %v14041_v0, %s13232_s23 }
0x1151   :  { %12148 = vrot.lane.b32.xlu1 %v13553_v9, %s13245_s2 }
0x1152   :  { %3562 = vrot.lane.b32.xlu0 %v14039_v31, %s13232_s23 }
0x1155   :  { %3602 = vrot.lane.b32.xlu1 %v14229_v21, %s13246_s30 }
0x1156   :  { %3600 = vrot.lane.b32.xlu0 %v14231_v34, %s13246_s30 }
0x1159   :  { %3566 = vrot.lane.b32.xlu1 %v14043_v52, %s13232_s23 }
0x115a   :  { %3564 = vrot.lane.b32.xlu0 %v14045_v48, %s13232_s23 }
0x115d   :  { %3606 = vrot.lane.b32.xlu1 %v14233_v46, %s13246_s30 }
0x115e   :  { %3604 = vrot.lane.b32.xlu0 %v14235_v24, %s13246_s30 }
0x1161   :  { %3570 = vrot.lane.b32.xlu1 %v14047_v3, %s13232_s23 }
0x1162   :  { %3568 = vrot.lane.b32.xlu0 %v14049_v47, %s13232_s23 }
0x1165   :  { %3610 = vrot.lane.b32.xlu1 %v14237_v44, %s13246_s30 }
0x1166   :  { %3608 = vrot.lane.b32.xlu0 %v14239_v16, %s13246_s30 }
0x1169   :  { %3574 = vrot.lane.b32.xlu1 %v14051_v60, %s13232_s23 }
0x116a   :  { %3572 = vrot.lane.b32.xlu0 %v14053_v38, %s13232_s23 }
0x116d   :  { %3614 = vrot.lane.b32.xlu1 %v14241_v42, %s13246_s30 }
0x116e   :  { %3612 = vrot.lane.b32.xlu0 %v14243_v12, %s13246_s30 }
0x1171   :  { %3578 = vrot.lane.b32.xlu1 %v14055_v50, %s13232_s23 }
0x1172   :  { %3576 = vrot.lane.b32.xlu0 %v14057_v63, %s13232_s23 }
0x1175   :  { %3618 = vrot.lane.b32.xlu1 %v14245_v23, %s13246_s30 }
0x1176   :  { %3616 = vrot.lane.b32.xlu0 %v14247_v13, %s13246_s30 }
0x11b4   :  { %v3330_v6 = vpop.xlane.xlu1 %3329 }
0x11b5   :  { %v3327_v9 = vpop.xlane.xlu0 %3326 }
0x11b6   :  { %12374 = vrcp.f32 %v3327_v9 }
0x11b7   :  { %12376 = vrcp.f32 %v3330_v6 }
0x11b9   :  { %v3336_v31 = vpop.xlane.xlu1 %3335 }
0x11ba   :  { %v3333_v47 = vpop.xlane.xlu0 %3332 }
0x11bb   :  { %12378 = vrcp.f32 %v3333_v47 }
0x11bc   :  { %12380 = vrcp.f32 %v3336_v31 }
0x11bd   :  { %v3342_v0 = vpop.xlane.xlu1 %3341 }
0x11c0   :  { %v12375_v52 = vpop.eup %12374 }
0x11c1   :  { %v3339_v48 = vpop.xlane.xlu1 %3338  ;;  %v3365_v3 = vmul.f32 %v12375_v52, %v14284_v33  ;;  %v3345_v38 = vpop.xlane.xlu0 %3344 }
0x11c2   :  { %12382 = vrcp.f32 %v3339_v48  ;;  %v12377_v23 = vpop.eup %12376 }
0x11c3   :  { %11018 = vmatprep.mubr.msk.f32.mxu1 %vm1764_vm15, %v3365_v3  ;;  %12384 = vrcp.f32 %v3342_v0  ;;  %v3366_v33 = vmul.f32 %v12377_v23, %v14282_v26 }
0x11c4   :  { %12386 = vrcp.f32 %v3345_v38 }
0x11c5   :  { %v3348_v60 = vpop.xlane.xlu1 %3347  ;;  %v12154_v21 = vpop.permute.xlu0 %12153 }
0x11c6   :  { %v12156_v46 = vunpack.i.h.bf16 %v12154_v21  ;;  %v12155_v24 = vunpack.i.l.bf16 %v12154_v21  ;;  %v12379_v13 = vpop.eup %12378  ;;  %12388 = vrcp.f32 %v3348_v60 }
0x11c7   :  { %v12381_v30 = vpop.eup %12380  ;;  %v3367_v62 = vmul.f32 %v12379_v13, %v14293_v8 }
0x11c8   :  { %v11675_v12 = vpack.c.bf16 %v12156_v46, %v12155_v24  ;;  %v3368_v1 = vmul.f32 %v12381_v30, %v14290_v22 }
0x11c9   :  { %v3354_v50 = vpop.xlane.xlu1 %3353  ;;  %v3561_v41 = vpop.permute.xlu0 %3560 }
0x11cc   :  { %v12383_v45 = vpop.eup %12382 }
0x11cd   :  { %v3351_v63 = vpop.xlane.xlu1 %3350  ;;  %v12385_v17 = vpop.eup %12384  ;;  %v3369_v10 = vmul.f32 %v12383_v45, %v14303_v11  ;;  %v13248_v11 = vmov 0.0|0.0  }
0x11ce   :  { %12390 = vrcp.f32 %v3351_v63  ;;  %v12387_v20 = vpop.eup %12386  ;;  %v3370_v26 = vmul.f32 %v12385_v17, %v14299_v56  ;;  %v3703_v56 = vld [vmem:[#allocation2 + $0xc0] sm:$0xff] }
0x11cf   :  { %12392 = vrcp.f32 %v3354_v50  ;;  %v3371_v8 = vmul.f32 %v12387_v20, %v14305_v18  ;;  %v11683_v39 = vpack.c.bf16 %v3703_v56, %v3702_v58  ;;  %v3944_v18 = vld [vmem:[#allocation2 + $0x168] sm:$0xff]  ;;  %v4100_v20 = vld [vmem:[#allocation2 + $0x150] sm:$0xff] }
0x11d0   :  { %v12389_v61 = vpop.eup %12388 }
0x11d1   :  { %v12149_v34 = vpop.permute.xlu1 %12148  ;;  %v3372_v22 = vmul.f32 %v12389_v61, %v14309_v25  ;;  %v3945_v25 = vld [vmem:[#allocation2 + $0x170] sm:$0xff] }
0x11d2   :  { %v12151_v44 = vunpack.i.h.bf16 %v12149_v34  ;;  %v12150_v16 = vunpack.i.l.bf16 %v12149_v34  ;;  %v11695_v36 = vpack.c.bf16 %v3945_v25, %v3944_v18 }
0x11d4   :  { %v11671_v42 = vpack.c.bf16 %v12151_v44, %v12150_v16  ;;  %11696 = vmatprep.subr.bf16.mxu0 %v11695_v36  ;;  %v4098_v16 = vld [vmem:[#allocation2 + $0x140] sm:$0xff] }
0x11d5   :  { %11698 = vmatpush3.bf16.msra.mxu0 %v11695_v36  ;;  %v3603_v55 = vpop.permute.xlu1 %3602 }
0x11d6   :  { %11672 = vmatprep.subr.bf16.mxu1 %v11671_v42 }
0x11d7   :  { %11674 = vmatpush3.bf16.msra.mxu1 %v11671_v42  ;;  %v4099_v42 = vld [vmem:[#allocation2 + $0x148] sm:$0xff] }
0x11d8   :  { %11676 = vmatprep.subr.bf16.mxu1 %v11675_v12  ;;  %v12391_v49 = vpop.eup %12390 }
0x11d9   :  { %v12393_v5 = vpop.eup %12392  ;;  %v3373_v35 = vmul.f32 %v12391_v49, %v14319_v37  ;;  %v3563_v37 = vpop.permute.xlu0 %3562  ;;  %v4103_v49 = vld [vmem:[#allocation2 + $0x190] sm:$0xff] }
0x11da   :  { %v3374_v7 = vmul.f32 %v12393_v5, %v14315_v15  ;;  %v3567_v9 = vpop.permute.xlu1 %3566 }
0x11db   :  { %11678 = vmatpush3.bf16.msra.mxu1 %v11675_v12  ;;  %v16096_v12 = vld [vmem:[#allocation11_spill] sm:$0xff] }
0x11dc   :  { %11680 = vmatprep.subr.bf16.mxu1 %v11679_v27  ;;  %v3670_v23 = vsel %vm474_vm10, %v16096_v12, %v3561_v41 }
0x11dd   :  { %v3601_v6 = vpop.permute.xlu0 %3600 }
0x11de   :  { %11019 = vmatmul.mubr.msk.f32.vlgmr.msra.gmra.mrb[48].mxu1 %vm1764_vm15, %v3366_v33  ;;  %v3607_v0 = vpop.permute.xlu1 %3606  ;;  %v16097_v33 = vld [vmem:[#allocation10_spill] sm:$0xff] }
0x11df   :  { %11021 = vmatprep.mubr.msk.f32.mxu1 %vm1764_vm15, %v3367_v62  ;;  %11682 = vmatpush3.bf16.msra.mxu1 %v11679_v27  ;;  %v3671_v30 = vsel %vm474_vm10, %v16097_v33, %v3563_v37  ;;  %v3680_v62 = vsel %vm16081_vm14, %v3670_v23, %v3601_v6  ;;  %v3946_v23 = vld [vmem:[#allocation2 + $0x178] sm:$0xff] }
0x11e0   :  { %11684 = vmatprep.subr.bf16.mxu1 %v11683_v39  ;;  %v3681_v17 = vsel %vm16081_vm14, %v3671_v30, %v3603_v55  ;;  %v16103_v55 = vld [vmem:[#allocation16_spill] sm:$0xff] }
0x11e1   :  { %v3565_v31 = vpop.permute.xlu0 %3564  ;;  %v10032_v30 = vld [vmem:[#allocation2 + $0xc8] ss:$0 sm:$0xff] }
0x11e2   :  { %11022 = vmatmul.mubr.msk.f32.gmra.mrb[50].mxu1 %vm1764_vm15, %v3368_v1  ;;  %v3571_v48 = vpop.permute.xlu1 %3570  ;;  %v14403_v1 = vpack.c.bf16 %v4099_v42, %v4098_v16 }
0x11e3   :  { %11024 = vmatprep.mubr.msk.f32.mxu1 %vm1764_vm15, %v3369_v10  ;;  %11686 = vmatpush3.bf16.msra.mxu1 %v11683_v39 }
0x11e4   :  { %11703 = vmatprep.subr.bf16.mxu1 %v13248_v11 }
0x11e5   :  { %v3605_v52 = vpop.permute.xlu0 %3604 }
0x11e6   :  { %11025 = vmatmul.mubr.msk.f32.gmra.mrb[52].mxu1 %vm1764_vm15, %v3370_v26  ;;  %v3611_v47 = vpop.permute.xlu1 %3610  ;;  %v4101_v26 = vld [vmem:[#allocation2 + $0x158] sm:$0xff] }
0x11e7   :  { %11027 = vmatprep.mubr.msk.f32.mxu1 %vm1764_vm15, %v3371_v8  ;;  %v4102_v8 = vld [vmem:[#allocation2 + $0x188] sm:$0xff]  ;;  %v14416_v27 = vpack.c.bf16 %v4101_v26, %v4100_v20 }
0x11e9   :  { %v3569_v3 = vpop.permute.xlu0 %3568 }
0x11ea   :  { %11028 = vmatmul.mubr.msk.f32.gmra.mrb[54].mxu1 %vm1764_vm15, %v3372_v22  ;;  %v3575_v38 = vpop.permute.xlu1 %3574  ;;  %v16098_v22 = vld [vmem:[#allocation13_spill] sm:$0xff] }
0x11eb   :  { %11030 = vmatprep.mubr.msk.f32.mxu1 %vm1764_vm15, %v3373_v35  ;;  %v3672_v5 = vsel %vm474_vm10, %v16098_v22, %v3565_v31  ;;  %v3677_v6 = vsel %vm474_vm10, %v16103_v55, %v3575_v38 }
0x11ec   :  { %v3682_v40 = vsel %vm16081_vm14, %v3672_v5, %v3605_v52 }
0x11ed   :  { %v3609_v60 = vpop.permute.xlu0 %3608 }
0x11ee   :  { %11031 = vmatmul.mubr.msk.f32.gmra.mrb[56].mxu1 %vm1764_vm15, %v3374_v7  ;;  %v3615_v63 = vpop.permute.xlu1 %3614  ;;  %v16099_v7 = vld [vmem:[#allocation12_spill] sm:$0xff]  ;;  %vm4581_vm15 = vcmask 1041409  }
0x11ef   :  { %v3673_v54 = vsel %vm474_vm10, %v16099_v7, %v3567_v9 }
0x11f0   :  { %v3683_v56 = vsel %vm16081_vm14, %v3673_v54, %v3607_v0  ;;  %v3687_v0 = vsel %vm16081_vm14, %v3677_v6, %v3615_v63 }
0x11f1   :  { %v3573_v50 = vpop.permute.xlu0 %3572 }
0x11f2   :  { %v3579_v34 = vpop.permute.xlu1 %3578 }
0x11f5   :  { %v3613_v21 = vpop.permute.xlu0 %3612 }
0x11f6   :  { %v3619_v24 = vpop.permute.xlu1 %3618 }
0x11f9   :  { %v3577_v46 = vpop.permute.xlu0 %3576 }
0x11fd   :  { %v3617_v44 = vpop.permute.xlu0 %3616 }
0x12b1   :  { %v11020_v57 = vpop.f32.mrb[48].mxu1 }
0x12b2   :  { %3642 = vrot.lane.b32.xlu1 %v11020_v57, %s13247_s4  ;;  %v3501_v43 = vpop.f32.mrb[49].mxu1  ;;  %v14421_v57 = vpack.c.bf16 %v4103_v49, %v4102_v8 }
0x12b3   :  { %3640 = vrot.lane.b32.xlu0 %v3501_v43, %s13247_s4 }
0x12b5   :  { %v11023_v59 = vpop.f32.mrb[50].mxu1 }
0x12b6   :  { %3646 = vrot.lane.b32.xlu1 %v11023_v59, %s13247_s4  ;;  %v3511_v14 = vpop.f32.mrb[51].mxu1  ;;  %v16100_v59 = vld [vmem:[#allocation15_spill] sm:$0xff] }
0x12b7   :  { %3644 = vrot.lane.b32.xlu0 %v3511_v14, %s13247_s4  ;;  %v3674_v14 = vsel %vm474_vm10, %v16100_v59, %v3569_v3  ;;  %v16104_v3 = vld [vmem:[#allocation19_spill] sm:$0xff] }
0x12b9   :  { %v11026_v4 = vpop.f32.mrb[52].mxu1 }
0x12ba   :  { %3650 = vrot.lane.b32.xlu1 %v11026_v4, %s13247_s4  ;;  %v3521_v29 = vpop.f32.mrb[53].mxu1 }
0x12bb   :  { %3648 = vrot.lane.b32.xlu0 %v3521_v29, %s13247_s4  ;;  %v16101_v29 = vld [vmem:[#allocation14_spill] sm:$0xff] }
0x12bc   :  { %v3675_v18 = vsel %vm474_vm10, %v16101_v29, %v3571_v48 }
0x12bd   :  { %v11029_v32 = vpop.f32.mrb[54].mxu1 }
0x12be   :  { %3654 = vrot.lane.b32.xlu1 %v11029_v32, %s13247_s4  ;;  %v3531_v2 = vpop.f32.mrb[55].mxu1  ;;  %v3684_v32 = vsel %vm16081_vm14, %v3674_v14, %v3609_v60 }
0x12bf   :  { %3652 = vrot.lane.b32.xlu0 %v3531_v2, %s13247_s4  ;;  %v3685_v2 = vsel %vm16081_vm14, %v3675_v18, %v3611_v47  ;;  %v3678_v47 = vsel %vm474_vm10, %v16104_v3, %v3577_v46  ;;  %v13250_v46 = vmov 0.0  }
0x12c1   :  { %v11032_v53 = vpop.f32.mrb[56].mxu1 }
0x12c2   :  { %3658 = vrot.lane.b32.xlu1 %v11032_v53, %s13247_s4  ;;  %v3541_v15 = vpop.f32.mrb[57].mxu1 }
0x12c3   :  { %3656 = vrot.lane.b32.xlu0 %v3541_v15, %s13247_s4  ;;  %v16102_v15 = vld [vmem:[#allocation17_spill] sm:$0xff] }
0x12c4   :  { %v3676_v41 = vsel %vm474_vm10, %v16102_v15, %v3573_v50  ;;  %v16105_v50 = vld [vmem:[#allocation18_spill] sm:$0xff] }
0x12c5   :  { %v3686_v9 = vsel %vm16081_vm14, %v3676_v41, %v3613_v21  ;;  %v3679_v38 = vsel %vm474_vm10, %v16105_v50, %v3579_v34  ;;  %v3688_v21 = vsel %vm16081_vm14, %v3678_v47, %v3617_v44  ;;  %v4104_v34 = vld [vmem:[#allocation2 + $0x198] sm:$0xff] }
0x12c6   :  { %v3689_v63 = vsel %vm16081_vm14, %v3679_v38, %v3619_v24  ;;  %v4105_v24 = vld [vmem:[#allocation2 + $0x1a0] sm:$0xff] }
0x12c7   :  { %v14463_v44 = vpack.c.bf16 %v4105_v24, %v4104_v34 }
0x1324   :  { %v3643_v13 = vpop.permute.xlu1 %3642 }
0x1325   :  { %v3641_v45 = vpop.permute.xlu0 %3640  ;;  %v3691_v61 = vsel %vm16080_vm13, %v3681_v17, %v3643_v13  ;;  %v3947_v13 = vld [vmem:[#allocation2 + $0x180] sm:$0xff] }
0x1326   :  { %v3690_v10 = vsel %vm16080_vm13, %v3680_v62, %v3641_v45  ;;  %v11699_v33 = vpack.c.bf16 %v3947_v13, %v3946_v23 }
0x1327   :  { %11041 = vmatprep.mubr.msk.f32.mxu1 %vm386_vm6, %v3690_v10 }
0x1328   :  { %11042 = vmatmul.mubr.msk.f32.vlgmr.msra.gmra.mrb[58].mxu1 %vm386_vm6, %v3691_v61  ;;  %v3647_v35 = vpop.permute.xlu1 %3646  ;;  %11700 = vmatprep.subr.bf16.mxu0 %v11699_v33 }
0x1329   :  { %v3645_v58 = vpop.permute.xlu0 %3644  ;;  %11705 = vmatpush3.bf16.msra.mxu1 %v14403_v1  ;;  %v3693_v43 = vsel %vm16080_vm13, %v3683_v56, %v3647_v35  ;;  %11702 = vmatpush3.bf16.msra.mxu0 %v11699_v33 }
0x132a   :  { %v3692_v39 = vsel %vm16080_vm13, %v3682_v40, %v3645_v58  ;;  %11706 = vmatprep.subr.bf16.mxu1 %v13248_v11  ;;  %11717 = vmatprep.subr.bf16.mxu0 %v13248_v11 }
0x132b   :  { %11044 = vmatprep.mubr.msk.f32.mxu1 %vm386_vm6, %v3692_v39 }
0x132c   :  { %11045 = vmatmul.mubr.msk.f32.gmra.mrb[60].mxu1 %vm386_vm6, %v3693_v43  ;;  %v3651_v4 = vpop.permute.xlu1 %3650 }
0x132d   :  { %v3649_v25 = vpop.permute.xlu0 %3648  ;;  %11708 = vmatpush3.bf16.msra.mxu1 %v14416_v27  ;;  %v3695_v53 = vsel %vm16080_vm13, %v3685_v2, %v3651_v4 }
0x132e   :  { %v3694_v36 = vsel %vm16080_vm13, %v3684_v32, %v3649_v25  ;;  %11710 = vmatprep.subr.bf16.mxu1 %v14421_v57  ;;  %v10046_v32 = vld [vmem:[#allocation2 + $0x1a8] ss:$0 sm:$0xff] }
0x132f   :  { %11047 = vmatprep.mubr.msk.f32.mxu1 %vm386_vm6, %v3694_v36 }
0x1330   :  { %11048 = vmatmul.mubr.msk.f32.gmra.mrb[62].mxu1 %vm386_vm6, %v3695_v53  ;;  %v3655_v37 = vpop.permute.xlu1 %3654 }
0x1331   :  { %v3653_v31 = vpop.permute.xlu0 %3652  ;;  %v3697_v48 = vsel %vm16080_vm13, %v3687_v0, %v3655_v37 }
0x1332   :  { %v3696_v52 = vsel %vm16080_vm13, %v3686_v9, %v3653_v31 }
0x1333   :  { %11050 = vmatprep.mubr.msk.f32.mxu1 %vm386_vm6, %v3696_v52 }
0x1334   :  { %11051 = vmatmul.mubr.msk.f32.gmra.mrb[64].mxu1 %vm386_vm6, %v3697_v48  ;;  %v3659_v60 = vpop.permute.xlu1 %3658 }
0x1335   :  { %v3657_v16 = vpop.permute.xlu0 %3656  ;;  %v3699_v12 = vsel %vm16080_vm13, %v3689_v63, %v3659_v60 }
0x1336   :  { %v3698_v42 = vsel %vm16080_vm13, %v3688_v21, %v3657_v16 }
0x1337   :  { %11053 = vmatprep.mubr.msk.f32.mxu1 %vm386_vm6, %v3698_v42 }
0x1338   :  { %11054 = vmatmul.mubr.msk.f32.gmra.mrb[66].mxu1 %vm386_vm6, %v3699_v12 }
0x1339   :  { %11098 = vmatprep.mubr.msk.f32.mxu1 %vm13249_vm12, %v13250_v46 }
0x133c   :  { %11099 = vmatmul.mubr.f32.vlgmr.msra.gmra.mrb[68].mxu1 %v13250_v46 }
0x133d   :  { %11712 = vmatpush3.bf16.msra.mxu1 %v14421_v57  ;;  %11109 = vmatprep.mubr.f32.mxu1 %v13250_v46 }
0x133e   :  { %11714 = vmatprep.subr.bf16.mxu1 %v14463_v44 }
0x1341   :  { %11716 = vmatpush3.bf16.msra.mxu1 %v14463_v44 }
0x1342   :  { %11724 = vmatprep.subr.bf16.mxu1 %v14421_v57 }
0x1344   :  { %11110 = vmatmul.mubr.f32.vlgmr.msra.gmra.mrb[70].mxu1 %v13250_v46 }
0x1345   :  { %11726 = vmatpush3.bf16.msra.mxu1 %v14421_v57 }
0x1346   :  { %11728 = vmatprep.subr.bf16.mxu1 %v14463_v44 }
0x1349   :  { %11730 = vmatpush3.bf16.msra.mxu1 %v14463_v44 }
0x134a   :  { %11738 = vmatprep.subr.bf16.mxu1 %v14421_v57 }
0x13fb   :  { %v11043_v62 = vpop.f32.mrb[58].mxu1 }
0x13fc   :  { %v3805_v45 = vpop.f32.mrb[59].mxu1  ;;  %v3811_v10 = vadd.f32 %v11043_v62, %v10032_v30 }
0x13fd   :  { %v3806_v17 = vadd.f32 %v10032_v30, %v3805_v45 }
0x13ff   :  { %v11046_v20 = vpop.f32.mrb[60].mxu1  ;;  %11075 = vmatprep.mubr.msk.f32.mxu0 %vm386_vm6, %v3806_v17 }
0x1400   :  { %v3815_v26 = vpop.f32.mrb[61].mxu1  ;;  %11076 = vmatmul.mubr.msk.f32.vlgmr.msra.gmra.mrb[66].mxu0 %vm386_vm6, %v3811_v10  ;;  %v3821_v8 = vadd.f32 %v11046_v20, %v10032_v30 }
0x1401   :  { %v3816_v61 = vadd.f32 %v10032_v30, %v3815_v26  ;;  %11719 = vmatpush3.bf16.msra.mxu0 %v14403_v1 }
0x1402   :  { %11720 = vmatprep.subr.bf16.mxu0 %v13248_v11 }
0x1403   :  { %v11049_v49 = vpop.f32.mrb[62].mxu1  ;;  %11078 = vmatprep.mubr.msk.f32.mxu0 %vm386_vm6, %v3816_v61 }
0x1404   :  { %v3825_v22 = vpop.f32.mrb[63].mxu1  ;;  %11079 = vmatmul.mubr.msk.f32.gmra.mrb[68].mxu0 %vm386_vm6, %v3821_v8  ;;  %v3831_v35 = vadd.f32 %v11049_v49, %v10032_v30 }
0x1405   :  { %v3826_v5 = vadd.f32 %v10032_v30, %v3825_v22  ;;  %11722 = vmatpush3.bf16.msra.mxu0 %v14416_v27 }
0x1406   :  { %11731 = vmatprep.subr.bf16.mxu0 %v13248_v11 }
0x1407   :  { %v11052_v7 = vpop.f32.mrb[64].mxu1  ;;  %11081 = vmatprep.mubr.msk.f32.mxu0 %vm386_vm6, %v3826_v5 }
0x1408   :  { %v3835_v54 = vpop.f32.mrb[65].mxu1  ;;  %11082 = vmatmul.mubr.msk.f32.gmra.mrb[70].mxu0 %vm386_vm6, %v3831_v35  ;;  %v3841_v58 = vadd.f32 %v11052_v7, %v10032_v30 }
0x1409   :  { %v3836_v40 = vadd.f32 %v10032_v30, %v3835_v54 }
0x140b   :  { %v11055_v56 = vpop.f32.mrb[66].mxu1  ;;  %11084 = vmatprep.mubr.msk.f32.mxu0 %vm386_vm6, %v3836_v40 }
0x140c   :  { %v3845_v39 = vpop.f32.mrb[67].mxu1  ;;  %11085 = vmatmul.mubr.msk.f32.gmra.mrb[72].mxu0 %vm386_vm6, %v3841_v58  ;;  %v3851_v59 = vadd.f32 %v11055_v56, %v10032_v30 }
0x140d   :  { %v3846_v43 = vadd.f32 %v10032_v30, %v3845_v39 }
0x140f   :  { %11087 = vmatprep.mubr.msk.f32.mxu0 %vm386_vm6, %v3846_v43  ;;  %v14487_v14 = vpop.f32.mrb[68].mxu1 }
0x1410   :  { %11088 = vmatmul.mubr.msk.f32.gmra.mrb[74].mxu0 %vm386_vm6, %v3851_v59  ;;  %v11100_v4 = vpop.f32.mrb[69].mxu1 }
0x1411   :  { %11120 = vmatprep.mubr.msk.f32.mxu0 %vm13249_vm12, %v13250_v46 }
0x1417   :  { %v11111_v29 = vpop.f32.mrb[70].mxu1 }
0x1418   :  { %v4251_v18 = vpop.f32.mrb[71].mxu1  ;;  %v4269_v10 = vrot.slane %v11111_v29, 1 }
0x1419   :  { %v4262_v25 = vrot.slane %v4251_v18, 1  ;;  %v4264_v6 = vrot.slane %v4251_v18, 3  ;;  %v4263_v52 = vrot.slane %v4251_v18, 2  ;;  %v4265_v38 = vrot.slane %v4251_v18, 4 }
0x141a   :  { %v4266_v16 = vrot.slane %v4251_v18, 5  ;;  %v4267_v23 = vrot.slane %v4251_v18, 6  ;;  %v4268_v13 = vrot.slane %v4251_v18, 7 }
0x14d3   :  { %v11077_v2 = vpop.f32.mrb[66].mxu0 }
0x14d4   :  { %v14492_v36 = vadd.f32 %v11077_v2, %v10046_v32  ;;  %v4049_v53 = vpop.f32.mrb[67].mxu0 }
0x14d5   :  { %v14494_v15 = vadd.f32 %v10046_v32, %v4049_v53 }
0x14d6   :  { %v4281_v41 = vadd.f32 %v4262_v25, %v14492_v36 }
0x14d7   :  { %v4280_v37 = vadd.f32 %v4251_v18, %v14494_v15  ;;  %v11080_v55 = vpop.f32.mrb[68].mxu0 }
0x14d8   :  { %12394 = vtanh.f32 %v4281_v41  ;;  %v14498_v9 = vadd.f32 %v11080_v55, %v10046_v32  ;;  %v4059_v31 = vpop.f32.mrb[69].mxu0  ;;  %v10060_v43 = vmul.f32 -1.442695, %v4281_v41 }
0x14d9   :  { %v14500_v0 = vadd.f32 %v10046_v32, %v4059_v31  ;;  %12396 = vtanh.f32 %v4280_v37  ;;  %v10059_v59 = vmul.f32 -1.442695, %v4280_v37 }
0x14da   :  { %v4283_v48 = vadd.f32 %v4264_v6, %v14498_v9 }
0x14db   :  { %v11083_v3 = vpop.f32.mrb[70].mxu0  ;;  %v4282_v47 = vadd.f32 %v4263_v52, %v14500_v0 }
0x14dc   :  { %12398 = vtanh.f32 %v4283_v48  ;;  %v14504_v60 = vadd.f32 %v11083_v3, %v10046_v32  ;;  %v4069_v50 = vpop.f32.mrb[71].mxu0  ;;  %v10062_v4 = vmul.f32 -1.442695, %v4283_v48 }
0x14dd   :  { %v14506_v21 = vadd.f32 %v10046_v32, %v4069_v50  ;;  %12400 = vtanh.f32 %v4282_v47 }
0x14de   :  { %v4285_v12 = vadd.f32 %v4266_v16, %v14504_v60 }
0x14df   :  { %v4284_v63 = vadd.f32 %v4265_v38, %v14506_v21  ;;  %v11086_v42 = vpop.f32.mrb[72].mxu0 }
0x14e0   :  { %v14510_v34 = vadd.f32 %v11086_v42, %v10046_v32  ;;  %v4079_v24 = vpop.f32.mrb[73].mxu0 }
0x14e1   :  { %12402 = vtanh.f32 %v4284_v63  ;;  %v14512_v33 = vadd.f32 %v10046_v32, %v4079_v24  ;;  %v10063_v18 = vmul.f32 -1.442695, %v4284_v63 }
0x14e2   :  { %v12395_v30 = vpop.eup %12394  ;;  %v4287_v62 = vadd.f32 %v4268_v13, %v14510_v34  ;;  %12404 = vtanh.f32 %v4285_v12 }
0x14e3   :  { %v4286_v45 = vadd.f32 %v4267_v23, %v14512_v33  ;;  %4430 = vrot.lane.b32.xlu0 %v12395_v30, %s13241_s27  ;;  %v11089_v17 = vpop.f32.mrb[74].mxu0  ;;  %v12397_v61 = vpop.eup %12396 }
0x14e4   :  { %v14517_v20 = vadd.f32 %v11089_v17, %v10046_v32  ;;  %v4089_v26 = vpop.f32.mrb[75].mxu0  ;;  %v10066_v53 = vmul.f32 -1.442695, %v4287_v62 }
0x14e5   :  { %12406 = vtanh.f32 %v4286_v45  ;;  %v14519_v8 = vadd.f32 %v10046_v32, %v4089_v26  ;;  %v10064_v32 = vmul.f32 -1.442695, %v4285_v12  ;;  %v10065_v2 = vmul.f32 -1.442695, %v4286_v45 }
0x14e6   :  { %v12399_v49 = vpop.eup %12398  ;;  %v4289_v22 = vadd.f32 %v4269_v10, %v14517_v20  ;;  %12408 = vtanh.f32 %v4287_v62 }
0x14e7   :  { %4434 = vrot.lane.b32.xlu1 %v12399_v49, %s13241_s27  ;;  %4428 = vrot.lane.b32.xlu0 %v12397_v61, %s13241_s27  ;;  %v4288_v5 = vadd.f32 %v11111_v29, %v14519_v8  ;;  %v12401_v35 = vpop.eup %12400  ;;  %v10061_v29 = vmul.f32 -1.442695, %v4282_v47  ;;  %v10043_v49 = vld [vmem:[#allocation2 + $0x160] ss:$0 sm:$0xff] }
0x14e8   :  { %12410 = vtanh.f32 %v4289_v22  ;;  %v10068_v31 = vmul.f32 -1.442695, %v4289_v22 }
0x14e9   :  { %12412 = vtanh.f32 %v4288_v5  ;;  %v10067_v37 = vmul.f32 -1.442695, %v4288_v5 }
0x14ea   :  { %12414 = vpow2.f32 %v10060_v43 }
0x14eb   :  { %v12403_v7 = vpop.eup %12402  ;;  %4432 = vrot.lane.b32.xlu1 %v12401_v35, %s13241_s27  ;;  %12416 = vpow2.f32 %v10059_v59  ;;  %v4180_v35 = vrot.slane %v14487_v14, 1 }
0x14ec   :  { %4436 = vrot.lane.b32.xlu0 %v12403_v7, %s13241_s27  ;;  %v12405_v54 = vpop.eup %12404  ;;  %12418 = vpow2.f32 %v10062_v4 }
0x14ed   :  { %12420 = vpow2.f32 %v10061_v29 }
0x14ee   :  { %12422 = vpow2.f32 %v10063_v18  ;;  %v14555_v18 = vadd.f32 %v10043_v49, %v14271_v19 }
0x14ef   :  { %v12407_v40 = vpop.eup %12406  ;;  %4438 = vrot.lane.b32.xlu1 %v12405_v54, %s13241_s27  ;;  %12424 = vpow2.f32 %v10064_v32 }
0x14f0   :  { %4440 = vrot.lane.b32.xlu0 %v12407_v40, %s13241_s27  ;;  %v12409_v58 = vpop.eup %12408  ;;  %12426 = vpow2.f32 %v10065_v2 }
0x14f1   :  { %12428 = vpow2.f32 %v10066_v53 }
0x14f2   :  { %v12411_v56 = vpop.eup %12410 }
0x14f3   :  { %4442 = vrot.lane.b32.xlu1 %v12409_v58, %s13241_s27  ;;  %v12413_v39 = vpop.eup %12412  ;;  %v14544_v58 = vadd.f32 %v14269_v28, %v10043_v49 }
0x14f4   :  { %4446 = vrot.lane.b32.xlu0 %v12411_v56, %s13241_s27  ;;  %v12415_v25 = vpop.eup %12414 }
0x14f5   :  { %v12417_v55 = vpop.eup %12416  ;;  %v4369_v6 = vadd.f32 1.0, %v12415_v25  ;;  %v4184_v59 = vadd.f32 %v4180_v35, %v14544_v58  ;;  %v4183_v25 = vadd.f32 %v14487_v14, %v14555_v18 }
0x14f6   :  { %v12419_v52 = vpop.eup %12418  ;;  %v4368_v41 = vadd.f32 1.0, %v12417_v55 }
0x14f7   :  { %4444 = vrot.lane.b32.xlu1 %v12413_v39, %s13241_s27  ;;  %12430 = vrcp.f32 %v4369_v6  ;;  %v4371_v48 = vadd.f32 1.0, %v12419_v52  ;;  %v12421_v3 = vpop.eup %12420 }
0x14f8   :  { %12432 = vpow2.f32 %v10068_v31  ;;  %v12423_v47 = vpop.eup %12422  ;;  %v4370_v50 = vadd.f32 1.0, %v12421_v3 }
0x14f9   :  { %12434 = vrcp.f32 %v4368_v41  ;;  %v12425_v38 = vpop.eup %12424  ;;  %v4372_v16 = vadd.f32 1.0, %v12423_v47 }
0x14fa   :  { %12436 = vpow2.f32 %v10067_v37  ;;  %v12427_v63 = vpop.eup %12426  ;;  %v4373_v12 = vadd.f32 1.0, %v12425_v38 }
0x14fb   :  { %12438 = vrcp.f32 %v4371_v48  ;;  %v12429_v42 = vpop.eup %12428  ;;  %v4374_v23 = vadd.f32 1.0, %v12427_v63  ;;  %v10058_v63 = vmul.f32 -1.442695, %v4184_v59 }
0x14fc   :  { %12440 = vrcp.f32 %v4370_v50  ;;  %v4375_v17 = vadd.f32 1.0, %v12429_v42  ;;  %v10057_v42 = vmul.f32 -1.442695, %v4183_v25 }
0x14fd   :  { %12442 = vrcp.f32 %v4372_v16 }
0x14fe   :  { %12444 = vrcp.f32 %v4373_v12 }
0x14ff   :  { %12446 = vrcp.f32 %v4374_v23 }
0x1500   :  { %12448 = vrcp.f32 %v4375_v17 }
0x1501   :  { %v14532_v24 = vpop.eup %12430 }
0x1502   :  { %v12433_v13 = vpop.eup %12432 }
0x1503   :  { %v14535_v45 = vpop.eup %12434  ;;  %v4377_v26 = vadd.f32 1.0, %v12433_v13 }
0x1504   :  { %v12437_v10 = vpop.eup %12436  ;;  %v4408_v13 = vmul.f32 0.0, %v14535_v45 }
0x1505   :  { %v14538_v61 = vpop.eup %12438  ;;  %v4376_v40 = vadd.f32 1.0, %v12437_v10  ;;  %12450 = vrcp.f32 %v4377_v26 }
0x1506   :  { %v14548_v56 = vpop.eup %12440 }
0x1507   :  { %v14550_v43 = vpop.eup %12442  ;;  %12452 = vrcp.f32 %v4376_v40  ;;  %v4410_v49 = vmul.f32 0.0, %v14548_v56 }
0x1508   :  { %v14559_v32 = vpop.eup %12444  ;;  %12454 = vtanh.f32 %v4184_v59 }
0x1509   :  { %v14564_v53 = vpop.eup %12446  ;;  %12456 = vtanh.f32 %v4183_v25 }
0x150a   :  { %v14569_v31 = vpop.eup %12448  ;;  %12458 = vpow2.f32 %v10058_v63 }
0x150b   :  { %12460 = vpow2.f32 %v10057_v42  ;;  %v4414_v42 = vmul.f32 0.0, %v14564_v53 }
0x150f   :  { %v14572_v14 = vpop.eup %12450 }
0x1511   :  { %v14577_v3 = vpop.eup %12452 }
0x1512   :  { %v12455_v38 = vpop.eup %12454 }
0x1513   :  { %v12457_v16 = vpop.eup %12456 }
0x1514   :  { %v12459_v23 = vpop.eup %12458 }
0x1515   :  { %v4297_v10 = vadd.f32 1.0, %v12459_v23  ;;  %v12461_v26 = vpop.eup %12460 }
0x1555   :  { %v4431_v30 = vpop.permute.xlu0 %4430 }
0x1556   :  { %v4459_v62 = vmul.f32 %v14532_v24, %v4431_v30 }
0x1558   :  { %4480 = vrot.lane.b32.xlu0 %v4459_v62, %s13251_s5 }
0x1559   :  { %v4435_v22 = vpop.permute.xlu1 %4434  ;;  %v4429_v5 = vpop.permute.xlu0 %4428 }
0x155a   :  { %v4461_v7 = vmul.f32 %v14538_v61, %v4435_v22  ;;  %v4458_v54 = vmul.f32 %v14535_v45, %v4429_v5 }
0x155c   :  { %4484 = vrot.lane.b32.xlu1 %v4461_v7, %s13251_s5  ;;  %4478 = vrot.lane.b32.xlu0 %v4458_v54, %s13251_s5  ;;  %v4296_v7 = vadd.f32 1.0, %v12461_v26  ;;  %v4413_v54 = vmul.f32 0.0, %v14559_v32  ;;  %v4417_v26 = vmul.f32 0.0, %v14572_v14 }
0x155d   :  { %v4433_v39 = vpop.permute.xlu1 %4432 }
0x155e   :  { %v4460_v4 = vmul.f32 %v14548_v56, %v4433_v39  ;;  %v4437_v29 = vpop.permute.xlu0 %4436 }
0x155f   :  { %v4462_v28 = vmul.f32 %v14550_v43, %v4437_v29  ;;  %v4409_v29 = vmul.f32 0.0, %v14532_v24 }
0x1560   :  { %4482 = vrot.lane.b32.xlu1 %v4460_v4, %s13251_s5  ;;  %v4412_v4 = vmul.f32 0.0, %v14550_v43 }
0x1561   :  { %v4439_v2 = vpop.permute.xlu1 %4438  ;;  %4486 = vrot.lane.b32.xlu0 %v4462_v28, %s13251_s5 }
0x1562   :  { %v4463_v55 = vmul.f32 %v14559_v32, %v4439_v2  ;;  %v4441_v19 = vpop.permute.xlu0 %4440 }
0x1563   :  { %v4464_v6 = vmul.f32 %v14564_v53, %v4441_v19 }
0x1564   :  { %4488 = vrot.lane.b32.xlu1 %v4463_v55, %s13251_s5 }
0x1565   :  { %v4443_v52 = vpop.permute.xlu1 %4442  ;;  %4490 = vrot.lane.b32.xlu0 %v4464_v6, %s13251_s5  ;;  %v4415_v6 = vmul.f32 0.0, %v14569_v31 }
0x1566   :  { %v4465_v41 = vmul.f32 %v14569_v31, %v4443_v52  ;;  %v4447_v37 = vpop.permute.xlu0 %4446  ;;  %v4411_v52 = vmul.f32 0.0, %v14538_v61 }
0x1567   :  { %v4467_v48 = vmul.f32 %v14572_v14, %v4447_v37 }
0x1568   :  { %4492 = vrot.lane.b32.xlu1 %v4465_v41, %s13251_s5 }
0x1569   :  { %v4445_v47 = vpop.permute.xlu1 %4444  ;;  %4496 = vrot.lane.b32.xlu0 %v4467_v48, %s13251_s5 }
0x156a   :  { %v4466_v50 = vmul.f32 %v14577_v3, %v4445_v47 }
0x156c   :  { %4494 = vrot.lane.b32.xlu1 %v4466_v50, %s13251_s5 }
0x156d   :  { %4310 = vrot.lane.b32.xlu0 %v12455_v38, %s13241_s27 }
0x1570   :  { %4308 = vrot.lane.b32.xlu1 %v12457_v16, %s13241_s27  ;;  %v4416_v16 = vmul.f32 0.0, %v14577_v3 }
0x15ca   :  { %v4481_v12 = vpop.permute.xlu0 %4480 }
0x15cb   :  { %v14600_v2 = vadd.f32 %v4481_v12, %v4409_v29 }
0x15ce   :  { %v4485_v30 = vpop.permute.xlu1 %4484  ;;  %v4479_v62 = vpop.permute.xlu0 %4478 }
0x15cf   :  { %v14585_v17 = vadd.f32 %v4479_v62, %v4408_v13  ;;  %v14611_v50 = vadd.f32 %v4485_v30, %v4411_v52 }
0x15d1   :  { %12462 = vtanh.f32 %v14585_v17 }
0x15d2   :  { %v4483_v22 = vpop.permute.xlu1 %4482  ;;  %12464 = vrcp.f32 %v4297_v10 }
0x15d3   :  { %v14589_v5 = vadd.f32 %v4483_v22, %v4410_v49  ;;  %v4487_v35 = vpop.permute.xlu0 %4486 }
0x15d4   :  { %v14598_v28 = vadd.f32 %v4487_v35, %v4412_v4 }
0x15d5   :  { %12466 = vtanh.f32 %v14589_v5 }
0x15d6   :  { %v4489_v40 = vpop.permute.xlu1 %4488  ;;  %12468 = vrcp.f32 %v4296_v7 }
0x15d7   :  { %v14593_v39 = vadd.f32 %v4489_v40, %v4413_v54  ;;  %v4491_v59 = vpop.permute.xlu0 %4490 }
0x15d8   :  { %v14624_v62 = vadd.f32 %v4491_v59, %v4414_v42 }
0x15d9   :  { %12470 = vtanh.f32 %v14593_v39 }
0x15da   :  { %v4493_v25 = vpop.permute.xlu1 %4492  ;;  %12472 = vtanh.f32 %v14598_v28 }
0x15db   :  { %v4497_v55 = vpop.permute.xlu0 %4496  ;;  %v12463_v19 = vpop.eup %12462  ;;  %v14608_v37 = vadd.f32 %v4493_v25, %v4415_v6  ;;  %12474 = vtanh.f32 %v14600_v2 }
0x15dc   :  { %4538 = vrot.lane.b32.xlu1 %v12463_v19, %s13241_s27  ;;  %v14605_v41 = vpop.eup %12464  ;;  %v14632_v49 = vadd.f32 %v4497_v55, %v4417_v26 }
0x15dd   :  { %12476 = vtanh.f32 %v14608_v37 }
0x15de   :  { %v4495_v48 = vpop.permute.xlu1 %4494  ;;  %12478 = vtanh.f32 %v14611_v50 }
0x15df   :  { %v12467_v47 = vpop.eup %12466  ;;  %v4311_v38 = vpop.permute.xlu0 %4310  ;;  %v14620_v23 = vadd.f32 %v4495_v48, %v4416_v16  ;;  %v4305_v16 = vmul.f32 0.0, %v14605_v41 }
0x15e0   :  { %v4315_v63 = vmul.f32 %v14605_v41, %v4311_v38  ;;  %4542 = vrot.lane.b32.xlu1 %v12467_v47, %s13241_s27  ;;  %v14617_v12 = vpop.eup %12468 }
0x15e1   :  { %12480 = vtanh.f32 %v14620_v23 }
0x15e2   :  { %v4309_v13 = vpop.permute.xlu1 %4308  ;;  %4320 = vrot.lane.b32.xlu0 %v4315_v63, %s13251_s5  ;;  %12482 = vtanh.f32 %v14624_v62 }
0x15e3   :  { %v12471_v30 = vpop.eup %12470  ;;  %v4314_v10 = vmul.f32 %v14617_v12, %v4309_v13  ;;  %12484 = vtanh.f32 %v14632_v49 }
0x15e4   :  { %4548 = vrot.lane.b32.xlu1 %v12471_v30, %s13241_s27  ;;  %v12473_v22 = vpop.eup %12472  ;;  %v4304_v30 = vmul.f32 0.0, %v14617_v12 }
0x15e5   :  { %v12475_v35 = vpop.eup %12474 }
0x15e6   :  { %4318 = vrot.lane.b32.xlu0 %v4314_v10, %s13251_s5 }
0x15e7   :  { %v12477_v7 = vpop.eup %12476 }
0x15e8   :  { %4546 = vrot.lane.b32.xlu1 %v12473_v22, %s13241_s27  ;;  %v12479_v54 = vpop.eup %12478 }
0x15ea   :  { %4540 = vrot.lane.b32.xlu0 %v12475_v35, %s13241_s27 }
0x15eb   :  { %v12481_v40 = vpop.eup %12480 }
0x15ec   :  { %4552 = vrot.lane.b32.xlu1 %v12477_v7, %s13241_s27  ;;  %v12483_v59 = vpop.eup %12482 }
0x15ed   :  { %v12485_v4 = vpop.eup %12484 }
0x15ee   :  { %4544 = vrot.lane.b32.xlu0 %v12479_v54, %s13241_s27 }
0x15f0   :  { %4554 = vrot.lane.b32.xlu1 %v12481_v40, %s13241_s27 }
0x15f2   :  { %4550 = vrot.lane.b32.xlu0 %v12483_v59, %s13241_s27 }
0x15f6   :  { %4556 = vrot.lane.b32.xlu0 %v12485_v4, %s13241_s27 }
0x164e   :  { %v4539_v29 = vpop.permute.xlu1 %4538 }
0x164f   :  { %v4568_v63 = vmul.f32 %v14535_v45, %v4539_v29 }
0x1652   :  { %v4543_v25 = vpop.permute.xlu1 %4542 }
0x1653   :  { %v4570_v38 = vmul.f32 %v14548_v56, %v4543_v25 }
0x1654   :  { %v4321_v55 = vpop.permute.xlu0 %4320 }
0x1655   :  { %v14646_v13 = vadd.f32 %v4321_v55, %v4305_v16  ;;  %v4675_v7 = vrot.slane %v4570_v38, 6 }
0x1656   :  { %v4549_v19 = vpop.permute.xlu1 %4548 }
0x1657   :  { %v4573_v22 = vmul.f32 %v14559_v32, %v4549_v19  ;;  %12486 = vtanh.f32 %v14646_v13 }
0x1658   :  { %v4319_v6 = vpop.permute.xlu0 %4318 }
0x1659   :  { %v14653_v54 = vadd.f32 %v4319_v6, %v4304_v30  ;;  %v4684_v4 = vrot.slane %v4573_v22, 3 }
0x165a   :  { %v4547_v52 = vpop.permute.xlu1 %4546 }
0x165b   :  { %v4572_v10 = vmul.f32 %v14550_v43, %v4547_v52  ;;  %12488 = vtanh.f32 %v14653_v54 }
0x165c   :  { %v4541_v48 = vpop.permute.xlu0 %4540 }
0x165d   :  { %v4569_v47 = vmul.f32 %v14532_v24, %v4541_v48  ;;  %v4681_v40 = vrot.slane %v4572_v10, 4 }
0x165e   :  { %v4553_v24 = vpop.permute.xlu1 %4552 }
0x165f   :  { %v4673_v42 = vrot.slane %v4569_v47, 7  ;;  %v4575_v43 = vmul.f32 %v14569_v31, %v4553_v24 }
0x1660   :  { %v4545_v26 = vpop.permute.xlu0 %4544 }
0x1661   :  { %v4674_v35 = vsel %vm4581_vm15, %v4673_v42, %v4568_v63  ;;  %v4571_v56 = vmul.f32 %v14538_v61, %v4545_v26  ;;  %v4690_v6 = vrot.slane %v4575_v43, 1  ;;  %v12487_v42 = vpop.eup %12486 }
0x1662   :  { %v4677_v32 = vsel %vm4676_vm0, %v4675_v7, %v4674_v35  ;;  %v4555_v52 = vpop.permute.xlu1 %4554 }
0x1663   :  { %v4678_v45 = vrot.slane %v4571_v56, 5 }
0x1664   :  { %v4551_v59 = vpop.permute.xlu0 %4550 }
0x1665   :  { %v4680_v29 = vsel %vm4679_vm1, %v4678_v45, %v4677_v32  ;;  %v4574_v61 = vmul.f32 %v14564_v53, %v4551_v59  ;;  %v4576_v53 = vmul.f32 %v14577_v3, %v4555_v52  ;;  %v12489_v30 = vpop.eup %12488 }
0x1666   :  { %v4683_v25 = vsel %vm4682_vm3, %v4681_v40, %v4680_v29 }
0x1667   :  { %v4687_v55 = vrot.slane %v4574_v61, 2  ;;  %v4686_v19 = vsel %vm4685_vm4, %v4684_v4, %v4683_v25 }
0x1668   :  { %v4557_v31 = vpop.permute.xlu0 %4556 }
0x1669   :  { %v4577_v48 = vmul.f32 %v14572_v14, %v4557_v31  ;;  %v4689_v47 = vsel %vm4688_vm5, %v4687_v55, %v4686_v19 }
0x166a   :  { %v4692_v38 = vsel %vm4691_vm7, %v4690_v6, %v4689_v47 }
0x166b   :  { %v4693_v16 = vrot.slane %v4577_v48, 7  ;;  %4695 = vrot.lane.b32.xlu0 %v4692_v38, %s13251_s5 }
0x166d   :  { %v4694_v63 = vsel %vm4581_vm15, %v4693_v16, %v4576_v53 }
0x166e   :  { %4697 = vrot.lane.b32.xlu1 %v4694_v63, %s13251_s5 }
0x166f   :  { %4332 = vrot.lane.b32.xlu0 %v12487_v42, %s13241_s27 }
0x1672   :  { %4330 = vrot.lane.b32.xlu1 %v12489_v30, %s13241_s27 }
0x16dd   :  { %v4696_v14 = vpop.permute.xlu0 %4695 }
0x16de   :  { %11131 = vmatprep.mubr.msk.f32.mxu1 %vm386_vm6, %v4696_v14 }
0x16e0   :  { %v4698_v10 = vpop.permute.xlu1 %4697 }
0x16e1   :  { %v4333_v26 = vpop.permute.xlu0 %4332  ;;  %11132 = vmatmul.mubr.msk.f32.vlgmr.msra.gmra.mrb[72].mxu1 %vm386_vm6, %v4698_v10 }
0x16e2   :  { %v4337_v3 = vmul.f32 %v14605_v41, %v4333_v26  ;;  %11740 = vmatpush3.bf16.msra.mxu1 %v14421_v57 }
0x16e3   :  { %11742 = vmatprep.subr.bf16.mxu1 %v14463_v44 }
0x16e4   :  { %v4580_v22 = vrot.slane %v4337_v3, 7  ;;  %v4331_v35 = vpop.permute.xlu1 %4330 }
0x16e5   :  { %v4336_v24 = vmul.f32 %v14617_v12, %v4331_v35 }
0x16e6   :  { %11744 = vmatpush3.bf16.msra.mxu1 %v14463_v44 }
0x16e7   :  { %v4582_v56 = vsel %vm4581_vm15, %v4580_v22, %v4336_v24  ;;  %11752 = vmatprep.subr.bf16.mxu1 %v14421_v57 }
0x16e8   :  { %4583 = vrot.lane.b32.xlu0 %v4582_v56, %s13251_s5 }
0x175a   :  { %v4584_v7 = vpop.permute.xlu0 %4583 }
0x175b   :  { %11121 = vmatmul.mubr.msk.f32.vlgmr.msra.gmra.mrb[76].mxu0 %vm386_vm6, %v4584_v7 }
0x175c   :  { %11733 = vmatpush3.bf16.msra.mxu0 %v14403_v1  ;;  %11142 = vmatprep.mubr.msk.f32.mxu0 %vm13249_vm12, %v13250_v46 }
0x175d   :  { %11734 = vmatprep.subr.bf16.mxu0 %v13248_v11 }
0x1760   :  { %11736 = vmatpush3.bf16.msra.mxu0 %v14416_v27 }
0x1761   :  { %11745 = vmatprep.subr.bf16.mxu0 %v13248_v11 }
0x17b4   :  { %v11133_v41 = vpop.f32.mrb[72].mxu1 }
0x17b5   :  { %v4769_v12 = vpop.f32.mrb[73].mxu1  ;;  %v4787_v31 = vrot.slane %v11133_v41, 7  ;;  %v4807_v42 = vadd.f32 %v11133_v41, %v14517_v20 }
0x17b6   :  { %v4781_v45 = vrot.slane %v4769_v12, 1  ;;  %v4780_v40 = vrot.slane %v4769_v12, 7  ;;  %v4799_v43 = vadd.f32 %v4769_v12, %v14492_v36  ;;  %v4782_v32 = vrot.slane %v4769_v12, 2 }
0x17b7   :  { %v4783_v4 = vrot.slane %v4769_v12, 3  ;;  %v4784_v61 = vrot.slane %v4769_v12, 4  ;;  %v4785_v55 = vrot.slane %v4769_v12, 5  ;;  %v4786_v6 = vrot.slane %v4769_v12, 6 }
0x17b8   :  { %v4800_v59 = vadd.f32 %v4781_v45, %v14500_v0  ;;  %v4798_v29 = vadd.f32 %v4780_v40, %v14494_v15  ;;  %12490 = vtanh.f32 %v4799_v43  ;;  %v4801_v25 = vadd.f32 %v4782_v32, %v14498_v9 }
0x17b9   :  { %v4802_v19 = vadd.f32 %v4783_v4, %v14506_v21  ;;  %v4803_v52 = vadd.f32 %v4784_v61, %v14504_v60  ;;  %v4804_v48 = vadd.f32 %v4785_v55, %v14512_v33  ;;  %v4805_v38 = vadd.f32 %v4786_v6, %v14510_v34 }
0x17ba   :  { %12492 = vtanh.f32 %v4800_v59  ;;  %v4806_v16 = vadd.f32 %v4787_v31, %v14519_v8  ;;  %v10075_v24 = vmul.f32 -1.442695, %v4799_v43  ;;  %v10076_v56 = vmul.f32 -1.442695, %v4800_v59 }
0x17bb   :  { %12494 = vtanh.f32 %v4798_v29  ;;  %v10074_v7 = vmul.f32 -1.442695, %v4798_v29  ;;  %v10077_v41 = vmul.f32 -1.442695, %v4801_v25  ;;  %v10078_v12 = vmul.f32 -1.442695, %v4802_v19 }
0x17bc   :  { %12496 = vtanh.f32 %v4801_v25  ;;  %v10079_v45 = vmul.f32 -1.442695, %v4803_v52  ;;  %v10080_v32 = vmul.f32 -1.442695, %v4804_v48  ;;  %v10081_v43 = vmul.f32 -1.442695, %v4805_v38 }
0x17bd   :  { %12498 = vtanh.f32 %v4802_v19  ;;  %v10083_v25 = vmul.f32 -1.442695, %v4807_v42  ;;  %v10082_v31 = vmul.f32 -1.442695, %v4806_v16 }
0x17be   :  { %12500 = vtanh.f32 %v4803_v52 }
0x17bf   :  { %12502 = vtanh.f32 %v4804_v48 }
0x17c0   :  { %12504 = vtanh.f32 %v4805_v38 }
0x17c1   :  { %12506 = vtanh.f32 %v4806_v16 }
0x17c2   :  { %v12491_v47 = vpop.eup %12490  ;;  %12508 = vtanh.f32 %v4807_v42 }
0x17c3   :  { %4984 = vrot.lane.b32.xlu1 %v12491_v47, %s13241_s27  ;;  %12510 = vpow2.f32 %v10075_v24 }
0x17c4   :  { %v12493_v53 = vpop.eup %12492  ;;  %12512 = vpow2.f32 %v10076_v56 }
0x17c5   :  { %4986 = vrot.lane.b32.xlu0 %v12493_v53, %s13241_s27  ;;  %v12495_v63 = vpop.eup %12494  ;;  %12514 = vpow2.f32 %v10074_v7 }
0x17c6   :  { %v12497_v30 = vpop.eup %12496  ;;  %12516 = vpow2.f32 %v10077_v41 }
0x17c7   :  { %4982 = vrot.lane.b32.xlu1 %v12495_v63, %s13241_s27  ;;  %v12499_v14 = vpop.eup %12498  ;;  %12518 = vpow2.f32 %v10078_v12 }
0x17c8   :  { %v12501_v10 = vpop.eup %12500  ;;  %12520 = vpow2.f32 %v10079_v45 }
0x17c9   :  { %4988 = vrot.lane.b32.xlu0 %v12497_v30, %s13241_s27  ;;  %v12503_v26 = vpop.eup %12502 }
0x17ca   :  { %v12505_v3 = vpop.eup %12504 }
0x17cb   :  { %4990 = vrot.lane.b32.xlu1 %v12499_v14, %s13241_s27  ;;  %v12507_v22 = vpop.eup %12506 }
0x17cc   :  { %v12509_v35 = vpop.eup %12508 }
0x17cd   :  { %4992 = vrot.lane.b32.xlu0 %v12501_v10, %s13241_s27  ;;  %v12511_v6 = vpop.eup %12510 }
0x17ce   :  { %v12513_v29 = vpop.eup %12512  ;;  %v4893_v19 = vadd.f32 1.0, %v12511_v6 }
0x17cf   :  { %4994 = vrot.lane.b32.xlu1 %v12503_v26, %s13241_s27  ;;  %v12515_v52 = vpop.eup %12514  ;;  %v4894_v48 = vadd.f32 1.0, %v12513_v29 }
0x17d0   :  { %v12517_v47 = vpop.eup %12516  ;;  %v4892_v53 = vadd.f32 1.0, %v12515_v52 }
0x17d1   :  { %4996 = vrot.lane.b32.xlu0 %v12505_v3, %s13241_s27  ;;  %v12519_v38 = vpop.eup %12518  ;;  %v4895_v30 = vadd.f32 1.0, %v12517_v47 }
0x17d2   :  { %v12521_v63 = vpop.eup %12520  ;;  %v4896_v42 = vadd.f32 1.0, %v12519_v38 }
0x17d3   :  { %4998 = vrot.lane.b32.xlu1 %v12507_v22, %s13241_s27  ;;  %v4897_v16 = vadd.f32 1.0, %v12521_v63 }
0x17d5   :  { %5000 = vrot.lane.b32.xlu0 %v12509_v35, %s13241_s27 }
0x182e   :  { %v4653_v40 = vpop.f32.mrb[76].mxu0 }
0x182f   :  { %v4658_v4 = vrot.slane %v4653_v40, 7  ;;  %v14710_v61 = vadd.f32 %v4653_v40, %v14544_v58  ;;  %v11122_v55 = vpop.f32.mrb[77].mxu0 }
0x1831   :  { %v14713_v59 = vadd.f32 %v4658_v4, %v14555_v18  ;;  %12522 = vtanh.f32 %v14710_v61 }
0x1832   :  { %12524 = vpow2.f32 %v10080_v32 }
0x1833   :  { %12526 = vtanh.f32 %v14713_v59 }
0x1834   :  { %12528 = vpow2.f32 %v10081_v43 }
0x1835   :  { %12530 = vpow2.f32 %v10083_v25  ;;  %v4985_v56 = vpop.permute.xlu1 %4984 }
0x1836   :  { %12532 = vrcp.f32 %v4893_v19 }
0x1837   :  { %12534 = vpow2.f32 %v10082_v31  ;;  %v4987_v40 = vpop.permute.xlu0 %4986 }
0x1838   :  { %12536 = vrcp.f32 %v4894_v48 }
0x1839   :  { %12538 = vrcp.f32 %v4892_v53  ;;  %v4983_v43 = vpop.permute.xlu1 %4982 }
0x183a   :  { %12540 = vrcp.f32 %v4895_v30 }
0x183b   :  { %v12523_v14 = vpop.eup %12522  ;;  %12542 = vrcp.f32 %v4896_v42  ;;  %v4989_v19 = vpop.permute.xlu0 %4988 }
0x183c   :  { %4834 = vrot.lane.b32.xlu0 %v12523_v14, %s13241_s27  ;;  %v12525_v10 = vpop.eup %12524  ;;  %12544 = vrcp.f32 %v4897_v16 }
0x183d   :  { %v12527_v26 = vpop.eup %12526  ;;  %v4898_v35 = vadd.f32 1.0, %v12525_v10  ;;  %v4991_v48 = vpop.permute.xlu1 %4990 }
0x183e   :  { %v12529_v3 = vpop.eup %12528  ;;  %4832 = vrot.lane.b32.xlu1 %v12527_v26, %s13241_s27 }
0x183f   :  { %v12531_v22 = vpop.eup %12530  ;;  %v4899_v7 = vadd.f32 1.0, %v12529_v3  ;;  %12546 = vrcp.f32 %v4898_v35  ;;  %v4993_v38 = vpop.permute.xlu0 %4992 }
0x1840   :  { %v14719_v24 = vpop.eup %12532  ;;  %v4901_v32 = vadd.f32 1.0, %v12531_v22 }
0x1841   :  { %v12535_v41 = vpop.eup %12534  ;;  %v5013_v12 = vmul.f32 %v14719_v24, %v4985_v56  ;;  %12548 = vrcp.f32 %v4899_v7  ;;  %v4995_v30 = vpop.permute.xlu1 %4994 }
0x1842   :  { %v14722_v45 = vpop.eup %12536  ;;  %v4900_v6 = vadd.f32 1.0, %v12535_v41  ;;  %12550 = vrcp.f32 %v4901_v32 }
0x1843   :  { %v5014_v4 = vmul.f32 %v14722_v45, %v4987_v40  ;;  %5034 = vrot.lane.b32.xlu1 %v5013_v12, %s13251_s5  ;;  %v14726_v55 = vpop.eup %12538  ;;  %v4997_v10 = vpop.permute.xlu0 %4996  ;;  %v10073_v12 = vmul.f32 -1.442695, %v14710_v61  ;;  %v10072_v40 = vmul.f32 -1.442695, %v14713_v59  ;;  %v4943_v59 = vrot.slane %v14600_v2, 7 }
0x1844   :  { %v5012_v29 = vmul.f32 %v14726_v55, %v4983_v43  ;;  %v14730_v25 = vpop.eup %12540  ;;  %12552 = vrcp.f32 %v4900_v6 }
0x1845   :  { %5036 = vrot.lane.b32.xlu0 %v5014_v4, %s13251_s5  ;;  %v5015_v52 = vmul.f32 %v14730_v25, %v4989_v19  ;;  %v14734_v31 = vpop.eup %12542  ;;  %v4999_v3 = vpop.permute.xlu1 %4998  ;;  %12554 = vpow2.f32 %v10073_v12 }
0x1846   :  { %v5016_v47 = vmul.f32 %v14734_v31, %v4991_v48  ;;  %v14738_v53 = vpop.eup %12544  ;;  %12556 = vpow2.f32 %v10072_v40 }
0x1847   :  { %5032 = vrot.lane.b32.xlu1 %v5012_v29, %s13251_s5  ;;  %v5017_v63 = vmul.f32 %v14738_v53, %v4993_v38  ;;  %v5001_v56 = vpop.permute.xlu0 %5000  ;;  %v4944_v38 = vrot.slane %v14589_v5, 7  ;;  %v4946_v5 = vrot.slane %v14598_v28, 7 }
0x1849   :  { %5038 = vrot.lane.b32.xlu0 %v5015_v52, %s13251_s5  ;;  %v14742_v14 = vpop.eup %12546 }
0x184a   :  { %v5018_v26 = vmul.f32 %v14742_v14, %v4995_v30 }
0x184b   :  { %5040 = vrot.lane.b32.xlu1 %v5016_v47, %s13251_s5  ;;  %v14745_v42 = vpop.eup %12548 }
0x184c   :  { %v5019_v16 = vmul.f32 %v14745_v42, %v4997_v10  ;;  %v14749_v22 = vpop.eup %12550  ;;  %v4942_v10 = vrot.slane %v14585_v17, 7 }
0x184d   :  { %5042 = vrot.lane.b32.xlu0 %v5017_v63, %s13251_s5  ;;  %v5021_v41 = vmul.f32 %v14749_v22, %v5001_v56  ;;  %v4963_v63 = vmul.f32 %v14719_v24, %v4943_v59  ;;  %v4945_v56 = vrot.slane %v14611_v50, 7  ;;  %v4966_v50 = vmul.f32 %v14734_v31, %v4946_v5 }
0x184e   :  { %v14753_v35 = vpop.eup %12552  ;;  %v4962_v2 = vmul.f32 %v14726_v55, %v4942_v10 }
0x184f   :  { %5046 = vrot.lane.b32.xlu1 %v5019_v16, %s13251_s5  ;;  %v5020_v7 = vmul.f32 %v14753_v35, %v4999_v3  ;;  %v12555_v32 = vpop.eup %12554  ;;  %v4965_v17 = vmul.f32 %v14730_v25, %v4945_v56 }
0x1850   :  { %v12557_v4 = vpop.eup %12556  ;;  %v4815_v6 = vadd.f32 1.0, %v12555_v32  ;;  %v4947_v32 = vrot.slane %v14593_v39, 7 }
0x1851   :  { %5044 = vrot.lane.b32.xlu0 %v5018_v26, %s13251_s5  ;;  %v4814_v43 = vadd.f32 1.0, %v12557_v4  ;;  %v4964_v26 = vmul.f32 %v14722_v45, %v4944_v38 }
0x1852   :  { %12558 = vrcp.f32 %v4815_v6  ;;  %v4967_v28 = vmul.f32 %v14738_v53, %v4947_v32 }
0x1853   :  { %5048 = vrot.lane.b32.xlu1 %v5020_v7, %s13251_s5  ;;  %12560 = vrcp.f32 %v4814_v43 }
0x1855   :  { %5050 = vrot.lane.b32.xlu0 %v5021_v41, %s13251_s5 }
0x185c   :  { %v14761_v29 = vpop.eup %12558 }
0x185d   :  { %v14764_v48 = vpop.eup %12560 }
0x18ae   :  { %v4835_v19 = vpop.permute.xlu0 %4834 }
0x18af   :  { %v4839_v52 = vmul.f32 %v14761_v29, %v4835_v19 }
0x18b0   :  { %v4833_v47 = vpop.permute.xlu1 %4832 }
0x18b1   :  { %4844 = vrot.lane.b32.xlu0 %v4839_v52, %s13251_s5  ;;  %v4838_v61 = vmul.f32 %v14764_v48, %v4833_v47  ;;  %v4948_v52 = vrot.slane %v14624_v62, 7  ;;  %v4949_v47 = vrot.slane %v14608_v37, 7  ;;  %v4951_v62 = vrot.slane %v14632_v49, 7 }
0x18b2   :  { %v4950_v37 = vrot.slane %v14620_v23, 7 }
0x18b3   :  { %4842 = vrot.lane.b32.xlu1 %v4838_v61, %s13251_s5  ;;  %v4968_v59 = vmul.f32 %v14742_v14, %v4948_v52  ;;  %v4969_v38 = vmul.f32 %v14745_v42, %v4949_v47  ;;  %v4825_v47 = vrot.slane %v14646_v13, 7 }
0x18b5   :  { %v5035_v30 = vpop.permute.xlu1 %5034 }
0x18b6   :  { %v14774_v16 = vadd.f32 %v5035_v30, %v4963_v63 }
0x18b7   :  { %v5037_v3 = vpop.permute.xlu0 %5036 }
0x18b8   :  { %v14777_v7 = vadd.f32 %v5037_v3, %v4964_v26  ;;  %12562 = vtanh.f32 %v14774_v16 }
0x18b9   :  { %v5033_v41 = vpop.permute.xlu1 %5032 }
0x18ba   :  { %12564 = vtanh.f32 %v14777_v7  ;;  %v14784_v12 = vadd.f32 %v5033_v41, %v4962_v2  ;;  %v4971_v2 = vmul.f32 %v14749_v22, %v4951_v62  ;;  %v4970_v41 = vmul.f32 %v14753_v35, %v4950_v37 }
0x18bb   :  { %v5039_v40 = vpop.permute.xlu0 %5038 }
0x18bc   :  { %v14787_v4 = vadd.f32 %v5039_v40, %v4965_v17  ;;  %12566 = vtanh.f32 %v14784_v12 }
0x18bd   :  { %v5041_v6 = vpop.permute.xlu1 %5040 }
0x18be   :  { %12568 = vtanh.f32 %v14787_v4  ;;  %v14793_v43 = vadd.f32 %v5041_v6, %v4966_v50 }
0x18bf   :  { %v5043_v19 = vpop.permute.xlu0 %5042 }
0x18c0   :  { %v14797_v61 = vadd.f32 %v5043_v19, %v4967_v28  ;;  %12570 = vtanh.f32 %v14793_v43 }
0x18c1   :  { %v5047_v30 = vpop.permute.xlu1 %5046 }
0x18c2   :  { %v12563_v39 = vpop.eup %12562  ;;  %12572 = vtanh.f32 %v14797_v61  ;;  %v14808_v3 = vadd.f32 %v5047_v30, %v4969_v38 }
0x18c3   :  { %v5045_v63 = vpop.permute.xlu0 %5044  ;;  %5094 = vrot.lane.b32.xlu1 %v12563_v39, %s13241_s27  ;;  %v4829_v39 = vmul.f32 %v14761_v29, %v4825_v47 }
0x18c4   :  { %v12565_v10 = vpop.eup %12564  ;;  %v14806_v26 = vadd.f32 %v5045_v63, %v4968_v59  ;;  %v4824_v59 = vrot.slane %v14653_v54, 7 }
0x18c5   :  { %5096 = vrot.lane.b32.xlu0 %v12565_v10, %s13241_s27  ;;  %v5049_v17 = vpop.permute.xlu1 %5048 }
0x18c6   :  { %v12567_v56 = vpop.eup %12566  ;;  %12574 = vtanh.f32 %v14806_v26  ;;  %v14818_v40 = vadd.f32 %v5049_v17, %v4970_v41  ;;  %v4828_v30 = vmul.f32 %v14764_v48, %v4824_v59 }
0x18c7   :  { %12576 = vtanh.f32 %v14808_v3  ;;  %v5051_v5 = vpop.permute.xlu0 %5050  ;;  %5092 = vrot.lane.b32.xlu1 %v12567_v56, %s13241_s27 }
0x18c8   :  { %v12569_v23 = vpop.eup %12568  ;;  %v14816_v49 = vadd.f32 %v5051_v5, %v4971_v2 }
0x18c9   :  { %5098 = vrot.lane.b32.xlu0 %v12569_v23, %s13241_s27 }
0x18ca   :  { %v12571_v32 = vpop.eup %12570  ;;  %12578 = vtanh.f32 %v14816_v49 }
0x18cb   :  { %12580 = vtanh.f32 %v14818_v40  ;;  %5100 = vrot.lane.b32.xlu1 %v12571_v32, %s13241_s27 }
0x18cc   :  { %v12573_v50 = vpop.eup %12572 }
0x18cd   :  { %5102 = vrot.lane.b32.xlu0 %v12573_v50, %s13241_s27 }
0x18d0   :  { %v12575_v6 = vpop.eup %12574 }
0x18d1   :  { %v12577_v28 = vpop.eup %12576  ;;  %5104 = vrot.lane.b32.xlu1 %v12575_v6, %s13241_s27 }
0x18d2   :  { %5106 = vrot.lane.b32.xlu0 %v12577_v28, %s13241_s27 }
0x18d4   :  { %v12579_v19 = vpop.eup %12578 }
0x18d5   :  { %v12581_v52 = vpop.eup %12580 }
0x18d6   :  { %5110 = vrot.lane.b32.xlu0 %v12579_v19, %s13241_s27  ;;  %5108 = vrot.lane.b32.xlu1 %v12581_v52, %s13241_s27 }
0x1923   :  { %v4845_v38 = vpop.permute.xlu0 %4844 }
0x1924   :  { %v14832_v63 = vadd.f32 %v4845_v38, %v4829_v39 }
0x1925   :  { %v4843_v10 = vpop.permute.xlu1 %4842 }
0x1926   :  { %12582 = vtanh.f32 %v14832_v63  ;;  %v14836_v62 = vadd.f32 %v4843_v10, %v4828_v30 }
0x1928   :  { %12584 = vtanh.f32 %v14836_v62 }
0x1930   :  { %v12583_v37 = vpop.eup %12582 }
0x1931   :  { %4856 = vrot.lane.b32.xlu0 %v12583_v37, %s13241_s27 }
0x1932   :  { %v12585_v13 = vpop.eup %12584 }
0x1933   :  { %4854 = vrot.lane.b32.xlu1 %v12585_v13, %s13241_s27 }
0x1935   :  { %v5095_v56 = vpop.permute.xlu1 %5094 }
0x1936   :  { %v5123_v23 = vmul.f32 %v14719_v24, %v5095_v56 }
0x1937   :  { %v5097_v54 = vpop.permute.xlu0 %5096 }
0x1938   :  { %v5124_v2 = vmul.f32 %v14722_v45, %v5097_v54 }
0x1939   :  { %v5093_v41 = vpop.permute.xlu1 %5092 }
0x193a   :  { %v5122_v5 = vmul.f32 %v14726_v55, %v5093_v41  ;;  %v5229_v6 = vrot.slane %v5124_v2, 7 }
0x193b   :  { %v5099_v17 = vpop.permute.xlu0 %5098 }
0x193c   :  { %v5125_v32 = vmul.f32 %v14730_v25, %v5099_v17  ;;  %v5227_v50 = vrot.slane %v5122_v5, 1 }
0x193d   :  { %v5101_v28 = vpop.permute.xlu1 %5100 }
0x193e   :  { %v5228_v19 = vsel %vm4581_vm15, %v5123_v23, %v5227_v50  ;;  %v5126_v52 = vmul.f32 %v14734_v31, %v5101_v28  ;;  %v5231_v47 = vrot.slane %v5125_v32, 6 }
0x193f   :  { %v5230_v39 = vsel %vm4676_vm0, %v5229_v6, %v5228_v19  ;;  %v5103_v59 = vpop.permute.xlu0 %5102 }
0x1940   :  { %v5233_v45 = vrot.slane %v5126_v52, 5  ;;  %v5127_v38 = vmul.f32 %v14738_v53, %v5103_v59  ;;  %v5232_v55 = vsel %vm4679_vm1, %v5231_v47, %v5230_v39 }
0x1942   :  { %v5234_v24 = vsel %vm4682_vm3, %v5233_v45, %v5232_v55  ;;  %v5235_v37 = vrot.slane %v5127_v38, 4 }
0x1943   :  { %v5105_v30 = vpop.permute.xlu1 %5104 }
0x1944   :  { %v5107_v25 = vpop.permute.xlu0 %5106  ;;  %v5128_v10 = vmul.f32 %v14742_v14, %v5105_v30  ;;  %v5236_v54 = vsel %vm4685_vm4, %v5235_v37, %v5234_v24 }
0x1945   :  { %v5129_v13 = vmul.f32 %v14745_v42, %v5107_v25 }
0x1946   :  { %v5237_v56 = vrot.slane %v5128_v10, 3 }
0x1947   :  { %v5239_v31 = vrot.slane %v5129_v13, 2 }
0x1948   :  { %v5111_v2 = vpop.permute.xlu0 %5110  ;;  %v5109_v41 = vpop.permute.xlu1 %5108  ;;  %v5238_v5 = vsel %vm4688_vm5, %v5237_v56, %v5236_v54 }
0x1949   :  { %v5130_v53 = vmul.f32 %v14753_v35, %v5109_v41  ;;  %v5240_v17 = vsel %vm4691_vm7, %v5239_v31, %v5238_v5  ;;  %v5131_v23 = vmul.f32 %v14749_v22, %v5111_v2 }
0x194a   :  { %5243 = vrot.lane.b32.xlu1 %v5240_v17, %s13251_s5 }
0x194b   :  { %v5241_v14 = vrot.slane %v5130_v53, 1 }
0x194d   :  { %v5242_v32 = vsel %vm4581_vm15, %v5131_v23, %v5241_v14 }
0x194e   :  { %5245 = vrot.lane.b32.xlu0 %v5242_v32, %s13251_s5 }
0x19a3   :  { %v4857_v42 = vpop.permute.xlu0 %4856 }
0x19a4   :  { %v4861_v28 = vmul.f32 %v14761_v29, %v4857_v42 }
0x19a5   :  { %v4855_v50 = vpop.permute.xlu1 %4854 }
0x19a6   :  { %v4860_v6 = vmul.f32 %v14764_v48, %v4855_v50 }
0x19a8   :  { %v5134_v19 = vrot.slane %v4860_v6, 1 }
0x19aa   :  { %v5135_v35 = vsel %vm4581_vm15, %v4861_v28, %v5134_v19 }
0x19ab   :  { %5136 = vrot.lane.b32.xlu1 %v5135_v35, %s13251_s5 }
0x19bc   :  { %v5244_v52 = vpop.permute.xlu1 %5243 }
0x19bd   :  { %11153 = vmatprep.mubr.msk.f32.mxu1 %vm386_vm6, %v5244_v52 }
0x19c0   :  { %v5246_v22 = vpop.permute.xlu0 %5245 }
0x19c1   :  { %11154 = vmatmul.mubr.msk.f32.vlgmr.msra.gmra.mrb[74].mxu1 %vm386_vm6, %v5246_v22 }
0x19c2   :  { %11754 = vmatpush3.bf16.msra.mxu1 %v14421_v57 }
0x19c3   :  { %11756 = vmatprep.subr.bf16.mxu1 %v14463_v44 }
0x19c6   :  { %11758 = vmatpush3.bf16.msra.mxu1 %v14463_v44 }
0x19c7   :  { %11766 = vmatprep.subr.bf16.mxu1 %v14421_v57 }
0x1a1d   :  { %v5137_v29 = vpop.permute.xlu1 %5136 }
0x1a1e   :  { %11143 = vmatmul.mubr.msk.f32.vlgmr.msra.gmra.mrb[78].mxu0 %vm386_vm6, %v5137_v29 }
0x1a1f   :  { %11747 = vmatpush3.bf16.msra.mxu0 %v14403_v1  ;;  %11164 = vmatprep.mubr.msk.f32.mxu0 %vm13249_vm12, %v13250_v46 }
0x1a20   :  { %11748 = vmatprep.subr.bf16.mxu0 %v13248_v11 }
0x1a23   :  { %11750 = vmatpush3.bf16.msra.mxu0 %v14416_v27 }
0x1a24   :  { %11759 = vmatprep.subr.bf16.mxu0 %v13248_v11 }
0x1a94   :  { %v11155_v48 = vpop.f32.mrb[74].mxu1 }
0x1a95   :  { %v5317_v47 = vpop.f32.mrb[75].mxu1  ;;  %v5335_v54 = vrot.slane %v11155_v48, 6  ;;  %v5336_v5 = vrot.slane %v11155_v48, 7 }
0x1a96   :  { %v5328_v39 = vrot.slane %v5317_v47, 6  ;;  %v5330_v45 = vrot.slane %v5317_v47, 1  ;;  %v5329_v38 = vrot.slane %v5317_v47, 7  ;;  %v5349_v55 = vadd.f32 %v5317_v47, %v14500_v0 }
0x1a97   :  { %v5331_v30 = vrot.slane %v5317_v47, 2  ;;  %v5332_v25 = vrot.slane %v5317_v47, 3  ;;  %v5333_v37 = vrot.slane %v5317_v47, 4  ;;  %v5334_v56 = vrot.slane %v5317_v47, 5 }
0x1a98   :  { %v5347_v59 = vadd.f32 %v5328_v39, %v14494_v15  ;;  %v5350_v24 = vadd.f32 %v5330_v45, %v14498_v9  ;;  %v5348_v10 = vadd.f32 %v5329_v38, %v14492_v36  ;;  %v5355_v23 = vadd.f32 %v5335_v54, %v14519_v8 }
0x1a99   :  { %v5351_v13 = vadd.f32 %v5331_v30, %v14506_v21  ;;  %v5352_v31 = vadd.f32 %v5332_v25, %v14504_v60  ;;  %v5353_v2 = vadd.f32 %v5333_v37, %v14512_v33  ;;  %v5354_v53 = vadd.f32 %v5334_v56, %v14510_v34 }
0x1a9a   :  { %12586 = vtanh.f32 %v5347_v59  ;;  %v5356_v14 = vadd.f32 %v5336_v5, %v14517_v20  ;;  %v10089_v25 = vmul.f32 -1.442695, %v5347_v59  ;;  %v10091_v37 = vmul.f32 -1.442695, %v5349_v55 }
0x1a9b   :  { %12588 = vtanh.f32 %v5349_v55  ;;  %v10092_v56 = vmul.f32 -1.442695, %v5350_v24  ;;  %v10090_v54 = vmul.f32 -1.442695, %v5348_v10  ;;  %v10094_v5 = vmul.f32 -1.442695, %v5352_v31 }
0x1a9c   :  { %12590 = vtanh.f32 %v5350_v24 }
0x1a9d   :  { %12592 = vtanh.f32 %v5348_v10 }
0x1a9e   :  { %12594 = vtanh.f32 %v5351_v13 }
0x1a9f   :  { %12596 = vtanh.f32 %v5352_v31 }
0x1aa0   :  { %12598 = vtanh.f32 %v5353_v2 }
0x1aa1   :  { %12600 = vtanh.f32 %v5354_v53 }
0x1aa2   :  { %12602 = vtanh.f32 %v5355_v23 }
0x1aa3   :  { %12604 = vtanh.f32 %v5356_v14 }
0x1aa4   :  { %v12587_v41 = vpop.eup %12586 }
0x1aa5   :  { %5531 = vrot.lane.b32.xlu0 %v12587_v41, %s13241_s27  ;;  %v12589_v17 = vpop.eup %12588  ;;  %v10093_v41 = vmul.f32 -1.442695, %v5351_v13 }
0x1aa6   :  { %5535 = vrot.lane.b32.xlu1 %v12589_v17, %s13241_s27  ;;  %v12591_v32 = vpop.eup %12590  ;;  %v10095_v17 = vmul.f32 -1.442695, %v5353_v2 }
0x1aa7   :  { %v12593_v42 = vpop.eup %12592 }
0x1aa8   :  { %v12595_v50 = vpop.eup %12594 }
0x1aa9   :  { %5537 = vrot.lane.b32.xlu0 %v12591_v32, %s13241_s27  ;;  %v12597_v6 = vpop.eup %12596 }
0x1aaa   :  { %5533 = vrot.lane.b32.xlu1 %v12593_v42, %s13241_s27  ;;  %v12599_v28 = vpop.eup %12598  ;;  %v10096_v42 = vmul.f32 -1.442695, %v5354_v53 }
0x1aab   :  { %v12601_v19 = vpop.eup %12600 }
0x1aac   :  { %v12603_v35 = vpop.eup %12602 }
0x1aad   :  { %5539 = vrot.lane.b32.xlu0 %v12595_v50, %s13241_s27  ;;  %v12605_v52 = vpop.eup %12604 }
0x1aae   :  { %5541 = vrot.lane.b32.xlu1 %v12597_v6, %s13241_s27  ;;  %v10097_v6 = vmul.f32 -1.442695, %v5355_v23 }
0x1ab1   :  { %5543 = vrot.lane.b32.xlu0 %v12599_v28, %s13241_s27 }
0x1ab2   :  { %5545 = vrot.lane.b32.xlu1 %v12601_v19, %s13241_s27  ;;  %v10098_v19 = vmul.f32 -1.442695, %v5356_v14 }
0x1ab5   :  { %5547 = vrot.lane.b32.xlu0 %v12603_v35, %s13241_s27 }
0x1ab6   :  { %5549 = vrot.lane.b32.xlu1 %v12605_v52, %s13241_s27 }
0x1af1   :  { %v5206_v22 = vpop.f32.mrb[78].mxu0 }
0x1af2   :  { %v5211_v29 = vrot.slane %v5206_v22, 6  ;;  %v5212_v48 = vrot.slane %v5206_v22, 7  ;;  %v11144_v47 = vpop.f32.mrb[79].mxu0 }
0x1af4   :  { %v14899_v39 = vadd.f32 %v5211_v29, %v14555_v18  ;;  %v14902_v45 = vadd.f32 %v5212_v48, %v14544_v58 }
0x1af6   :  { %12606 = vtanh.f32 %v14899_v39 }
0x1af7   :  { %12608 = vtanh.f32 %v14902_v45 }
0x1af8   :  { %12610 = vpow2.f32 %v10089_v25 }
0x1af9   :  { %12612 = vpow2.f32 %v10091_v37 }
0x1afa   :  { %12614 = vpow2.f32 %v10092_v56 }
0x1afb   :  { %12616 = vpow2.f32 %v10090_v54 }
0x1afc   :  { %12618 = vpow2.f32 %v10093_v41 }
0x1afd   :  { %12620 = vpow2.f32 %v10094_v5 }
0x1afe   :  { %12622 = vpow2.f32 %v10095_v17 }
0x1aff   :  { %12624 = vpow2.f32 %v10096_v42 }
0x1b00   :  { %v12607_v38 = vpop.eup %12606  ;;  %12626 = vpow2.f32 %v10097_v6 }
0x1b01   :  { %v12609_v30 = vpop.eup %12608  ;;  %5381 = vrot.lane.b32.xlu0 %v12607_v38, %s13241_s27 }
0x1b02   :  { %5383 = vrot.lane.b32.xlu1 %v12609_v30, %s13241_s27  ;;  %v12611_v32 = vpop.eup %12610 }
0x1b03   :  { %v12613_v50 = vpop.eup %12612  ;;  %v5441_v28 = vadd.f32 1.0, %v12611_v32 }
0x1b04   :  { %v12615_v59 = vpop.eup %12614  ;;  %v5443_v55 = vadd.f32 1.0, %v12613_v50 }
0x1b05   :  { %v12617_v24 = vpop.eup %12616  ;;  %12628 = vrcp.f32 %v5441_v28  ;;  %v5444_v10 = vadd.f32 1.0, %v12615_v59 }
0x1b06   :  { %12630 = vpow2.f32 %v10098_v19  ;;  %v12619_v13 = vpop.eup %12618  ;;  %v5442_v31 = vadd.f32 1.0, %v12617_v24 }
0x1b07   :  { %12632 = vrcp.f32 %v5443_v55  ;;  %v12621_v2 = vpop.eup %12620  ;;  %v5445_v35 = vadd.f32 1.0, %v12619_v13 }
0x1b08   :  { %12634 = vrcp.f32 %v5444_v10  ;;  %v12623_v53 = vpop.eup %12622  ;;  %v5446_v23 = vadd.f32 1.0, %v12621_v2 }
0x1b09   :  { %12636 = vrcp.f32 %v5442_v31  ;;  %v12625_v52 = vpop.eup %12624  ;;  %v5447_v14 = vadd.f32 1.0, %v12623_v53 }
0x1b0a   :  { %v12627_v22 = vpop.eup %12626  ;;  %12638 = vrcp.f32 %v5445_v35  ;;  %v5448_v47 = vadd.f32 1.0, %v12625_v52 }
0x1b0b   :  { %12640 = vrcp.f32 %v5446_v23  ;;  %v5449_v56 = vadd.f32 1.0, %v12627_v22 }
0x1b0c   :  { %12642 = vrcp.f32 %v5447_v14 }
0x1b0d   :  { %12644 = vrcp.f32 %v5448_v47 }
0x1b0e   :  { %12646 = vrcp.f32 %v5449_v56 }
0x1b0f   :  { %v14908_v29 = vpop.eup %12628 }
0x1b10   :  { %v12631_v38 = vpop.eup %12630 }
0x1b11   :  { %v14911_v25 = vpop.eup %12632  ;;  %v5450_v41 = vadd.f32 1.0, %v12631_v38 }
0x1b12   :  { %v14915_v5 = vpop.eup %12634 }
0x1b13   :  { %v14918_v32 = vpop.eup %12636  ;;  %12648 = vrcp.f32 %v5450_v41 }
0x1b14   :  { %v14923_v28 = vpop.eup %12638 }
0x1b15   :  { %v14926_v59 = vpop.eup %12640 }
0x1b16   :  { %v14931_v13 = vpop.eup %12642 }
0x1b17   :  { %v5532_v48 = vpop.permute.xlu0 %5531  ;;  %v14934_v2 = vpop.eup %12644 }
0x1b18   :  { %v5561_v30 = vmul.f32 %v14908_v29, %v5532_v48  ;;  %v5536_v37 = vpop.permute.xlu1 %5535  ;;  %v14939_v52 = vpop.eup %12646 }
0x1b19   :  { %v5563_v54 = vmul.f32 %v14911_v25, %v5536_v37  ;;  %v10088_v37 = vmul.f32 -1.442695, %v14902_v45  ;;  %v5491_v45 = vrot.slane %v14784_v12, 7 }
0x1b1a   :  { %5581 = vrot.lane.b32.xlu0 %v5561_v30, %s13251_s5  ;;  %v10087_v30 = vmul.f32 -1.442695, %v14899_v39 }
0x1b1b   :  { %5585 = vrot.lane.b32.xlu1 %v5563_v54, %s13251_s5  ;;  %v5538_v17 = vpop.permute.xlu0 %5537 }
0x1b1c   :  { %v5534_v42 = vpop.permute.xlu1 %5533  ;;  %v5564_v50 = vmul.f32 %v14915_v5, %v5538_v17  ;;  %12650 = vpow2.f32 %v10087_v30  ;;  %v5495_v30 = vrot.slane %v14793_v43, 7 }
0x1b1d   :  { %v5562_v6 = vmul.f32 %v14918_v32, %v5534_v42  ;;  %v14942_v14 = vpop.eup %12648  ;;  %12652 = vpow2.f32 %v10088_v37 }
0x1b1e   :  { %5587 = vrot.lane.b32.xlu0 %v5564_v50, %s13251_s5 }
0x1b1f   :  { %5583 = vrot.lane.b32.xlu1 %v5562_v6, %s13251_s5  ;;  %v5540_v19 = vpop.permute.xlu0 %5539 }
0x1b20   :  { %v5542_v55 = vpop.permute.xlu1 %5541  ;;  %v5565_v24 = vmul.f32 %v14923_v28, %v5540_v19 }
0x1b21   :  { %v5566_v10 = vmul.f32 %v14926_v59, %v5542_v55 }
0x1b22   :  { %5589 = vrot.lane.b32.xlu0 %v5565_v24, %s13251_s5  ;;  %v5493_v24 = vrot.slane %v14777_v7, 7 }
0x1b23   :  { %5591 = vrot.lane.b32.xlu1 %v5566_v10, %s13251_s5  ;;  %v5544_v31 = vpop.permute.xlu0 %5543  ;;  %v5511_v10 = vmul.f32 %v14908_v29, %v5491_v45 }
0x1b24   :  { %v5546_v35 = vpop.permute.xlu1 %5545  ;;  %v5567_v53 = vmul.f32 %v14931_v13, %v5544_v31 }
0x1b25   :  { %v5568_v23 = vmul.f32 %v14934_v2, %v5546_v35  ;;  %v5513_v35 = vmul.f32 %v14911_v25, %v5493_v24 }
0x1b26   :  { %5593 = vrot.lane.b32.xlu0 %v5567_v53, %s13251_s5  ;;  %v12651_v56 = vpop.eup %12650 }
0x1b27   :  { %5595 = vrot.lane.b32.xlu1 %v5568_v23, %s13251_s5  ;;  %v5548_v22 = vpop.permute.xlu0 %5547  ;;  %v12653_v54 = vpop.eup %12652  ;;  %v5363_v41 = vadd.f32 1.0, %v12651_v56  ;;  %v5494_v23 = vrot.slane %v14787_v4, 7  ;;  %v5496_v4 = vrot.slane %v14797_v61, 7 }
0x1b28   :  { %v5550_v48 = vpop.permute.xlu1 %5549  ;;  %v5569_v47 = vmul.f32 %v14939_v52, %v5548_v22  ;;  %v5364_v17 = vadd.f32 1.0, %v12653_v54 }
0x1b29   :  { %v5570_v38 = vmul.f32 %v14942_v14, %v5550_v48  ;;  %12654 = vrcp.f32 %v5363_v41  ;;  %v5492_v48 = vrot.slane %v14774_v16, 7  ;;  %v5514_v12 = vmul.f32 %v14915_v5, %v5494_v23 }
0x1b2a   :  { %5597 = vrot.lane.b32.xlu0 %v5569_v47, %s13251_s5  ;;  %12656 = vrcp.f32 %v5364_v17  ;;  %v5515_v16 = vmul.f32 %v14923_v28, %v5495_v30  ;;  %v5516_v41 = vmul.f32 %v14926_v59, %v5496_v4  ;;  %v5500_v23 = vrot.slane %v14816_v49, 7 }
0x1b2b   :  { %5599 = vrot.lane.b32.xlu1 %v5570_v38, %s13251_s5  ;;  %v5512_v7 = vmul.f32 %v14918_v32, %v5492_v48 }
0x1b33   :  { %v14950_v42 = vpop.eup %12654 }
0x1b34   :  { %v14952_v6 = vpop.eup %12656 }
0x1b73   :  { %v5382_v50 = vpop.permute.xlu0 %5381 }
0x1b74   :  { %v5387_v19 = vmul.f32 %v14950_v42, %v5382_v50  ;;  %v5384_v55 = vpop.permute.xlu1 %5383  ;;  %v5497_v50 = vrot.slane %v14806_v26, 7 }
0x1b75   :  { %v5388_v39 = vmul.f32 %v14952_v6, %v5384_v55  ;;  %v5498_v55 = vrot.slane %v14808_v3, 7 }
0x1b76   :  { %5391 = vrot.lane.b32.xlu0 %v5387_v19, %s13251_s5  ;;  %v5517_v61 = vmul.f32 %v14931_v13, %v5497_v50 }
0x1b77   :  { %5393 = vrot.lane.b32.xlu1 %v5388_v39, %s13251_s5  ;;  %v5518_v24 = vmul.f32 %v14934_v2, %v5498_v55  ;;  %v5373_v55 = vrot.slane %v14836_v62, 7 }
0x1b8c   :  { %v5582_v31 = vpop.permute.xlu0 %5581 }
0x1b8d   :  { %v14962_v53 = vadd.f32 %v5582_v31, %v5511_v10  ;;  %v5586_v22 = vpop.permute.xlu1 %5585  ;;  %v5499_v31 = vrot.slane %v14818_v40, 7  ;;  %v5520_v40 = vmul.f32 %v14942_v14, %v5500_v23 }
0x1b8e   :  { %v14966_v47 = vadd.f32 %v5586_v22, %v5513_v35 }
0x1b8f   :  { %12658 = vtanh.f32 %v14962_v53  ;;  %v5519_v48 = vmul.f32 %v14939_v52, %v5499_v31 }
0x1b90   :  { %12660 = vtanh.f32 %v14966_v47  ;;  %v5588_v38 = vpop.permute.xlu0 %5587 }
0x1b91   :  { %v5584_v37 = vpop.permute.xlu1 %5583  ;;  %v14973_v56 = vadd.f32 %v5588_v38, %v5514_v12 }
0x1b92   :  { %v14976_v54 = vadd.f32 %v5584_v37, %v5512_v7 }
0x1b93   :  { %12662 = vtanh.f32 %v14973_v56 }
0x1b94   :  { %12664 = vtanh.f32 %v14976_v54  ;;  %v5590_v17 = vpop.permute.xlu0 %5589 }
0x1b95   :  { %v5592_v19 = vpop.permute.xlu1 %5591  ;;  %v14983_v43 = vadd.f32 %v5590_v17, %v5515_v16 }
0x1b96   :  { %v14986_v39 = vadd.f32 %v5592_v19, %v5516_v41 }
0x1b97   :  { %12666 = vtanh.f32 %v14983_v43 }
0x1b98   :  { %12668 = vtanh.f32 %v14986_v39  ;;  %v5594_v10 = vpop.permute.xlu0 %5593 }
0x1b99   :  { %v12659_v45 = vpop.eup %12658  ;;  %v5596_v26 = vpop.permute.xlu1 %5595  ;;  %v14993_v35 = vadd.f32 %v5594_v10, %v5517_v61  ;;  %v5374_v61 = vrot.slane %v14832_v63, 7 }
0x1b9a   :  { %5641 = vrot.lane.b32.xlu0 %v12659_v45, %s13241_s27  ;;  %v12661_v3 = vpop.eup %12660  ;;  %v14997_v22 = vadd.f32 %v5596_v26, %v5518_v24  ;;  %v5377_v45 = vmul.f32 %v14950_v42, %v5373_v55 }
0x1b9b   :  { %12670 = vtanh.f32 %v14993_v35  ;;  %5645 = vrot.lane.b32.xlu1 %v12661_v3, %s13241_s27  ;;  %v5378_v10 = vmul.f32 %v14952_v6, %v5374_v61 }
0x1b9c   :  { %12672 = vtanh.f32 %v14997_v22  ;;  %v5598_v12 = vpop.permute.xlu0 %5597 }
0x1b9d   :  { %v12663_v7 = vpop.eup %12662  ;;  %v5600_v38 = vpop.permute.xlu1 %5599  ;;  %v15004_v30 = vadd.f32 %v5598_v12, %v5519_v48 }
0x1b9e   :  { %v12665_v37 = vpop.eup %12664  ;;  %v15006_v4 = vadd.f32 %v5600_v38, %v5520_v40  ;;  %5647 = vrot.lane.b32.xlu0 %v12663_v7, %s13241_s27 }
0x1b9f   :  { %12674 = vtanh.f32 %v15004_v30  ;;  %5643 = vrot.lane.b32.xlu1 %v12665_v37, %s13241_s27 }
0x1ba0   :  { %12676 = vtanh.f32 %v15006_v4 }
0x1ba1   :  { %v12667_v49 = vpop.eup %12666 }
0x1ba2   :  { %v12669_v16 = vpop.eup %12668  ;;  %5649 = vrot.lane.b32.xlu0 %v12667_v49, %s13241_s27 }
0x1ba3   :  { %5651 = vrot.lane.b32.xlu1 %v12669_v16, %s13241_s27 }
0x1ba5   :  { %v12671_v41 = vpop.eup %12670 }
0x1ba6   :  { %v12673_v17 = vpop.eup %12672  ;;  %5653 = vrot.lane.b32.xlu0 %v12671_v41, %s13241_s27 }
0x1ba7   :  { %5655 = vrot.lane.b32.xlu1 %v12673_v17, %s13241_s27 }
0x1ba9   :  { %v12675_v50 = vpop.eup %12674 }
0x1baa   :  { %v12677_v19 = vpop.eup %12676  ;;  %5657 = vrot.lane.b32.xlu0 %v12675_v50, %s13241_s27 }
0x1bab   :  { %5659 = vrot.lane.b32.xlu1 %v12677_v19, %s13241_s27 }
0x1be8   :  { %v5392_v24 = vpop.permute.xlu0 %5391 }
0x1be9   :  { %v15022_v31 = vadd.f32 %v5392_v24, %v5377_v45  ;;  %v5394_v26 = vpop.permute.xlu1 %5393 }
0x1bea   :  { %v15024_v3 = vadd.f32 %v5394_v26, %v5378_v10 }
0x1beb   :  { %12678 = vtanh.f32 %v15022_v31 }
0x1bec   :  { %12680 = vtanh.f32 %v15024_v3 }
0x1bf5   :  { %v12679_v23 = vpop.eup %12678 }
0x1bf6   :  { %v12681_v48 = vpop.eup %12680  ;;  %5403 = vrot.lane.b32.xlu0 %v12679_v23, %s13241_s27 }
0x1bf7   :  { %5405 = vrot.lane.b32.xlu1 %v12681_v48, %s13241_s27 }
0x1c0c   :  { %v5642_v63 = vpop.permute.xlu0 %5641 }
0x1c0d   :  { %v5646_v62 = vpop.permute.xlu1 %5645  ;;  %v5671_v40 = vmul.f32 %v14908_v29, %v5642_v63 }
0x1c0e   :  { %v5673_v50 = vmul.f32 %v14911_v25, %v5646_v62 }
0x1c0f   :  { %v5777_v49 = vrot.slane %v5671_v40, 2 }
0x1c10   :  { %v5648_v12 = vpop.permute.xlu0 %5647 }
0x1c11   :  { %v5644_v7 = vpop.permute.xlu1 %5643  ;;  %v5674_v38 = vmul.f32 %v14915_v5, %v5648_v12 }
0x1c12   :  { %v5672_v37 = vmul.f32 %v14918_v32, %v5644_v7 }
0x1c13   :  { %v5781_v41 = vrot.slane %v5674_v38, 7 }
0x1c14   :  { %v5778_v16 = vrot.slane %v5672_v37, 1  ;;  %v5650_v17 = vpop.permute.xlu0 %5649 }
0x1c15   :  { %v5652_v19 = vpop.permute.xlu1 %5651  ;;  %v5675_v55 = vmul.f32 %v14923_v28, %v5650_v17 }
0x1c16   :  { %v5779_v61 = vsel %vm4581_vm15, %v5778_v16, %v5777_v49  ;;  %v5676_v45 = vmul.f32 %v14926_v59, %v5652_v19 }
0x1c17   :  { %v5780_v29 = vsel %vm4676_vm0, %v5673_v50, %v5779_v61  ;;  %v5783_v24 = vrot.slane %v5675_v55, 6 }
0x1c18   :  { %v5782_v5 = vsel %vm4679_vm1, %v5781_v41, %v5780_v29  ;;  %v5654_v10 = vpop.permute.xlu0 %5653  ;;  %v5785_v48 = vrot.slane %v5676_v45, 5 }
0x1c19   :  { %v5784_v32 = vsel %vm4682_vm3, %v5783_v24, %v5782_v5  ;;  %v5656_v26 = vpop.permute.xlu1 %5655  ;;  %v5677_v23 = vmul.f32 %v14931_v13, %v5654_v10 }
0x1c1a   :  { %v5678_v25 = vmul.f32 %v14934_v2, %v5656_v26  ;;  %v5786_v40 = vsel %vm4685_vm4, %v5785_v48, %v5784_v32 }
0x1c1b   :  { %v5787_v63 = vrot.slane %v5677_v23, 4 }
0x1c1c   :  { %v5789_v28 = vrot.slane %v5678_v25, 3  ;;  %v5658_v62 = vpop.permute.xlu0 %5657 }
0x1c1d   :  { %v5660_v59 = vpop.permute.xlu1 %5659  ;;  %v5679_v12 = vmul.f32 %v14939_v52, %v5658_v62  ;;  %v5788_v7 = vsel %vm4688_vm5, %v5787_v63, %v5786_v40 }
0x1c1e   :  { %v5680_v38 = vmul.f32 %v14942_v14, %v5660_v59  ;;  %v5790_v37 = vsel %vm4691_vm7, %v5789_v28, %v5788_v7 }
0x1c1f   :  { %v5791_v49 = vrot.slane %v5679_v12, 2  ;;  %5794 = vrot.lane.b32.xlu0 %v5790_v37, %s13251_s5 }
0x1c20   :  { %v5792_v13 = vrot.slane %v5680_v38, 1 }
0x1c22   :  { %v5793_v2 = vsel %vm4581_vm15, %v5792_v13, %v5791_v49 }
0x1c23   :  { %5796 = vrot.lane.b32.xlu1 %v5793_v2, %s13251_s5 }
0x1c68   :  { %v5404_v16 = vpop.permute.xlu0 %5403 }
0x1c69   :  { %v5409_v41 = vmul.f32 %v14950_v42, %v5404_v16  ;;  %v5406_v17 = vpop.permute.xlu1 %5405 }
0x1c6a   :  { %v5410_v52 = vmul.f32 %v14952_v6, %v5406_v17 }
0x1c6b   :  { %v5683_v50 = vrot.slane %v5409_v41, 2 }
0x1c6c   :  { %v5684_v19 = vrot.slane %v5410_v52, 1 }
0x1c6e   :  { %v5685_v14 = vsel %vm4581_vm15, %v5684_v19, %v5683_v50 }
0x1c6f   :  { %5686 = vrot.lane.b32.xlu0 %v5685_v14, %s13251_s5 }
0x1c91   :  { %v5795_v55 = vpop.permute.xlu0 %5794 }
0x1c92   :  { %11175 = vmatprep.mubr.msk.f32.mxu1 %vm386_vm6, %v5795_v55 }
0x1c95   :  { %v5797_v61 = vpop.permute.xlu1 %5796 }
0x1c96   :  { %11176 = vmatmul.mubr.msk.f32.vlgmr.msra.gmra.mrb[76].mxu1 %vm386_vm6, %v5797_v61 }
0x1c97   :  { %11768 = vmatpush3.bf16.msra.mxu1 %v14421_v57 }
0x1c98   :  { %11770 = vmatprep.subr.bf16.mxu1 %v14463_v44 }
0x1c9b   :  { %11772 = vmatpush3.bf16.msra.mxu1 %v14463_v44 }
0x1c9c   :  { %11780 = vmatprep.subr.bf16.mxu1 %v14421_v57 }
0x1ce1   :  { %v5687_v42 = vpop.permute.xlu0 %5686 }
0x1ce2   :  { %11165 = vmatmul.mubr.msk.f32.vlgmr.msra.gmra.mrb[80].mxu0 %vm386_vm6, %v5687_v42 }
0x1ce3   :  { %11761 = vmatpush3.bf16.msra.mxu0 %v14403_v1  ;;  %11186 = vmatprep.mubr.msk.f32.mxu0 %vm13249_vm12, %v13250_v46 }
0x1ce4   :  { %11762 = vmatprep.subr.bf16.mxu0 %v13248_v11 }
0x1ce7   :  { %11764 = vmatpush3.bf16.msra.mxu0 %v14416_v27 }
0x1ce8   :  { %11773 = vmatprep.subr.bf16.mxu0 %v13248_v11 }
0x1d69   :  { %v11177_v6 = vpop.f32.mrb[76].mxu1 }
0x1d6a   :  { %v5868_v45 = vpop.f32.mrb[77].mxu1  ;;  %v5887_v59 = vrot.slane %v11177_v6, 6  ;;  %v5886_v38 = vrot.slane %v11177_v6, 5 }
0x1d6b   :  { %v5880_v29 = vrot.slane %v5868_v45, 6  ;;  %v5882_v5 = vrot.slane %v5868_v45, 1  ;;  %v5879_v10 = vrot.slane %v5868_v45, 5  ;;  %v5901_v32 = vadd.f32 %v5868_v45, %v14498_v9 }
0x1d6c   :  { %v5883_v26 = vrot.slane %v5868_v45, 2  ;;  %v5881_v48 = vrot.slane %v5868_v45, 7  ;;  %v5885_v63 = vrot.slane %v5868_v45, 4  ;;  %v5884_v62 = vrot.slane %v5868_v45, 3 }
0x1d6d   :  { %v5899_v24 = vadd.f32 %v5880_v29, %v14492_v36  ;;  %v5902_v23 = vadd.f32 %v5882_v5, %v14506_v21  ;;  %v5898_v25 = vadd.f32 %v5879_v10, %v14494_v15  ;;  %v5907_v49 = vadd.f32 %v5887_v59, %v14517_v20 }
0x1d6e   :  { %v5903_v28 = vadd.f32 %v5883_v26, %v14504_v60  ;;  %v5900_v40 = vadd.f32 %v5881_v48, %v14500_v0  ;;  %v5905_v12 = vadd.f32 %v5885_v63, %v14510_v34  ;;  %v5904_v37 = vadd.f32 %v5884_v62, %v14512_v33 }
0x1d6f   :  { %12682 = vtanh.f32 %v5899_v24  ;;  %v5906_v16 = vadd.f32 %v5886_v38, %v14519_v8  ;;  %v10105_v48 = vmul.f32 -1.442695, %v5899_v24  ;;  %v10107_v63 = vmul.f32 -1.442695, %v5901_v32 }
0x1d70   :  { %12684 = vtanh.f32 %v5901_v32  ;;  %v10108_v62 = vmul.f32 -1.442695, %v5902_v23  ;;  %v10104_v59 = vmul.f32 -1.442695, %v5898_v25  ;;  %v10106_v38 = vmul.f32 -1.442695, %v5900_v40 }
0x1d71   :  { %12686 = vtanh.f32 %v5902_v23  ;;  %v10112_v24 = vmul.f32 -1.442695, %v5906_v16 }
0x1d72   :  { %12688 = vtanh.f32 %v5898_v25 }
0x1d73   :  { %12690 = vtanh.f32 %v5903_v28 }
0x1d74   :  { %12692 = vtanh.f32 %v5900_v40 }
0x1d75   :  { %12694 = vtanh.f32 %v5905_v12 }
0x1d76   :  { %12696 = vtanh.f32 %v5904_v37 }
0x1d77   :  { %12698 = vtanh.f32 %v5907_v49 }
0x1d78   :  { %12700 = vtanh.f32 %v5906_v16 }
0x1d79   :  { %v12683_v7 = vpop.eup %12682 }
0x1d7a   :  { %6084 = vrot.lane.b32.xlu0 %v12683_v7, %s13241_s27  ;;  %v12685_v13 = vpop.eup %12684  ;;  %v10109_v7 = vmul.f32 -1.442695, %v5903_v28 }
0x1d7b   :  { %v12687_v2 = vpop.eup %12686  ;;  %6088 = vrot.lane.b32.xlu1 %v12685_v13, %s13241_s27  ;;  %v10111_v13 = vmul.f32 -1.442695, %v5905_v12 }
0x1d7c   :  { %v12689_v41 = vpop.eup %12688 }
0x1d7d   :  { %v12691_v17 = vpop.eup %12690 }
0x1d7e   :  { %6090 = vrot.lane.b32.xlu0 %v12687_v2, %s13241_s27  ;;  %v12693_v52 = vpop.eup %12692 }
0x1d7f   :  { %6082 = vrot.lane.b32.xlu1 %v12689_v41, %s13241_s27  ;;  %v12695_v50 = vpop.eup %12694  ;;  %v10113_v41 = vmul.f32 -1.442695, %v5907_v49 }
0x1d80   :  { %v12697_v19 = vpop.eup %12696 }
0x1d81   :  { %v12699_v14 = vpop.eup %12698 }
0x1d82   :  { %6092 = vrot.lane.b32.xlu0 %v12691_v17, %s13241_s27  ;;  %v12701_v55 = vpop.eup %12700  ;;  %v10110_v17 = vmul.f32 -1.442695, %v5904_v37 }
0x1d83   :  { %6086 = vrot.lane.b32.xlu1 %v12693_v52, %s13241_s27 }
0x1d86   :  { %6096 = vrot.lane.b32.xlu0 %v12695_v50, %s13241_s27 }
0x1d87   :  { %6094 = vrot.lane.b32.xlu1 %v12697_v19, %s13241_s27 }
0x1d8a   :  { %6100 = vrot.lane.b32.xlu0 %v12699_v14, %s13241_s27 }
0x1d8b   :  { %6098 = vrot.lane.b32.xlu1 %v12701_v55, %s13241_s27 }
0x1db5   :  { %v5756_v61 = vpop.f32.mrb[80].mxu0 }
0x1db6   :  { %v5761_v42 = vrot.slane %v5756_v61, 5  ;;  %v5762_v6 = vrot.slane %v5756_v61, 6  ;;  %v11166_v45 = vpop.f32.mrb[81].mxu0 }
0x1db8   :  { %v15088_v29 = vadd.f32 %v5761_v42, %v14555_v18  ;;  %v15091_v5 = vadd.f32 %v5762_v6, %v14544_v58 }
0x1dba   :  { %12702 = vtanh.f32 %v15088_v29 }
0x1dbb   :  { %12704 = vtanh.f32 %v15091_v5 }
0x1dbc   :  { %12706 = vpow2.f32 %v10105_v48 }
0x1dbd   :  { %12708 = vpow2.f32 %v10107_v63 }
0x1dbe   :  { %12710 = vpow2.f32 %v10108_v62 }
0x1dbf   :  { %12712 = vpow2.f32 %v10104_v59 }
0x1dc0   :  { %12714 = vpow2.f32 %v10109_v7 }
0x1dc1   :  { %12716 = vpow2.f32 %v10106_v38 }
0x1dc2   :  { %12718 = vpow2.f32 %v10111_v13 }
0x1dc3   :  { %12720 = vpow2.f32 %v10113_v41 }
0x1dc4   :  { %v12703_v10 = vpop.eup %12702  ;;  %12722 = vpow2.f32 %v10110_v17 }
0x1dc5   :  { %v12705_v26 = vpop.eup %12704  ;;  %5932 = vrot.lane.b32.xlu1 %v12703_v10, %s13241_s27 }
0x1dc6   :  { %5934 = vrot.lane.b32.xlu0 %v12705_v26, %s13241_s27  ;;  %v12707_v2 = vpop.eup %12706 }
0x1dc7   :  { %v5993_v52 = vadd.f32 1.0, %v12707_v2  ;;  %v12709_v50 = vpop.eup %12708 }
0x1dc8   :  { %v12711_v19 = vpop.eup %12710  ;;  %v5995_v32 = vadd.f32 1.0, %v12709_v50 }
0x1dc9   :  { %12724 = vrcp.f32 %v5993_v52  ;;  %v12713_v23 = vpop.eup %12712  ;;  %v5996_v25 = vadd.f32 1.0, %v12711_v19 }
0x1dca   :  { %v12715_v28 = vpop.eup %12714  ;;  %12726 = vpow2.f32 %v10112_v24  ;;  %v5992_v40 = vadd.f32 1.0, %v12713_v23 }
0x1dcb   :  { %12728 = vrcp.f32 %v5995_v32  ;;  %v12717_v12 = vpop.eup %12716  ;;  %v5997_v49 = vadd.f32 1.0, %v12715_v28 }
0x1dcc   :  { %12730 = vrcp.f32 %v5996_v25  ;;  %v12719_v14 = vpop.eup %12718  ;;  %v5994_v55 = vadd.f32 1.0, %v12717_v12 }
0x1dcd   :  { %v12721_v37 = vpop.eup %12720  ;;  %12732 = vrcp.f32 %v5992_v40  ;;  %v5999_v42 = vadd.f32 1.0, %v12719_v14 }
0x1dce   :  { %v12723_v61 = vpop.eup %12722  ;;  %12734 = vrcp.f32 %v5997_v49  ;;  %v6001_v48 = vadd.f32 1.0, %v12721_v37 }
0x1dcf   :  { %12736 = vrcp.f32 %v5994_v55  ;;  %v5998_v10 = vadd.f32 1.0, %v12723_v61 }
0x1dd0   :  { %12738 = vrcp.f32 %v5999_v42 }
0x1dd1   :  { %12740 = vrcp.f32 %v5998_v10  ;;  %v10103_v10 = vmul.f32 -1.442695, %v15091_v5 }
0x1dd2   :  { %12742 = vrcp.f32 %v6001_v48 }
0x1dd3   :  { %v15097_v16 = vpop.eup %12724 }
0x1dd4   :  { %v12727_v26 = vpop.eup %12726 }
0x1dd5   :  { %v15101_v63 = vpop.eup %12728  ;;  %v6000_v13 = vadd.f32 1.0, %v12727_v26 }
0x1dd6   :  { %v15103_v59 = vpop.eup %12730 }
0x1dd7   :  { %v15108_v41 = vpop.eup %12732  ;;  %12744 = vrcp.f32 %v6000_v13 }
0x1dd8   :  { %v15111_v52 = vpop.eup %12734 }
0x1dd9   :  { %v15116_v32 = vpop.eup %12736 }
0x1dda   :  { %v15119_v25 = vpop.eup %12738 }
0x1ddb   :  { %v15124_v49 = vpop.eup %12740 }
0x1ddc   :  { %v15127_v37 = vpop.eup %12742 }
0x1dec   :  { %v6085_v6 = vpop.permute.xlu0 %6084 }
0x1ded   :  { %v6113_v45 = vmul.f32 %v15097_v16, %v6085_v6  ;;  %v6089_v62 = vpop.permute.xlu1 %6088  ;;  %v10102_v6 = vmul.f32 -1.442695, %v15088_v29 }
0x1dee   :  { %v6115_v7 = vmul.f32 %v15101_v63, %v6089_v62 }
0x1def   :  { %6134 = vrot.lane.b32.xlu0 %v6113_v45, %s13251_s5  ;;  %v15133_v45 = vpop.eup %12744  ;;  %12746 = vpow2.f32 %v10102_v6  ;;  %v6042_v6 = vrot.slane %v14962_v53, 7 }
0x1df0   :  { %v6091_v38 = vpop.permute.xlu0 %6090  ;;  %6138 = vrot.lane.b32.xlu1 %v6115_v7, %s13251_s5  ;;  %12748 = vpow2.f32 %v10103_v10 }
0x1df1   :  { %v6116_v2 = vmul.f32 %v15103_v59, %v6091_v38  ;;  %v6083_v17 = vpop.permute.xlu1 %6082 }
0x1df2   :  { %v6112_v50 = vmul.f32 %v15108_v41, %v6083_v17 }
0x1df3   :  { %6140 = vrot.lane.b32.xlu0 %v6116_v2, %s13251_s5 }
0x1df4   :  { %v6093_v19 = vpop.permute.xlu0 %6092  ;;  %6132 = vrot.lane.b32.xlu1 %v6112_v50, %s13251_s5 }
0x1df5   :  { %v6117_v24 = vmul.f32 %v15111_v52, %v6093_v19  ;;  %v6087_v23 = vpop.permute.xlu1 %6086 }
0x1df6   :  { %v6114_v28 = vmul.f32 %v15116_v32, %v6087_v23 }
0x1df7   :  { %6142 = vrot.lane.b32.xlu0 %v6117_v24, %s13251_s5  ;;  %v6043_v24 = vrot.slane %v14976_v54, 7 }
0x1df8   :  { %v6097_v40 = vpop.permute.xlu0 %6096  ;;  %6136 = vrot.lane.b32.xlu1 %v6114_v28, %s13251_s5 }
0x1df9   :  { %v6119_v12 = vmul.f32 %v15119_v25, %v6097_v40  ;;  %v6095_v14 = vpop.permute.xlu1 %6094  ;;  %v12747_v62 = vpop.eup %12746  ;;  %v6063_v23 = vmul.f32 %v15097_v16, %v6043_v24  ;;  %v6045_v40 = vrot.slane %v14973_v56, 7  ;;  %v6062_v56 = vmul.f32 %v15108_v41, %v6042_v6 }
0x1dfa   :  { %v6118_v55 = vmul.f32 %v15124_v49, %v6095_v14  ;;  %v12749_v7 = vpop.eup %12748  ;;  %v5914_v38 = vadd.f32 1.0, %v12747_v62  ;;  %v6046_v14 = vrot.slane %v14983_v43, 7  ;;  %v6048_v24 = vrot.slane %v14993_v35, 7 }
0x1dfb   :  { %6146 = vrot.lane.b32.xlu0 %v6119_v12, %s13251_s5  ;;  %v5915_v13 = vadd.f32 1.0, %v12749_v7  ;;  %v6044_v7 = vrot.slane %v14966_v47, 7  ;;  %v6050_v35 = vrot.slane %v15004_v30, 7 }
0x1dfc   :  { %v6101_v61 = vpop.permute.xlu0 %6100  ;;  %6144 = vrot.lane.b32.xlu1 %v6118_v55, %s13251_s5  ;;  %12750 = vrcp.f32 %v5914_v38  ;;  %v6065_v55 = vmul.f32 %v15101_v63, %v6045_v40  ;;  %v6068_v40 = vmul.f32 %v15124_v49, %v6048_v24 }
0x1dfd   :  { %v6121_v42 = vmul.f32 %v15127_v37, %v6101_v61  ;;  %v6099_v26 = vpop.permute.xlu1 %6098  ;;  %12752 = vrcp.f32 %v5915_v13  ;;  %v6049_v13 = vrot.slane %v14997_v22, 7 }
0x1dfe   :  { %v6120_v48 = vmul.f32 %v15133_v45, %v6099_v26  ;;  %v6047_v26 = vrot.slane %v14986_v39, 7  ;;  %v6064_v39 = vmul.f32 %v15116_v32, %v6044_v7 }
0x1dff   :  { %6150 = vrot.lane.b32.xlu0 %v6121_v42, %s13251_s5  ;;  %v6066_v42 = vmul.f32 %v15103_v59, %v6046_v14 }
0x1e00   :  { %6148 = vrot.lane.b32.xlu1 %v6120_v48, %s13251_s5  ;;  %v6067_v62 = vmul.f32 %v15111_v52, %v6047_v26  ;;  %v6070_v26 = vmul.f32 %v15133_v45, %v6050_v35 }
0x1e06   :  { %v15139_v29 = vpop.eup %12750 }
0x1e07   :  { %v15141_v17 = vpop.eup %12752 }
0x1e37   :  { %v5933_v2 = vpop.permute.xlu1 %5932 }
0x1e38   :  { %v5935_v5 = vpop.permute.xlu0 %5934  ;;  %v5938_v50 = vmul.f32 %v15139_v29, %v5933_v2 }
0x1e39   :  { %v5939_v19 = vmul.f32 %v15141_v17, %v5935_v5 }
0x1e3a   :  { %5942 = vrot.lane.b32.xlu1 %v5938_v50, %s13251_s5  ;;  %v6069_v50 = vmul.f32 %v15119_v25, %v6049_v13 }
0x1e3b   :  { %5944 = vrot.lane.b32.xlu0 %v5939_v19, %s13251_s5 }
0x1e61   :  { %v6135_v28 = vpop.permute.xlu0 %6134 }
0x1e62   :  { %v15150_v12 = vadd.f32 %v6135_v28, %v6063_v23  ;;  %v6139_v61 = vpop.permute.xlu1 %6138  ;;  %v6051_v28 = vrot.slane %v15006_v4, 7 }
0x1e63   :  { %v15157_v10 = vadd.f32 %v6139_v61, %v6065_v55 }
0x1e64   :  { %12754 = vtanh.f32 %v15150_v12  ;;  %v6071_v55 = vmul.f32 %v15127_v37, %v6051_v28 }
0x1e65   :  { %v6141_v54 = vpop.permute.xlu0 %6140  ;;  %12756 = vtanh.f32 %v15157_v10 }
0x1e66   :  { %v15160_v48 = vadd.f32 %v6141_v54, %v6066_v42  ;;  %v6133_v43 = vpop.permute.xlu1 %6132 }
0x1e67   :  { %v15167_v38 = vadd.f32 %v6133_v43, %v6062_v56 }
0x1e68   :  { %12758 = vtanh.f32 %v15160_v48 }
0x1e69   :  { %v6143_v53 = vpop.permute.xlu0 %6142  ;;  %12760 = vtanh.f32 %v15167_v38 }
0x1e6a   :  { %v15170_v2 = vadd.f32 %v6143_v53, %v6067_v62  ;;  %v6137_v5 = vpop.permute.xlu1 %6136 }
0x1e6b   :  { %v15177_v47 = vadd.f32 %v6137_v5, %v6064_v39 }
0x1e6c   :  { %12762 = vtanh.f32 %v15170_v2 }
0x1e6d   :  { %v6147_v23 = vpop.permute.xlu0 %6146  ;;  %12764 = vtanh.f32 %v15177_v47 }
0x1e6e   :  { %v12755_v19 = vpop.eup %12754  ;;  %v15180_v22 = vadd.f32 %v6147_v23, %v6069_v50  ;;  %v6145_v14 = vpop.permute.xlu1 %6144  ;;  %v5924_v50 = vrot.slane %v15022_v31, 7 }
0x1e6f   :  { %6194 = vrot.lane.b32.xlu0 %v12755_v19, %s13241_s27  ;;  %v12757_v61 = vpop.eup %12756  ;;  %v15188_v42 = vadd.f32 %v6145_v14, %v6068_v40  ;;  %v5925_v19 = vrot.slane %v15024_v3, 7 }
0x1e70   :  { %12766 = vtanh.f32 %v15180_v22  ;;  %6198 = vrot.lane.b32.xlu1 %v12757_v61, %s13241_s27  ;;  %v5928_v24 = vmul.f32 %v15139_v29, %v5924_v50 }
0x1e71   :  { %v6151_v6 = vpop.permute.xlu0 %6150  ;;  %12768 = vtanh.f32 %v15188_v42  ;;  %v5929_v23 = vmul.f32 %v15141_v17, %v5925_v19 }
0x1e72   :  { %v12759_v4 = vpop.eup %12758  ;;  %v15191_v54 = vadd.f32 %v6151_v6, %v6071_v55  ;;  %v6149_v56 = vpop.permute.xlu1 %6148 }
0x1e73   :  { %6200 = vrot.lane.b32.xlu0 %v12759_v4, %s13241_s27  ;;  %v12761_v43 = vpop.eup %12760  ;;  %v15197_v62 = vadd.f32 %v6149_v56, %v6070_v26 }
0x1e74   :  { %12770 = vtanh.f32 %v15191_v54  ;;  %6192 = vrot.lane.b32.xlu1 %v12761_v43, %s13241_s27 }
0x1e75   :  { %12772 = vtanh.f32 %v15197_v62 }
0x1e76   :  { %v12763_v30 = vpop.eup %12762 }
0x1e77   :  { %6202 = vrot.lane.b32.xlu0 %v12763_v30, %s13241_s27  ;;  %v12765_v7 = vpop.eup %12764 }
0x1e78   :  { %6196 = vrot.lane.b32.xlu1 %v12765_v7, %s13241_s27 }
0x1e7a   :  { %v12767_v53 = vpop.eup %12766 }
0x1e7b   :  { %6206 = vrot.lane.b32.xlu0 %v12767_v53, %s13241_s27  ;;  %v12769_v13 = vpop.eup %12768 }
0x1e7c   :  { %6204 = vrot.lane.b32.xlu1 %v12769_v13, %s13241_s27 }
0x1e7e   :  { %v12771_v39 = vpop.eup %12770 }
0x1e7f   :  { %6210 = vrot.lane.b32.xlu0 %v12771_v39, %s13241_s27  ;;  %v12773_v5 = vpop.eup %12772 }
0x1e80   :  { %6208 = vrot.lane.b32.xlu1 %v12773_v5, %s13241_s27 }
0x1eac   :  { %v5943_v28 = vpop.permute.xlu1 %5942 }
0x1ead   :  { %v5945_v40 = vpop.permute.xlu0 %5944  ;;  %v15211_v14 = vadd.f32 %v5943_v28, %v5928_v24 }
0x1eae   :  { %v15213_v55 = vadd.f32 %v5945_v40, %v5929_v23 }
0x1eaf   :  { %12774 = vtanh.f32 %v15211_v14 }
0x1eb0   :  { %12776 = vtanh.f32 %v15213_v55 }
0x1eb9   :  { %v12775_v61 = vpop.eup %12774 }
0x1eba   :  { %v12777_v35 = vpop.eup %12776  ;;  %5954 = vrot.lane.b32.xlu1 %v12775_v61, %s13241_s27 }
0x1ebb   :  { %5956 = vrot.lane.b32.xlu0 %v12777_v35, %s13241_s27 }
0x1ee1   :  { %v6195_v31 = vpop.permute.xlu0 %6194 }
0x1ee2   :  { %v6199_v3 = vpop.permute.xlu1 %6198  ;;  %v6223_v43 = vmul.f32 %v15097_v16, %v6195_v31 }
0x1ee3   :  { %v6225_v23 = vmul.f32 %v15101_v63, %v6199_v3 }
0x1ee4   :  { %v6329_v50 = vrot.slane %v6223_v43, 2 }
0x1ee5   :  { %v6201_v6 = vpop.permute.xlu0 %6200 }
0x1ee6   :  { %v6193_v4 = vpop.permute.xlu1 %6192  ;;  %v6226_v13 = vmul.f32 %v15103_v59, %v6201_v6 }
0x1ee7   :  { %v6222_v26 = vmul.f32 %v15108_v41, %v6193_v4 }
0x1ee8   :  { %v6334_v16 = vrot.slane %v6226_v13, 7 }
0x1ee9   :  { %v6203_v56 = vpop.permute.xlu0 %6202  ;;  %v6328_v30 = vrot.slane %v6222_v26, 3 }
0x1eea   :  { %v6197_v7 = vpop.permute.xlu1 %6196  ;;  %v6227_v53 = vmul.f32 %v15111_v52, %v6203_v56 }
0x1eeb   :  { %v6224_v39 = vmul.f32 %v15116_v32, %v6197_v7  ;;  %v6330_v41 = vsel %vm4581_vm15, %v6329_v50, %v6328_v30 }
0x1eec   :  { %v6336_v28 = vrot.slane %v6227_v53, 6 }
0x1eed   :  { %v6207_v5 = vpop.permute.xlu0 %6206  ;;  %v6331_v24 = vrot.slane %v6224_v39, 1 }
0x1eee   :  { %v6229_v19 = vmul.f32 %v15119_v25, %v6207_v5  ;;  %v6205_v40 = vpop.permute.xlu1 %6204 }
0x1eef   :  { %v6332_v61 = vsel %vm4676_vm0, %v6331_v24, %v6330_v41  ;;  %v6228_v52 = vmul.f32 %v15124_v49, %v6205_v40 }
0x1ef0   :  { %v6333_v59 = vsel %vm4679_vm1, %v6225_v23, %v6332_v61  ;;  %v6340_v32 = vrot.slane %v6229_v19, 4 }
0x1ef1   :  { %v6211_v35 = vpop.permute.xlu0 %6210  ;;  %v6335_v25 = vsel %vm4682_vm3, %v6334_v16, %v6333_v59  ;;  %v6338_v6 = vrot.slane %v6228_v52, 5 }
0x1ef2   :  { %v6231_v31 = vmul.f32 %v15127_v37, %v6211_v35  ;;  %v6337_v63 = vsel %vm4685_vm4, %v6336_v28, %v6335_v25  ;;  %v6209_v3 = vpop.permute.xlu1 %6208 }
0x1ef3   :  { %v6230_v4 = vmul.f32 %v15133_v45, %v6209_v3  ;;  %v6339_v56 = vsel %vm4688_vm5, %v6338_v6, %v6337_v63 }
0x1ef4   :  { %v6343_v26 = vrot.slane %v6231_v31, 2  ;;  %v6341_v43 = vsel %vm4691_vm7, %v6340_v32, %v6339_v56 }
0x1ef5   :  { %v6342_v49 = vrot.slane %v6230_v4, 3  ;;  %6345 = vrot.lane.b32.xlu1 %v6341_v43, %s13251_s5 }
0x1ef7   :  { %v6344_v30 = vsel %vm4581_vm15, %v6343_v26, %v6342_v49 }
0x1ef8   :  { %6347 = vrot.lane.b32.xlu0 %v6344_v30, %s13251_s5 }
0x1f2c   :  { %v5955_v37 = vpop.permute.xlu1 %5954 }
0x1f2d   :  { %v5957_v7 = vpop.permute.xlu0 %5956  ;;  %v5960_v53 = vmul.f32 %v15139_v29, %v5955_v37 }
0x1f2e   :  { %v5961_v13 = vmul.f32 %v15141_v17, %v5957_v7 }
0x1f2f   :  { %v6234_v39 = vrot.slane %v5960_v53, 3 }
0x1f30   :  { %v6235_v45 = vrot.slane %v5961_v13, 2 }
0x1f32   :  { %v6236_v5 = vsel %vm4581_vm15, %v6235_v45, %v6234_v39 }
0x1f33   :  { %6237 = vrot.lane.b32.xlu1 %v6236_v5, %s13251_s5 }
0x1f67   :  { %v6346_v50 = vpop.permute.xlu1 %6345 }
0x1f68   :  { %11197 = vmatprep.mubr.msk.f32.mxu1 %vm386_vm6, %v6346_v50 }
0x1f6a   :  { %v6348_v19 = vpop.permute.xlu0 %6347 }
0x1f6b   :  { %11198 = vmatmul.mubr.msk.f32.vlgmr.msra.gmra.mrb[78].mxu1 %vm386_vm6, %v6348_v19 }
0x1f6c   :  { %11782 = vmatpush3.bf16.msra.mxu1 %v14421_v57 }
0x1f6d   :  { %11784 = vmatprep.subr.bf16.mxu1 %v14463_v44 }
0x1f70   :  { %11786 = vmatpush3.bf16.msra.mxu1 %v14463_v44 }
0x1f71   :  { %11794 = vmatprep.subr.bf16.mxu1 %v14421_v57 }
0x1fa5   :  { %v6238_v29 = vpop.permute.xlu1 %6237 }
0x1fa6   :  { %11187 = vmatmul.mubr.msk.f32.vlgmr.msra.gmra.mrb[82].mxu0 %vm386_vm6, %v6238_v29 }
0x1fa7   :  { %11775 = vmatpush3.bf16.msra.mxu0 %v14403_v1  ;;  %11208 = vmatprep.mubr.msk.f32.mxu0 %vm13249_vm12, %v13250_v46 }
0x1fa8   :  { %11776 = vmatprep.subr.bf16.mxu0 %v13248_v11 }
0x1fab   :  { %11778 = vmatpush3.bf16.msra.mxu0 %v14416_v27 }
0x1fac   :  { %11787 = vmatprep.subr.bf16.mxu0 %v13248_v11 }
0x203e   :  { %v11199_v17 = vpop.f32.mrb[78].mxu1 }
0x203f   :  { %v6419_v24 = vpop.f32.mrb[79].mxu1  ;;  %v6437_v25 = vrot.slane %v11199_v17, 4  ;;  %v6438_v43 = vrot.slane %v11199_v17, 5 }
0x2040   :  { %v6430_v23 = vrot.slane %v6419_v24, 4  ;;  %v6432_v41 = vrot.slane %v6419_v24, 6  ;;  %v6434_v40 = vrot.slane %v6419_v24, 1  ;;  %v6431_v61 = vrot.slane %v6419_v24, 5 }
0x2041   :  { %v6453_v52 = vadd.f32 %v6419_v24, %v14506_v21  ;;  %v6435_v35 = vrot.slane %v6419_v24, 2  ;;  %v6433_v32 = vrot.slane %v6419_v24, 7  ;;  %v6436_v3 = vrot.slane %v6419_v24, 3 }
0x2042   :  { %v6449_v28 = vadd.f32 %v6430_v23, %v14494_v15  ;;  %v6451_v16 = vadd.f32 %v6432_v41, %v14500_v0  ;;  %v6454_v59 = vadd.f32 %v6434_v40, %v14504_v60  ;;  %v6450_v31 = vadd.f32 %v6431_v61, %v14492_v36 }
0x2043   :  { %v6455_v6 = vadd.f32 %v6435_v35, %v14512_v33  ;;  %v6452_v4 = vadd.f32 %v6433_v32, %v14498_v9  ;;  %v6457_v26 = vadd.f32 %v6437_v25, %v14519_v8  ;;  %v6456_v49 = vadd.f32 %v6436_v3, %v14510_v34 }
0x2044   :  { %12778 = vtanh.f32 %v6449_v28  ;;  %v6458_v5 = vadd.f32 %v6438_v43, %v14517_v20  ;;  %v10119_v35 = vmul.f32 -1.442695, %v6449_v28  ;;  %v10121_v32 = vmul.f32 -1.442695, %v6451_v16 }
0x2045   :  { %12780 = vtanh.f32 %v6451_v16  ;;  %v10123_v25 = vmul.f32 -1.442695, %v6453_v52  ;;  %v10120_v3 = vmul.f32 -1.442695, %v6450_v31 }
0x2046   :  { %12782 = vtanh.f32 %v6453_v52 }
0x2047   :  { %12784 = vtanh.f32 %v6454_v59 }
0x2048   :  { %12786 = vtanh.f32 %v6450_v31 }
0x2049   :  { %12788 = vtanh.f32 %v6455_v6 }
0x204a   :  { %12790 = vtanh.f32 %v6452_v4 }
0x204b   :  { %12792 = vtanh.f32 %v6457_v26 }
0x204c   :  { %12794 = vtanh.f32 %v6456_v49 }
0x204e   :  { %v12779_v63 = vpop.eup %12778 }
0x204f   :  { %6633 = vrot.lane.b32.xlu0 %v12779_v63, %s13241_s27  ;;  %v12781_v56 = vpop.eup %12780  ;;  %v10124_v63 = vmul.f32 -1.442695, %v6454_v59  ;;  %v10128_v59 = vmul.f32 -1.442695, %v6458_v5 }
0x2050   :  { %v12783_v53 = vpop.eup %12782 }
0x2051   :  { %6641 = vrot.lane.b32.xlu1 %v12783_v53, %s13241_s27  ;;  %v12785_v45 = vpop.eup %12784 }
0x2052   :  { %v12787_v50 = vpop.eup %12786 }
0x2053   :  { %6637 = vrot.lane.b32.xlu0 %v12781_v56, %s13241_s27  ;;  %v12789_v29 = vpop.eup %12788  ;;  %v10125_v56 = vmul.f32 -1.442695, %v6455_v6 }
0x2054   :  { %v12791_v17 = vpop.eup %12790 }
0x2055   :  { %6635 = vrot.lane.b32.xlu1 %v12787_v50, %s13241_s27  ;;  %v12793_v24 = vpop.eup %12792 }
0x2056   :  { %v12795_v23 = vpop.eup %12794 }
0x2057   :  { %6643 = vrot.lane.b32.xlu0 %v12785_v45, %s13241_s27 }
0x2059   :  { %6639 = vrot.lane.b32.xlu1 %v12791_v17, %s13241_s27 }
0x205b   :  { %6645 = vrot.lane.b32.xlu0 %v12789_v29, %s13241_s27 }
0x205d   :  { %6647 = vrot.lane.b32.xlu1 %v12795_v23, %s13241_s27 }
0x205f   :  { %6649 = vrot.lane.b32.xlu0 %v12793_v24, %s13241_s27 }
0x2079   :  { %v6307_v30 = vpop.f32.mrb[82].mxu0 }
0x207a   :  { %v6312_v37 = vrot.slane %v6307_v30, 4  ;;  %v11188_v7 = vpop.f32.mrb[83].mxu0  ;;  %v6313_v13 = vrot.slane %v6307_v30, 5  ;;  %v10122_v30 = vmul.f32 -1.442695, %v6452_v4 }
0x207c   :  { %v6316_v39 = vadd.f32 %v6312_v37, %v14555_v18  ;;  %v6317_v19 = vadd.f32 %v6313_v13, %v14544_v58  ;;  %v10127_v37 = vmul.f32 -1.442695, %v6457_v26  ;;  %v10126_v13 = vmul.f32 -1.442695, %v6456_v49 }
0x207e   :  { %12796 = vtanh.f32 %v6316_v39  ;;  %v10117_v28 = vmul.f32 -1.442695, %v6316_v39  ;;  %v10118_v26 = vmul.f32 -1.442695, %v6317_v19 }
0x207f   :  { %12798 = vtanh.f32 %v6458_v5 }
0x2080   :  { %12800 = vtanh.f32 %v6317_v19 }
0x2081   :  { %12802 = vpow2.f32 %v10119_v35 }
0x2082   :  { %12804 = vpow2.f32 %v10121_v32 }
0x2083   :  { %12806 = vpow2.f32 %v10123_v25 }
0x2084   :  { %12808 = vpow2.f32 %v10124_v63 }
0x2085   :  { %12810 = vpow2.f32 %v10120_v3 }
0x2086   :  { %12812 = vpow2.f32 %v10125_v56 }
0x2087   :  { %12814 = vpow2.f32 %v10122_v30 }
0x2088   :  { %v12797_v41 = vpop.eup %12796  ;;  %12816 = vpow2.f32 %v10127_v37 }
0x2089   :  { %6483 = vrot.lane.b32.xlu0 %v12797_v41, %s13241_s27  ;;  %v12799_v40 = vpop.eup %12798 }
0x208a   :  { %6651 = vrot.lane.b32.xlu1 %v12799_v40, %s13241_s27  ;;  %v12801_v61 = vpop.eup %12800 }
0x208b   :  { %v12803_v43 = vpop.eup %12802 }
0x208c   :  { %v6543_v7 = vadd.f32 1.0, %v12803_v43  ;;  %v12805_v53 = vpop.eup %12804 }
0x208d   :  { %v12807_v45 = vpop.eup %12806  ;;  %v6545_v16 = vadd.f32 1.0, %v12805_v53 }
0x208e   :  { %6485 = vrot.lane.b32.xlu1 %v12801_v61, %s13241_s27  ;;  %12818 = vrcp.f32 %v6543_v7  ;;  %v12809_v52 = vpop.eup %12808  ;;  %v6547_v31 = vadd.f32 1.0, %v12807_v45 }
0x208f   :  { %12820 = vpow2.f32 %v10126_v13  ;;  %v12811_v50 = vpop.eup %12810  ;;  %v6548_v6 = vadd.f32 1.0, %v12809_v52 }
0x2090   :  { %12822 = vpow2.f32 %v10117_v28  ;;  %v12813_v4 = vpop.eup %12812  ;;  %v6544_v29 = vadd.f32 1.0, %v12811_v50 }
0x2091   :  { %12824 = vrcp.f32 %v6545_v16  ;;  %v12815_v17 = vpop.eup %12814  ;;  %v6549_v49 = vadd.f32 1.0, %v12813_v4 }
0x2092   :  { %12826 = vpow2.f32 %v10128_v59  ;;  %v12817_v24 = vpop.eup %12816  ;;  %v6546_v5 = vadd.f32 1.0, %v12815_v17 }
0x2093   :  { %12828 = vrcp.f32 %v6547_v31  ;;  %v6551_v61 = vadd.f32 1.0, %v12817_v24 }
0x2094   :  { %12830 = vrcp.f32 %v6548_v6 }
0x2095   :  { %12832 = vpow2.f32 %v10118_v26 }
0x2096   :  { %12834 = vrcp.f32 %v6544_v29 }
0x2097   :  { %12836 = vrcp.f32 %v6549_v49 }
0x2098   :  { %v15280_v39 = vpop.eup %12818  ;;  %12838 = vrcp.f32 %v6546_v5 }
0x2099   :  { %v12821_v41 = vpop.eup %12820  ;;  %12840 = vrcp.f32 %v6551_v61 }
0x209a   :  { %v12823_v35 = vpop.eup %12822  ;;  %v6550_v25 = vadd.f32 1.0, %v12821_v41 }
0x209b   :  { %v15284_v19 = vpop.eup %12824  ;;  %v6465_v43 = vadd.f32 1.0, %v12823_v35 }
0x209c   :  { %v12827_v63 = vpop.eup %12826  ;;  %12842 = vrcp.f32 %v6550_v25 }
0x209d   :  { %v15287_v56 = vpop.eup %12828  ;;  %v6552_v53 = vadd.f32 1.0, %v12827_v63  ;;  %12844 = vrcp.f32 %v6465_v43 }
0x209e   :  { %v15291_v7 = vpop.eup %12830 }
0x209f   :  { %v12833_v45 = vpop.eup %12832  ;;  %12846 = vrcp.f32 %v6552_v53  ;;  %v6593_v53 = vrot.slane %v15167_v38, 7 }
0x20a0   :  { %v15295_v16 = vpop.eup %12834  ;;  %v6466_v50 = vadd.f32 1.0, %v12833_v45 }
0x20a1   :  { %v15299_v31 = vpop.eup %12836 }
0x20a2   :  { %v15303_v26 = vpop.eup %12838  ;;  %12848 = vrcp.f32 %v6466_v50 }
0x20a3   :  { %v15307_v49 = vpop.eup %12840 }
0x20a6   :  { %v15311_v5 = vpop.eup %12842 }
0x20a7   :  { %v15315_v61 = vpop.eup %12844 }
0x20a9   :  { %v15319_v25 = vpop.eup %12846 }
0x20ac   :  { %v15324_v43 = vpop.eup %12848 }
0x20c1   :  { %v6634_v23 = vpop.permute.xlu0 %6633 }
0x20c2   :  { %v6663_v40 = vmul.f32 %v15280_v39, %v6634_v23 }
0x20c3   :  { %v6642_v30 = vpop.permute.xlu1 %6641 }
0x20c4   :  { %6683 = vrot.lane.b32.xlu0 %v6663_v40, %s13251_s5  ;;  %v6667_v37 = vmul.f32 %v15287_v56, %v6642_v30 }
0x20c5   :  { %v6638_v32 = vpop.permute.xlu0 %6637 }
0x20c6   :  { %v6665_v3 = vmul.f32 %v15284_v19, %v6638_v32  ;;  %6691 = vrot.lane.b32.xlu1 %v6667_v37, %s13251_s5 }
0x20c7   :  { %v6636_v52 = vpop.permute.xlu1 %6635 }
0x20c8   :  { %6687 = vrot.lane.b32.xlu0 %v6665_v3, %s13251_s5  ;;  %v6664_v59 = vmul.f32 %v15295_v16, %v6636_v52 }
0x20c9   :  { %v6644_v13 = vpop.permute.xlu0 %6643 }
0x20ca   :  { %v6668_v28 = vmul.f32 %v15291_v7, %v6644_v13  ;;  %6685 = vrot.lane.b32.xlu1 %v6664_v59, %s13251_s5  ;;  %v6613_v13 = vmul.f32 %v15280_v39, %v6593_v53  ;;  %v6597_v59 = vrot.slane %v15160_v48, 7 }
0x20cb   :  { %v6640_v29 = vpop.permute.xlu1 %6639 }
0x20cc   :  { %6693 = vrot.lane.b32.xlu0 %v6668_v28, %s13251_s5  ;;  %v6666_v17 = vmul.f32 %v15303_v26, %v6640_v29  ;;  %v6595_v28 = vrot.slane %v15177_v47, 7  ;;  %v6617_v29 = vmul.f32 %v15287_v56, %v6597_v59 }
0x20cd   :  { %v6646_v6 = vpop.permute.xlu0 %6645 }
0x20ce   :  { %v6669_v4 = vmul.f32 %v15299_v31, %v6646_v6  ;;  %6689 = vrot.lane.b32.xlu1 %v6666_v17, %s13251_s5  ;;  %v6615_v50 = vmul.f32 %v15284_v19, %v6595_v28 }
0x20cf   :  { %v6648_v41 = vpop.permute.xlu1 %6647 }
0x20d0   :  { %6695 = vrot.lane.b32.xlu0 %v6669_v4, %s13251_s5  ;;  %v6670_v40 = vmul.f32 %v15311_v5, %v6648_v41  ;;  %v6598_v4 = vrot.slane %v15170_v2, 7  ;;  %v6599_v41 = vrot.slane %v15188_v42, 7 }
0x20d1   :  { %v6650_v24 = vpop.permute.xlu0 %6649 }
0x20d2   :  { %v6671_v23 = vmul.f32 %v15307_v49, %v6650_v24  ;;  %6697 = vrot.lane.b32.xlu1 %v6670_v40, %s13251_s5  ;;  %v6594_v24 = vrot.slane %v15150_v12, 7  ;;  %v6618_v48 = vmul.f32 %v15291_v7, %v6598_v4  ;;  %v6619_v12 = vmul.f32 %v15299_v31, %v6599_v41 }
0x20d4   :  { %6699 = vrot.lane.b32.xlu0 %v6671_v23, %s13251_s5  ;;  %v6614_v2 = vmul.f32 %v15295_v16, %v6594_v24 }
0x20fb   :  { %v6484_v35 = vpop.permute.xlu0 %6483 }
0x20fc   :  { %v6489_v32 = vmul.f32 %v15315_v61, %v6484_v35  ;;  %v6652_v63 = vpop.permute.xlu1 %6651 }
0x20fd   :  { %v6672_v3 = vmul.f32 %v15319_v25, %v6652_v63 }
0x20fe   :  { %6493 = vrot.lane.b32.xlu0 %v6489_v32, %s13251_s5  ;;  %v6596_v32 = vrot.slane %v15157_v10, 7  ;;  %v6600_v10 = vrot.slane %v15180_v22, 7 }
0x20ff   :  { %6701 = vrot.lane.b32.xlu1 %v6672_v3, %s13251_s5 }
0x2100   :  { %v6486_v30 = vpop.permute.xlu1 %6485  ;;  %v6616_v42 = vmul.f32 %v15303_v26, %v6596_v32  ;;  %v6476_v32 = vrot.slane %v15213_v55, 7 }
0x2101   :  { %v6490_v37 = vmul.f32 %v15324_v43, %v6486_v30 }
0x2103   :  { %6495 = vrot.lane.b32.xlu1 %v6490_v37, %s13251_s5  ;;  %v6601_v37 = vrot.slane %v15197_v62, 7  ;;  %v6475_v62 = vrot.slane %v15211_v14, 7 }
0x2105   :  { %v6621_v28 = vmul.f32 %v15307_v49, %v6601_v37 }
0x2136   :  { %v6684_v45 = vpop.permute.xlu0 %6683 }
0x2137   :  { %v15331_v52 = vadd.f32 %v6684_v45, %v6613_v13 }
0x2138   :  { %v6692_v38 = vpop.permute.xlu1 %6691 }
0x2139   :  { %12850 = vtanh.f32 %v15331_v52  ;;  %v15341_v23 = vadd.f32 %v6692_v38, %v6617_v29  ;;  %v6602_v38 = vrot.slane %v15191_v54, 7 }
0x213a   :  { %v6688_v6 = vpop.permute.xlu0 %6687 }
0x213b   :  { %v15338_v17 = vadd.f32 %v6688_v6, %v6615_v50  ;;  %v6620_v6 = vmul.f32 %v15311_v5, %v6600_v10  ;;  %v6622_v41 = vmul.f32 %v15319_v25, %v6602_v38 }
0x213c   :  { %v6686_v35 = vpop.permute.xlu1 %6685 }
0x213d   :  { %12852 = vtanh.f32 %v15338_v17  ;;  %v15351_v63 = vadd.f32 %v6686_v35, %v6614_v2 }
0x213e   :  { %v6694_v47 = vpop.permute.xlu0 %6693  ;;  %12854 = vtanh.f32 %v15341_v23 }
0x213f   :  { %v15348_v40 = vadd.f32 %v6694_v47, %v6618_v48  ;;  %v6479_v48 = vmul.f32 %v15315_v61, %v6475_v62 }
0x2140   :  { %v6690_v13 = vpop.permute.xlu1 %6689 }
0x2141   :  { %12856 = vtanh.f32 %v15348_v40  ;;  %v15362_v45 = vadd.f32 %v6690_v13, %v6616_v42 }
0x2142   :  { %v6696_v3 = vpop.permute.xlu0 %6695  ;;  %12858 = vtanh.f32 %v15351_v63 }
0x2143   :  { %v12851_v30 = vpop.eup %12850  ;;  %v15358_v53 = vadd.f32 %v6696_v3, %v6619_v12 }
0x2144   :  { %6743 = vrot.lane.b32.xlu0 %v12851_v30, %s13241_s27  ;;  %v6698_v29 = vpop.permute.xlu1 %6697  ;;  %v6480_v30 = vmul.f32 %v15324_v43, %v6476_v32 }
0x2145   :  { %12860 = vtanh.f32 %v15358_v53  ;;  %v15373_v24 = vadd.f32 %v6698_v29, %v6620_v6 }
0x2146   :  { %v6700_v59 = vpop.permute.xlu0 %6699  ;;  %12862 = vtanh.f32 %v15362_v45 }
0x2147   :  { %v12853_v50 = vpop.eup %12852  ;;  %v15369_v4 = vadd.f32 %v6700_v59, %v6621_v28 }
0x2148   :  { %6747 = vrot.lane.b32.xlu0 %v12853_v50, %s13241_s27  ;;  %v12855_v22 = vpop.eup %12854 }
0x2149   :  { %12864 = vtanh.f32 %v15369_v4  ;;  %6751 = vrot.lane.b32.xlu1 %v12855_v22, %s13241_s27 }
0x214a   :  { %12866 = vtanh.f32 %v15373_v24 }
0x214b   :  { %v12857_v47 = vpop.eup %12856 }
0x214c   :  { %6753 = vrot.lane.b32.xlu0 %v12857_v47, %s13241_s27  ;;  %v12859_v54 = vpop.eup %12858 }
0x214d   :  { %6745 = vrot.lane.b32.xlu1 %v12859_v54, %s13241_s27 }
0x214f   :  { %v12861_v3 = vpop.eup %12860 }
0x2150   :  { %6755 = vrot.lane.b32.xlu0 %v12861_v3, %s13241_s27  ;;  %v12863_v42 = vpop.eup %12862 }
0x2151   :  { %6749 = vrot.lane.b32.xlu1 %v12863_v42, %s13241_s27 }
0x2153   :  { %v12865_v55 = vpop.eup %12864 }
0x2154   :  { %6759 = vrot.lane.b32.xlu0 %v12865_v55, %s13241_s27  ;;  %v12867_v10 = vpop.eup %12866 }
0x2155   :  { %6757 = vrot.lane.b32.xlu1 %v12867_v10, %s13241_s27 }
0x2170   :  { %v6494_v14 = vpop.permute.xlu0 %6493 }
0x2171   :  { %v15380_v2 = vadd.f32 %v6494_v14, %v6479_v48  ;;  %v6702_v35 = vpop.permute.xlu1 %6701 }
0x2172   :  { %v15384_v12 = vadd.f32 %v6702_v35, %v6622_v41 }
0x2173   :  { %12868 = vtanh.f32 %v15380_v2 }
0x2174   :  { %12870 = vtanh.f32 %v15384_v12 }
0x2175   :  { %v6496_v37 = vpop.permute.xlu1 %6495 }
0x2176   :  { %v15391_v13 = vadd.f32 %v6496_v37, %v6480_v30 }
0x2178   :  { %12872 = vtanh.f32 %v15391_v13 }
0x217d   :  { %v12869_v28 = vpop.eup %12868 }
0x217e   :  { %6505 = vrot.lane.b32.xlu0 %v12869_v28, %s13241_s27  ;;  %v12871_v59 = vpop.eup %12870 }
0x217f   :  { %6761 = vrot.lane.b32.xlu1 %v12871_v59, %s13241_s27 }
0x2182   :  { %v12873_v50 = vpop.eup %12872 }
0x2183   :  { %6507 = vrot.lane.b32.xlu1 %v12873_v50, %s13241_s27 }
0x21b6   :  { %v6744_v62 = vpop.permute.xlu0 %6743 }
0x21b7   :  { %v6773_v48 = vmul.f32 %v15280_v39, %v6744_v62 }
0x21b9   :  { %v6879_v54 = vrot.slane %v6773_v48, 4 }
0x21ba   :  { %v6748_v6 = vpop.permute.xlu0 %6747 }
0x21bb   :  { %v6752_v29 = vpop.permute.xlu1 %6751  ;;  %v6775_v22 = vmul.f32 %v15284_v19, %v6748_v6 }
0x21bd   :  { %v6882_v41 = vrot.slane %v6775_v22, 2 }
0x21be   :  { %v6754_v38 = vpop.permute.xlu0 %6753 }
0x21bf   :  { %v6746_v14 = vpop.permute.xlu1 %6745  ;;  %v6778_v3 = vmul.f32 %v15291_v7, %v6754_v38 }
0x21c0   :  { %v6774_v47 = vmul.f32 %v15295_v16, %v6746_v14  ;;  %v6777_v16 = vmul.f32 %v15287_v56, %v6752_v29 }
0x21c1   :  { %v6887_v28 = vrot.slane %v6778_v3, 7 }
0x21c2   :  { %v6756_v35 = vpop.permute.xlu0 %6755  ;;  %v6880_v32 = vrot.slane %v6774_v47, 3 }
0x21c3   :  { %v6750_v30 = vpop.permute.xlu1 %6749  ;;  %v6779_v37 = vmul.f32 %v15299_v31, %v6756_v35 }
0x21c4   :  { %v6881_v42 = vsel %vm4581_vm15, %v6880_v32, %v6879_v54  ;;  %v6776_v55 = vmul.f32 %v15303_v26, %v6750_v30 }
0x21c5   :  { %v6883_v19 = vsel %vm4676_vm0, %v6882_v41, %v6881_v42  ;;  %v6889_v50 = vrot.slane %v6779_v37, 6 }
0x21c6   :  { %v6760_v10 = vpop.permute.xlu0 %6759  ;;  %v6884_v39 = vrot.slane %v6776_v55, 1 }
0x21c7   :  { %v6758_v59 = vpop.permute.xlu1 %6757  ;;  %v6781_v6 = vmul.f32 %v15307_v49, %v6760_v10 }
0x21c8   :  { %v6885_v62 = vsel %vm4679_vm1, %v6884_v39, %v6883_v19  ;;  %v6780_v7 = vmul.f32 %v15311_v5, %v6758_v59 }
0x21c9   :  { %v6886_v31 = vsel %vm4682_vm3, %v6777_v16, %v6885_v62  ;;  %v6893_v56 = vrot.slane %v6781_v6, 4 }
0x21ca   :  { %v6888_v26 = vsel %vm4685_vm4, %v6887_v28, %v6886_v31  ;;  %v6891_v38 = vrot.slane %v6780_v7, 5 }
0x21cb   :  { %v6890_v14 = vsel %vm4688_vm5, %v6889_v50, %v6888_v26 }
0x21cc   :  { %v6892_v29 = vsel %vm4691_vm7, %v6891_v38, %v6890_v14 }
0x21cd   :  { %6896 = vrot.lane.b32.xlu0 %v6892_v29, %s13251_s5 }
0x21f0   :  { %v6506_v22 = vpop.permute.xlu0 %6505 }
0x21f1   :  { %v6762_v48 = vpop.permute.xlu1 %6761  ;;  %v6511_v41 = vmul.f32 %v15315_v61, %v6506_v22 }
0x21f2   :  { %v6782_v47 = vmul.f32 %v15319_v25, %v6762_v48 }
0x21f3   :  { %v6785_v54 = vrot.slane %v6511_v41, 4 }
0x21f4   :  { %v6894_v5 = vrot.slane %v6782_v47, 3 }
0x21f5   :  { %v6508_v49 = vpop.permute.xlu1 %6507 }
0x21f6   :  { %v6895_v35 = vsel %vm4581_vm15, %v6894_v5, %v6893_v56  ;;  %v6512_v32 = vmul.f32 %v15324_v43, %v6508_v49 }
0x21f7   :  { %6898 = vrot.lane.b32.xlu1 %v6895_v35, %s13251_s5 }
0x21f8   :  { %v6786_v3 = vrot.slane %v6512_v32, 3 }
0x21fa   :  { %v6787_v30 = vsel %vm4581_vm15, %v6786_v3, %v6785_v54 }
0x21fb   :  { %6788 = vrot.lane.b32.xlu0 %v6787_v30, %s13251_s5 }
0x223f   :  { %v6897_v25 = vpop.permute.xlu0 %6896 }
0x2240   :  { %11219 = vmatprep.mubr.msk.f32.mxu1 %vm386_vm6, %v6897_v25 }
0x2269   :  { %v6899_v61 = vpop.permute.xlu1 %6898 }
0x226a   :  { %11220 = vmatmul.mubr.msk.f32.vlgmr.msra.gmra.mrb[80].mxu1 %vm386_vm6, %v6899_v61 }
0x226b   :  { %11796 = vmatpush3.bf16.msra.mxu1 %v14421_v57 }
0x226c   :  { %11798 = vmatprep.subr.bf16.mxu1 %v14463_v44 }
0x226d   :  { %v6789_v37 = vpop.permute.xlu0 %6788 }
0x226e   :  { %11209 = vmatmul.mubr.msk.f32.vlgmr.msra.gmra.mrb[84].mxu0 %vm386_vm6, %v6789_v37 }
0x226f   :  { %11800 = vmatpush3.bf16.msra.mxu1 %v14463_v44  ;;  %11789 = vmatpush3.bf16.msra.mxu0 %v14403_v1 }
0x2270   :  { %11790 = vmatprep.subr.bf16.mxu0 %v13248_v11  ;;  %11230 = vmatprep.mubr.msk.f32.mxu0 %vm13249_vm12, %v13250_v46 }
0x2271   :  { %11808 = vmatprep.subr.bf16.mxu1 %v14421_v57 }
0x2273   :  { %11792 = vmatpush3.bf16.msra.mxu0 %v14416_v27 }
0x2274   :  { %11801 = vmatprep.subr.bf16.mxu0 %v13248_v11 }
0x233d   :  { %v11221_v43 = vpop.f32.mrb[80].mxu1 }
0x233e   :  { %v6970_v42 = vpop.f32.mrb[81].mxu1  ;;  %v6989_v26 = vrot.slane %v11221_v43, 4  ;;  %v6988_v49 = vrot.slane %v11221_v43, 3 }
0x233f   :  { %v6982_v10 = vrot.slane %v6970_v42, 4  ;;  %v6984_v39 = vrot.slane %v6970_v42, 6  ;;  %v6986_v16 = vrot.slane %v6970_v42, 1  ;;  %v6981_v50 = vrot.slane %v6970_v42, 3 }
0x2340   :  { %v7005_v62 = vadd.f32 %v6970_v42, %v14504_v60  ;;  %v6987_v7 = vrot.slane %v6970_v42, 2  ;;  %v6983_v31 = vrot.slane %v6970_v42, 5  ;;  %v6985_v48 = vrot.slane %v6970_v42, 7 }
0x2341   :  { %v6858_v55 = vpop.f32.mrb[84].mxu0  ;;  %v7001_v28 = vadd.f32 %v6982_v10, %v14492_v36  ;;  %v7003_v59 = vadd.f32 %v6984_v39, %v14498_v9  ;;  %v7006_v6 = vadd.f32 %v6986_v16, %v14512_v33  ;;  %v7000_v22 = vadd.f32 %v6981_v50, %v14494_v15 }
0x2342   :  { %v11210_v19 = vpop.f32.mrb[85].mxu0  ;;  %v7007_v38 = vadd.f32 %v6987_v7, %v14510_v34  ;;  %v7002_v47 = vadd.f32 %v6983_v31, %v14500_v0  ;;  %v6864_v56 = vrot.slane %v6858_v55, 4  ;;  %v7009_v29 = vadd.f32 %v6989_v26, %v14517_v20 }
0x2343   :  { %12874 = vtanh.f32 %v7001_v28  ;;  %v7004_v41 = vadd.f32 %v6985_v48, %v14506_v21  ;;  %v6863_v32 = vrot.slane %v6858_v55, 3  ;;  %v7008_v30 = vadd.f32 %v6988_v49, %v14519_v8 }
0x2344   :  { %12876 = vtanh.f32 %v7003_v59  ;;  %v6868_v35 = vadd.f32 %v6864_v56, %v14544_v58  ;;  %v10135_v16 = vmul.f32 -1.442695, %v7001_v28  ;;  %v10137_v50 = vmul.f32 -1.442695, %v7003_v59 }
0x2345   :  { %12878 = vtanh.f32 %v7005_v62  ;;  %v6867_v61 = vadd.f32 %v6863_v32, %v14555_v18  ;;  %v10139_v7 = vmul.f32 -1.442695, %v7005_v62  ;;  %v10140_v31 = vmul.f32 -1.442695, %v7006_v6 }
0x2346   :  { %12880 = vtanh.f32 %v7006_v6  ;;  %v10134_v26 = vmul.f32 -1.442695, %v7000_v22  ;;  %v10141_v48 = vmul.f32 -1.442695, %v7007_v38  ;;  %v10136_v56 = vmul.f32 -1.442695, %v7002_v47 }
0x2347   :  { %12882 = vtanh.f32 %v7000_v22  ;;  %v10138_v32 = vmul.f32 -1.442695, %v7004_v41  ;;  %v10133_v28 = vmul.f32 -1.442695, %v6868_v35  ;;  %v10142_v6 = vmul.f32 -1.442695, %v7008_v30 }
0x2348   :  { %12884 = vtanh.f32 %v7007_v38 }
0x2349   :  { %12886 = vtanh.f32 %v7002_v47 }
0x234a   :  { %12888 = vtanh.f32 %v7009_v29 }
0x234b   :  { %12890 = vtanh.f32 %v7004_v41 }
0x234c   :  { %12892 = vtanh.f32 %v6868_v35 }
0x234d   :  { %v12875_v14 = vpop.eup %12874  ;;  %12894 = vtanh.f32 %v7008_v30 }
0x234e   :  { %7186 = vrot.lane.b32.xlu0 %v12875_v14, %s13241_s27  ;;  %v12877_v5 = vpop.eup %12876  ;;  %12896 = vtanh.f32 %v6867_v61 }
0x234f   :  { %v12879_v54 = vpop.eup %12878  ;;  %12898 = vpow2.f32 %v10135_v16 }
0x2350   :  { %7194 = vrot.lane.b32.xlu1 %v12879_v54, %s13241_s27  ;;  %v12881_v3 = vpop.eup %12880  ;;  %12900 = vpow2.f32 %v10137_v50 }
0x2351   :  { %v12883_v25 = vpop.eup %12882  ;;  %12902 = vpow2.f32 %v10139_v7 }
0x2352   :  { %7190 = vrot.lane.b32.xlu0 %v12877_v5, %s13241_s27  ;;  %v12885_v37 = vpop.eup %12884  ;;  %12904 = vpow2.f32 %v10140_v31  ;;  %v10143_v5 = vmul.f32 -1.442695, %v7009_v29  ;;  %v10132_v29 = vmul.f32 -1.442695, %v6867_v61 }
0x2353   :  { %v12887_v43 = vpop.eup %12886  ;;  %12906 = vpow2.f32 %v10134_v26 }
0x2354   :  { %7184 = vrot.lane.b32.xlu1 %v12883_v25, %s13241_s27  ;;  %v12889_v42 = vpop.eup %12888  ;;  %12908 = vpow2.f32 %v10141_v48 }
0x2355   :  { %v12891_v55 = vpop.eup %12890  ;;  %12910 = vpow2.f32 %v10136_v56 }
0x2356   :  { %7196 = vrot.lane.b32.xlu0 %v12881_v3, %s13241_s27  ;;  %v12893_v19 = vpop.eup %12892  ;;  %12912 = vpow2.f32 %v10143_v5 }
0x2357   :  { %v12895_v10 = vpop.eup %12894 }
0x2358   :  { %7188 = vrot.lane.b32.xlu1 %v12887_v43, %s13241_s27  ;;  %v12897_v39 = vpop.eup %12896 }
0x2359   :  { %v12899_v14 = vpop.eup %12898 }
0x235a   :  { %7198 = vrot.lane.b32.xlu0 %v12885_v37, %s13241_s27  ;;  %v7095_v49 = vadd.f32 1.0, %v12899_v14  ;;  %v12901_v54 = vpop.eup %12900 }
0x235b   :  { %v12903_v3 = vpop.eup %12902  ;;  %v7097_v59 = vadd.f32 1.0, %v12901_v54 }
0x235c   :  { %7192 = vrot.lane.b32.xlu1 %v12891_v55, %s13241_s27  ;;  %12914 = vrcp.f32 %v7095_v49  ;;  %v12905_v62 = vpop.eup %12904  ;;  %v7099_v22 = vadd.f32 1.0, %v12903_v3 }
0x235d   :  { %12916 = vpow2.f32 %v10138_v32  ;;  %v12907_v25 = vpop.eup %12906  ;;  %v7100_v38 = vadd.f32 1.0, %v12905_v62 }
0x235e   :  { %7202 = vrot.lane.b32.xlu0 %v12889_v42, %s13241_s27  ;;  %12918 = vpow2.f32 %v10133_v28  ;;  %v12909_v47 = vpop.eup %12908  ;;  %v7094_v37 = vadd.f32 1.0, %v12907_v25 }
0x235f   :  { %12920 = vrcp.f32 %v7097_v59  ;;  %v12911_v43 = vpop.eup %12910  ;;  %v7101_v41 = vadd.f32 1.0, %v12909_v47 }
0x2360   :  { %7200 = vrot.lane.b32.xlu1 %v12895_v10, %s13241_s27  ;;  %12922 = vpow2.f32 %v10142_v6  ;;  %v12913_v42 = vpop.eup %12912  ;;  %v7096_v30 = vadd.f32 1.0, %v12911_v43 }
0x2361   :  { %12924 = vrcp.f32 %v7099_v22 }
0x2362   :  { %7036 = vrot.lane.b32.xlu0 %v12893_v19, %s13241_s27  ;;  %12926 = vrcp.f32 %v7100_v38 }
0x2363   :  { %12928 = vpow2.f32 %v10132_v29 }
0x2364   :  { %7034 = vrot.lane.b32.xlu1 %v12897_v39, %s13241_s27  ;;  %12930 = vrcp.f32 %v7094_v37  ;;  %v7103_v39 = vadd.f32 1.0, %v12913_v42 }
0x2365   :  { %12932 = vrcp.f32 %v7101_v41 }
0x2366   :  { %v15461_v35 = vpop.eup %12914  ;;  %12934 = vrcp.f32 %v7096_v30 }
0x2367   :  { %v12917_v19 = vpop.eup %12916  ;;  %12936 = vrcp.f32 %v7103_v39 }
0x2368   :  { %v12919_v16 = vpop.eup %12918  ;;  %v7098_v7 = vadd.f32 1.0, %v12917_v19 }
0x2369   :  { %v15465_v61 = vpop.eup %12920  ;;  %v7017_v14 = vadd.f32 1.0, %v12919_v16 }
0x236a   :  { %v12923_v31 = vpop.eup %12922  ;;  %12938 = vrcp.f32 %v7098_v7 }
0x236b   :  { %v15468_v48 = vpop.eup %12924  ;;  %v7102_v54 = vadd.f32 1.0, %v12923_v31  ;;  %12940 = vrcp.f32 %v7017_v14 }
0x236c   :  { %v15472_v49 = vpop.eup %12926 }
0x236d   :  { %v12929_v3 = vpop.eup %12928  ;;  %12942 = vrcp.f32 %v7102_v54  ;;  %v7145_v54 = vrot.slane %v15351_v63, 7 }
0x236e   :  { %v15476_v59 = vpop.eup %12930  ;;  %v7016_v25 = vadd.f32 1.0, %v12929_v3 }
0x236f   :  { %v15480_v22 = vpop.eup %12932 }
0x2370   :  { %v15484_v29 = vpop.eup %12934  ;;  %12944 = vrcp.f32 %v7016_v25 }
0x2371   :  { %v15488_v41 = vpop.eup %12936 }
0x2374   :  { %v15492_v30 = vpop.eup %12938 }
0x2375   :  { %v15496_v39 = vpop.eup %12940 }
0x2377   :  { %v15500_v7 = vpop.eup %12942 }
0x237a   :  { %v15505_v14 = vpop.eup %12944 }
0x23c0   :  { %v7187_v55 = vpop.permute.xlu0 %7186 }
0x23c1   :  { %v7215_v10 = vmul.f32 %v15461_v35, %v7187_v55 }
0x23c2   :  { %v7195_v56 = vpop.permute.xlu1 %7194 }
0x23c3   :  { %7236 = vrot.lane.b32.xlu0 %v7215_v10, %s13251_s5  ;;  %v7219_v5 = vmul.f32 %v15468_v48, %v7195_v56 }
0x23c4   :  { %v7191_v50 = vpop.permute.xlu0 %7190 }
0x23c5   :  { %v7217_v26 = vmul.f32 %v15465_v61, %v7191_v50  ;;  %7244 = vrot.lane.b32.xlu1 %v7219_v5, %s13251_s5 }
0x23c6   :  { %v7185_v62 = vpop.permute.xlu1 %7184 }
0x23c7   :  { %7240 = vrot.lane.b32.xlu0 %v7217_v26, %s13251_s5  ;;  %v7214_v6 = vmul.f32 %v15476_v59, %v7185_v62 }
0x23c8   :  { %v7197_v32 = vpop.permute.xlu0 %7196 }
0x23c9   :  { %v7220_v28 = vmul.f32 %v15472_v49, %v7197_v32  ;;  %7234 = vrot.lane.b32.xlu1 %v7214_v6, %s13251_s5  ;;  %v7165_v32 = vmul.f32 %v15461_v35, %v7145_v54  ;;  %v7149_v6 = vrot.slane %v15348_v40, 7 }
0x23ca   :  { %v7189_v37 = vpop.permute.xlu1 %7188 }
0x23cb   :  { %7246 = vrot.lane.b32.xlu0 %v7220_v28, %s13251_s5  ;;  %v7216_v43 = vmul.f32 %v15484_v29, %v7189_v37  ;;  %v7147_v28 = vrot.slane %v15362_v45, 7  ;;  %v7169_v37 = vmul.f32 %v15468_v48, %v7149_v6 }
0x23cc   :  { %v7199_v38 = vpop.permute.xlu0 %7198 }
0x23cd   :  { %v7221_v47 = vmul.f32 %v15480_v22, %v7199_v38  ;;  %7238 = vrot.lane.b32.xlu1 %v7216_v43, %s13251_s5  ;;  %v7167_v25 = vmul.f32 %v15465_v61, %v7147_v28 }
0x23ce   :  { %v7193_v19 = vpop.permute.xlu1 %7192 }
0x23cf   :  { %7248 = vrot.lane.b32.xlu0 %v7221_v47, %s13251_s5  ;;  %v7218_v10 = vmul.f32 %v15492_v30, %v7193_v19  ;;  %v7150_v47 = vrot.slane %v15358_v53, 7  ;;  %v7151_v19 = vrot.slane %v15373_v24, 7 }
0x23d0   :  { %v7203_v42 = vpop.permute.xlu0 %7202 }
0x23d1   :  { %v7223_v55 = vmul.f32 %v15488_v41, %v7203_v42  ;;  %7242 = vrot.lane.b32.xlu1 %v7218_v10, %s13251_s5  ;;  %v7144_v42 = vrot.slane %v15331_v52, 7  ;;  %v7170_v40 = vmul.f32 %v15472_v49, %v7150_v47  ;;  %v7171_v52 = vmul.f32 %v15480_v22, %v7151_v19 }
0x23d2   :  { %v7201_v31 = vpop.permute.xlu1 %7200 }
0x23d3   :  { %7252 = vrot.lane.b32.xlu0 %v7223_v55, %s13251_s5  ;;  %v7222_v26 = vmul.f32 %v15500_v7, %v7201_v31  ;;  %v7164_v53 = vmul.f32 %v15476_v59, %v7144_v42 }
0x23d4   :  { %v7037_v16 = vpop.permute.xlu0 %7036 }
0x23d5   :  { %v7041_v50 = vmul.f32 %v15496_v39, %v7037_v16  ;;  %7250 = vrot.lane.b32.xlu1 %v7222_v26, %s13251_s5 }
0x23d6   :  { %v7035_v56 = vpop.permute.xlu1 %7034 }
0x23d7   :  { %7046 = vrot.lane.b32.xlu0 %v7041_v50, %s13251_s5  ;;  %v7040_v5 = vmul.f32 %v15505_v14, %v7035_v56  ;;  %v7146_v50 = vrot.slane %v15338_v17, 7  ;;  %v7148_v17 = vrot.slane %v15341_v23, 7 }
0x23d9   :  { %7044 = vrot.lane.b32.xlu1 %v7040_v5, %s13251_s5  ;;  %v7153_v5 = vrot.slane %v15384_v12, 7  ;;  %v7166_v24 = vmul.f32 %v15484_v29, %v7146_v50  ;;  %v7027_v12 = vrot.slane %v15391_v13, 7  ;;  %v7026_v50 = vrot.slane %v15380_v2, 7 }
0x23db   :  { %v7173_v28 = vmul.f32 %v15488_v41, %v7153_v5 }
0x2435   :  { %v7237_v3 = vpop.permute.xlu0 %7236 }
0x2436   :  { %v15512_v62 = vadd.f32 %v7237_v3, %v7165_v32 }
0x2437   :  { %v7245_v63 = vpop.permute.xlu1 %7244 }
0x2438   :  { %12946 = vtanh.f32 %v15512_v62  ;;  %v15522_v55 = vadd.f32 %v7245_v63, %v7169_v37  ;;  %v7152_v63 = vrot.slane %v15369_v4, 7 }
0x2439   :  { %v7241_v38 = vpop.permute.xlu0 %7240 }
0x243a   :  { %v15519_v43 = vadd.f32 %v7241_v38, %v7167_v25  ;;  %v7168_v38 = vmul.f32 %v15492_v30, %v7148_v17  ;;  %v7172_v19 = vmul.f32 %v15500_v7, %v7152_v63 }
0x243b   :  { %v7235_v16 = vpop.permute.xlu1 %7234 }
0x243c   :  { %12948 = vtanh.f32 %v15519_v43  ;;  %v15532_v31 = vadd.f32 %v7235_v16, %v7164_v53 }
0x243d   :  { %v7247_v45 = vpop.permute.xlu0 %7246  ;;  %12950 = vtanh.f32 %v15522_v55 }
0x243e   :  { %v15529_v10 = vadd.f32 %v7247_v45, %v7170_v40  ;;  %v7031_v40 = vmul.f32 %v15496_v39, %v7027_v12 }
0x243f   :  { %v7239_v32 = vpop.permute.xlu1 %7238 }
0x2440   :  { %12952 = vtanh.f32 %v15529_v10  ;;  %v15543_v3 = vadd.f32 %v7239_v32, %v7166_v24 }
0x2441   :  { %v7249_v26 = vpop.permute.xlu0 %7248  ;;  %12954 = vtanh.f32 %v15532_v31 }
0x2442   :  { %v12947_v56 = vpop.eup %12946  ;;  %v15539_v54 = vadd.f32 %v7249_v26, %v7171_v52 }
0x2443   :  { %7296 = vrot.lane.b32.xlu0 %v12947_v56, %s13241_s27  ;;  %v7243_v37 = vpop.permute.xlu1 %7242  ;;  %v7030_v56 = vmul.f32 %v15505_v14, %v7026_v50 }
0x2444   :  { %12956 = vtanh.f32 %v15539_v54  ;;  %v15554_v42 = vadd.f32 %v7243_v37, %v7168_v38 }
0x2445   :  { %v7253_v6 = vpop.permute.xlu0 %7252  ;;  %12958 = vtanh.f32 %v15543_v3 }
0x2446   :  { %v12949_v25 = vpop.eup %12948  ;;  %v15550_v47 = vadd.f32 %v7253_v6, %v7173_v28 }
0x2447   :  { %7300 = vrot.lane.b32.xlu0 %v12949_v25, %s13241_s27  ;;  %v12951_v23 = vpop.eup %12950  ;;  %v7251_v16 = vpop.permute.xlu1 %7250 }
0x2448   :  { %12960 = vtanh.f32 %v15550_v47  ;;  %7304 = vrot.lane.b32.xlu1 %v12951_v23, %s13241_s27  ;;  %v15565_v52 = vadd.f32 %v7251_v16, %v7172_v19 }
0x2449   :  { %v7047_v13 = vpop.permute.xlu0 %7046  ;;  %12962 = vtanh.f32 %v15554_v42 }
0x244a   :  { %v12953_v45 = vpop.eup %12952  ;;  %v15561_v53 = vadd.f32 %v7047_v13, %v7031_v40 }
0x244b   :  { %7306 = vrot.lane.b32.xlu0 %v12953_v45, %s13241_s27  ;;  %v12955_v4 = vpop.eup %12954  ;;  %v7045_v5 = vpop.permute.xlu1 %7044 }
0x244c   :  { %12964 = vtanh.f32 %v15561_v53  ;;  %7294 = vrot.lane.b32.xlu1 %v12955_v4, %s13241_s27  ;;  %v15572_v32 = vadd.f32 %v7045_v5, %v7030_v56 }
0x244d   :  { %12966 = vtanh.f32 %v15565_v52 }
0x244e   :  { %v12957_v26 = vpop.eup %12956  ;;  %12968 = vtanh.f32 %v15572_v32 }
0x244f   :  { %7308 = vrot.lane.b32.xlu0 %v12957_v26, %s13241_s27  ;;  %v12959_v24 = vpop.eup %12958 }
0x2450   :  { %7298 = vrot.lane.b32.xlu1 %v12959_v24, %s13241_s27 }
0x2452   :  { %v12961_v2 = vpop.eup %12960 }
0x2453   :  { %7312 = vrot.lane.b32.xlu0 %v12961_v2, %s13241_s27  ;;  %v12963_v17 = vpop.eup %12962 }
0x2454   :  { %7302 = vrot.lane.b32.xlu1 %v12963_v17, %s13241_s27 }
0x2456   :  { %v12965_v28 = vpop.eup %12964 }
0x2457   :  { %7058 = vrot.lane.b32.xlu0 %v12965_v28, %s13241_s27  ;;  %v12967_v6 = vpop.eup %12966 }
0x2458   :  { %7310 = vrot.lane.b32.xlu1 %v12967_v6, %s13241_s27  ;;  %v12969_v25 = vpop.eup %12968 }
0x245c   :  { %7056 = vrot.lane.b32.xlu1 %v12969_v25, %s13241_s27 }
0x24b5   :  { %v7297_v12 = vpop.permute.xlu0 %7296 }
0x24b6   :  { %v7325_v13 = vmul.f32 %v15461_v35, %v7297_v12 }
0x24b8   :  { %v7431_v50 = vrot.slane %v7325_v13, 4 }
0x24b9   :  { %v7301_v38 = vpop.permute.xlu0 %7300 }
0x24ba   :  { %v7305_v37 = vpop.permute.xlu1 %7304  ;;  %v7327_v26 = vmul.f32 %v15465_v61, %v7301_v38 }
0x24bb   :  { %v7329_v61 = vmul.f32 %v15468_v48, %v7305_v37 }
0x24bc   :  { %v7435_v25 = vrot.slane %v7327_v26, 2 }
0x24bd   :  { %v7307_v23 = vpop.permute.xlu0 %7306 }
0x24be   :  { %v7295_v63 = vpop.permute.xlu1 %7294  ;;  %v7330_v2 = vmul.f32 %v15472_v49, %v7307_v23 }
0x24bf   :  { %v7324_v40 = vmul.f32 %v15476_v59, %v7295_v63 }
0x24c0   :  { %v7440_v38 = vrot.slane %v7330_v2, 7 }
0x24c1   :  { %v7309_v45 = vpop.permute.xlu0 %7308  ;;  %v7430_v19 = vrot.slane %v7324_v40, 5 }
0x24c2   :  { %v7299_v16 = vpop.permute.xlu1 %7298  ;;  %v7331_v28 = vmul.f32 %v15480_v22, %v7309_v45 }
0x24c3   :  { %v7326_v4 = vmul.f32 %v15484_v29, %v7299_v16  ;;  %v7432_v24 = vsel %vm4581_vm15, %v7431_v50, %v7430_v19 }
0x24c4   :  { %v7442_v40 = vrot.slane %v7331_v28, 6 }
0x24c5   :  { %v7313_v56 = vpop.permute.xlu0 %7312  ;;  %v7433_v5 = vrot.slane %v7326_v4, 3 }
0x24c6   :  { %v7303_v17 = vpop.permute.xlu1 %7302  ;;  %v7333_v6 = vmul.f32 %v15488_v41, %v7313_v56 }
0x24c7   :  { %v7434_v59 = vsel %vm4676_vm0, %v7433_v5, %v7432_v24  ;;  %v7328_v35 = vmul.f32 %v15492_v30, %v7303_v17 }
0x24c8   :  { %v7436_v63 = vsel %vm4679_vm1, %v7435_v25, %v7434_v59  ;;  %v7445_v23 = vrot.slane %v7333_v6, 4 }
0x24c9   :  { %v7059_v29 = vpop.permute.xlu0 %7058  ;;  %v7437_v12 = vrot.slane %v7328_v35, 1 }
0x24ca   :  { %v7311_v13 = vpop.permute.xlu1 %7310  ;;  %v7063_v45 = vmul.f32 %v15496_v39, %v7059_v29 }
0x24cb   :  { %v7438_v49 = vsel %vm4682_vm3, %v7437_v12, %v7436_v63  ;;  %v7332_v22 = vmul.f32 %v15500_v7, %v7311_v13 }
0x24cc   :  { %v7439_v30 = vsel %vm4685_vm4, %v7329_v61, %v7438_v49  ;;  %v7337_v4 = vrot.slane %v7063_v45, 4 }
0x24cd   :  { %v7444_v41 = vrot.slane %v7332_v22, 5  ;;  %v7441_v19 = vsel %vm4688_vm5, %v7440_v38, %v7439_v30 }
0x24ce   :  { %v7443_v16 = vsel %vm4691_vm7, %v7442_v40, %v7441_v19  ;;  %v7057_v48 = vpop.permute.xlu1 %7056 }
0x24cf   :  { %7447 = vrot.lane.b32.xlu1 %v7443_v16, %s13251_s5  ;;  %v7446_v37 = vsel %vm4581_vm15, %v7445_v23, %v7444_v41  ;;  %v7062_v50 = vmul.f32 %v15505_v14, %v7057_v48 }
0x24d0   :  { %7449 = vrot.lane.b32.xlu0 %v7446_v37, %s13251_s5 }
0x24d1   :  { %v7336_v7 = vrot.slane %v7062_v50, 5 }
0x24d3   :  { %v7338_v39 = vsel %vm4581_vm15, %v7337_v4, %v7336_v7 }
0x24d4   :  { %7339 = vrot.lane.b32.xlu1 %v7338_v39, %s13251_s5 }
0x2541   :  { %v7448_v26 = vpop.permute.xlu1 %7447 }
0x2542   :  { %11241 = vmatprep.mubr.msk.f32.mxu1 %vm386_vm6, %v7448_v26  ;;  %v7450_v56 = vpop.permute.xlu0 %7449 }
0x2543   :  { %11242 = vmatmul.mubr.msk.f32.vlgmr.msra.gmra.mrb[82].mxu1 %vm386_vm6, %v7450_v56 }
0x2544   :  { %11810 = vmatpush3.bf16.msra.mxu1 %v14421_v57 }
0x2545   :  { %11812 = vmatprep.subr.bf16.mxu1 %v14463_v44 }
0x2546   :  { %v7340_v5 = vpop.permute.xlu1 %7339 }
0x2547   :  { %11231 = vmatmul.mubr.msk.f32.vlgmr.msra.gmra.mrb[86].mxu0 %vm386_vm6, %v7340_v5 }
0x2548   :  { %11814 = vmatpush3.bf16.msra.mxu1 %v14463_v44  ;;  %11803 = vmatpush3.bf16.msra.mxu0 %v14403_v1 }
0x2549   :  { %11804 = vmatprep.subr.bf16.mxu0 %v13248_v11  ;;  %11252 = vmatprep.mubr.msk.f32.mxu0 %vm13249_vm12, %v13250_v46 }
0x254c   :  { %11806 = vmatpush3.bf16.msra.mxu0 %v14416_v27 }
0x254d   :  { %11815 = vmatprep.subr.bf16.mxu0 %v13248_v11 }
0x2616   :  { %v11243_v14 = vpop.f32.mrb[82].mxu1 }
0x2617   :  { %v7521_v57 = vpop.f32.mrb[83].mxu1  ;;  %v7539_v29 = vrot.slane %v11243_v14, 2  ;;  %v7540_v30 = vrot.slane %v11243_v14, 3 }
0x2618   :  { %v7532_v17 = vrot.slane %v7521_v57, 2  ;;  %v7534_v28 = vrot.slane %v7521_v57, 4  ;;  %v7536_v44 = vrot.slane %v7521_v57, 6  ;;  %v7533_v35 = vrot.slane %v7521_v57, 3 }
0x2619   :  { %v7538_v25 = vrot.slane %v7521_v57, 1  ;;  %v7557_v27 = vadd.f32 %v7521_v57, %v14512_v33  ;;  %v7535_v61 = vrot.slane %v7521_v57, 5  ;;  %v7559_v13 = vadd.f32 %v7539_v29, %v14519_v8 }
0x261a   :  { %v7409_v24 = vpop.f32.mrb[86].mxu0  ;;  %v7551_v59 = vadd.f32 %v7532_v17, %v14494_v15  ;;  %v7553_v1 = vadd.f32 %v7534_v28, %v14500_v0  ;;  %v7555_v6 = vadd.f32 %v7536_v44, %v14506_v21  ;;  %v7552_v12 = vadd.f32 %v7533_v35, %v14492_v36 }
0x261b   :  { %v11232_v2 = vpop.f32.mrb[87].mxu0  ;;  %v7558_v38 = vadd.f32 %v7538_v25, %v14510_v34  ;;  %v7414_v40 = vrot.slane %v7409_v24, 2  ;;  %v7537_v49 = vrot.slane %v7521_v57, 7  ;;  %v7554_v22 = vadd.f32 %v7535_v61, %v14498_v9 }
0x261c   :  { %12970 = vtanh.f32 %v7551_v59  ;;  %v7415_v48 = vrot.slane %v7409_v24, 3  ;;  %v7560_v37 = vadd.f32 %v7540_v30, %v14517_v20  ;;  %v10149_v24 = vmul.f32 -1.442695, %v7551_v59 }
0x261d   :  { %12972 = vtanh.f32 %v7553_v1  ;;  %v7418_v45 = vadd.f32 %v7414_v40, %v14555_v18  ;;  %v7556_v41 = vadd.f32 %v7537_v49, %v14504_v60  ;;  %v10151_v2 = vmul.f32 -1.442695, %v7553_v1 }
0x261e   :  { %12974 = vtanh.f32 %v7555_v6  ;;  %v7419_v7 = vadd.f32 %v7415_v48, %v14544_v58  ;;  %v10155_v17 = vmul.f32 -1.442695, %v7557_v27  ;;  %v10153_v28 = vmul.f32 -1.442695, %v7555_v6 }
0x261f   :  { %12976 = vtanh.f32 %v7557_v27  ;;  %v10150_v44 = vmul.f32 -1.442695, %v7552_v12  ;;  %v10156_v35 = vmul.f32 -1.442695, %v7558_v38  ;;  %v10157_v29 = vmul.f32 -1.442695, %v7559_v13 }
0x2620   :  { %12978 = vtanh.f32 %v7552_v12  ;;  %v10152_v61 = vmul.f32 -1.442695, %v7554_v22  ;;  %v10154_v49 = vmul.f32 -1.442695, %v7556_v41  ;;  %v10147_v59 = vmul.f32 -1.442695, %v7418_v45 }
0x2621   :  { %12980 = vtanh.f32 %v7558_v38  ;;  %v10158_v6 = vmul.f32 -1.442695, %v7560_v37 }
0x2622   :  { %12982 = vtanh.f32 %v7559_v13 }
0x2623   :  { %12984 = vtanh.f32 %v7554_v22  ;;  %v10148_v22 = vmul.f32 -1.442695, %v7419_v7 }
0x2624   :  { %12986 = vtanh.f32 %v7418_v45 }
0x2625   :  { %12988 = vtanh.f32 %v7556_v41 }
0x2626   :  { %v12971_v63 = vpop.eup %12970  ;;  %12990 = vtanh.f32 %v7560_v37 }
0x2627   :  { %7735 = vrot.lane.b32.xlu0 %v12971_v63, %s13241_s27  ;;  %v12973_v23 = vpop.eup %12972  ;;  %12992 = vtanh.f32 %v7419_v7 }
0x2628   :  { %v12975_v19 = vpop.eup %12974  ;;  %12994 = vpow2.f32 %v10149_v24 }
0x2629   :  { %v12977_v16 = vpop.eup %12976  ;;  %12996 = vpow2.f32 %v10151_v2 }
0x262a   :  { %7747 = vrot.lane.b32.xlu1 %v12977_v16, %s13241_s27  ;;  %v12979_v4 = vpop.eup %12978  ;;  %12998 = vpow2.f32 %v10155_v17 }
0x262b   :  { %7739 = vrot.lane.b32.xlu0 %v12973_v23, %s13241_s27  ;;  %v12981_v50 = vpop.eup %12980  ;;  %13000 = vpow2.f32 %v10153_v28 }
0x262c   :  { %v12983_v39 = vpop.eup %12982  ;;  %13002 = vpow2.f32 %v10150_v44 }
0x262d   :  { %v12985_v26 = vpop.eup %12984  ;;  %13004 = vpow2.f32 %v10156_v35 }
0x262e   :  { %7737 = vrot.lane.b32.xlu1 %v12979_v4, %s13241_s27  ;;  %v12987_v56 = vpop.eup %12986  ;;  %13006 = vpow2.f32 %v10157_v29 }
0x262f   :  { %7743 = vrot.lane.b32.xlu0 %v12975_v19, %s13241_s27  ;;  %v12989_v5 = vpop.eup %12988  ;;  %13008 = vpow2.f32 %v10152_v61 }
0x2630   :  { %v12991_v14 = vpop.eup %12990 }
0x2631   :  { %v12993_v57 = vpop.eup %12992 }
0x2632   :  { %7741 = vrot.lane.b32.xlu1 %v12985_v26, %s13241_s27  ;;  %v12995_v25 = vpop.eup %12994 }
0x2633   :  { %7749 = vrot.lane.b32.xlu0 %v12981_v50, %s13241_s27  ;;  %v7645_v63 = vadd.f32 1.0, %v12995_v25  ;;  %v12997_v40 = vpop.eup %12996 }
0x2634   :  { %v12999_v23 = vpop.eup %12998  ;;  %v7647_v1 = vadd.f32 1.0, %v12997_v40 }
0x2635   :  { %13010 = vrcp.f32 %v7645_v63  ;;  %v13001_v27 = vpop.eup %13000  ;;  %v7651_v12 = vadd.f32 1.0, %v12999_v23 }
0x2636   :  { %7745 = vrot.lane.b32.xlu1 %v12989_v5, %s13241_s27  ;;  %13012 = vpow2.f32 %v10154_v49  ;;  %v13003_v38 = vpop.eup %13002  ;;  %v7649_v13 = vadd.f32 1.0, %v13001_v27 }
0x2637   :  { %7751 = vrot.lane.b32.xlu0 %v12983_v39, %s13241_s27  ;;  %13014 = vpow2.f32 %v10147_v59  ;;  %v13005_v30 = vpop.eup %13004  ;;  %v7646_v19 = vadd.f32 1.0, %v13003_v38 }
0x2638   :  { %13016 = vrcp.f32 %v7647_v1  ;;  %v13007_v16 = vpop.eup %13006  ;;  %v7652_v41 = vadd.f32 1.0, %v13005_v30 }
0x2639   :  { %13018 = vpow2.f32 %v10158_v6  ;;  %v13009_v45 = vpop.eup %13008  ;;  %v7653_v37 = vadd.f32 1.0, %v13007_v16 }
0x263a   :  { %7753 = vrot.lane.b32.xlu1 %v12991_v14, %s13241_s27  ;;  %13020 = vrcp.f32 %v7651_v12  ;;  %v7648_v26 = vadd.f32 1.0, %v13009_v45 }
0x263b   :  { %7585 = vrot.lane.b32.xlu0 %v12987_v56, %s13241_s27  ;;  %13022 = vrcp.f32 %v7649_v13 }
0x263c   :  { %13024 = vpow2.f32 %v10148_v22 }
0x263d   :  { %13026 = vrcp.f32 %v7646_v19 }
0x263e   :  { %7587 = vrot.lane.b32.xlu1 %v12993_v57, %s13241_s27  ;;  %13028 = vrcp.f32 %v7652_v41 }
0x263f   :  { %v15641_v48 = vpop.eup %13010  ;;  %13030 = vrcp.f32 %v7653_v37 }
0x2640   :  { %v13013_v39 = vpop.eup %13012  ;;  %13032 = vrcp.f32 %v7648_v26 }
0x2641   :  { %v13015_v56 = vpop.eup %13014  ;;  %v7650_v57 = vadd.f32 1.0, %v13013_v39 }
0x2642   :  { %v15645_v7 = vpop.eup %13016  ;;  %v7567_v2 = vadd.f32 1.0, %v13015_v56 }
0x2643   :  { %v13019_v24 = vpop.eup %13018  ;;  %13034 = vrcp.f32 %v7650_v57 }
0x2644   :  { %v15648_v17 = vpop.eup %13020  ;;  %v7654_v63 = vadd.f32 1.0, %v13019_v24  ;;  %13036 = vrcp.f32 %v7567_v2  ;;  %v7695_v24 = vrot.slane %v15532_v31, 7 }
0x2645   :  { %v15651_v28 = vpop.eup %13022 }
0x2646   :  { %v13025_v61 = vpop.eup %13024  ;;  %13038 = vrcp.f32 %v7654_v63  ;;  %v7715_v2 = vmul.f32 %v15641_v48, %v7695_v24  ;;  %v7701_v63 = vrot.slane %v15529_v10, 7 }
0x2647   :  { %v15655_v40 = vpop.eup %13026  ;;  %v7568_v6 = vadd.f32 1.0, %v13025_v61 }
0x2648   :  { %v15659_v49 = vpop.eup %13028  ;;  %v7721_v31 = vmul.f32 %v15648_v17, %v7701_v63 }
0x2649   :  { %v15663_v12 = vpop.eup %13030  ;;  %13040 = vrcp.f32 %v7568_v6  ;;  %v7696_v6 = vrot.slane %v15512_v62, 7  ;;  %v7703_v62 = vrot.slane %v15565_v52, 7  ;;  %v7577_v52 = vrot.slane %v15572_v32, 7 }
0x264a   :  { %v15667_v38 = vpop.eup %13032 }
0x264b   :  { %v7716_v10 = vmul.f32 %v15655_v40, %v7696_v6 }
0x264d   :  { %v15671_v16 = vpop.eup %13034 }
0x264e   :  { %v15675_v41 = vpop.eup %13036 }
0x2650   :  { %v15681_v39 = vpop.eup %13038 }
0x2699   :  { %v7736_v4 = vpop.permute.xlu0 %7735 }
0x269a   :  { %v7765_v50 = vmul.f32 %v15641_v48, %v7736_v4 }
0x269c   :  { %7785 = vrot.lane.b32.xlu0 %v7765_v50, %s13251_s5  ;;  %v7748_v44 = vpop.permute.xlu1 %7747 }
0x269d   :  { %v7740_v5 = vpop.permute.xlu0 %7739  ;;  %v7771_v25 = vmul.f32 %v15648_v17, %v7748_v44 }
0x269e   :  { %v7767_v14 = vmul.f32 %v15645_v7, %v7740_v5  ;;  %v15685_v5 = vpop.eup %13040 }
0x269f   :  { %7797 = vrot.lane.b32.xlu1 %v7771_v25, %s13251_s5 }
0x26a0   :  { %7789 = vrot.lane.b32.xlu0 %v7767_v14, %s13251_s5  ;;  %v7738_v59 = vpop.permute.xlu1 %7737 }
0x26a1   :  { %v7744_v35 = vpop.permute.xlu0 %7743  ;;  %v7766_v1 = vmul.f32 %v15655_v40, %v7738_v59  ;;  %v7699_v59 = vrot.slane %v15554_v42, 7 }
0x26a2   :  { %v7769_v29 = vmul.f32 %v15651_v28, %v7744_v35  ;;  %v7697_v35 = vrot.slane %v15543_v3, 7 }
0x26a3   :  { %7787 = vrot.lane.b32.xlu1 %v7766_v1, %s13251_s5  ;;  %v7719_v1 = vmul.f32 %v15651_v28, %v7699_v59 }
0x26a4   :  { %7793 = vrot.lane.b32.xlu0 %v7769_v29, %s13251_s5  ;;  %v7742_v13 = vpop.permute.xlu1 %7741  ;;  %v7717_v29 = vmul.f32 %v15645_v7, %v7697_v35 }
0x26a5   :  { %v7750_v23 = vpop.permute.xlu0 %7749  ;;  %v7768_v22 = vmul.f32 %v15667_v38, %v7742_v13  ;;  %v7702_v13 = vrot.slane %v15539_v54, 7 }
0x26a6   :  { %v7772_v27 = vmul.f32 %v15659_v49, %v7750_v23 }
0x26a7   :  { %7791 = vrot.lane.b32.xlu1 %v7768_v22, %s13251_s5  ;;  %v7722_v42 = vmul.f32 %v15659_v49, %v7702_v13  ;;  %v7578_v13 = vrot.slane %v15561_v53, 7 }
0x26a8   :  { %7799 = vrot.lane.b32.xlu0 %v7772_v27, %s13251_s5  ;;  %v7746_v45 = vpop.permute.xlu1 %7745 }
0x26a9   :  { %v7752_v30 = vpop.permute.xlu0 %7751  ;;  %v7770_v37 = vmul.f32 %v15671_v16, %v7746_v45 }
0x26aa   :  { %v7773_v19 = vmul.f32 %v15663_v12, %v7752_v30 }
0x26ab   :  { %7795 = vrot.lane.b32.xlu1 %v7770_v37, %s13251_s5  ;;  %v7698_v37 = vrot.slane %v15519_v43, 7  ;;  %v7700_v43 = vrot.slane %v15522_v55, 7  ;;  %v7704_v55 = vrot.slane %v15550_v47, 7 }
0x26ac   :  { %7801 = vrot.lane.b32.xlu0 %v7773_v19, %s13251_s5  ;;  %v7754_v26 = vpop.permute.xlu1 %7753 }
0x26ad   :  { %v7586_v4 = vpop.permute.xlu0 %7585  ;;  %v7774_v56 = vmul.f32 %v15681_v39, %v7754_v26  ;;  %v7718_v26 = vmul.f32 %v15667_v38, %v7698_v37  ;;  %v7720_v35 = vmul.f32 %v15671_v16, %v7700_v43 }
0x26ae   :  { %v7591_v50 = vmul.f32 %v15675_v41, %v7586_v4 }
0x26af   :  { %7803 = vrot.lane.b32.xlu1 %v7774_v56, %s13251_s5  ;;  %v7723_v56 = vmul.f32 %v15663_v12, %v7703_v62 }
0x26b0   :  { %7595 = vrot.lane.b32.xlu0 %v7591_v50, %s13251_s5  ;;  %v7588_v14 = vpop.permute.xlu1 %7587 }
0x26b1   :  { %v7592_v57 = vmul.f32 %v15685_v5, %v7588_v14 }
0x26b3   :  { %7597 = vrot.lane.b32.xlu1 %v7592_v57, %s13251_s5 }
0x270e   :  { %v7786_v44 = vpop.permute.xlu0 %7785 }
0x270f   :  { %v15692_v25 = vadd.f32 %v7786_v44, %v7715_v2 }
0x2711   :  { %13042 = vtanh.f32 %v15692_v25  ;;  %v7798_v3 = vpop.permute.xlu1 %7797 }
0x2712   :  { %v7790_v61 = vpop.permute.xlu0 %7789  ;;  %v15705_v30 = vadd.f32 %v7798_v3, %v7721_v31  ;;  %v7724_v3 = vmul.f32 %v15681_v39, %v7704_v55 }
0x2713   :  { %v15698_v23 = vadd.f32 %v7790_v61, %v7717_v29  ;;  %v7581_v29 = vmul.f32 %v15675_v41, %v7577_v52 }
0x2715   :  { %13044 = vtanh.f32 %v15698_v23  ;;  %v7788_v19 = vpop.permute.xlu1 %7787 }
0x2716   :  { %v7794_v27 = vpop.permute.xlu0 %7793  ;;  %13046 = vtanh.f32 %v15705_v30  ;;  %v15715_v54 = vadd.f32 %v7788_v19, %v7716_v10 }
0x2717   :  { %v15707_v22 = vadd.f32 %v7794_v27, %v7719_v1 }
0x2719   :  { %13048 = vtanh.f32 %v15707_v22  ;;  %v7792_v14 = vpop.permute.xlu1 %7791 }
0x271a   :  { %v7800_v45 = vpop.permute.xlu0 %7799  ;;  %13050 = vtanh.f32 %v15715_v54  ;;  %v15726_v2 = vadd.f32 %v7792_v14, %v7718_v26 }
0x271b   :  { %v13043_v4 = vpop.eup %13042  ;;  %v15717_v50 = vadd.f32 %v7800_v45, %v7722_v42  ;;  %v7582_v42 = vmul.f32 %v15685_v5, %v7578_v13 }
0x271c   :  { %7845 = vrot.lane.b32.xlu0 %v13043_v4, %s13241_s27 }
0x271d   :  { %13052 = vtanh.f32 %v15717_v50  ;;  %v7796_v61 = vpop.permute.xlu1 %7795 }
0x271e   :  { %v7802_v57 = vpop.permute.xlu0 %7801  ;;  %13054 = vtanh.f32 %v15726_v2  ;;  %v15736_v32 = vadd.f32 %v7796_v61, %v7720_v35 }
0x271f   :  { %v13045_v24 = vpop.eup %13044  ;;  %v15728_v44 = vadd.f32 %v7802_v57, %v7723_v56 }
0x2720   :  { %7849 = vrot.lane.b32.xlu0 %v13045_v24, %s13241_s27  ;;  %v13047_v59 = vpop.eup %13046 }
0x2721   :  { %13056 = vtanh.f32 %v15728_v44  ;;  %7857 = vrot.lane.b32.xlu1 %v13047_v59, %s13241_s27  ;;  %v7804_v27 = vpop.permute.xlu1 %7803 }
0x2722   :  { %v7596_v63 = vpop.permute.xlu0 %7595  ;;  %13058 = vtanh.f32 %v15736_v32  ;;  %v15746_v47 = vadd.f32 %v7804_v27, %v7724_v3 }
0x2723   :  { %v15738_v31 = vadd.f32 %v7596_v63, %v7581_v29  ;;  %v13049_v1 = vpop.eup %13048 }
0x2724   :  { %7853 = vrot.lane.b32.xlu0 %v13049_v1, %s13241_s27  ;;  %v13051_v6 = vpop.eup %13050 }
0x2725   :  { %13060 = vtanh.f32 %v15738_v31  ;;  %7847 = vrot.lane.b32.xlu1 %v13051_v6, %s13241_s27  ;;  %v7598_v19 = vpop.permute.xlu1 %7597 }
0x2726   :  { %13062 = vtanh.f32 %v15746_v47  ;;  %v15752_v4 = vadd.f32 %v7598_v19, %v7582_v42 }
0x2727   :  { %v13053_v10 = vpop.eup %13052 }
0x2728   :  { %7859 = vrot.lane.b32.xlu0 %v13053_v10, %s13241_s27  ;;  %v13055_v45 = vpop.eup %13054  ;;  %13064 = vtanh.f32 %v15752_v4 }
0x2729   :  { %7851 = vrot.lane.b32.xlu1 %v13055_v45, %s13241_s27 }
0x272b   :  { %v13057_v37 = vpop.eup %13056 }
0x272c   :  { %7861 = vrot.lane.b32.xlu0 %v13057_v37, %s13241_s27  ;;  %v13059_v53 = vpop.eup %13058 }
0x272d   :  { %7855 = vrot.lane.b32.xlu1 %v13059_v53, %s13241_s27 }
0x272f   :  { %v13061_v62 = vpop.eup %13060 }
0x2730   :  { %7607 = vrot.lane.b32.xlu0 %v13061_v62, %s13241_s27  ;;  %v13063_v26 = vpop.eup %13062 }
0x2731   :  { %7863 = vrot.lane.b32.xlu1 %v13063_v26, %s13241_s27 }
0x2732   :  { %v13065_v56 = vpop.eup %13064 }
0x2735   :  { %7609 = vrot.lane.b32.xlu1 %v13065_v56, %s13241_s27 }
0x278e   :  { %v7846_v14 = vpop.permute.xlu0 %7845 }
0x278f   :  { %v7875_v35 = vmul.f32 %v15641_v48, %v7846_v14 }
0x2791   :  { %v7981_v1 = vrot.slane %v7875_v35, 6 }
0x2792   :  { %v7850_v57 = vpop.permute.xlu0 %7849 }
0x2793   :  { %v7858_v24 = vpop.permute.xlu1 %7857  ;;  %v7877_v52 = vmul.f32 %v15645_v7, %v7850_v57 }
0x2795   :  { %v7984_v59 = vrot.slane %v7877_v52, 4 }
0x2796   :  { %v7854_v43 = vpop.permute.xlu0 %7853 }
0x2797   :  { %v7848_v29 = vpop.permute.xlu1 %7847  ;;  %v7879_v55 = vmul.f32 %v15651_v28, %v7854_v43 }
0x2798   :  { %v7876_v61 = vmul.f32 %v15655_v40, %v7848_v29 }
0x2799   :  { %v7988_v42 = vrot.slane %v7879_v55, 2 }
0x279a   :  { %v7860_v63 = vpop.permute.xlu0 %7859  ;;  %v7982_v3 = vrot.slane %v7876_v61, 5 }
0x279b   :  { %v7852_v27 = vpop.permute.xlu1 %7851  ;;  %v7882_v48 = vmul.f32 %v15659_v49, %v7860_v63 }
0x279c   :  { %v7983_v6 = vsel %vm4581_vm15, %v7982_v3, %v7981_v1  ;;  %v7878_v13 = vmul.f32 %v15667_v38, %v7852_v27  ;;  %v7881_v38 = vmul.f32 %v15648_v17, %v7858_v24 }
0x279d   :  { %v7985_v10 = vsel %vm4676_vm0, %v7984_v59, %v7983_v6  ;;  %v7993_v56 = vrot.slane %v7882_v48, 7 }
0x279e   :  { %v7862_v7 = vpop.permute.xlu0 %7861  ;;  %v7986_v19 = vrot.slane %v7878_v13, 3 }
0x279f   :  { %v7856_v45 = vpop.permute.xlu1 %7855  ;;  %v7883_v28 = vmul.f32 %v15663_v12, %v7862_v7 }
0x27a0   :  { %v7987_v40 = vsel %vm4679_vm1, %v7986_v19, %v7985_v10  ;;  %v7880_v37 = vmul.f32 %v15671_v16, %v7856_v45 }
0x27a1   :  { %v7989_v53 = vsel %vm4682_vm3, %v7988_v42, %v7987_v40  ;;  %v7995_v49 = vrot.slane %v7883_v28, 6 }
0x27a2   :  { %v7608_v62 = vpop.permute.xlu0 %7607  ;;  %v7990_v26 = vrot.slane %v7880_v37, 1 }
0x27a3   :  { %v7864_v14 = vpop.permute.xlu1 %7863  ;;  %v7613_v52 = vmul.f32 %v15675_v41, %v7608_v62 }
0x27a4   :  { %v7991_v57 = vsel %vm4685_vm4, %v7990_v26, %v7989_v53  ;;  %v7884_v43 = vmul.f32 %v15681_v39, %v7864_v14 }
0x27a5   :  { %v7992_v35 = vsel %vm4688_vm5, %v7881_v38, %v7991_v57  ;;  %v7887_v63 = vrot.slane %v7613_v52, 6 }
0x27a6   :  { %v7996_v16 = vrot.slane %v7884_v43, 5  ;;  %v7994_v12 = vsel %vm4691_vm7, %v7993_v56, %v7992_v35 }
0x27a7   :  { %7998 = vrot.lane.b32.xlu0 %v7994_v12, %s13251_s5  ;;  %v7610_v29 = vpop.permute.xlu1 %7609 }
0x27a8   :  { %v7997_v61 = vsel %vm4581_vm15, %v7996_v16, %v7995_v49  ;;  %v7614_v17 = vmul.f32 %v15685_v5, %v7610_v29 }
0x27a9   :  { %8000 = vrot.lane.b32.xlu1 %v7997_v61, %s13251_s5 }
0x27aa   :  { %v7888_v24 = vrot.slane %v7614_v17, 5 }
0x27ac   :  { %v7889_v39 = vsel %vm4581_vm15, %v7888_v24, %v7887_v63 }
0x27ad   :  { %7890 = vrot.lane.b32.xlu0 %v7889_v39, %s13251_s5 }
0x2819   :  { %v7999_v41 = vpop.permute.xlu0 %7998 }
0x281a   :  { %11263 = vmatprep.mubr.msk.f32.mxu1 %vm386_vm6, %v7999_v41 }
0x281b   :  { %v8001_v59 = vpop.permute.xlu1 %8000 }
0x281c   :  { %11264 = vmatmul.mubr.msk.f32.vlgmr.msra.gmra.mrb[84].mxu1 %vm386_vm6, %v8001_v59 }
0x281f   :  { %v7891_v55 = vpop.permute.xlu0 %7890 }
0x2820   :  { %11253 = vmatmul.mubr.msk.f32.vlgmr.msra.gmra.mrb[88].mxu0 %vm386_vm6, %v7891_v55 }
0x2821   :  { %11274 = vmatprep.mubr.msk.f32.mxu0 %vm13249_vm12, %v13250_v46 }
0x28ef   :  { %v11265_v5 = vpop.f32.mrb[84].mxu1 }
0x28f0   :  { %v8090_v1 = vrot.slane %v11265_v5, 1  ;;  %v8072_v3 = vpop.f32.mrb[85].mxu1  ;;  %v8091_v56 = vrot.slane %v11265_v5, 2 }
0x28f1   :  { %v8083_v10 = vrot.slane %v8072_v3, 1  ;;  %v8084_v42 = vrot.slane %v8072_v3, 2  ;;  %v8085_v7 = vrot.slane %v8072_v3, 3  ;;  %v8086_v48 = vrot.slane %v8072_v3, 4 }
0x28f2   :  { %v8110_v27 = vadd.f32 %v8090_v1, %v14519_v8  ;;  %v8087_v37 = vrot.slane %v8072_v3, 5  ;;  %v8088_v53 = vrot.slane %v8072_v3, 6  ;;  %v8089_v62 = vrot.slane %v8072_v3, 7 }
0x28f3   :  { %v7960_v6 = vpop.f32.mrb[88].mxu0  ;;  %v8102_v19 = vadd.f32 %v8083_v10, %v14494_v15  ;;  %v8103_v45 = vadd.f32 %v8084_v42, %v14492_v36  ;;  %v8104_v28 = vadd.f32 %v8085_v7, %v14500_v0  ;;  %v8105_v8 = vadd.f32 %v8086_v48, %v14498_v9 }
0x28f4   :  { %13066 = vtanh.f32 %v8110_v27  ;;  %v11254_v13 = vpop.f32.mrb[89].mxu0  ;;  %v8106_v26 = vadd.f32 %v8087_v37, %v14506_v21  ;;  %v8107_v15 = vadd.f32 %v8088_v53, %v14504_v60  ;;  %v8108_v36 = vadd.f32 %v8089_v62, %v14512_v33 }
0x28f5   :  { %13068 = vtanh.f32 %v8102_v19  ;;  %v8109_v38 = vadd.f32 %v8072_v3, %v14510_v34  ;;  %v7966_v0 = vrot.slane %v7960_v6, 2  ;;  %v8111_v9 = vadd.f32 %v8091_v56, %v14517_v20 }
0x28f6   :  { %13070 = vtanh.f32 %v8103_v45  ;;  %v7965_v21 = vrot.slane %v7960_v6, 1  ;;  %v10172_v12 = vmul.f32 -1.442695, %v8110_v27  ;;  %v10164_v29 = vmul.f32 -1.442695, %v8102_v19 }
0x28f7   :  { %13072 = vtanh.f32 %v8104_v28  ;;  %v7970_v60 = vadd.f32 %v7966_v0, %v14544_v58  ;;  %v10165_v61 = vmul.f32 -1.442695, %v8103_v45  ;;  %v10166_v17 = vmul.f32 -1.442695, %v8104_v28 }
0x28f8   :  { %13074 = vtanh.f32 %v8105_v8  ;;  %v7969_v34 = vadd.f32 %v7965_v21, %v14555_v18  ;;  %v10167_v24 = vmul.f32 -1.442695, %v8105_v8  ;;  %v10168_v41 = vmul.f32 -1.442695, %v8106_v26 }
0x28f9   :  { %13076 = vtanh.f32 %v8106_v26  ;;  %v10169_v59 = vmul.f32 -1.442695, %v8107_v15  ;;  %v10170_v55 = vmul.f32 -1.442695, %v8108_v36  ;;  %v10171_v5 = vmul.f32 -1.442695, %v8109_v38 }
0x28fa   :  { %13078 = vtanh.f32 %v8107_v15  ;;  %v10173_v27 = vmul.f32 -1.442695, %v8111_v9  ;;  %v10163_v6 = vmul.f32 -1.442695, %v7970_v60  ;;  %v10162_v45 = vmul.f32 -1.442695, %v7969_v34 }
0x28fb   :  { %13080 = vtanh.f32 %v8108_v36 }
0x28fc   :  { %13082 = vtanh.f32 %v8109_v38 }
0x28fd   :  { %13084 = vtanh.f32 %v8111_v9 }
0x28fe   :  { %v13067_v40 = vpop.eup %13066  ;;  %13086 = vtanh.f32 %v7970_v60 }
0x28ff   :  { %8302 = vrot.lane.b32.xlu0 %v13067_v40, %s13241_s27  ;;  %v13069_v14 = vpop.eup %13068  ;;  %13088 = vtanh.f32 %v7969_v34 }
0x2900   :  { %v13071_v57 = vpop.eup %13070  ;;  %8286 = vrot.lane.b32.xlu1 %v13069_v14, %s13241_s27  ;;  %13090 = vpow2.f32 %v10172_v12 }
0x2901   :  { %v13073_v43 = vpop.eup %13072  ;;  %13092 = vpow2.f32 %v10164_v29 }
0x2902   :  { %v13075_v33 = vpop.eup %13074  ;;  %13094 = vpow2.f32 %v10165_v61 }
0x2903   :  { %8288 = vrot.lane.b32.xlu0 %v13071_v57, %s13241_s27  ;;  %v13077_v49 = vpop.eup %13076  ;;  %13096 = vpow2.f32 %v10166_v17 }
0x2904   :  { %8290 = vrot.lane.b32.xlu1 %v13073_v43, %s13241_s27  ;;  %v13079_v52 = vpop.eup %13078  ;;  %13098 = vpow2.f32 %v10167_v24 }
0x2905   :  { %v13081_v20 = vpop.eup %13080 }
0x2906   :  { %v13083_v35 = vpop.eup %13082 }
0x2907   :  { %8292 = vrot.lane.b32.xlu0 %v13075_v33, %s13241_s27  ;;  %v13085_v58 = vpop.eup %13084 }
0x2908   :  { %8294 = vrot.lane.b32.xlu1 %v13077_v49, %s13241_s27  ;;  %v13087_v16 = vpop.eup %13086 }
0x2909   :  { %v13089_v18 = vpop.eup %13088 }
0x290a   :  { %v13091_v63 = vpop.eup %13090 }
0x290b   :  { %8296 = vrot.lane.b32.xlu0 %v13079_v52, %s13241_s27  ;;  %v8204_v39 = vadd.f32 1.0, %v13091_v63  ;;  %v13093_v1 = vpop.eup %13092 }
0x290c   :  { %8298 = vrot.lane.b32.xlu1 %v13081_v20, %s13241_s27  ;;  %v13095_v3 = vpop.eup %13094  ;;  %v8196_v10 = vadd.f32 1.0, %v13093_v1 }
0x290d   :  { %13100 = vrcp.f32 %v8204_v39  ;;  %v13097_v13 = vpop.eup %13096  ;;  %v8197_v7 = vadd.f32 1.0, %v13095_v3 }
0x290e   :  { %13102 = vpow2.f32 %v10168_v41  ;;  %v13099_v42 = vpop.eup %13098  ;;  %v8198_v37 = vadd.f32 1.0, %v13097_v13 }
0x290f   :  { %8300 = vrot.lane.b32.xlu0 %v13083_v35, %s13241_s27  ;;  %13104 = vpow2.f32 %v10169_v59  ;;  %v8199_v53 = vadd.f32 1.0, %v13099_v42 }
0x2910   :  { %8304 = vrot.lane.b32.xlu1 %v13085_v58, %s13241_s27  ;;  %13106 = vpow2.f32 %v10170_v55 }
0x2911   :  { %13108 = vpow2.f32 %v10171_v5 }
0x2912   :  { %13110 = vpow2.f32 %v10173_v27 }
0x2913   :  { %8138 = vrot.lane.b32.xlu0 %v13087_v16, %s13241_s27  ;;  %13112 = vpow2.f32 %v10163_v6 }
0x2914   :  { %8136 = vrot.lane.b32.xlu1 %v13089_v18, %s13241_s27  ;;  %13114 = vrcp.f32 %v8196_v10 }
0x2915   :  { %13116 = vrcp.f32 %v8197_v7 }
0x2916   :  { %13118 = vpow2.f32 %v10162_v45 }
0x2917   :  { %v15814_v19 = vpop.eup %13100  ;;  %13120 = vrcp.f32 %v8198_v37 }
0x2918   :  { %v13103_v28 = vpop.eup %13102  ;;  %13122 = vrcp.f32 %v8199_v53 }
0x2919   :  { %v13105_v8 = vpop.eup %13104  ;;  %v8200_v62 = vadd.f32 1.0, %v13103_v28  ;;  %v8254_v28 = vrot.slane %v15728_v44, 7  ;;  %v8249_v44 = vrot.slane %v15726_v2, 7 }
0x291a   :  { %v13107_v26 = vpop.eup %13106  ;;  %v8201_v15 = vadd.f32 1.0, %v13105_v8 }
0x291b   :  { %v13109_v56 = vpop.eup %13108  ;;  %13124 = vrcp.f32 %v8200_v62  ;;  %v8202_v38 = vadd.f32 1.0, %v13107_v26  ;;  %v8274_v53 = vmul.f32 %v15814_v19, %v8254_v28  ;;  %v8246_v26 = vrot.slane %v15692_v25, 7 }
0x291c   :  { %v13111_v36 = vpop.eup %13110  ;;  %v8203_v14 = vadd.f32 1.0, %v13109_v56  ;;  %13126 = vrcp.f32 %v8201_v15  ;;  %v8247_v15 = vrot.slane %v15715_v54, 7 }
0x291d   :  { %v13113_v0 = vpop.eup %13112  ;;  %v8205_v33 = vadd.f32 1.0, %v13111_v36  ;;  %13128 = vrcp.f32 %v8202_v38 }
0x291e   :  { %v15818_v57 = vpop.eup %13114  ;;  %v8119_v52 = vadd.f32 1.0, %v13113_v0  ;;  %13130 = vrcp.f32 %v8203_v14  ;;  %v8248_v14 = vrot.slane %v15698_v23, 7  ;;  %v8251_v23 = vrot.slane %v15736_v32, 7 }
0x291f   :  { %v15820_v21 = vpop.eup %13116  ;;  %13132 = vrcp.f32 %v8205_v33  ;;  %v8266_v56 = vmul.f32 %v15818_v57, %v8246_v26 }
0x2920   :  { %v13119_v49 = vpop.eup %13118  ;;  %13134 = vrcp.f32 %v8119_v52  ;;  %v8267_v38 = vmul.f32 %v15820_v21, %v8247_v15 }
0x2921   :  { %v15825_v20 = vpop.eup %13120  ;;  %v8118_v12 = vadd.f32 1.0, %v13119_v49 }
0x2922   :  { %v15828_v58 = vpop.eup %13122  ;;  %v8268_v25 = vmul.f32 %v15825_v20, %v8248_v14 }
0x2923   :  { %13136 = vrcp.f32 %v8118_v12  ;;  %v8269_v33 = vmul.f32 %v15828_v58, %v8249_v44  ;;  %v8252_v12 = vrot.slane %v15705_v30, 7  ;;  %v8129_v30 = vrot.slane %v15752_v4, 7  ;;  %v8473_v44 = vld [vmem:[#allocation2 + $0xd8] sm:$0xff] }
0x2925   :  { %v15833_v61 = vpop.eup %13124 }
0x2926   :  { %v15836_v17 = vpop.eup %13126 }
0x2927   :  { %v15841_v59 = vpop.eup %13128 }
0x2928   :  { %v15844_v5 = vpop.eup %13130 }
0x2929   :  { %v15849_v6 = vpop.eup %13132 }
0x292a   :  { %v15852_v10 = vpop.eup %13134 }
0x292d   :  { %v15857_v45 = vpop.eup %13136 }
0x2971   :  { %v8303_v48 = vpop.permute.xlu0 %8302 }
0x2972   :  { %v8324_v40 = vmul.f32 %v15814_v19, %v8303_v48  ;;  %v8287_v9 = vpop.permute.xlu1 %8286 }
0x2973   :  { %v8316_v60 = vmul.f32 %v15818_v57, %v8287_v9 }
0x2974   :  { %8352 = vrot.lane.b32.xlu0 %v8324_v40, %s13251_s5 }
0x2975   :  { %v8289_v43 = vpop.permute.xlu0 %8288  ;;  %8336 = vrot.lane.b32.xlu1 %v8316_v60, %s13251_s5 }
0x2976   :  { %v8317_v34 = vmul.f32 %v15820_v21, %v8289_v43  ;;  %v8291_v35 = vpop.permute.xlu1 %8290 }
0x2977   :  { %v8318_v16 = vmul.f32 %v15825_v20, %v8291_v35 }
0x2978   :  { %8338 = vrot.lane.b32.xlu0 %v8317_v34, %s13251_s5  ;;  %v8250_v34 = vrot.slane %v15707_v22, 7  ;;  %v8272_v22 = vmul.f32 %v15841_v59, %v8252_v12 }
0x2979   :  { %v8293_v18 = vpop.permute.xlu0 %8292  ;;  %8340 = vrot.lane.b32.xlu1 %v8318_v16, %s13251_s5 }
0x297a   :  { %v8319_v29 = vmul.f32 %v15828_v58, %v8293_v18  ;;  %v8295_v63 = vpop.permute.xlu1 %8294  ;;  %v8270_v2 = vmul.f32 %v15833_v61, %v8250_v34  ;;  %v8271_v18 = vmul.f32 %v15836_v17, %v8251_v23 }
0x297b   :  { %v8320_v24 = vmul.f32 %v15833_v61, %v8295_v63 }
0x297c   :  { %8342 = vrot.lane.b32.xlu0 %v8319_v29, %s13251_s5 }
0x297d   :  { %v8297_v39 = vpop.permute.xlu0 %8296  ;;  %8344 = vrot.lane.b32.xlu1 %v8320_v24, %s13251_s5  ;;  %v8253_v24 = vrot.slane %v15717_v50, 7 }
0x297e   :  { %v8321_v41 = vmul.f32 %v15836_v17, %v8297_v39  ;;  %v8299_v55 = vpop.permute.xlu1 %8298 }
0x297f   :  { %v8322_v1 = vmul.f32 %v15841_v59, %v8299_v55 }
0x2980   :  { %8346 = vrot.lane.b32.xlu0 %v8321_v41, %s13251_s5  ;;  %v8273_v41 = vmul.f32 %v15844_v5, %v8253_v24 }
0x2981   :  { %v8301_v3 = vpop.permute.xlu0 %8300  ;;  %8348 = vrot.lane.b32.xlu1 %v8322_v1, %s13251_s5  ;;  %v8255_v1 = vrot.slane %v15746_v47, 7  ;;  %v8128_v47 = vrot.slane %v15738_v31, 7 }
0x2982   :  { %v8323_v27 = vmul.f32 %v15844_v5, %v8301_v3  ;;  %v8305_v13 = vpop.permute.xlu1 %8304 }
0x2983   :  { %v8325_v42 = vmul.f32 %v15849_v6, %v8305_v13  ;;  %v8275_v50 = vmul.f32 %v15849_v6, %v8255_v1 }
0x2984   :  { %8350 = vrot.lane.b32.xlu0 %v8323_v27, %s13251_s5 }
0x2985   :  { %v8139_v7 = vpop.permute.xlu0 %8138  ;;  %8354 = vrot.lane.b32.xlu1 %v8325_v42, %s13251_s5 }
0x2986   :  { %v8143_v48 = vmul.f32 %v15852_v10, %v8139_v7  ;;  %v8137_v40 = vpop.permute.xlu1 %8136 }
0x2987   :  { %v8142_v37 = vmul.f32 %v15857_v45, %v8137_v40 }
0x2988   :  { %8148 = vrot.lane.b32.xlu0 %v8143_v48, %s13251_s5  ;;  %v8133_v48 = vmul.f32 %v15852_v10, %v8129_v30 }
0x2989   :  { %8146 = vrot.lane.b32.xlu1 %v8142_v37, %s13251_s5 }
0x29e6   :  { %v8353_v8 = vpop.permute.xlu0 %8352 }
0x29e7   :  { %v8374_v62 = vadd.f32 %v8353_v8, %v8274_v53  ;;  %v8337_v36 = vpop.permute.xlu1 %8336  ;;  %v8132_v8 = vmul.f32 %v15857_v45, %v8128_v47 }
0x29e8   :  { %v8366_v9 = vadd.f32 %v8337_v36, %v8266_v56 }
0x29e9   :  { %13138 = vtanh.f32 %v8374_v62 }
0x29ea   :  { %v8339_v60 = vpop.permute.xlu0 %8338  ;;  %13140 = vtanh.f32 %v8366_v9 }
0x29eb   :  { %v8367_v43 = vadd.f32 %v8339_v60, %v8267_v38  ;;  %v8341_v54 = vpop.permute.xlu1 %8340  ;;  %v8474_v38 = vld [vmem:[#allocation2 + $0xe0] sm:$0xff]  ;;  %v8472_v60 = vld [vmem:[#allocation2 + $0xd0] sm:$0xff] }
0x29ec   :  { %v8368_v49 = vadd.f32 %v8341_v54, %v8268_v25  ;;  %v12157_v54 = vpack.i.bf16 %v8473_v44, %v8472_v60 }
0x29ed   :  { %13142 = vtanh.f32 %v8367_v43 }
0x29ee   :  { %v8343_v52 = vpop.permute.xlu0 %8342  ;;  %13144 = vtanh.f32 %v8368_v49 }
0x29ef   :  { %v8369_v35 = vadd.f32 %v8343_v52, %v8269_v33  ;;  %v8345_v16 = vpop.permute.xlu1 %8344 }
0x29f0   :  { %v8370_v29 = vadd.f32 %v8345_v16, %v8270_v2 }
0x29f1   :  { %13146 = vtanh.f32 %v8369_v35 }
0x29f2   :  { %v8347_v63 = vpop.permute.xlu0 %8346  ;;  %13148 = vtanh.f32 %v8370_v29 }
0x29f3   :  { %v13139_v0 = vpop.eup %13138  ;;  %v8371_v39 = vadd.f32 %v8347_v63, %v8271_v18  ;;  %v8349_v32 = vpop.permute.xlu1 %8348 }
0x29f4   :  { %8412 = vrot.lane.b32.xlu0 %v13139_v0, %s13241_s27  ;;  %v13141_v55 = vpop.eup %13140  ;;  %v8372_v3 = vadd.f32 %v8349_v32, %v8272_v22  ;;  %v8475_v0 = vld [vmem:[#allocation2 + $0xe8] sm:$0xff] }
0x29f5   :  { %13150 = vtanh.f32 %v8371_v39  ;;  %8396 = vrot.lane.b32.xlu1 %v13141_v55, %s13241_s27  ;;  %v12162_v43 = vpack.i.bf16 %v8475_v0, %v8474_v38  ;;  %v11819_v47 = vpack.c.bf16 %v8475_v0, %v8474_v38 }
0x29f6   :  { %v8351_v27 = vpop.permute.xlu0 %8350  ;;  %13152 = vtanh.f32 %v8372_v3 }
0x29f7   :  { %v13143_v13 = vpop.eup %13142  ;;  %v8373_v42 = vadd.f32 %v8351_v27, %v8273_v41  ;;  %v8355_v7 = vpop.permute.xlu1 %8354 }
0x29f8   :  { %8398 = vrot.lane.b32.xlu0 %v13143_v13, %s13241_s27  ;;  %v13145_v40 = vpop.eup %13144  ;;  %v8375_v37 = vadd.f32 %v8355_v7, %v8275_v50 }
0x29f9   :  { %13154 = vtanh.f32 %v8373_v42  ;;  %8400 = vrot.lane.b32.xlu1 %v13145_v40, %s13241_s27 }
0x29fa   :  { %v8149_v28 = vpop.permute.xlu0 %8148  ;;  %13156 = vtanh.f32 %v8375_v37 }
0x29fb   :  { %v13147_v53 = vpop.eup %13146  ;;  %v8153_v4 = vadd.f32 %v8149_v28, %v8133_v48  ;;  %v8147_v62 = vpop.permute.xlu1 %8146 }
0x29fc   :  { %8402 = vrot.lane.b32.xlu0 %v13147_v53, %s13241_s27  ;;  %v13149_v26 = vpop.eup %13148  ;;  %v8152_v15 = vadd.f32 %v8147_v62, %v8132_v8 }
0x29fd   :  { %13158 = vtanh.f32 %v8153_v4  ;;  %8404 = vrot.lane.b32.xlu1 %v13149_v26, %s13241_s27 }
0x29fe   :  { %13160 = vtanh.f32 %v8152_v15 }
0x29ff   :  { %v13151_v56 = vpop.eup %13150 }
0x2a00   :  { %8406 = vrot.lane.b32.xlu0 %v13151_v56, %s13241_s27  ;;  %v13153_v31 = vpop.eup %13152 }
0x2a01   :  { %8408 = vrot.lane.b32.xlu1 %v13153_v31, %s13241_s27 }
0x2a03   :  { %v13155_v36 = vpop.eup %13154 }
0x2a04   :  { %8410 = vrot.lane.b32.xlu0 %v13155_v36, %s13241_s27  ;;  %v13157_v14 = vpop.eup %13156 }
0x2a05   :  { %8414 = vrot.lane.b32.xlu1 %v13157_v14, %s13241_s27 }
0x2a07   :  { %v13159_v9 = vpop.eup %13158 }
0x2a08   :  { %8160 = vrot.lane.b32.xlu0 %v13159_v9, %s13241_s27  ;;  %v13161_v25 = vpop.eup %13160 }
0x2a09   :  { %8158 = vrot.lane.b32.xlu1 %v13161_v25, %s13241_s27 }
0x2a0c   :  { %12163 = vrot.lane.b32.xlu0 %v12162_v43, %s13235_s1 }
0x2a0d   :  { %12158 = vrot.lane.b32.xlu1 %v12157_v54, %s13235_s1 }
0x2a66   :  { %v8413_v33 = vpop.permute.xlu0 %8412 }
0x2a67   :  { %v8397_v34 = vpop.permute.xlu1 %8396 }
0x2a68   :  { %v8426_v49 = vmul.f32 %v15818_v57, %v8397_v34 }
0x2a6a   :  { %v8399_v52 = vpop.permute.xlu0 %8398  ;;  %vm8442_vm8 = vcmp.ge.f32.partialorder %v8426_v49, 0.0  ;;  %v8452_v35 = vmul.f32 0.01, %v8426_v49 }
0x2a6b   :  { %v8427_v23 = vmul.f32 %v15820_v21, %v8399_v52  ;;  %v8401_v16 = vpop.permute.xlu1 %8400  ;;  %v11816_v21 = vpack.c.bf16 %v8473_v44, %v8472_v60 }
0x2a6c   :  { %v8462_v18 = vsel %vm8442_vm8, %v8426_v49, %v8452_v35  ;;  %v8428_v12 = vmul.f32 %v15825_v20, %v8401_v16 }
0x2a6d   :  { %vm8443_vm9 = vcmp.ge.f32.partialorder %v8427_v23, 0.0  ;;  %v8453_v2 = vmul.f32 0.01, %v8427_v23  ;;  %v8570_v39 = vrot.slane %v8462_v18, 7  ;;  %11817 = vmatpush3.bf16.msra.mxu0 %v11816_v21 }
0x2a6e   :  { %v8403_v29 = vpop.permute.xlu0 %8402  ;;  %vm8444_vm13 = vcmp.ge.f32.partialorder %v8428_v12, 0.0  ;;  %v8454_v32 = vmul.f32 0.01, %v8428_v12  ;;  %11818 = vmatprep.subr.bf16.mxu0 %v13248_v11 }
0x2a6f   :  { %v8463_v63 = vsel %vm8443_vm9, %v8427_v23, %v8453_v2  ;;  %v8429_v24 = vmul.f32 %v15828_v58, %v8403_v29  ;;  %v8405_v41 = vpop.permute.xlu1 %8404  ;;  %v8434_v58 = vmul.f32 %v15814_v19, %v8413_v33 }
0x2a70   :  { %v8571_v22 = vrot.slane %v8463_v63, 6  ;;  %v8464_v1 = vsel %vm8444_vm13, %v8428_v12, %v8454_v32  ;;  %v8430_v3 = vmul.f32 %v15833_v61, %v8405_v41 }
0x2a71   :  { %vm8445_vm14 = vcmp.ge.f32.partialorder %v8429_v24, 0.0  ;;  %v8455_v57 = vmul.f32 0.01, %v8429_v24  ;;  %v8573_v13 = vrot.slane %v8464_v1, 5  ;;  %11820 = vmatpush3.bf16.msra.mxu0 %v11819_v47  ;;  %v8460_v8 = vmul.f32 0.01, %v8434_v58 }
0x2a72   :  { %v8572_v55 = vsel %vm4581_vm15, %v8571_v22, %v8570_v39  ;;  %v8407_v27 = vpop.permute.xlu0 %8406  ;;  %vm8446_vm8 = vcmp.ge.f32.partialorder %v8430_v3, 0.0  ;;  %v8456_v50 = vmul.f32 0.01, %v8430_v3  ;;  %11829 = vmatprep.subr.bf16.mxu0 %v13248_v11  ;;  %vm8450_vm13 = vcmp.ge.f32.partialorder %v8434_v58, 0.0 }
0x2a73   :  { %v8465_v20 = vsel %vm8445_vm14, %v8429_v24, %v8455_v57  ;;  %v8431_v30 = vmul.f32 %v15836_v17, %v8407_v27  ;;  %v8574_v7 = vsel %vm4676_vm0, %v8573_v13, %v8572_v55  ;;  %v8409_v40 = vpop.permute.xlu1 %8408  ;;  %v8470_v60 = vsel %vm8450_vm13, %v8434_v58, %v8460_v8  ;;  %v10174_v57 = vld [vmem:[#allocation2 + $0xf0] ss:$0 sm:$0xff] }
0x2a74   :  { %v8575_v42 = vrot.slane %v8465_v20, 4  ;;  %v8466_v37 = vsel %vm8446_vm8, %v8430_v3, %v8456_v50  ;;  %v8432_v28 = vmul.f32 %v15841_v59, %v8409_v40  ;;  %v8584_v52 = vrot.slane %v8470_v60, 7 }
0x2a75   :  { %vm8447_vm9 = vcmp.ge.f32.partialorder %v8431_v30, 0.0  ;;  %v8457_v48 = vmul.f32 0.01, %v8431_v30  ;;  %v8577_v53 = vrot.slane %v8466_v37, 3  ;;  %v16108_v8 = vmov -1e+09  }
0x2a76   :  { %v8576_v61 = vsel %vm4679_vm1, %v8575_v42, %v8574_v7  ;;  %v8411_v17 = vpop.permute.xlu0 %8410  ;;  %vm8448_vm14 = vcmp.ge.f32.partialorder %v8432_v28, 0.0  ;;  %v8458_v26 = vmul.f32 0.01, %v8432_v28  ;;  %vm8788_vm13 = vcmask 80896  }
0x2a77   :  { %v8467_v4 = vsel %vm8447_vm9, %v8431_v30, %v8457_v48  ;;  %v8433_v19 = vmul.f32 %v15844_v5, %v8411_v17  ;;  %v8578_v15 = vsel %vm4682_vm3, %v8577_v53, %v8576_v61  ;;  %v8415_v31 = vpop.permute.xlu1 %8414  ;;  %v16106_v17 = vld [vmem:[#allocation8_spill] sm:$0xff]  ;;  %vm8792_vm9 = vcmask 1041408  }
0x2a78   :  { %v8579_v62 = vrot.slane %v8467_v4, 2  ;;  %v8468_v36 = vsel %vm8448_vm14, %v8432_v28, %v8458_v26  ;;  %v8435_v59 = vmul.f32 %v15849_v6, %v8415_v31  ;;  %v73_v53 = vmul.u32 5, %v16106_v17  ;;  %v16107_v4 = vld [vmem:[#allocation9_spill] sm:$0xff]  ;;  %vm15976_vm14 = vmpackc.low %vm8792_vm9, %vm13233_vm2 }
0x2a79   :  { %vm8449_vm0 = vcmp.ge.f32.partialorder %v8433_v19, 0.0  ;;  %v8459_v56 = vmul.f32 0.01, %v8433_v19  ;;  %v8581_v5 = vrot.slane %v8468_v36, 1  ;;  %vm16111_vm2 = vcmask 130048  }
0x2a7a   :  { %v8161_v38 = vpop.permute.xlu0 %8160  ;;  %v8580_v0 = vsel %vm4685_vm4, %v8579_v62, %v8578_v15  ;;  %vm8451_vm1 = vcmp.ge.f32.partialorder %v8435_v59, 0.0  ;;  %v8461_v44 = vmul.f32 0.01, %v8435_v59 }
0x2a7b   :  { %v8469_v14 = vsel %vm8449_vm0, %v8433_v19, %v8459_v56  ;;  %v8165_v9 = vmul.f32 %v15852_v10, %v8161_v38  ;;  %v8159_v25 = vpop.permute.xlu1 %8158  ;;  %v8582_v54 = vsel %vm4688_vm5, %v8581_v5, %v8580_v0  ;;  %v74_v19 = vsub.s32 %v16107_v4, %v73_v53 }
0x2a7c   :  { %v8471_v33 = vsel %vm8451_vm1, %v8435_v59, %v8461_v44  ;;  %v8164_v34 = vmul.f32 %v15857_v45, %v8159_v25  ;;  %v8583_v6 = vsel %vm4691_vm7, %v8469_v14, %v8582_v54  ;;  %vm8771_vm7 = vcmask 74752  }
0x2a7d   :  { %vm8437_vm8 = vcmp.ge.f32.partialorder %v8165_v9, 0.0  ;;  %v8439_v43 = vmul.f32 0.01, %v8165_v9  ;;  %v8585_v23 = vrot.slane %v8471_v33, 6  ;;  %8587 = vrot.lane.b32.xlu1 %v8583_v6, %s13251_s5  ;;  %vm76_vm4 = vcmp.lt.s32.totalorder %v74_v19, 5 }
0x2a7e   :  { %v12164_v49 = vpop.permute.xlu0 %12163  ;;  %vm8436_vm3 = vcmp.ge.f32.partialorder %v8164_v34, 0.0  ;;  %v8438_v10 = vmul.f32 0.01, %v8164_v34  ;;  %vm9585_vm0 = vcmask 523264  }
0x2a7f   :  { %v8441_v35 = vsel %vm8437_vm8, %v8165_v9, %v8439_v43  ;;  %v12166_v2 = vunpack.i.h.bf16 %v12164_v49  ;;  %v12165_v16 = vunpack.i.l.bf16 %v12164_v49  ;;  %v8586_v12 = vsel %vm4581_vm15, %v8585_v23, %v8584_v52  ;;  %v12159_v29 = vpop.permute.xlu1 %12158 }
0x2a80   :  { %v8484_v18 = vrot.slane %v8441_v35, 6  ;;  %v8440_v63 = vsel %vm8436_vm3, %v8164_v34, %v8438_v10  ;;  %8589 = vrot.lane.b32.xlu0 %v8586_v12, %s13251_s5  ;;  %v12161_v45 = vunpack.i.h.bf16 %v12159_v29  ;;  %v12160_v24 = vunpack.i.l.bf16 %v12159_v29  ;;  %vm16113_vm3 = vmmov %vm16111_vm2 }
0x2a81   :  { %v8483_v39 = vrot.slane %v8440_v63, 7  ;;  %v11825_v32 = vpack.c.bf16 %v12166_v2, %v12165_v16  ;;  %v9406_v2 = vld [vmem:[#allocation2 + $0x100] sm:$0xff] }
0x2a82   :  { %v11821_v22 = vpack.c.bf16 %v12161_v45, %v12160_v24 }
0x2a83   :  { %v8485_v41 = vsel %vm4581_vm15, %v8484_v18, %v8483_v39  ;;  %vm75_vm15 = vcmp.ge.s32.totalorder %v74_v19, 0 }
0x2a84   :  { %8486 = vrot.lane.b32.xlu1 %v8485_v41, %s13251_s5  ;;  %11822 = vmatprep.subr.bf16.mxu1 %v11821_v22  ;;  %vm77_vm5 = vmand %vm75_vm15, %vm76_vm4  ;;  %vm9827_vm15 = vcmask 17408  }
0x2a85   :  { %11824 = vmatpush3.bf16.msra.mxu1 %v11821_v22  ;;  %8608 = vrot.lane.b32.xlu0 %v10174_v57, %s13235_s1  ;;  %v15959_v62 = vsel %vm77_vm5, 0.0, %v16108_v8 }
0x2a86   :  { %11826 = vmatprep.subr.bf16.mxu1 %v11825_v32 }
0x2a89   :  { %11828 = vmatpush3.bf16.msra.mxu1 %v11825_v32 }
0x2a8a   :  { %11833 = vmatprep.subr.bf16.mxu1 %v13248_v11 }
0x2aef   :  { %v8588_v21 = vpop.permute.xlu1 %8587 }
0x2af0   :  { %11285 = vmatprep.mubr.msk.f32.mxu1 %vm386_vm6, %v8588_v21 }
0x2af2   :  { %v8590_v55 = vpop.permute.xlu0 %8589 }
0x2af3   :  { %11286 = vmatmul.mubr.msk.f32.vlgmr.msra.gmra.mrb[86].mxu1 %vm386_vm6, %v8590_v55 }
0x2af4   :  { %11299 = vmatprep.mubr.msk.f32.mxu1 %vm13249_vm12, %v13250_v46 }
0x2af6   :  { %v8487_v1 = vpop.permute.xlu1 %8486 }
0x2af7   :  { %11275 = vmatmul.mubr.msk.f32.vlgmr.msra.gmra.mrb[90].mxu0 %vm386_vm6, %v8487_v1  ;;  %v8609_v3 = vpop.permute.xlu0 %8608 }
0x2af8   :  { %11292 = vmatprep.mubr.msk.f32.mxu0 %vm13249_vm12, %v13250_v46 }
0x2bc6   :  { %v11287_v27 = vpop.f32.mrb[86].mxu1 }
0x2bc7   :  { %v8687_v13 = vadd.f32 %v11287_v27, %v8609_v3  ;;  %v8681_v20 = vpop.f32.mrb[87].mxu1 }
0x2bc8   :  { %v8682_v30 = vadd.f32 %v8681_v20, %v8609_v3 }
0x2bca   :  { %v8556_v58 = vpop.f32.mrb[90].mxu0  ;;  %v15935_v42 = vpack.i.bf16 %v8687_v13, %v8682_v30  ;;  %v11830_v50 = vpack.c.bf16 %v8687_v13, %v8682_v30 }
0x2bcb   :  { %v15937_v7 = vadd.f32 %v10174_v57, %v8556_v58  ;;  %v11276_v48 = vpop.f32.mrb[91].mxu0 }
0x2bcc   :  { %12168 = vrot.lane.b32.xlu1 %v15935_v42, %s13234_s21  ;;  %11832 = vmatpush3.bf16.xpose.msk.msra.mxu0 %vm13377_vm11, %v11830_v50 }
0x2bcd   :  { %8865 = vrot.lane.b32.xlu0 %v15937_v7, %s13234_s21  ;;  %11837 = vmatprep.subr.bf16.mxu0 %v13248_v11 }
0x2bd3   :  { %11293 = vmatmul.mubr.msk.f32.vlgmr.msra.gmra.mrb[92].mxu0 %vm474_vm10, %v15937_v7 }
0x2bd4   :  { %11306 = vmatprep.mubr.msk.f32.mxu0 %vm13249_vm12, %v13250_v46 }
0x2c3e   :  { %v12169_v40 = vpop.permute.xlu1 %12168 }
0x2c3f   :  { %v12171_v47 = vunpack.i.h.bf16 %v12169_v40  ;;  %v12170_v61 = vunpack.i.l.bf16 %v12169_v40  ;;  %v8866_v28 = vpop.permute.xlu0 %8865 }
0x2c41   :  { %v11838_v37 = vpack.c.bf16 %v12171_v47, %v12170_v61 }
0x2c43   :  { %11840 = vmatpush3.bf16.xpose.msk.msra.mxu0 %vm13377_vm11, %v11838_v37 }
0x2c44   :  { %11849 = vmatprep.subr.bf16.mxu0 %v13248_v11 }
0x2c4a   :  { %11307 = vmatmul.mubr.msk.f32.vlgmr.msra.gmra.mrb[94].mxu0 %vm474_vm10, %v8866_v28 }
0x2c4b   :  { %11327 = vmatprep.mubr.msk.f32.mxu0 %vm13249_vm12, %v13250_v46 }
0x2ca6   :  { %v8765_v26 = vpop.f32.mrb[92].mxu0 }
0x2ca7   :  { %v8769_v15 = vmul.f32 0.35355338, %v8765_v26  ;;  %v11294_v56 = vpop.f32.mrb[93].mxu0 }
0x2ca9   :  { %v8770_v31 = vadd.f32 %v8769_v15, %v15959_v62 }
0x2cab   :  { %v8772_v36 = vsel %vm8771_vm7, %v8770_v31, -inf }
0x2cac   :  { %8773 = vmax.xlane.f32.xlu1 %v8772_v36 }
0x2cbd   :  { %12178 = vrot.lane.b32.xlu1 %v15935_v42, %s13237_s24 }
0x2d1d   :  { %v8943_v59 = vpop.f32.mrb[94].mxu0 }
0x2d1e   :  { %v8947_v38 = vmul.f32 0.35355338, %v8943_v59  ;;  %v11308_v0 = vpop.f32.mrb[95].mxu0 }
0x2d20   :  { %v8948_v5 = vadd.f32 %v8947_v38, %v15959_v62 }
0x2d22   :  { %v8949_v14 = vsel %vm8771_vm7, %v8948_v5, -inf }
0x2d23   :  { %8950 = vmax.xlane.f32.xlu0 %v8949_v14 }
0x2d39   :  { %v8774_v9 = vpop.xlane.xlu1 %8773 }
0x2d3a   :  { %v8775_v60 = vsub.f32 %v8770_v31, %v8774_v9 }
0x2d3c   :  { %v8776_v44 = vmul.f32 1.442695, %v8775_v60 }
0x2d3d   :  { %v12179_v16 = vpop.permute.xlu1 %12178 }
0x2d3e   :  { %13162 = vpow2.f32 %v8776_v44  ;;  %v12181_v12 = vunpack.i.h.bf16 %v12179_v16  ;;  %v12180_v29 = vunpack.i.l.bf16 %v12179_v16  ;;  %v9407_v16 = vld [vmem:[#allocation2 + $0x108] sm:$0xff] }
0x2d40   :  { %v11842_v24 = vpack.c.bf16 %v12181_v12, %v12180_v29  ;;  %v9408_v12 = vld [vmem:[#allocation2 + $0x110] sm:$0xff] }
0x2d41   :  { %v11865_v29 = vpack.c.bf16 %v9408_v12, %v9407_v16 }
0x2d48   :  { %v13163_v43 = vpop.eup %13162 }
0x2d49   :  { %v8778_v25 = vsel %vm8771_vm7, %v13163_v43, 0.0 }
0x2d4a   :  { %8779 = vadd.xlane.f32.xlu0 %v8778_v25 }
0x2d60   :  { %12173 = vrot.lane.b32.xlu0 %v15935_v42, %s13235_s1 }
0x2d64   :  { %9040 = vrot.lane.b32.xlu0 %v15937_v7, %s13238_s25 }
0x2db0   :  { %v8951_v54 = vpop.xlane.xlu0 %8950 }
0x2db1   :  { %v8952_v33 = vsub.f32 %v8948_v5, %v8951_v54 }
0x2db3   :  { %v8953_v34 = vmul.f32 1.442695, %v8952_v33 }
0x2db5   :  { %13164 = vpow2.f32 %v8953_v34 }
0x2dbf   :  { %v13165_v6 = vpop.eup %13164 }
0x2dc0   :  { %v8955_v49 = vsel %vm8771_vm7, %v13165_v6, 0.0 }
0x2dc1   :  { %8956 = vadd.xlane.f32.xlu1 %v8955_v49 }
0x2dd2   :  { %12183 = vrot.lane.b32.xlu1 %v15935_v42, %s13238_s25 }
0x2dd7   :  { %v8780_v52 = vpop.xlane.xlu0 %8779 }
0x2dd8   :  { %13166 = vrcp.f32 %v8780_v52 }
0x2ddb   :  { %v12174_v23 = vpop.permute.xlu0 %12173 }
0x2ddc   :  { %v12176_v35 = vunpack.i.h.bf16 %v12174_v23  ;;  %v12175_v10 = vunpack.i.l.bf16 %v12174_v23 }
0x2dde   :  { %v11834_v18 = vpack.c.bf16 %v12176_v35, %v12175_v10  ;;  %v9405_v10 = vld [vmem:[#allocation2 + $0xf8] sm:$0xff] }
0x2ddf   :  { %v9041_v1 = vpop.permute.xlu0 %9040 }
0x2de0   :  { %11836 = vmatpush3.bf16.msk.msra.mxu1 %vm15976_vm14, %v11834_v18  ;;  %v11862_v18 = vpack.c.bf16 %v9406_v2, %v9405_v10  ;;  %v10206_v10 = vld [vmem:[#allocation2 + $0x258] ss:$0 sm:$0xff] }
0x2de1   :  { %11841 = vmatprep.subr.bf16.mxu1 %v13248_v11 }
0x2de2   :  { %v13167_v63 = vpop.eup %13166 }
0x2de3   :  { %v8782_v45 = vmul.f32 %v13167_v63, %v13163_v43  ;;  %v9487_v63 = vld [vmem:[#allocation2 + $0x1b0] sm:$0xff] }
0x2de5   :  { %11300 = vmatmul.mubr.msk.f32.vlgmr.msra.gmra.mrb[88].mxu1 %vm8788_vm13, %v8782_v45  ;;  %v9488_v45 = vld [vmem:[#allocation2 + $0x1b8] sm:$0xff] }
0x2de6   :  { %11844 = vmatpush3.bf16.msk.msra.mxu1 %vm15976_vm14, %v11842_v24  ;;  %11313 = vmatprep.mubr.msk.f32.mxu1 %vm13249_vm12, %v13250_v46  ;;  %v11868_v24 = vpack.c.bf16 %v9488_v45, %v9487_v63 }
0x2de7   :  { %11845 = vmatprep.subr.bf16.mxu1 %v13248_v11 }
0x2e4e   :  { %v8957_v39 = vpop.xlane.xlu1 %8956 }
0x2e4f   :  { %13168 = vrcp.f32 %v8957_v39 }
0x2e52   :  { %v12184_v22 = vpop.permute.xlu1 %12183 }
0x2e53   :  { %v12186_v32 = vunpack.i.h.bf16 %v12184_v22  ;;  %v12185_v57 = vunpack.i.l.bf16 %v12184_v22 }
0x2e55   :  { %v11846_v55 = vpack.c.bf16 %v12186_v32, %v12185_v57 }
0x2e59   :  { %v13169_v41 = vpop.eup %13168 }
0x2e5a   :  { %v8959_v21 = vmul.f32 %v13169_v41, %v13165_v6 }
0x2e5c   :  { %11314 = vmatmul.mubr.msk.f32.vlgmr.msra.gmra.mrb[90].mxu1 %vm8788_vm13, %v8959_v21 }
0x2e5d   :  { %11848 = vmatpush3.bf16.xpose.msk.msra.mxu1 %vm13377_vm11, %v11846_v55  ;;  %11320 = vmatprep.mubr.msk.f32.mxu1 %vm13249_vm12, %v13250_v46 }
0x2e5e   :  { %11857 = vmatprep.subr.bf16.mxu1 %v13248_v11 }
0x2e64   :  { %11321 = vmatmul.mubr.msk.f32.vlgmr.msra.gmra.mrb[92].mxu1 %vm474_vm10, %v9041_v1 }
0x2e65   :  { %11341 = vmatprep.mubr.msk.f32.mxu1 %vm13249_vm12, %v13250_v46 }
0x2eb8   :  { %v15998_v3 = vpop.f32.mrb[88].mxu1 }
0x2eb9   :  { %v11301_v27 = vpop.f32.mrb[89].mxu1 }
0x2eba   :  { %v9489_v27 = vld [vmem:[#allocation2 + $0x1c0] sm:$0xff] }
0x2f2f   :  { %v9036_v13 = vpop.f32.mrb[90].mxu1 }
0x2f30   :  { %v11315_v20 = vpop.f32.mrb[91].mxu1 }
0x2f37   :  { %v9118_v30 = vpop.f32.mrb[92].mxu1 }
0x2f38   :  { %v9122_v58 = vmul.f32 0.35355338, %v9118_v30  ;;  %v11322_v50 = vpop.f32.mrb[93].mxu1  ;;  %v9572_v30 = vld [vmem:[#allocation2 + $0x1d8] sm:$0xff] }
0x2f39   :  { %v9574_v50 = vld [vmem:[#allocation2 + $0x1e8] sm:$0xff] }
0x2f3a   :  { %v9123_v48 = vadd.f32 %v9122_v58, %v15959_v62  ;;  %v9573_v58 = vld [vmem:[#allocation2 + $0x1e0] sm:$0xff] }
0x2f3c   :  { %v9124_v40 = vsel %vm8771_vm7, %v9123_v48, -inf }
0x2f3d   :  { %9125 = vmax.xlane.f32.xlu1 %v9124_v40 }
0x2f4e   :  { %12193 = vrot.lane.b32.xlu1 %v15935_v42, %s13244_s0 }
0x2f52   :  { %9215 = vrot.lane.b32.xlu1 %v15937_v7, %s13244_s0 }
0x2fca   :  { %v9126_v47 = vpop.xlane.xlu1 %9125 }
0x2fcb   :  { %v9127_v61 = vsub.f32 %v9123_v48, %v9126_v47  ;;  %v11874_v48 = vpack.c.bf16 %v9573_v58, %v9572_v30  ;;  %v9576_v47 = vld [vmem:[#allocation2 + $0x1f8] sm:$0xff] }
0x2fcd   :  { %v9128_v37 = vmul.f32 1.442695, %v9127_v61  ;;  %v9577_v61 = vld [vmem:[#allocation2 + $0x200] sm:$0xff] }
0x2fce   :  { %v12194_v15 = vpop.permute.xlu1 %12193 }
0x2fcf   :  { %13170 = vpow2.f32 %v9128_v37  ;;  %v12196_v56 = vunpack.i.h.bf16 %v12194_v15  ;;  %v12195_v31 = vunpack.i.l.bf16 %v12194_v15  ;;  %v11880_v37 = vpack.c.bf16 %v9577_v61, %v9576_v47  ;;  %v9662_v15 = vld [vmem:[#allocation2 + $0x220] sm:$0xff] }
0x2fd1   :  { %v11854_v59 = vpack.c.bf16 %v12196_v56, %v12195_v31  ;;  %v10200_v31 = vld [vmem:[#allocation2 + $0x1d0] ss:$0 sm:$0xff] }
0x2fd2   :  { %v9216_v38 = vpop.permute.xlu1 %9215 }
0x2fd9   :  { %v13171_v28 = vpop.eup %13170 }
0x2fda   :  { %v9130_v17 = vsel %vm8771_vm7, %v13171_v28, 0.0 }
0x2fdb   :  { %9131 = vadd.xlane.f32.xlu0 %v9130_v17 }
0x2ff1   :  { %12188 = vrot.lane.b32.xlu0 %v15935_v42, %s13236_s22 }
0x3068   :  { %v9132_v53 = vpop.xlane.xlu0 %9131 }
0x3069   :  { %13172 = vrcp.f32 %v9132_v53 }
0x306c   :  { %v12189_v4 = vpop.permute.xlu0 %12188 }
0x306d   :  { %v12191_v19 = vunpack.i.h.bf16 %v12189_v4  ;;  %v12190_v8 = vunpack.i.l.bf16 %v12189_v4 }
0x306f   :  { %v11850_v26 = vpack.c.bf16 %v12191_v19, %v12190_v8  ;;  %v9578_v19 = vld [vmem:[#allocation2 + $0x208] sm:$0xff]  ;;  %v9579_v8 = vld [vmem:[#allocation2 + $0x210] sm:$0xff] }
0x3071   :  { %11852 = vmatpush3.bf16.msk.msra.mxu0 %vm15976_vm14, %v11850_v26  ;;  %v11883_v26 = vpack.c.bf16 %v9579_v8, %v9578_v19 }
0x3072   :  { %11853 = vmatprep.subr.bf16.mxu0 %v13248_v11 }
0x3073   :  { %v13173_v7 = vpop.eup %13172 }
0x3074   :  { %v9134_v36 = vmul.f32 %v13173_v7, %v13171_v28  ;;  %v10198_v28 = vld [vmem:[#allocation2 + $0x118] ss:$0 sm:$0xff]  ;;  %v9663_v7 = vld [vmem:[#allocation2 + $0x228] sm:$0xff] }
0x3075   :  { %v11886_v56 = vpack.c.bf16 %v9663_v7, %v9662_v15 }
0x3076   :  { %11328 = vmatmul.mubr.msk.f32.vlgmr.msra.gmra.mrb[96].mxu0 %vm8788_vm13, %v9134_v36 }
0x3077   :  { %11334 = vmatprep.mubr.msk.f32.mxu0 %vm13249_vm12, %v13250_v46 }
0x307a   :  { %11856 = vmatpush3.bf16.xpose.msk.msra.mxu0 %vm13377_vm11, %v11854_v59  ;;  %vm16112_vm11 = vcmask 195584  }
0x307b   :  { %11867 = vmatprep.subr.bf16.mxu0 %v13248_v11 }
0x3081   :  { %11335 = vmatmul.mubr.msk.f32.vlgmr.msra.gmra.mrb[98].mxu0 %vm474_vm10, %v9216_v38 }
0x3082   :  { %11363 = vmatprep.mubr.msk.f32.mxu0 %vm13249_vm12, %v13250_v46  ;;  %11869 = vmatpush3.bf16.msra.mxu0 %v11868_v24 }
0x3083   :  { %11870 = vmatprep.subr.bf16.mxu0 %v13248_v11 }
0x3149   :  { %v9211_v0 = vpop.f32.mrb[96].mxu0 }
0x314a   :  { %v11329_v5 = vpop.f32.mrb[97].mxu0 }
0x3154   :  { %v9293_v14 = vpop.f32.mrb[98].mxu0 }
0x3155   :  { %v9297_v9 = vmul.f32 0.35355338, %v9293_v14  ;;  %v11336_v60 = vpop.f32.mrb[99].mxu0  ;;  %v9664_v14 = vld [vmem:[#allocation2 + $0x230] sm:$0xff] }
0x3157   :  { %v9298_v44 = vadd.f32 %v9297_v9, %v15959_v62  ;;  %v9665_v9 = vld [vmem:[#allocation2 + $0x238] sm:$0xff] }
0x3158   :  { %v11889_v60 = vpack.c.bf16 %v9665_v9, %v9664_v14 }
0x3159   :  { %v9299_v43 = vsel %vm8771_vm7, %v9298_v44, -inf }
0x315a   :  { %9300 = vmax.xlane.f32.xlu0 %v9299_v43 }
0x3170   :  { %12198 = vrot.lane.b32.xlu0 %v15935_v42, %s13243_s29 }
0x3174   :  { %9395 = vrot.lane.b32.xlu0 %v9211_v0, %s13246_s30 }
0x31e7   :  { %v9301_v51 = vpop.xlane.xlu0 %9300 }
0x31e8   :  { %v9302_v25 = vsub.f32 %v9298_v44, %v9301_v51  ;;  %v10202_v44 = vld [vmem:[#allocation2 + $0x218] ss:$0 sm:$0xff] }
0x31ea   :  { %v9303_v54 = vmul.f32 1.442695, %v9302_v25 }
0x31eb   :  { %v12199_v33 = vpop.permute.xlu0 %12198 }
0x31ec   :  { %13174 = vpow2.f32 %v9303_v54  ;;  %v12201_v34 = vunpack.i.h.bf16 %v12199_v33  ;;  %v12200_v6 = vunpack.i.l.bf16 %v12199_v33 }
0x31ee   :  { %v11858_v49 = vpack.c.bf16 %v12201_v34, %v12200_v6  ;;  %v9747_v34 = vld [vmem:[#allocation2 + $0x248] sm:$0xff]  ;;  %v9748_v6 = vld [vmem:[#allocation2 + $0x250] sm:$0xff] }
0x31ef   :  { %v9396_v41 = vpop.permute.xlu0 %9395 }
0x31f0   :  { %11860 = vmatpush3.bf16.msk.msra.mxu1 %vm15976_vm14, %v11858_v49  ;;  %v11892_v49 = vpack.c.bf16 %v9748_v6, %v9747_v34 }
0x31f1   :  { %11861 = vmatprep.subr.bf16.mxu1 %v13248_v11 }
0x31f6   :  { %v13175_v62 = vpop.eup %13174 }
0x31f7   :  { %v9305_v52 = vsel %vm8771_vm7, %v13175_v62, 0.0 }
0x31f8   :  { %9306 = vadd.xlane.f32.xlu1 %v9305_v52 }
0x3209   :  { %9391 = vrot.lane.b32.xlu1 %v9036_v13, %s13232_s23  ;;  %v9490_v13 = vld [vmem:[#allocation2 + $0x1c8] sm:$0xff]  ;;  %s13252_s23 = smov [#allocation5]  }
0x320a   :  { %v11871_v20 = vpack.c.bf16 %v9490_v13, %v9489_v27  ;;  %s9846_s6 = sshll.u32 %s13252_s23, 4  ;;  %s9847_s6 = int_to_ptr.vmem [resolvable:$true] %s9846_s6 }
0x320b   :  { %s13204_s7 = scalar_lea.vmem %s9847_s6, 32  ;;  %p13209_p9 = scmp.lt.s32.totalorder %s9847_s6, %s9847_s6 }
0x320c   :  { %11872 = vmatpush3.bf16.msra.mxu0 %v11871_v20  ;;  %p13205_p8 = scmp.ne.s32.totalorder %s9847_s6, %s13204_s7  ;;  %p13210_p10 = scmp.lt.s32.totalorder %s13204_s7, %s13204_s7 }
0x320d   :  { %11885 = vmatprep.subr.bf16.mxu0 %v13248_v11 }
0x320e   :  { %p13211_p11 = por %p13210_p10, %p13209_p9 }
0x3210   :  { %p13212_p12 = pnand %p13211_p11, %p13205_p8 }
0x3285   :  { %v9307_v42 = vpop.xlane.xlu1 %9306 }
0x3286   :  { %13176 = vrcp.f32 %v9307_v42 }
0x3289   :  { %v9392_v32 = vpop.permute.xlu1 %9391 }
0x328a   :  { %v9402_v57 = vsel %vm474_vm10, %v15998_v3, %v9392_v32  ;;  %v9575_v3 = vld [vmem:[#allocation2 + $0x1f0] sm:$0xff] }
0x328b   :  { %v9403_v21 = vsel %vm16111_vm2, %v9402_v57, %v9396_v41  ;;  %v11877_v40 = vpack.c.bf16 %v9575_v3, %v9574_v50 }
0x3290   :  { %v13177_v23 = vpop.eup %13176 }
0x3291   :  { %v9309_v35 = vmul.f32 %v13177_v23, %v13175_v62  ;;  %v10204_v62 = vld [vmem:[#allocation2 + $0x240] ss:$0 sm:$0xff] }
0x3293   :  { %11342 = vmatmul.mubr.msk.f32.vlgmr.msra.gmra.mrb[94].mxu1 %vm8788_vm13, %v9309_v35 }
0x3294   :  { %11352 = vmatprep.mubr.msk.f32.mxu1 %vm13249_vm12, %v13250_v46  ;;  %11863 = vmatpush3.bf16.msra.mxu1 %v11862_v18 }
0x3295   :  { %11864 = vmatprep.subr.bf16.mxu1 %v13248_v11 }
0x3298   :  { %11866 = vmatpush3.bf16.msra.mxu1 %v11865_v29 }
0x3299   :  { %11873 = vmatprep.subr.bf16.mxu1 %v13248_v11 }
0x3366   :  { %v9386_v39 = vpop.f32.mrb[94].mxu1 }
0x3367   :  { %9399 = vrot.lane.b32.xlu1 %v9386_v39, %s13247_s4  ;;  %v11343_v22 = vpop.f32.mrb[95].mxu1 }
0x33d9   :  { %v9400_v55 = vpop.permute.xlu1 %9399 }
0x33da   :  { %v9404_v1 = vsel %vm16112_vm11, %v9403_v21, %v9400_v55 }
0x33db   :  { %11353 = vmatmul.mubr.msk.f32.vlgmr.msra.gmra.mrb[96].mxu1 %vm386_vm6, %v9404_v1 }
0x33dc   :  { %11382 = vmatprep.mubr.msk.f32.mxu1 %vm13249_vm12, %v13250_v46  ;;  %11875 = vmatpush3.bf16.msra.mxu1 %v11874_v48 }
0x33dd   :  { %11876 = vmatprep.subr.bf16.mxu1 %v13248_v11 }
0x33e0   :  { %11878 = vmatpush3.bf16.msra.mxu1 %v11877_v40 }
0x33e1   :  { %11879 = vmatprep.subr.bf16.mxu1 %v13248_v11 }
0x33e4   :  { %11881 = vmatpush3.bf16.msra.mxu1 %v11880_v37 }
0x33e5   :  { %11882 = vmatprep.subr.bf16.mxu1 %v13248_v11 }
0x33e8   :  { %11884 = vmatpush3.bf16.msra.mxu1 %v11883_v26 }
0x34ae   :  { %v9483_v17 = vpop.f32.mrb[96].mxu1 }
0x34af   :  { %v9484_v53 = vadd.f32 %v10198_v28, %v9483_v17  ;;  %v11354_v4 = vpop.f32.mrb[97].mxu1 }
0x34b1   :  { %11364 = vmatmul.mubr.msk.f32.vlgmr.msra.gmra.mrb[100].mxu0 %vm386_vm6, %v9484_v53 }
0x34b2   :  { %11393 = vmatprep.mubr.msk.f32.mxu0 %vm13249_vm12, %v13250_v46  ;;  %11887 = vmatpush3.bf16.msra.mxu0 %v11886_v56 }
0x34b3   :  { %11888 = vmatprep.subr.bf16.mxu0 %v13248_v11 }
0x34b6   :  { %11890 = vmatpush3.bf16.msra.mxu0 %v11889_v60 }
0x34b7   :  { %11891 = vmatprep.subr.bf16.mxu0 %v13248_v11 }
0x3584   :  { %v9565_v36 = vpop.f32.mrb[100].mxu0 }
0x3585   :  { %v9566_v59 = vadd.f32 %v10200_v31, %v9565_v36  ;;  %v11365_v38 = vpop.f32.mrb[101].mxu0 }
0x3587   :  { %vm9569_vm10 = vcmp.ge.f32.partialorder %v9566_v59, 0.0  ;;  %v9570_v0 = vmul.f32 0.01, %v9566_v59 }
0x3589   :  { %v9571_v5 = vsel %vm9569_vm10, %v9566_v59, %v9570_v0 }
0x358a   :  { %11383 = vmatmul.mubr.msk.f32.vlgmr.msra.gmra.mrb[98].mxu1 %vm9585_vm0, %v9571_v5 }
0x365d   :  { %v9655_v43 = vpop.f32.mrb[98].mxu1 }
0x365e   :  { %v9656_v51 = vadd.f32 %v10202_v44, %v9655_v43  ;;  %v11384_v25 = vpop.f32.mrb[99].mxu1 }
0x3660   :  { %vm9659_vm1 = vcmp.ge.f32.partialorder %v9656_v51, 0.0  ;;  %v9660_v54 = vmul.f32 0.01, %v9656_v51 }
0x3662   :  { %v9661_v33 = vsel %vm9659_vm1, %v9656_v51, %v9660_v54 }
0x3663   :  { %11394 = vmatmul.mubr.msk.f32.vlgmr.msra.gmra.mrb[102].mxu0 %vm386_vm6, %v9661_v33 }
0x3664   :  { %11400 = vmatprep.mubr.msk.f32.mxu0 %vm13249_vm12, %v13250_v46  ;;  %11893 = vmatpush3.bf16.msra.mxu0 %v11892_v49 }
0x3736   :  { %v9740_v52 = vpop.f32.mrb[102].mxu0 }
0x3737   :  { %v9741_v42 = vadd.f32 %v10204_v62, %v9740_v52  ;;  %v11395_v11 = vpop.f32.mrb[103].mxu0 }
0x3739   :  { %vm9744_vm8 = vcmp.ge.f32.partialorder %v9741_v42, 0.0  ;;  %v9745_v23 = vmul.f32 0.01, %v9741_v42 }
0x373b   :  { %v9746_v35 = vsel %vm9744_vm8, %v9741_v42, %v9745_v23 }
0x373c   :  { %11401 = vmatmul.mubr.msk.f32.vlgmr.msra.gmra.mrb[104].mxu0 %vm16113_vm3, %v9746_v35 }
0x380f   :  { %v9823_v2 = vpop.f32.mrb[104].mxu0 }
0x3810   :  { %v9824_v16 = vadd.f32 %v10206_v10, %v9823_v2  ;;  %v11402_v18 = vpop.f32.mrb[105].mxu0 }
0x3812   :  { %v9828_v46 = vsel %vm9827_vm15, %v9824_v16, -inf }
0x3813   :  { %9829 = vmax.xlane.f32.xlu0 %v9828_v46 }
0x38a0   :  { %v9830_v12 = vpop.xlane.xlu0 %9829 }
0x38a1   :  { %v9831_v29 = vsub.f32 %v9824_v16, %v9830_v12 }
0x38a3   :  { %v9832_v63 = vmul.f32 1.442695, %v9831_v29 }
0x38a5   :  { %13178 = vpow2.f32 %v9832_v63 }
0x38af   :  { %v13179_v45 = vpop.eup %13178 }
0x38b0   :  { %v9834_v24 = vsel %vm9827_vm15, %v13179_v45, 0.0 }
0x38b1   :  { %9835 = vadd.xlane.f32.xlu1 %v9834_v24 }
0x393e   :  { %v9836_v39 = vpop.xlane.xlu1 %9835 }
0x393f   :  { %13180 = vrcp.f32 %v9836_v39 }
0x3949   :  { %v13181_v22 = vpop.eup %13180 }
0x394a   :  { %v9838_v32 = vmul.f32 %v13181_v22, %v13179_v45 }
0x394c   :  { %9839 = vst.msk [vmem:[#allocation5] sm:$0x3] %vm9827_vm15, %v9838_v32 }
0x394d   :  { %13215 = shalt.err (!%p13212_p12)
}
0x394e   :  { %s13216_s10 = scalar_lea.hbm %s16076_s3, 32 }
0x394f   :  { %p13217_p13 = scmp.ne.s32.totalorder %s16076_s3, %s13216_s10  ;;  %p13220_p0 = scmp.lt.u32.totalorder %s13216_s10, %s16076_s3 }
0x3951   :  { %p13222_p1 = pnand %p13220_p0, %p13217_p13 }
0x3953   :  { %13225 = shalt.err (!%p13222_p1)
}
0x3954   :  { %9849 = dma.vmem_to_hbm [thread:$0]  %s9847_s6, 32, %s16076_s3, [#allocation4]  }
0x3955   :  { %13228 = dma.done.wait [#allocation4], 32  }
0x3956   :  { %13229 = vsyncadd [#allocation4], 4294967264 }
0x3957   :  { %9853 = vsyncpa [#allocation3], 1 }
0x3958   :  { %9854 = vsyncpa [#allocation4], 1 }

</bundles_post_ra>
